<compile_context>
chip_gen: v5e
topology: v5e:2x2
jax: 0.10.0
libtpu: 0.0.40
codegen_flags: <defaults>
</compile_context>

<pallas_src>
import jax
import jax.numpy as jnp
from jax.experimental import pallas as pl
from jax.experimental.pallas import tpu as pltpu


FC_SIZE = 1024
LANE = 128
SUBLANE_BF16 = 16
VMEM_LIMIT_BYTES = 32 * 1024 * 1024


def _round_up(n, m):
    return ((n + m - 1) // m) * m


def mlp_kernel(x_ref, w1_ref, b1_ref, w2_ref, b2_ref, w3_ref, b3_ref, o_ref):
    """Fused Linear-ReLU-Linear-ReLU-Linear for one batch tile.

    Matmuls run in bf16 on the MXU with f32 accumulation; biases are added in
    f32, ReLU applied, then cast back to bf16 for the next layer's MXU feed.
    """
    x = x_ref[...]
    h1 = jnp.dot(x, w1_ref[...], preferred_element_type=jnp.float32) + b1_ref[...]
    h1 = jnp.maximum(h1, 0.0).astype(w2_ref.dtype)
    h2 = jnp.dot(h1, w2_ref[...], preferred_element_type=jnp.float32) + b2_ref[...]
    h2 = jnp.maximum(h2, 0.0).astype(w3_ref.dtype)
    out = jnp.dot(h2, w3_ref[...], preferred_element_type=jnp.float32) + b3_ref[...]
    o_ref[...] = out.astype(o_ref.dtype)


def _pick_batch_tile(B, k1, n3, fc, compute_dtype):
    """Largest 16-aligned batch tile (<=512) that keeps double-buffered x/out
    tiles + weights comfortably inside the scoped VMEM limit."""
    itemsize = jnp.dtype(compute_dtype).itemsize
    # Weights (worst case double-buffered) + biases.
    weight_bytes = 2 * (k1 * fc + fc * fc + fc * n3) * itemsize + 3 * fc * 4
    budget = int(VMEM_LIMIT_BYTES * 0.75) - weight_bytes
    tile = min(512, _round_up(B, SUBLANE_BF16))
    tile = max(SUBLANE_BF16, _round_up(tile, SUBLANE_BF16))
    while tile > SUBLANE_BF16:
        # x tile (bf16, x2 buffers) + out tile (f32, x2 buffers) + f32 temps.
        per_tile = tile * (2 * k1 * itemsize + 2 * n3 * 4 + 2 * fc * 4)
        if per_tile <= budget:
            break
        tile -= SUBLANE_BF16
    return max(SUBLANE_BF16, tile)


def cmodel_forward(x, params, *, batch_tile=None, compute_dtype=jnp.bfloat16):
    """Pallas implementation of cmodel.forward (the `actor` MLP)."""
    w1, b1, w2, b2, w3, b3 = params
    B, in_size = x.shape
    fc = w1.shape[1]
    out_size = w3.shape[1]
    out_dtype = x.dtype

    # --- lane-friendly padding (done once in the wrapper, sliced off at end) ---
    k1 = _round_up(in_size, LANE)     # first-matmul K padded to 128
    n3 = _round_up(out_size, LANE)    # output N padded to 128 -> lane-dense stores

    # --- batch tiling: large tiles when batch allows, VMEM-aware for huge K ---
    if batch_tile is None:
        batch_tile = _pick_batch_tile(B, k1, n3, fc, compute_dtype)
    batch_tile = max(SUBLANE_BF16, _round_up(int(batch_tile), SUBLANE_BF16))
    b_pad = _round_up(B, batch_tile)
    num_tiles = b_pad // batch_tile

    # --- one-time bf16 casts + zero padding (not per grid step) ---
    cd = compute_dtype
    xp = jnp.zeros((b_pad, k1), cd).at[:B, :in_size].set(x.astype(cd))
    w1p = jnp.zeros((k1, fc), cd).at[:in_size, :].set(w1.astype(cd))
    w2p = w2.astype(cd)
    w3p = jnp.zeros((fc, n3), cd).at[:, :out_size].set(w3.astype(cd))
    b1p = b1.reshape(1, fc).astype(jnp.float32)
    b2p = b2.reshape(1, fc).astype(jnp.float32)
    b3p = jnp.zeros((1, n3), jnp.float32).at[:, :out_size].set(
        b3.reshape(1, out_size).astype(jnp.float32))

    itemsize = jnp.dtype(cd).itemsize
    cost = pl.CostEstimate(
        flops=2 * b_pad * (k1 * fc + fc * fc + fc * n3),
        transcendentals=0,
        bytes_accessed=(xp.size + w1p.size + w2p.size + w3p.size) * itemsize
        + (b1p.size + b2p.size + b3p.size) * 4
        + b_pad * n3 * jnp.dtype(out_dtype).itemsize,
    )

    # Few grid steps => weight-load bound: don't split the batch axis across
    # the two v7x TensorCores (would duplicate weight DMAs). Many tiles =>
    # MXU bound, so megacore-parallel over the batch axis wins.
    semantics = ("arbitrary",) if num_tiles <= 4 else ("parallel",)
    compiler_params = pltpu.CompilerParams(
        dimension_semantics=semantics,
        vmem_limit_bytes=VMEM_LIMIT_BYTES,
    )

    def build(single_buffer_weights):
        if single_buffer_weights:
            # Constant across the grid -> a single VMEM buffer is enough.
            def wspec(shape):
                return pl.BlockSpec(shape, lambda i: (0, 0),
                                    pipeline_mode=pl.Buffered(buffer_count=1))
        else:
            def wspec(shape):
                return pl.BlockSpec(shape, lambda i: (0, 0))

        return pl.pallas_call(
            mlp_kernel,
            out_shape=jax.ShapeDtypeStruct((b_pad, n3), out_dtype),
            grid_spec=pltpu.PrefetchScalarGridSpec(
                num_scalar_prefetch=0,
                grid=(num_tiles,),
                in_specs=[
                    pl.BlockSpec((batch_tile, k1), lambda i: (i, 0)),  # x tile
                    wspec(w1p.shape),   # (k1, 1024)
                    wspec(b1p.shape),   # (1, 1024)
                    wspec(w2p.shape),   # (1024, 1024)
                    wspec(b2p.shape),   # (1, 1024)
                    wspec(w3p.shape),   # (1024, n3)
                    wspec(b3p.shape),   # (1, n3)
                ],
                out_specs=pl.BlockSpec((batch_tile, n3), lambda i: (i, 0)),
            ),
            compiler_params=compiler_params,
            cost_estimate=cost,
        )

    args = (xp, w1p, b1p, w2p, b2p, w3p, b3p)
    try:
        out_p = jax.block_until_ready(build(True)(*args))
    except Exception:
        # Fallback if this JAX build does not lower pipeline_mode=Buffered(1):
        # default double-buffering (bf16 weights still fit the scoped VMEM limit).
        out_p = jax.block_until_ready(build(False)(*args))

    return out_p[:B, :out_size]


def init_params(key, input_size, output_size, fc_size=FC_SIZE, dtype=jnp.float32):
    """Deterministic init mimicking nn.Linear default (uniform +-1/sqrt(fan_in))."""
    ks = jax.random.split(key, 6)

    def linear(kw, kb, fan_in, fan_out):
        bound = 1.0 / jnp.sqrt(fan_in)
        w = jax.random.uniform(kw, (fan_in, fan_out), dtype, -bound, bound)
        b = jax.random.uniform(kb, (1, fan_out), dtype, -bound, bound)
        return w, b

    w1, b1 = linear(ks[0], ks[1], input_size, fc_size)
    w2, b2 = linear(ks[2], ks[3], fc_size, fc_size)
    w3, b3 = linear(ks[4], ks[5], fc_size, output_size)
    return (w1, b1, w2, b2, w3, b3)


def reference_forward(x, params, compute_dtype=jnp.bfloat16):
    """Pure-JAX reference with the same bf16-compute / f32-accumulate numerics."""
    w1, b1, w2, b2, w3, b3 = params
    cd = compute_dtype
    h1 = jnp.dot(x.astype(cd), w1.astype(cd),
                 preferred_element_type=jnp.float32) + b1.astype(jnp.float32)
    h1 = jnp.maximum(h1, 0.0)
    h2 = jnp.dot(h1.astype(cd), w2.astype(cd),
                 preferred_element_type=jnp.float32) + b2.astype(jnp.float32)
    h2 = jnp.maximum(h2, 0.0)
    out = jnp.dot(h2.astype(cd), w3.astype(cd),
                  preferred_element_type=jnp.float32) + b3.astype(jnp.float32)
    return out.astype(x.dtype)


if __name__ == "__main__":
    # Small shapes consistent with the module: observation -> [batch, input_size]
    batch = 8
    input_size = 32
    output_size = 8

    key = jax.random.PRNGKey(0)
    k_x, k_p = jax.random.split(key)

    x = jax.random.normal(k_x, (batch, input_size), dtype=jnp.float32)
    params = init_params(k_p, input_size, output_size)

    # TODO(synk): the SGD optimizer, HuberLoss and checkpoint save/load in the
    # module are training/host-side utilities, not part of forward(), so they
    # are not kernelized.
    out = cmodel_forward(x, params)
    out = jax.block_until_ready(out)

    ref = reference_forward(x, params)
    assert out.shape == (batch, output_size)
    assert jnp.allclose(out, ref, atol=2e-2, rtol=2e-2), "mismatch vs reference"

    print("KERNEL_OK")
</pallas_src>

<mosaic_0001>
module attributes {stable_mosaic.version = 11 : i64} {
  func.func @mlp_kernel(%arg0: i32, %arg1: memref<16x128xbf16, #tpu.memory_space<vmem>>, %arg2: memref<128x1024xbf16, #tpu.memory_space<vmem>>, %arg3: memref<1x1024xf32, #tpu.memory_space<vmem>>, %arg4: memref<1024x1024xbf16, #tpu.memory_space<vmem>>, %arg5: memref<1x1024xf32, #tpu.memory_space<vmem>>, %arg6: memref<1024x128xbf16, #tpu.memory_space<vmem>>, %arg7: memref<1x128xf32, #tpu.memory_space<vmem>>, %arg8: memref<16x128xf32, #tpu.memory_space<vmem>>) attributes {dimension_semantics = [#tpu.dimension_semantics<arbitrary>], iteration_bounds = array<i64: 1>, scalar_prefetch = 0 : i64, scratch_operands = 0 : i64, tpu.core_type = #tpu.core_type<tc>, window_params = [{transform_indices = @transform_0, window_bounds = array<i64: 16, 128>}, {pipeline_mode = #tpu.pipeline_mode<synchronous>, transform_indices = @transform_1, window_bounds = array<i64: 128, 1024>}, {pipeline_mode = #tpu.pipeline_mode<synchronous>, transform_indices = @transform_2, window_bounds = array<i64: 1, 1024>}, {pipeline_mode = #tpu.pipeline_mode<synchronous>, transform_indices = @transform_3, window_bounds = array<i64: 1024, 1024>}, {pipeline_mode = #tpu.pipeline_mode<synchronous>, transform_indices = @transform_4, window_bounds = array<i64: 1, 1024>}, {pipeline_mode = #tpu.pipeline_mode<synchronous>, transform_indices = @transform_5, window_bounds = array<i64: 1024, 128>}, {pipeline_mode = #tpu.pipeline_mode<synchronous>, transform_indices = @transform_6, window_bounds = array<i64: 1, 128>}, {transform_indices = @transform_7, window_bounds = array<i64: 16, 128>}]} {
    %c0 = arith.constant 0 : index
    %c0_0 = arith.constant 0 : index
    %0 = vector.load %arg1[%c0, %c0_0] : memref<16x128xbf16, #tpu.memory_space<vmem>>, vector<16x128xbf16>
    %c0_1 = arith.constant 0 : index
    %c0_2 = arith.constant 0 : index
    %1 = vector.load %arg2[%c0_1, %c0_2] : memref<128x1024xbf16, #tpu.memory_space<vmem>>, vector<128x1024xbf16>
    %cst = arith.constant dense<0.000000e+00> : vector<16x1024xf32>
    %2 = tpu.matmul %0, %1, %cst {dimension_numbers = #tpu.dot_dimension_numbers<[1], [0], [0], [1], [0, 0, 1, 1], [], []>} : vector<16x128xbf16>, vector<128x1024xbf16>, vector<16x1024xf32> -> vector<16x1024xf32>
    %c0_3 = arith.constant 0 : index
    %c0_4 = arith.constant 0 : index
    %3 = vector.load %arg3[%c0_3, %c0_4] : memref<1x1024xf32, #tpu.memory_space<vmem>>, vector<1x1024xf32>
    %4 = vector.broadcast %3 : vector<1x1024xf32> to vector<16x1024xf32>
    %5 = arith.addf %2, %4 : vector<16x1024xf32>
    %cst_5 = arith.constant 0.000000e+00 : f32
    %6 = vector.broadcast %cst_5 : f32 to vector<16x1024xf32>
    %7 = arith.maximumf %5, %6 : vector<16x1024xf32>
    %8 = arith.truncf %7 : vector<16x1024xf32> to vector<16x1024xbf16>
    %c0_6 = arith.constant 0 : index
    %c0_7 = arith.constant 0 : index
    %9 = vector.load %arg4[%c0_6, %c0_7] : memref<1024x1024xbf16, #tpu.memory_space<vmem>>, vector<1024x1024xbf16>
    %cst_8 = arith.constant dense<0.000000e+00> : vector<16x1024xf32>
    %10 = tpu.matmul %8, %9, %cst_8 {dimension_numbers = #tpu.dot_dimension_numbers<[1], [0], [0], [1], [0, 0, 1, 1], [], []>} : vector<16x1024xbf16>, vector<1024x1024xbf16>, vector<16x1024xf32> -> vector<16x1024xf32>
    %c0_9 = arith.constant 0 : index
    %c0_10 = arith.constant 0 : index
    %11 = vector.load %arg5[%c0_9, %c0_10] : memref<1x1024xf32, #tpu.memory_space<vmem>>, vector<1x1024xf32>
    %12 = vector.broadcast %11 : vector<1x1024xf32> to vector<16x1024xf32>
    %13 = arith.addf %10, %12 : vector<16x1024xf32>
    %cst_11 = arith.constant 0.000000e+00 : f32
    %14 = vector.broadcast %cst_11 : f32 to vector<16x1024xf32>
    %15 = arith.maximumf %13, %14 : vector<16x1024xf32>
    %16 = arith.truncf %15 : vector<16x1024xf32> to vector<16x1024xbf16>
    %c0_12 = arith.constant 0 : index
    %c0_13 = arith.constant 0 : index
    %17 = vector.load %arg6[%c0_12, %c0_13] : memref<1024x128xbf16, #tpu.memory_space<vmem>>, vector<1024x128xbf16>
    %cst_14 = arith.constant dense<0.000000e+00> : vector<16x128xf32>
    %18 = tpu.matmul %16, %17, %cst_14 {dimension_numbers = #tpu.dot_dimension_numbers<[1], [0], [0], [1], [0, 0, 1, 1], [], []>} : vector<16x1024xbf16>, vector<1024x128xbf16>, vector<16x128xf32> -> vector<16x128xf32>
    %c0_15 = arith.constant 0 : index
    %c0_16 = arith.constant 0 : index
    %19 = vector.load %arg7[%c0_15, %c0_16] : memref<1x128xf32, #tpu.memory_space<vmem>>, vector<1x128xf32>
    %20 = vector.broadcast %19 : vector<1x128xf32> to vector<16x128xf32>
    %21 = arith.addf %18, %20 : vector<16x128xf32>
    %c0_17 = arith.constant 0 : index
    %c0_18 = arith.constant 0 : index
    %22 = vector.load %arg8[%c0_17, %c0_18] : memref<16x128xf32, #tpu.memory_space<vmem>>, vector<16x128xf32>
    tpu.vector_store %arg8[%c0_17, %c0_18], %21 {strides = array<i32>} : memref<16x128xf32, #tpu.memory_space<vmem>>, vector<16x128xf32>,
    return
  }
  func.func @transform_0(%arg0: i32) -> (i32, i32) {
    %c0_i32 = arith.constant 0 : i32
    %c0_i32_0 = arith.constant 0 : i32
    return %arg0, %c0_i32 : i32, i32
  }
  func.func @transform_1(%arg0: i32) -> (i32, i32) {
    %c0_i32 = arith.constant 0 : i32
    %c0_i32_0 = arith.constant 0 : i32
    %c0_i32_1 = arith.constant 0 : i32
    return %c0_i32, %c0_i32_0 : i32, i32
  }
  func.func @transform_2(%arg0: i32) -> (i32, i32) {
    %c0_i32 = arith.constant 0 : i32
    %c0_i32_0 = arith.constant 0 : i32
    %c0_i32_1 = arith.constant 0 : i32
    return %c0_i32, %c0_i32_0 : i32, i32
  }
  func.func @transform_3(%arg0: i32) -> (i32, i32) {
    %c0_i32 = arith.constant 0 : i32
    %c0_i32_0 = arith.constant 0 : i32
    %c0_i32_1 = arith.constant 0 : i32
    return %c0_i32, %c0_i32_0 : i32, i32
  }
  func.func @transform_4(%arg0: i32) -> (i32, i32) {
    %c0_i32 = arith.constant 0 : i32
    %c0_i32_0 = arith.constant 0 : i32
    %c0_i32_1 = arith.constant 0 : i32
    return %c0_i32, %c0_i32_0 : i32, i32
  }
  func.func @transform_5(%arg0: i32) -> (i32, i32) {
    %c0_i32 = arith.constant 0 : i32
    %c0_i32_0 = arith.constant 0 : i32
    %c0_i32_1 = arith.constant 0 : i32
    return %c0_i32, %c0_i32_0 : i32, i32
  }
  func.func @transform_6(%arg0: i32) -> (i32, i32) {
    %c0_i32 = arith.constant 0 : i32
    %c0_i32_0 = arith.constant 0 : i32
    %c0_i32_1 = arith.constant 0 : i32
    return %c0_i32, %c0_i32_0 : i32, i32
  }
  func.func @transform_7(%arg0: i32) -> (i32, i32) {
    %c0_i32 = arith.constant 0 : i32
    %c0_i32_0 = arith.constant 0 : i32
    return %arg0, %c0_i32 : i32, i32
  }
}

module attributes {stable_mosaic.version = 11 : i64} {
  func.func @mlp_kernel(%arg0: i32, %arg1: memref<16x128xbf16, #tpu.memory_space<vmem>>, %arg2: memref<128x1024xbf16, #tpu.memory_space<vmem>>, %arg3: memref<1x1024xf32, #tpu.memory_space<vmem>>, %arg4: memref<1024x1024xbf16, #tpu.memory_space<vmem>>, %arg5: memref<1x1024xf32, #tpu.memory_space<vmem>>, %arg6: memref<1024x128xbf16, #tpu.memory_space<vmem>>, %arg7: memref<1x128xf32, #tpu.memory_space<vmem>>, %arg8: memref<16x128xf32, #tpu.memory_space<vmem>>) attributes {dimension_semantics = [#tpu.dimension_semantics<arbitrary>], iteration_bounds = array<i64: 1>, scalar_prefetch = 0 : i64, scratch_operands = 0 : i64, tpu.core_type = #tpu.core_type<tc>, window_params = [{transform_indices = @transform_0, window_bounds = array<i64: 16, 128>}, {pipeline_mode = #tpu.pipeline_mode<synchronous>, transform_indices = @transform_1, window_bounds = array<i64: 128, 1024>}, {pipeline_mode = #tpu.pipeline_mode<synchronous>, transform_indices = @transform_2, window_bounds = array<i64: 1, 1024>}, {pipeline_mode = #tpu.pipeline_mode<synchronous>, transform_indices = @transform_3, window_bounds = array<i64: 1024, 1024>}, {pipeline_mode = #tpu.pipeline_mode<synchronous>, transform_indices = @transform_4, window_bounds = array<i64: 1, 1024>}, {pipeline_mode = #tpu.pipeline_mode<synchronous>, transform_indices = @transform_5, window_bounds = array<i64: 1024, 128>}, {pipeline_mode = #tpu.pipeline_mode<synchronous>, transform_indices = @transform_6, window_bounds = array<i64: 1, 128>}, {transform_indices = @transform_7, window_bounds = array<i64: 16, 128>}]} {
    %c0 = arith.constant 0 : index
    %c0_0 = arith.constant 0 : index
    %0 = vector.load %arg1[%c0, %c0_0] : memref<16x128xbf16, #tpu.memory_space<vmem>>, vector<16x128xbf16>
    %c0_1 = arith.constant 0 : index
    %c0_2 = arith.constant 0 : index
    %1 = vector.load %arg2[%c0_1, %c0_2] : memref<128x1024xbf16, #tpu.memory_space<vmem>>, vector<128x1024xbf16>
    %cst = arith.constant dense<0.000000e+00> : vector<16x1024xf32>
    %2 = tpu.matmul %0, %1, %cst {dimension_numbers = #tpu.dot_dimension_numbers<[1], [0], [0], [1], [0, 0, 1, 1], [], []>} : vector<16x128xbf16>, vector<128x1024xbf16>, vector<16x1024xf32> -> vector<16x1024xf32>
    %c0_3 = arith.constant 0 : index
    %c0_4 = arith.constant 0 : index
    %3 = vector.load %arg3[%c0_3, %c0_4] : memref<1x1024xf32, #tpu.memory_space<vmem>>, vector<1x1024xf32>
    %4 = vector.broadcast %3 : vector<1x1024xf32> to vector<16x1024xf32>
    %5 = arith.addf %2, %4 : vector<16x1024xf32>
    %cst_5 = arith.constant 0.000000e+00 : f32
    %6 = vector.broadcast %cst_5 : f32 to vector<16x1024xf32>
    %7 = arith.maximumf %5, %6 : vector<16x1024xf32>
    %8 = arith.truncf %7 : vector<16x1024xf32> to vector<16x1024xbf16>
    %c0_6 = arith.constant 0 : index
    %c0_7 = arith.constant 0 : index
    %9 = vector.load %arg4[%c0_6, %c0_7] : memref<1024x1024xbf16, #tpu.memory_space<vmem>>, vector<1024x1024xbf16>
    %cst_8 = arith.constant dense<0.000000e+00> : vector<16x1024xf32>
    %10 = tpu.matmul %8, %9, %cst_8 {dimension_numbers = #tpu.dot_dimension_numbers<[1], [0], [0], [1], [0, 0, 1, 1], [], []>} : vector<16x1024xbf16>, vector<1024x1024xbf16>, vector<16x1024xf32> -> vector<16x1024xf32>
    %c0_9 = arith.constant 0 : index
    %c0_10 = arith.constant 0 : index
    %11 = vector.load %arg5[%c0_9, %c0_10] : memref<1x1024xf32, #tpu.memory_space<vmem>>, vector<1x1024xf32>
    %12 = vector.broadcast %11 : vector<1x1024xf32> to vector<16x1024xf32>
    %13 = arith.addf %10, %12 : vector<16x1024xf32>
    %cst_11 = arith.constant 0.000000e+00 : f32
    %14 = vector.broadcast %cst_11 : f32 to vector<16x1024xf32>
    %15 = arith.maximumf %13, %14 : vector<16x1024xf32>
    %16 = arith.truncf %15 : vector<16x1024xf32> to vector<16x1024xbf16>
    %c0_12 = arith.constant 0 : index
    %c0_13 = arith.constant 0 : index
    %17 = vector.load %arg6[%c0_12, %c0_13] : memref<1024x128xbf16, #tpu.memory_space<vmem>>, vector<1024x128xbf16>
    %cst_14 = arith.constant dense<0.000000e+00> : vector<16x128xf32>
    %18 = tpu.matmul %16, %17, %cst_14 {dimension_numbers = #tpu.dot_dimension_numbers<[1], [0], [0], [1], [0, 0, 1, 1], [], []>} : vector<16x1024xbf16>, vector<1024x128xbf16>, vector<16x128xf32> -> vector<16x128xf32>
    %c0_15 = arith.constant 0 : index
    %c0_16 = arith.constant 0 : index
    %19 = vector.load %arg7[%c0_15, %c0_16] : memref<1x128xf32, #tpu.memory_space<vmem>>, vector<1x128xf32>
    %20 = vector.broadcast %19 : vector<1x128xf32> to vector<16x128xf32>
    %21 = arith.addf %18, %20 : vector<16x128xf32>
    %c0_17 = arith.constant 0 : index
    %c0_18 = arith.constant 0 : index
    %22 = vector.load %arg8[%c0_17, %c0_18] : memref<16x128xf32, #tpu.memory_space<vmem>>, vector<16x128xf32>
    tpu.vector_store %arg8[%c0_17, %c0_18], %21 {strides = array<i32>} : memref<16x128xf32, #tpu.memory_space<vmem>>, vector<16x128xf32>,
    return
  }
  func.func @transform_0(%arg0: i32) -> (i32, i32) {
    %c0_i32 = arith.constant 0 : i32
    %c0_i32_0 = arith.constant 0 : i32
    return %arg0, %c0_i32 : i32, i32
  }
  func.func @transform_1(%arg0: i32) -> (i32, i32) {
    %c0_i32 = arith.constant 0 : i32
    %c0_i32_0 = arith.constant 0 : i32
    %c0_i32_1 = arith.constant 0 : i32
    return %c0_i32, %c0_i32_0 : i32, i32
  }
  func.func @transform_2(%arg0: i32) -> (i32, i32) {
    %c0_i32 = arith.constant 0 : i32
    %c0_i32_0 = arith.constant 0 : i32
    %c0_i32_1 = arith.constant 0 : i32
    return %c0_i32, %c0_i32_0 : i32, i32
  }
  func.func @transform_3(%arg0: i32) -> (i32, i32) {
    %c0_i32 = arith.constant 0 : i32
    %c0_i32_0 = arith.constant 0 : i32
    %c0_i32_1 = arith.constant 0 : i32
    return %c0_i32, %c0_i32_0 : i32, i32
  }
  func.func @transform_4(%arg0: i32) -> (i32, i32) {
    %c0_i32 = arith.constant 0 : i32
    %c0_i32_0 = arith.constant 0 : i32
    %c0_i32_1 = arith.constant 0 : i32
    return %c0_i32, %c0_i32_0 : i32, i32
  }
  func.func @transform_5(%arg0: i32) -> (i32, i32) {
    %c0_i32 = arith.constant 0 : i32
    %c0_i32_0 = arith.constant 0 : i32
    %c0_i32_1 = arith.constant 0 : i32
    return %c0_i32, %c0_i32_0 : i32, i32
  }
  func.func @transform_6(%arg0: i32) -> (i32, i32) {
    %c0_i32 = arith.constant 0 : i32
    %c0_i32_0 = arith.constant 0 : i32
    %c0_i32_1 = arith.constant 0 : i32
    return %c0_i32, %c0_i32_0 : i32, i32
  }
  func.func @transform_7(%arg0: i32) -> (i32, i32) {
    %c0_i32 = arith.constant 0 : i32
    %c0_i32_0 = arith.constant 0 : i32
    return %arg0, %c0_i32 : i32, i32
  }
}

</mosaic_0001>

<bundles_post_ra>
// kernel: tpu_custom_call.1
= control target key start
LH: loop header
LB: loop body
LE: loop exit
PB: predicated region body
PF: predicated region fallthrough
CT: control target
= control target key end

     0   :  { %12 = vsyncpa [#allocation3], 0  ;;  %s9161_s0 = inlined_call_operand.hbm [shape: bf16[16,128], index: 0, kind: input, shape index: {}]   ;;  %s9162_s1 = inlined_call_operand.hbm [shape: bf16[128,1024], index: 1, kind: input, shape index: {}]   ;;  %s9163_s2 = inlined_call_operand.hbm [shape: f32[1,1024], index: 2, kind: input, shape index: {}]   ;;  %s9164_s3 = inlined_call_operand.hbm [shape: bf16[1024,1024], index: 3, kind: input, shape index: {}]   ;;  %s9165_s4 = inlined_call_operand.hbm [shape: f32[1,1024], index: 4, kind: input, shape index: {}]   ;;  %s9166_s5 = inlined_call_operand.hbm [shape: bf16[1024,128], index: 5, kind: input, shape index: {}]   ;;  %s9167_s6 = inlined_call_operand.hbm [shape: f32[1,128], index: 6, kind: input, shape index: {}]   ;;  %s9168_s7 = inlined_call_operand.hbm [shape: f32[16,128], index: 7, kind: output, shape index: {}]  }
   0x1   :  { %13 = vsyncpa [#allocation6], 0 }
   0x2   :  { %14 = vsyncpa [#allocation9], 0 }
   0x3   :  { %15 = vsyncpa [#allocation12], 0  ;;  %s34_s26 = sshll.u32 %s9162_s1, 4  ;;  %s35_s26 = int_to_ptr.hbm [resolvable:$true] %s34_s26 }
   0x4   :  { %16 = vsyncpa [#allocation4], 0  ;;  %s8761_s27 = smov [#allocation5]   ;;  %s58_s8 = sshll.u32 %s9164_s3, 4  ;;  %s59_s8 = int_to_ptr.hbm [resolvable:$true] %s58_s8 }
   0x5   :  { %s36_s28 = sshll.u32 %s8761_s27, 4  ;;  %s8762_s9 = smov 512   ;;  %s37_s28 = int_to_ptr.vmem [resolvable:$true] %s36_s28 }
   0x6   :  { %s8763_s10 = smov 32   ;;  %s8764_s11 = smov [#allocation8]  }
   0x7   :  { %42 = dma.hbm_to_vmem [thread:$0]  %s35_s26, 8192, %s37_s28, [#allocation6], %s8762_s9, %s8762_s9, %s8763_s10  }
   0x8   :  { %s60_s12 = sshll.u32 %s8764_s11, 4  ;;  %s82_s1 = sshll.u32 %s9166_s5, 4  ;;  %s61_s12 = int_to_ptr.vmem [resolvable:$true] %s60_s12  ;;  %s83_s1 = int_to_ptr.hbm [resolvable:$true] %s82_s1 }
   0x9   :  { %66 = dma.hbm_to_vmem [thread:$0]  %s59_s8, 65536, %s61_s12, [#allocation9], %s8762_s9, %s8762_s9, %s8763_s10  }
   0xa   :  { %s8765_s15 = smov [#allocation11]   ;;  %s21_s3 = sshll.u32 %s9161_s0, 4  ;;  %s22_s3 = int_to_ptr.hbm [resolvable:$true] %s21_s3 }
   0xb   :  { %s84_s16 = sshll.u32 %s8765_s15, 4  ;;  %s8766_s19 = smov 64   ;;  %s85_s16 = int_to_ptr.vmem [resolvable:$true] %s84_s16 }
   0xc   :  { %s8767_s20 = smov 4   ;;  %s8768_s21 = smov [#allocation2]  }
   0xd   :  { %90 = dma.hbm_to_vmem [thread:$0]  %s83_s1, 8192, %s85_s16, [#allocation12], %s8766_s19, %s8766_s19, %s8767_s20  }
   0xe   :  { %s23_s22 = sshll.u32 %s8768_s21, 4  ;;  %s48_s25 = sshll.u32 %s9163_s2, 4  ;;  %s24_s22 = int_to_ptr.vmem [resolvable:$true] %s23_s22  ;;  %s49_s25 = int_to_ptr.hbm [resolvable:$true] %s48_s25 }
   0xf   :  { %29 = dma.hbm_to_vmem [thread:$0]  %s22_s3, 128, %s24_s22, [#allocation3], %s8766_s19, %s8766_s19, %s8767_s20  }
  0x10   :  { %s72_s27 = sshll.u32 %s9165_s4, 4  ;;  %s8769_s28 = smov [#allocation7]   ;;  %s73_s27 = int_to_ptr.hbm [resolvable:$true] %s72_s27 }
  0x11   :  { %s50_s29 = sshll.u32 %s8769_s28, 4  ;;  %s8770_s0 = smov [#allocation10]   ;;  %s51_s29 = int_to_ptr.vmem [resolvable:$true] %s50_s29 }
  0x12   :  { %53 = dma.hbm_to_vmem [thread:$0]  %s49_s25, 128, %s51_s29, [#allocation6]  }
  0x13   :  { %s74_s30 = sshll.u32 %s8770_s0, 4  ;;  %s96_s10 = sshll.u32 %s9167_s6, 4  ;;  %s75_s30 = int_to_ptr.vmem [resolvable:$true] %s74_s30  ;;  %s97_s10 = int_to_ptr.hbm [resolvable:$true] %s96_s10 }
  0x14   :  { %77 = dma.hbm_to_vmem [thread:$0]  %s73_s27, 128, %s75_s30, [#allocation9]  }
  0x15   :  { %s8771_s2 = smov [#allocation13]  }
  0x16   :  { %s98_s11 = sshll.u32 %s8771_s2, 4  ;;  %s99_s11 = int_to_ptr.vmem [resolvable:$true] %s98_s11 }
  0x17   :  { %101 = dma.hbm_to_vmem [thread:$0]  %s97_s10, 16, %s99_s11, [#allocation12]  }
  0x18   :  { %8751 = dma.done.wait [#allocation3], 128  }
  0x19   :  { %8752 = vsyncadd [#allocation3], 4294967168 }
  0x1a   :  { %8753 = dma.done.wait [#allocation6], 8320  }
  0x1b   :  { %8754 = vsyncadd [#allocation6], 4294958976 }
  0x1c   :  { %8755 = dma.done.wait [#allocation9], 65664  }
  0x1d   :  { %8756 = vsyncadd [#allocation9], 4294901632 }
  0x1e   :  { %8757 = dma.done.wait [#allocation12], 8208  }
  0x1f   :  { %8758 = vsyncadd [#allocation12], 4294959088  ;;  %v5568_v0 = vld [vmem:[#allocation5 + $0x1c0] sm:$0xf]  ;;  %v7959_v2 = vld [vmem:[#allocation5 + $0x1c4] sm:$0xf] }
  0x20   :  { %v7963_v1 = vld [vmem:[#allocation5 + $0x1dc] sm:$0xf0]  ;;  %v5570_v4 = vld [vmem:[#allocation5 + $0x1e0] sm:$0xf0]  ;;  %v5576_v5 = vld [vmem:[#allocation5 + $0x1c8] sm:$0xf] }
  0x21   :  { %v5569_v3 = vor.u32 %v7963_v1, %v5568_v0  ;;  %v7964_v6 = vld [vmem:[#allocation5 + $0x1e4] sm:$0xf0]  ;;  %v5573_v7 = vor.u32 %v7959_v2, %v5570_v4  ;;  %v7960_v9 = vld [vmem:[#allocation5 + $0x1cc] sm:$0xf]  ;;  %v5536_v11 = vld [vmem:[#allocation5 + $0x180] sm:$0xf] }
  0x22   :  { %v5577_v8 = vor.u32 %v7964_v6, %v5576_v5  ;;  %v5578_v10 = vld [vmem:[#allocation5 + $0x1e8] sm:$0xf0]  ;;  %v7955_v13 = vld [vmem:[#allocation5 + $0x19c] sm:$0xf0]  ;;  %v7951_v14 = vld [vmem:[#allocation5 + $0x184] sm:$0xf] }
  0x23   :  { %540 = vmatpush.bf16.msra.mxu0 %v5569_v3  ;;  %v5581_v12 = vor.u32 %v7960_v9, %v5578_v10  ;;  %v5538_v15 = vld [vmem:[#allocation5 + $0x1a0] sm:$0xf0]  ;;  %554 = vmatpush.bf16.msra.mxu1 %v5573_v7  ;;  %v5537_v16 = vor.u32 %v7955_v13, %v5536_v11  ;;  %v5544_v18 = vld [vmem:[#allocation5 + $0x188] sm:$0xf]  ;;  %v7952_v20 = vld [vmem:[#allocation5 + $0x18c] sm:$0xf] }
  0x24   :  { %568 = vmatpush.bf16.msra.mxu2 %v5577_v8  ;;  %v5541_v17 = vor.u32 %v7951_v14, %v5538_v15  ;;  %v7956_v19 = vld [vmem:[#allocation5 + $0x1a4] sm:$0xf0]  ;;  %v5546_v22 = vld [vmem:[#allocation5 + $0x1a8] sm:$0xf0]  ;;  %v5504_v23 = vld [vmem:[#allocation5 + $0x140] sm:$0xf] }
  0x25   :  { %582 = vmatpush.bf16.msra.mxu3 %v5581_v12  ;;  %v5545_v21 = vor.u32 %v7956_v19, %v5544_v18  ;;  %v7947_v24 = vld [vmem:[#allocation5 + $0x15c] sm:$0xf0]  ;;  %v5549_v25 = vor.u32 %v7952_v20, %v5546_v22  ;;  %v7943_v26 = vld [vmem:[#allocation5 + $0x144] sm:$0xf]  ;;  %v5512_v28 = vld [vmem:[#allocation5 + $0x148] sm:$0xf] }
  0x26   :  { %v5506_v27 = vld [vmem:[#allocation5 + $0x160] sm:$0xf0]  ;;  %v5505_v29 = vor.u32 %v7947_v24, %v5504_v23  ;;  %v7948_v30 = vld [vmem:[#allocation5 + $0x164] sm:$0xf0]  ;;  %v7944_v31 = vld [vmem:[#allocation5 + $0x14c] sm:$0xf] }
  0x27   :  { %541 = vmatpush.bf16.msra.mxu0 %v5537_v16  ;;  %v5514_v32 = vld [vmem:[#allocation5 + $0x168] sm:$0xf0]  ;;  %555 = vmatpush.bf16.msra.mxu1 %v5541_v17  ;;  %v5509_v33 = vor.u32 %v7943_v26, %v5506_v27  ;;  %v5513_v34 = vor.u32 %v7948_v30, %v5512_v28  ;;  %v5472_v35 = vld [vmem:[#allocation5 + $0x100] sm:$0xf]  ;;  %v7935_v37 = vld [vmem:[#allocation5 + $0x104] sm:$0xf] }
  0x28   :  { %569 = vmatpush.bf16.msra.mxu2 %v5545_v21  ;;  %v7939_v36 = vld [vmem:[#allocation5 + $0x11c] sm:$0xf0]  ;;  %v5517_v38 = vor.u32 %v7944_v31, %v5514_v32  ;;  %v5474_v39 = vld [vmem:[#allocation5 + $0x120] sm:$0xf0]  ;;  %v5480_v40 = vld [vmem:[#allocation5 + $0x108] sm:$0xf] }
  0x29   :  { %583 = vmatpush.bf16.msra.mxu3 %v5549_v25  ;;  %v7940_v41 = vld [vmem:[#allocation5 + $0x124] sm:$0xf0]  ;;  %v7936_v42 = vld [vmem:[#allocation5 + $0x10c] sm:$0xf]  ;;  %v5473_v44 = vor.u32 %v7939_v36, %v5472_v35  ;;  %v5477_v45 = vor.u32 %v7935_v37, %v5474_v39  ;;  %v5440_v47 = vld [vmem:[#allocation5 + $0xc0] sm:$0xf] }
  0x2a   :  { %v5482_v43 = vld [vmem:[#allocation5 + $0x128] sm:$0xf0]  ;;  %v5481_v46 = vor.u32 %v7940_v41, %v5480_v40  ;;  %v7931_v48 = vld [vmem:[#allocation5 + $0xdc] sm:$0xf0]  ;;  %v7927_v49 = vld [vmem:[#allocation5 + $0xc4] sm:$0xf] }
  0x2b   :  { %542 = vmatpush.bf16.msra.mxu0 %v5505_v29  ;;  %556 = vmatpush.bf16.msra.mxu1 %v5509_v33  ;;  %v5485_v50 = vor.u32 %v7936_v42, %v5482_v43  ;;  %v5442_v51 = vld [vmem:[#allocation5 + $0xe0] sm:$0xf0]  ;;  %v5448_v52 = vld [vmem:[#allocation5 + $0xc8] sm:$0xf]  ;;  %v7928_v54 = vld [vmem:[#allocation5 + $0xcc] sm:$0xf]  ;;  %v5441_v56 = vor.u32 %v7931_v48, %v5440_v47 }
  0x2c   :  { %570 = vmatpush.bf16.msra.mxu2 %v5513_v34  ;;  %v7932_v53 = vld [vmem:[#allocation5 + $0xe4] sm:$0xf0]  ;;  %v5450_v55 = vld [vmem:[#allocation5 + $0xe8] sm:$0xf0]  ;;  %v5445_v57 = vor.u32 %v7927_v49, %v5442_v51  ;;  %v5408_v59 = vld [vmem:[#allocation5 + $0x80] sm:$0xf] }
  0x2d   :  { %584 = vmatpush.bf16.msra.mxu3 %v5517_v38  ;;  %v5449_v58 = vor.u32 %v7932_v53, %v5448_v52  ;;  %v7923_v60 = vld [vmem:[#allocation5 + $0x9c] sm:$0xf0]  ;;  %v7919_v61 = vld [vmem:[#allocation5 + $0x84] sm:$0xf]  ;;  %v5453_v62 = vor.u32 %v7928_v54, %v5450_v55  ;;  %v5416_v0 = vld [vmem:[#allocation5 + $0x88] sm:$0xf] }
  0x2e   :  { %v5410_v63 = vld [vmem:[#allocation5 + $0xa0] sm:$0xf0]  ;;  %v7924_v1 = vld [vmem:[#allocation5 + $0xa4] sm:$0xf0]  ;;  %v7920_v2 = vld [vmem:[#allocation5 + $0x8c] sm:$0xf]  ;;  %v5409_v4 = vor.u32 %v7923_v60, %v5408_v59 }
  0x2f   :  { %543 = vmatpush.bf16.msra.mxu0 %v5473_v44  ;;  %557 = vmatpush.bf16.msra.mxu1 %v5477_v45  ;;  %v5418_v3 = vld [vmem:[#allocation5 + $0xa8] sm:$0xf0]  ;;  %v5413_v5 = vor.u32 %v7919_v61, %v5410_v63  ;;  %v5417_v6 = vor.u32 %v7924_v1, %v5416_v0  ;;  %v5376_v7 = vld [vmem:[#allocation5 + $0x40] sm:$0xf]  ;;  %v7911_v9 = vld [vmem:[#allocation5 + $0x44] sm:$0xf] }
  0x30   :  { %571 = vmatpush.bf16.msra.mxu2 %v5481_v46  ;;  %v7915_v8 = vld [vmem:[#allocation5 + $0x5c] sm:$0xf0]  ;;  %v5421_v10 = vor.u32 %v7920_v2, %v5418_v3  ;;  %v5378_v11 = vld [vmem:[#allocation5 + $0x60] sm:$0xf0]  ;;  %v5384_v12 = vld [vmem:[#allocation5 + $0x48] sm:$0xf] }
  0x31   :  { %585 = vmatpush.bf16.msra.mxu3 %v5485_v50  ;;  %v7916_v13 = vld [vmem:[#allocation5 + $0x64] sm:$0xf0]  ;;  %v7912_v14 = vld [vmem:[#allocation5 + $0x4c] sm:$0xf]  ;;  %v5377_v16 = vor.u32 %v7915_v8, %v5376_v7  ;;  %v5344_v17 = vld [vmem:[#allocation5] sm:$0xf]  ;;  %v5381_v19 = vor.u32 %v7911_v9, %v5378_v11 }
  0x32   :  { %v5386_v15 = vld [vmem:[#allocation5 + $0x68] sm:$0xf0]  ;;  %v7907_v18 = vld [vmem:[#allocation5 + $0x1c] sm:$0xf0]  ;;  %v5385_v20 = vor.u32 %v7916_v13, %v5384_v12  ;;  %v7903_v21 = vld [vmem:[#allocation5 + $0x4] sm:$0xf] }
  0x33   :  { %544 = vmatpush.bf16.msra.mxu0 %v5441_v56  ;;  %558 = vmatpush.bf16.msra.mxu1 %v5445_v57  ;;  %v5346_v22 = vld [vmem:[#allocation5 + $0x20] sm:$0xf0]  ;;  %v5352_v23 = vld [vmem:[#allocation5 + $0x8] sm:$0xf]  ;;  %v5389_v24 = vor.u32 %v7912_v14, %v5386_v15  ;;  %v7904_v26 = vld [vmem:[#allocation5 + $0xc] sm:$0xf]  ;;  %v5345_v31 = vor.u32 %v7907_v18, %v5344_v17 }
  0x34   :  { %572 = vmatpush.bf16.msra.mxu2 %v5449_v58  ;;  %v7908_v25 = vld [vmem:[#allocation5 + $0x24] sm:$0xf0]  ;;  %v5354_v27 = vld [vmem:[#allocation5 + $0x28] sm:$0xf0]  ;;  %v5584_v28 = vld [vmem:[#allocation5 + $0x1d0] sm:$0xf]  ;;  %v5349_v35 = vor.u32 %v7903_v21, %v5346_v22 }
  0x35   :  { %586 = vmatpush.bf16.msra.mxu3 %v5453_v62  ;;  %v7965_v29 = vld [vmem:[#allocation5 + $0x1ec] sm:$0xf0]  ;;  %v7961_v30 = vld [vmem:[#allocation5 + $0x1d4] sm:$0xf]  ;;  %v5592_v33 = vld [vmem:[#allocation5 + $0x1d8] sm:$0xf]  ;;  %v5353_v36 = vor.u32 %v7908_v25, %v5352_v23  ;;  %v5357_v39 = vor.u32 %v7904_v26, %v5354_v27 }
  0x36   :  { %v5586_v32 = vld [vmem:[#allocation5 + $0x1f0] sm:$0xf0]  ;;  %v7966_v34 = vld [vmem:[#allocation5 + $0x1f4] sm:$0xf0]  ;;  %v7962_v37 = vld [vmem:[#allocation5 + $0x1dc] sm:$0xf]  ;;  %v5585_v40 = vor.u32 %v7965_v29, %v5584_v28 }
  0x37   :  { %545 = vmatpush.bf16.msra.mxu0 %v5409_v4  ;;  %559 = vmatpush.bf16.msra.mxu1 %v5413_v5  ;;  %v5594_v38 = vld [vmem:[#allocation5 + $0x1f8] sm:$0xf0]  ;;  %v5589_v42 = vor.u32 %v7961_v30, %v5586_v32  ;;  %v5593_v43 = vor.u32 %v7966_v34, %v5592_v33  ;;  %v5552_v44 = vld [vmem:[#allocation5 + $0x190] sm:$0xf]  ;;  %v7953_v46 = vld [vmem:[#allocation5 + $0x194] sm:$0xf] }
  0x38   :  { %573 = vmatpush.bf16.msra.mxu2 %v5417_v6  ;;  %v8836_v41 = vld [vmem:[#allocation2] sm:$0xff]  ;;  %v7957_v45 = vld [vmem:[#allocation5 + $0x1ac] sm:$0xf0]  ;;  %v5597_v47 = vor.u32 %v7962_v37, %v5594_v38  ;;  %v5554_v48 = vld [vmem:[#allocation5 + $0x1b0] sm:$0xf0]  ;;  %s8772_s4 = smov [#allocation14]  }
  0x39   :  { %587 = vmatpush.bf16.msra.mxu3 %v5421_v10  ;;  %v5560_v49 = vld [vmem:[#allocation5 + $0x198] sm:$0xf]  ;;  %v7954_v51 = vld [vmem:[#allocation5 + $0x19c] sm:$0xf]  ;;  %v5553_v53 = vor.u32 %v7957_v45, %v5552_v44  ;;  %v5557_v54 = vor.u32 %v7953_v46, %v5554_v48  ;;  %v5520_v56 = vld [vmem:[#allocation5 + $0x150] sm:$0xf] }
  0x3a   :  { %v7958_v50 = vld [vmem:[#allocation5 + $0x1b4] sm:$0xf0]  ;;  %v5562_v52 = vld [vmem:[#allocation5 + $0x1b8] sm:$0xf0]  ;;  %v7949_v57 = vld [vmem:[#allocation5 + $0x16c] sm:$0xf0] }
  0x3b   :  { %546 = vmatpush.bf16.msra.mxu0 %v5377_v16  ;;  %560 = vmatpush.bf16.msra.mxu1 %v5381_v19  ;;  %v5561_v55 = vor.u32 %v7958_v50, %v5560_v49  ;;  %v7945_v58 = vld [vmem:[#allocation5 + $0x154] sm:$0xf]  ;;  %v5565_v59 = vor.u32 %v7954_v51, %v5562_v52  ;;  %v5528_v61 = vld [vmem:[#allocation5 + $0x158] sm:$0xf]  ;;  %v7946_v63 = vld [vmem:[#allocation5 + $0x15c] sm:$0xf]  ;;  %v5521_v1 = vor.u32 %v7949_v57, %v5520_v56 }
  0x3c   :  { %574 = vmatpush.bf16.msra.mxu2 %v5385_v20  ;;  %v5522_v60 = vld [vmem:[#allocation5 + $0x170] sm:$0xf0]  ;;  %v7950_v62 = vld [vmem:[#allocation5 + $0x174] sm:$0xf0]  ;;  %v5530_v0 = vld [vmem:[#allocation5 + $0x178] sm:$0xf0] }
  0x3d   :  { %588 = vmatpush.bf16.msra.mxu3 %v5389_v24  ;;  %v5525_v2 = vor.u32 %v7945_v58, %v5522_v60  ;;  %v5529_v3 = vor.u32 %v7950_v62, %v5528_v61  ;;  %v5488_v4 = vld [vmem:[#allocation5 + $0x110] sm:$0xf]  ;;  %v7937_v6 = vld [vmem:[#allocation5 + $0x114] sm:$0xf]  ;;  %v5533_v7 = vor.u32 %v7946_v63, %v5530_v0  ;;  %v5496_v9 = vld [vmem:[#allocation5 + $0x118] sm:$0xf] }
  0x3e   :  { %v7941_v5 = vld [vmem:[#allocation5 + $0x12c] sm:$0xf0]  ;;  %v5490_v8 = vld [vmem:[#allocation5 + $0x130] sm:$0xf0]  ;;  %v7942_v10 = vld [vmem:[#allocation5 + $0x134] sm:$0xf0] }
  0x3f   :  { %547 = vmatpush.bf16.msra.mxu0 %v5345_v31  ;;  %561 = vmatpush.bf16.msra.mxu1 %v5349_v35  ;;  %v7938_v11 = vld [vmem:[#allocation5 + $0x11c] sm:$0xf]  ;;  %v5489_v13 = vor.u32 %v7941_v5, %v5488_v4  ;;  %v5493_v14 = vor.u32 %v7937_v6, %v5490_v8  ;;  %v5497_v15 = vor.u32 %v7942_v10, %v5496_v9  ;;  %v5456_v16 = vld [vmem:[#allocation5 + $0xd0] sm:$0xf]  ;;  %v7929_v18 = vld [vmem:[#allocation5 + $0xd4] sm:$0xf] }
  0x40   :  { %575 = vmatpush.bf16.msra.mxu2 %v5353_v36  ;;  %v5498_v12 = vld [vmem:[#allocation5 + $0x138] sm:$0xf0]  ;;  %v7933_v17 = vld [vmem:[#allocation5 + $0xec] sm:$0xf0]  ;;  %v5458_v20 = vld [vmem:[#allocation5 + $0xf0] sm:$0xf0] }
  0x41   :  { %589 = vmatpush.bf16.msra.mxu3 %v5357_v39  ;;  %v5501_v19 = vor.u32 %v7938_v11, %v5498_v12  ;;  %v5464_v21 = vld [vmem:[#allocation5 + $0xd8] sm:$0xf]  ;;  %v7930_v23 = vld [vmem:[#allocation5 + $0xdc] sm:$0xf]  ;;  %v5457_v25 = vor.u32 %v7933_v17, %v5456_v16  ;;  %v5461_v26 = vor.u32 %v7929_v18, %v5458_v20  ;;  %v5424_v28 = vld [vmem:[#allocation5 + $0x90] sm:$0xf] }
  0x42   :  { %548 = vmatmul.bf16.vlgmr.msra.gmra.mxu0 %v8836_v41  ;;  %562 = vmatmul.bf16.vlgmr.msra.gmra.mxu1 %v8836_v41  ;;  %v7934_v22 = vld [vmem:[#allocation5 + $0xf4] sm:$0xf0]  ;;  %v5466_v24 = vld [vmem:[#allocation5 + $0xf8] sm:$0xf0]  ;;  %v7925_v29 = vld [vmem:[#allocation5 + $0xac] sm:$0xf0] }
  0x43   :  { %596 = vmatpush.bf16.msrb.mxu0 %v5585_v40  ;;  %610 = vmatpush.bf16.msrb.mxu1 %v5589_v42  ;;  %v5465_v27 = vor.u32 %v7934_v22, %v5464_v21  ;;  %v7921_v30 = vld [vmem:[#allocation5 + $0x94] sm:$0xf]  ;;  %v5469_v31 = vor.u32 %v7930_v23, %v5466_v24  ;;  %v5432_v33 = vld [vmem:[#allocation5 + $0x98] sm:$0xf]  ;;  %v7922_v35 = vld [vmem:[#allocation5 + $0x9c] sm:$0xf]  ;;  %v5425_v37 = vor.u32 %v7925_v29, %v5424_v28 }
  0x44   :  { %624 = vmatpush.bf16.msrb.mxu2 %v5593_v43  ;;  %590 = vmatmul.bf16.vlgmr.msra.gmra.mxu3 %v8836_v41  ;;  %v5426_v32 = vld [vmem:[#allocation5 + $0xb0] sm:$0xf0]  ;;  %v7926_v34 = vld [vmem:[#allocation5 + $0xb4] sm:$0xf0]  ;;  %v5434_v36 = vld [vmem:[#allocation5 + $0xb8] sm:$0xf0] }
  0x45   :  { %638 = vmatpush.bf16.msrb.mxu3 %v5597_v47  ;;  %576 = vmatmul.bf16.vlgmr.msra.gmra.mxu2 %v8836_v41  ;;  %v5429_v38 = vor.u32 %v7921_v30, %v5426_v32  ;;  %v5433_v39 = vor.u32 %v7926_v34, %v5432_v33  ;;  %v5392_v40 = vld [vmem:[#allocation5 + $0x50] sm:$0xf]  ;;  %v7913_v43 = vld [vmem:[#allocation5 + $0x54] sm:$0xf]  ;;  %v5437_v44 = vor.u32 %v7922_v35, %v5434_v36  ;;  %v5400_v46 = vld [vmem:[#allocation5 + $0x58] sm:$0xf] }
  0x46   :  { %v7917_v42 = vld [vmem:[#allocation5 + $0x6c] sm:$0xf0]  ;;  %v5394_v45 = vld [vmem:[#allocation5 + $0x70] sm:$0xf0]  ;;  %v7918_v47 = vld [vmem:[#allocation5 + $0x74] sm:$0xf0] }
  0x47   :  { %597 = vmatpush.bf16.msrb.mxu0 %v5553_v53  ;;  %611 = vmatpush.bf16.msrb.mxu1 %v5557_v54  ;;  %v7914_v48 = vld [vmem:[#allocation5 + $0x5c] sm:$0xf]  ;;  %v5393_v50 = vor.u32 %v7917_v42, %v5392_v40  ;;  %v5360_v51 = vld [vmem:[#allocation5 + $0x10] sm:$0xf]  ;;  %v5397_v52 = vor.u32 %v7913_v43, %v5394_v45  ;;  %v5401_v53 = vor.u32 %v7918_v47, %v5400_v46  ;;  %v5362_v56 = vld [vmem:[#allocation5 + $0x30] sm:$0xf0] }
  0x48   :  { %625 = vmatpush.bf16.msrb.mxu2 %v5561_v55  ;;  %v5402_v49 = vld [vmem:[#allocation5 + $0x78] sm:$0xf0]  ;;  %v7909_v54 = vld [vmem:[#allocation5 + $0x2c] sm:$0xf0]  ;;  %v7905_v55 = vld [vmem:[#allocation5 + $0x14] sm:$0xf] }
  0x49   :  { %639 = vmatpush.bf16.msrb.mxu3 %v5565_v59  ;;  %v5405_v57 = vor.u32 %v7914_v48, %v5402_v49  ;;  %v5368_v58 = vld [vmem:[#allocation5 + $0x18] sm:$0xf]  ;;  %v7906_v60 = vld [vmem:[#allocation5 + $0x1c] sm:$0xf]  ;;  %v5824_v62 = vld [vmem:[#allocation8 + $0x1c0] sm:$0xf]  ;;  %v5361_v0 = vor.u32 %v7909_v54, %v5360_v51 }
  0x4a   :  { %v7910_v59 = vld [vmem:[#allocation5 + $0x34] sm:$0xf0]  ;;  %v5370_v61 = vld [vmem:[#allocation5 + $0x38] sm:$0xf0]  ;;  %v8027_v63 = vld [vmem:[#allocation8 + $0x1dc] sm:$0xf0] }
  0x4b   :  { %598 = vmatpush.bf16.msrb.mxu0 %v5521_v1  ;;  %612 = vmatpush.bf16.msrb.mxu1 %v5525_v2  ;;  %v6080_v1 = vld [vmem:[#allocation8 + $0x3c0] sm:$0xf]  ;;  %v5369_v4 = vor.u32 %v7910_v59, %v5368_v58  ;;  %v5373_v5 = vor.u32 %v7906_v60, %v5370_v61  ;;  %v5825_v6 = vor.u32 %v8027_v63, %v5824_v62  ;;  %s5320_s6 = sshll.u32 %s8772_s4, 4  ;;  %s5322_s14 = sshll.u32 %s9168_s7, 4  ;;  %s5321_s6 = int_to_ptr.vmem [resolvable:$true] %s5320_s6  ;;  %s5323_s14 = int_to_ptr.hbm [resolvable:$true] %s5322_s14 }
  0x4c   :  { %626 = vmatpush.bf16.msrb.mxu2 %v5529_v3  ;;  %v8091_v2 = vld [vmem:[#allocation8 + $0x3dc] sm:$0xf0]  ;;  %v5365_v3 = vor.u32 %v7905_v55, %v5362_v56  ;;  %s8773_s1 = smov 128   ;;  %s8774_s15 = smov 8  }
  0x4d   :  { %640 = vmatpush.bf16.msrb.mxu3 %v5533_v7  ;;  %v5792_v7 = vld [vmem:[#allocation8 + $0x180] sm:$0xf]  ;;  %v6081_v10 = vor.u32 %v8091_v2, %v6080_v1 }
  0x4e   :  { %v6336_v8 = vld [vmem:[#allocation8 + $0x5c0] sm:$0xf] }
  0x4f   :  { %599 = vmatpush.bf16.msrb.mxu0 %v5489_v13  ;;  %613 = vmatpush.bf16.msrb.mxu1 %v5493_v14  ;;  %v8155_v9 = vld [vmem:[#allocation8 + $0x5dc] sm:$0xf0] }
  0x50   :  { %627 = vmatpush.bf16.msrb.mxu2 %v5497_v15  ;;  %v8019_v11 = vld [vmem:[#allocation8 + $0x19c] sm:$0xf0]  ;;  %v6337_v16 = vor.u32 %v8155_v9, %v6336_v8 }
  0x51   :  { %641 = vmatpush.bf16.msrb.mxu3 %v5501_v19  ;;  %v6592_v12 = vld [vmem:[#allocation8 + $0x7c0] sm:$0xf]  ;;  %v5793_v17 = vor.u32 %v8019_v11, %v5792_v7 }
  0x52   :  { %v8219_v13 = vld [vmem:[#allocation8 + $0x7dc] sm:$0xf0] }
  0x53   :  { %600 = vmatpush.bf16.msrb.mxu0 %v5457_v25  ;;  %614 = vmatpush.bf16.msrb.mxu1 %v5461_v26  ;;  %v6048_v14 = vld [vmem:[#allocation8 + $0x380] sm:$0xf]  ;;  %v6593_v18 = vor.u32 %v8219_v13, %v6592_v12 }
  0x54   :  { %628 = vmatpush.bf16.msrb.mxu2 %v5465_v27  ;;  %v8083_v15 = vld [vmem:[#allocation8 + $0x39c] sm:$0xf0] }
  0x55   :  { %642 = vmatpush.bf16.msrb.mxu3 %v5469_v31  ;;  %v5760_v19 = vld [vmem:[#allocation8 + $0x140] sm:$0xf]  ;;  %v6049_v22 = vor.u32 %v8083_v15, %v6048_v14 }
  0x56   :  { %v6304_v20 = vld [vmem:[#allocation8 + $0x580] sm:$0xf] }
  0x57   :  { %601 = vmatpush.bf16.msrb.mxu0 %v5425_v37  ;;  %615 = vmatpush.bf16.msrb.mxu1 %v5429_v38  ;;  %v8147_v21 = vld [vmem:[#allocation8 + $0x59c] sm:$0xf0] }
  0x58   :  { %629 = vmatpush.bf16.msrb.mxu2 %v5433_v39  ;;  %v8011_v23 = vld [vmem:[#allocation8 + $0x15c] sm:$0xf0]  ;;  %v6305_v28 = vor.u32 %v8147_v21, %v6304_v20 }
  0x59   :  { %643 = vmatpush.bf16.msrb.mxu3 %v5437_v44  ;;  %v6560_v24 = vld [vmem:[#allocation8 + $0x780] sm:$0xf]  ;;  %v5761_v29 = vor.u32 %v8011_v23, %v5760_v19 }
  0x5a   :  { %v8211_v25 = vld [vmem:[#allocation8 + $0x79c] sm:$0xf0] }
  0x5b   :  { %602 = vmatpush.bf16.msrb.mxu0 %v5393_v50  ;;  %616 = vmatpush.bf16.msrb.mxu1 %v5397_v52  ;;  %v6016_v26 = vld [vmem:[#allocation8 + $0x340] sm:$0xf]  ;;  %v6561_v30 = vor.u32 %v8211_v25, %v6560_v24 }
  0x5c   :  { %630 = vmatpush.bf16.msrb.mxu2 %v5401_v53  ;;  %v8075_v27 = vld [vmem:[#allocation8 + $0x35c] sm:$0xf0] }
  0x5d   :  { %644 = vmatpush.bf16.msrb.mxu3 %v5405_v57  ;;  %v5728_v31 = vld [vmem:[#allocation8 + $0x100] sm:$0xf]  ;;  %v6017_v34 = vor.u32 %v8075_v27, %v6016_v26 }
  0x5e   :  { %v6272_v32 = vld [vmem:[#allocation8 + $0x540] sm:$0xf] }
  0x5f   :  { %603 = vmatpush.bf16.msrb.mxu0 %v5361_v0  ;;  %617 = vmatpush.bf16.msrb.mxu1 %v5365_v3  ;;  %v8139_v33 = vld [vmem:[#allocation8 + $0x55c] sm:$0xf0] }
  0x60   :  { %631 = vmatpush.bf16.msrb.mxu2 %v5369_v4  ;;  %v8003_v35 = vld [vmem:[#allocation8 + $0x11c] sm:$0xf0]  ;;  %v6273_v40 = vor.u32 %v8139_v33, %v6272_v32 }
  0x61   :  { %645 = vmatpush.bf16.msrb.mxu3 %v5373_v5  ;;  %v6528_v36 = vld [vmem:[#allocation8 + $0x740] sm:$0xf] }
  0x62   :  { %604 = vmatmul.bf16.vlgmr.msrb.gmra.mxu0 %v8836_v41  ;;  %618 = vmatmul.bf16.vlgmr.msrb.gmra.mxu1 %v8836_v41  ;;  %v8203_v37 = vld [vmem:[#allocation8 + $0x75c] sm:$0xf0] }
  0x63   :  { %3766 = vmatpush.bf16.msra.mxu0 %v5825_v6  ;;  %3780 = vmatpush.bf16.msra.mxu1 %v6081_v10  ;;  %v5984_v38 = vld [vmem:[#allocation8 + $0x300] sm:$0xf]  ;;  %v6529_v43 = vor.u32 %v8203_v37, %v6528_v36 }
  0x64   :  { %632 = vmatmul.bf16.vlgmr.msrb.gmra.mxu2 %v8836_v41  ;;  %646 = vmatmul.bf16.vlgmr.msrb.gmra.mxu3 %v8836_v41  ;;  %v8067_v39 = vld [vmem:[#allocation8 + $0x31c] sm:$0xf0]  ;;  %v5729_v41 = vor.u32 %v8003_v35, %v5728_v31 }
  0x65   :  { %3794 = vmatpush.bf16.msra.mxu2 %v6337_v16  ;;  %3808 = vmatpush.bf16.msra.mxu3 %v6593_v18  ;;  %v5696_v42 = vld [vmem:[#allocation8 + $0xc0] sm:$0xf]  ;;  %v5985_v46 = vor.u32 %v8067_v39, %v5984_v38 }
  0x66   :  { %v6240_v44 = vld [vmem:[#allocation8 + $0x500] sm:$0xf] }
  0x67   :  { %3767 = vmatpush.bf16.msra.mxu0 %v5793_v17  ;;  %3781 = vmatpush.bf16.msra.mxu1 %v6049_v22  ;;  %v8131_v45 = vld [vmem:[#allocation8 + $0x51c] sm:$0xf0] }
  0x68   :  { %v7995_v47 = vld [vmem:[#allocation8 + $0xdc] sm:$0xf0]  ;;  %v6241_v52 = vor.u32 %v8131_v45, %v6240_v44 }
  0x69   :  { %3795 = vmatpush.bf16.msra.mxu2 %v6305_v28  ;;  %3809 = vmatpush.bf16.msra.mxu3 %v6561_v30  ;;  %v6496_v48 = vld [vmem:[#allocation8 + $0x700] sm:$0xf]  ;;  %v5697_v53 = vor.u32 %v7995_v47, %v5696_v42 }
  0x6a   :  { %v8195_v49 = vld [vmem:[#allocation8 + $0x71c] sm:$0xf0] }
  0x6b   :  { %3768 = vmatpush.bf16.msra.mxu0 %v5761_v29  ;;  %3782 = vmatpush.bf16.msra.mxu1 %v6017_v34  ;;  %v5952_v50 = vld [vmem:[#allocation8 + $0x2c0] sm:$0xf]  ;;  %v6497_v54 = vor.u32 %v8195_v49, %v6496_v48 }
  0x6c   :  { %v8059_v51 = vld [vmem:[#allocation8 + $0x2dc] sm:$0xf0] }
  0x6d   :  { %3796 = vmatpush.bf16.msra.mxu2 %v6273_v40  ;;  %3810 = vmatpush.bf16.msra.mxu3 %v6529_v43  ;;  %v5664_v55 = vld [vmem:[#allocation8 + $0x80] sm:$0xf]  ;;  %v5953_v58 = vor.u32 %v8059_v51, %v5952_v50 }
  0x6e   :  { %v6208_v56 = vld [vmem:[#allocation8 + $0x4c0] sm:$0xf] }
  0x6f   :  { %3769 = vmatpush.bf16.msra.mxu0 %v5729_v41  ;;  %v8123_v57 = vld [vmem:[#allocation8 + $0x4dc] sm:$0xf0]  ;;  %3783 = vmatpush.bf16.msra.mxu1 %v5985_v46 }
  0x70   :  { %v7987_v59 = vld [vmem:[#allocation8 + $0x9c] sm:$0xf0]  ;;  %v6209_v0 = vor.u32 %v8123_v57, %v6208_v56 }
  0x71   :  { %v6464_v60 = vld [vmem:[#allocation8 + $0x6c0] sm:$0xf]  ;;  %3797 = vmatpush.bf16.msra.mxu2 %v6241_v52  ;;  %3811 = vmatpush.bf16.msra.mxu3 %v6497_v54  ;;  %v5665_v1 = vor.u32 %v7987_v59, %v5664_v55 }
  0x72   :  { %v8187_v61 = vld [vmem:[#allocation8 + $0x6dc] sm:$0xf0] }
  0x73   :  { %v5920_v62 = vld [vmem:[#allocation8 + $0x280] sm:$0xf]  ;;  %3770 = vmatpush.bf16.msra.mxu0 %v5697_v53  ;;  %v6465_v2 = vor.u32 %v8187_v61, %v6464_v60  ;;  %3784 = vmatpush.bf16.msra.mxu1 %v5953_v58 }
  0x74   :  { %v8051_v63 = vld [vmem:[#allocation8 + $0x29c] sm:$0xf0] }
  0x75   :  { %v5632_v3 = vld [vmem:[#allocation8 + $0x40] sm:$0xf]  ;;  %v5921_v6 = vor.u32 %v8051_v63, %v5920_v62  ;;  %3798 = vmatpush.bf16.msra.mxu2 %v6209_v0  ;;  %3812 = vmatpush.bf16.msra.mxu3 %v6465_v2 }
  0x76   :  { %v6176_v4 = vld [vmem:[#allocation8 + $0x480] sm:$0xf] }
  0x77   :  { %v8115_v5 = vld [vmem:[#allocation8 + $0x49c] sm:$0xf0]  ;;  %3771 = vmatpush.bf16.msra.mxu0 %v5665_v1  ;;  %3785 = vmatpush.bf16.msra.mxu1 %v5921_v6 }
  0x78   :  { %v7979_v7 = vld [vmem:[#allocation8 + $0x5c] sm:$0xf0]  ;;  %v6177_v12 = vor.u32 %v8115_v5, %v6176_v4 }
  0x79   :  { %v6432_v8 = vld [vmem:[#allocation8 + $0x680] sm:$0xf]  ;;  %v5633_v14 = vor.u32 %v7979_v7, %v5632_v3 }
  0x7a   :  { %v8179_v9 = vld [vmem:[#allocation8 + $0x69c] sm:$0xf0]  ;;  %3799 = vmatpush.bf16.msra.mxu2 %v6177_v12 }
  0x7b   :  { %v5888_v10 = vld [vmem:[#allocation8 + $0x240] sm:$0xf]  ;;  %v6433_v15 = vor.u32 %v8179_v9, %v6432_v8  ;;  %3772 = vmatpush.bf16.msra.mxu0 %v5633_v14 }
  0x7c   :  { %v8043_v11 = vld [vmem:[#allocation8 + $0x25c] sm:$0xf0] }
  0x7d   :  { %v5600_v13 = vld [vmem:[#allocation8] sm:$0xf]  ;;  %v5889_v19 = vor.u32 %v8043_v11, %v5888_v10  ;;  %3813 = vmatpush.bf16.msra.mxu3 %v6433_v15 }
  0x7e   :  { %v7971_v16 = vld [vmem:[#allocation8 + $0x1c] sm:$0xf0] }
  0x7f   :  { %v6144_v17 = vld [vmem:[#allocation8 + $0x440] sm:$0xf]  ;;  %v5601_v29 = vor.u32 %v7971_v16, %v5600_v13  ;;  %3786 = vmatpush.bf16.msra.mxu1 %v5889_v19 }
  0x80   :  { %v8107_v18 = vld [vmem:[#allocation8 + $0x45c] sm:$0xf0] }
  0x81   :  { %v5856_v20 = vld [vmem:[#allocation8 + $0x200] sm:$0xf]  ;;  %v6145_v28 = vor.u32 %v8107_v18, %v6144_v17  ;;  %3773 = vmatpush.bf16.msra.mxu0 %v5601_v29 }
  0x82   :  { %v6400_v21 = vld [vmem:[#allocation8 + $0x640] sm:$0xf] }
  0x83   :  { %v8171_v22 = vld [vmem:[#allocation8 + $0x65c] sm:$0xf0]  ;;  %3800 = vmatpush.bf16.msra.mxu2 %v6145_v28 }
  0x84   :  { %v8035_v23 = vld [vmem:[#allocation8 + $0x21c] sm:$0xf0]  ;;  %v6401_v30 = vor.u32 %v8171_v22, %v6400_v21 }
  0x85   :  { %v6848_v24 = vld [vmem:[#allocation8 + $0x9c0] sm:$0xf]  ;;  %v5857_v35 = vor.u32 %v8035_v23, %v5856_v20 }
  0x86   :  { %v8283_v25 = vld [vmem:[#allocation8 + $0x9dc] sm:$0xf0]  ;;  %3814 = vmatpush.bf16.msra.mxu3 %v6401_v30 }
  0x87   :  { %v7104_v26 = vld [vmem:[#allocation8 + $0xbc0] sm:$0xf]  ;;  %v6849_v36 = vor.u32 %v8283_v25, %v6848_v24  ;;  %3787 = vmatpush.bf16.msra.mxu1 %v5857_v35 }
  0x88   :  { %v8347_v27 = vld [vmem:[#allocation8 + $0xbdc] sm:$0xf0] }
  0x89   :  { %v6816_v31 = vld [vmem:[#allocation8 + $0x980] sm:$0xf]  ;;  %v7105_v40 = vor.u32 %v8347_v27, %v7104_v26  ;;  %3822 = vmatpush.bf16.msrb.mxu0 %v6849_v36 }
  0x8a   :  { %v6112_v32 = vld [vmem:[#allocation8 + $0x400] sm:$0xf] }
  0x8b   :  { %v8099_v33 = vld [vmem:[#allocation8 + $0x41c] sm:$0xf0]  ;;  %3836 = vmatpush.bf16.msrb.mxu1 %v7105_v40 }
  0x8c   :  { %v6368_v34 = vld [vmem:[#allocation8 + $0x600] sm:$0xf]  ;;  %v6113_v46 = vor.u32 %v8099_v33, %v6112_v32 }
  0x8d   :  { %v8163_v37 = vld [vmem:[#allocation8 + $0x61c] sm:$0xf0] }
  0x8e   :  { %v7360_v38 = vld [vmem:[#allocation8 + $0xdc0] sm:$0xf]  ;;  %v6369_v47 = vor.u32 %v8163_v37, %v6368_v34  ;;  %3801 = vmatpush.bf16.msra.mxu2 %v6113_v46 }
  0x8f   :  { %v8411_v39 = vld [vmem:[#allocation8 + $0xddc] sm:$0xf0] }
  0x90   :  { %v8275_v42 = vld [vmem:[#allocation8 + $0x99c] sm:$0xf0]  ;;  %v7361_v48 = vor.u32 %v8411_v39, %v7360_v38  ;;  %3815 = vmatpush.bf16.msra.mxu3 %v6369_v47 }
  0x91   :  { %v7616_v41 = vld [vmem:[#allocation8 + $0xfc0] sm:$0xf]  ;;  %v6817_v49 = vor.u32 %v8275_v42, %v6816_v31 }
  0x92   :  { %v8475_v43 = vld [vmem:[#allocation8 + $0xfdc] sm:$0xf0]  ;;  %3850 = vmatpush.bf16.msrb.mxu2 %v7361_v48 }
  0x93   :  { %v7072_v44 = vld [vmem:[#allocation8 + $0xb80] sm:$0xf]  ;;  %v7617_v50 = vor.u32 %v8475_v43, %v7616_v41  ;;  %3823 = vmatpush.bf16.msrb.mxu0 %v6817_v49 }
  0x94   :  { %v8339_v45 = vld [vmem:[#allocation8 + $0xb9c] sm:$0xf0] }
  0x95   :  { %v6784_v51 = vld [vmem:[#allocation8 + $0x940] sm:$0xf]  ;;  %v7073_v54 = vor.u32 %v8339_v45, %v7072_v44  ;;  %3864 = vmatpush.bf16.msrb.mxu3 %v7617_v50 }
  0x96   :  { %v7328_v52 = vld [vmem:[#allocation8 + $0xd80] sm:$0xf] }
  0x97   :  { %v8403_v53 = vld [vmem:[#allocation8 + $0xd9c] sm:$0xf0]  ;;  %3837 = vmatpush.bf16.msrb.mxu1 %v7073_v54 }
  0x98   :  { %v8267_v55 = vld [vmem:[#allocation8 + $0x95c] sm:$0xf0]  ;;  %v7329_v60 = vor.u32 %v8403_v53, %v7328_v52 }
  0x99   :  { %v7584_v56 = vld [vmem:[#allocation8 + $0xf80] sm:$0xf]  ;;  %v6785_v61 = vor.u32 %v8267_v55, %v6784_v51 }
  0x9a   :  { %v8467_v57 = vld [vmem:[#allocation8 + $0xf9c] sm:$0xf0]  ;;  %3851 = vmatpush.bf16.msrb.mxu2 %v7329_v60 }
  0x9b   :  { %v7040_v58 = vld [vmem:[#allocation8 + $0xb40] sm:$0xf]  ;;  %v7585_v62 = vor.u32 %v8467_v57, %v7584_v56  ;;  %3824 = vmatpush.bf16.msrb.mxu0 %v6785_v61 }
  0x9c   :  { %v8331_v59 = vld [vmem:[#allocation8 + $0xb5c] sm:$0xf0] }
  0x9d   :  { %v7041_v63 = vor.u32 %v8331_v59, %v7040_v58  ;;  %v6752_v0 = vld [vmem:[#allocation8 + $0x900] sm:$0xf]  ;;  %3865 = vmatpush.bf16.msrb.mxu3 %v7585_v62 }
  0x9e   :  { %v8259_v1 = vld [vmem:[#allocation8 + $0x91c] sm:$0xf0] }
  0x9f   :  { %v7008_v2 = vld [vmem:[#allocation8 + $0xb00] sm:$0xf]  ;;  %v6753_v4 = vor.u32 %v8259_v1, %v6752_v0  ;;  %3838 = vmatpush.bf16.msrb.mxu1 %v7041_v63 }
  0xa0   :  { %v8323_v3 = vld [vmem:[#allocation8 + $0xb1c] sm:$0xf0] }
  0xa1   :  { %v7009_v5 = vor.u32 %v8323_v3, %v7008_v2  ;;  %3825 = vmatpush.bf16.msrb.mxu0 %v6753_v4  ;;  %v7296_v6 = vld [vmem:[#allocation8 + $0xd40] sm:$0xf]  ;;  %v8846_v2 = vld [vmem:[#allocation7] sm:$0xff] }
  0xa2   :  { %v8395_v7 = vld [vmem:[#allocation8 + $0xd5c] sm:$0xf0]  ;;  %v198_v4 = vperm.slane %v8846_v2, 0 }
  0xa3   :  { %3839 = vmatpush.bf16.msrb.mxu1 %v7009_v5  ;;  %v7552_v8 = vld [vmem:[#allocation8 + $0xf40] sm:$0xf]  ;;  %v7297_v9 = vor.u32 %v8395_v7, %v7296_v6  ;;  %v199_v6 = vperm.slane %v8846_v2, 1 }
  0xa4   :  { %v8459_v10 = vld [vmem:[#allocation8 + $0xf5c] sm:$0xf0] }
  0xa5   :  { %v7553_v11 = vor.u32 %v8459_v10, %v7552_v8  ;;  %v6720_v12 = vld [vmem:[#allocation8 + $0x8c0] sm:$0xf]  ;;  %3852 = vmatpush.bf16.msrb.mxu2 %v7297_v9 }
  0xa6   :  { %v8251_v13 = vld [vmem:[#allocation8 + $0x8dc] sm:$0xf0] }
  0xa7   :  { %v6976_v14 = vld [vmem:[#allocation8 + $0xac0] sm:$0xf]  ;;  %v6721_v15 = vor.u32 %v8251_v13, %v6720_v12  ;;  %3866 = vmatpush.bf16.msrb.mxu3 %v7553_v11 }
  0xa8   :  { %v8315_v16 = vld [vmem:[#allocation8 + $0xadc] sm:$0xf0] }
  0xa9   :  { %v6977_v17 = vor.u32 %v8315_v16, %v6976_v14  ;;  %v7264_v18 = vld [vmem:[#allocation8 + $0xd00] sm:$0xf]  ;;  %3826 = vmatpush.bf16.msrb.mxu0 %v6721_v15  ;;  %v8023_v15 = vld [vmem:[#allocation8 + $0x1c4] sm:$0xf] }
  0xaa   :  { %v8387_v19 = vld [vmem:[#allocation8 + $0xd1c] sm:$0xf0]  ;;  %v5826_v16 = vld [vmem:[#allocation8 + $0x1e0] sm:$0xf0] }
  0xab   :  { %v7265_v20 = vor.u32 %v8387_v19, %v7264_v18  ;;  %v7520_v21 = vld [vmem:[#allocation8 + $0xf00] sm:$0xf]  ;;  %3840 = vmatpush.bf16.msrb.mxu1 %v6977_v17  ;;  %v200_v18 = vperm.slane %v8846_v2, 2 }
  0xac   :  { %v8451_v22 = vld [vmem:[#allocation8 + $0xf1c] sm:$0xf0] }
  0xad   :  { %v7521_v23 = vor.u32 %v8451_v22, %v7520_v21  ;;  %v6688_v24 = vld [vmem:[#allocation8 + $0x880] sm:$0xf]  ;;  %3853 = vmatpush.bf16.msrb.mxu2 %v7265_v20  ;;  %v8087_v20 = vld [vmem:[#allocation8 + $0x3c4] sm:$0xf]  ;;  %v201_v22 = vperm.slane %v8846_v2, 3 }
  0xae   :  { %v8243_v25 = vld [vmem:[#allocation8 + $0x89c] sm:$0xf0]  ;;  %v6082_v21 = vld [vmem:[#allocation8 + $0x3e0] sm:$0xf0] }
  0xaf   :  { %v6944_v26 = vld [vmem:[#allocation8 + $0xa80] sm:$0xf]  ;;  %v6689_v27 = vor.u32 %v8243_v25, %v6688_v24  ;;  %3867 = vmatpush.bf16.msrb.mxu3 %v7521_v23  ;;  %v5829_v25 = vor.u32 %v8023_v15, %v5826_v16  ;;  %v5954_v15 = vld [vmem:[#allocation8 + $0x2e0] sm:$0xf0] }
  0xb0   :  { %v8307_v28 = vld [vmem:[#allocation8 + $0xa9c] sm:$0xf0] }
  0xb1   :  { %v6945_v29 = vor.u32 %v8307_v28, %v6944_v26  ;;  %v7232_v30 = vld [vmem:[#allocation8 + $0xcc0] sm:$0xf]  ;;  %3827 = vmatpush.bf16.msrb.mxu0 %v6689_v27  ;;  %v6085_v27 = vor.u32 %v8087_v20, %v6082_v21  ;;  %v8015_v28 = vld [vmem:[#allocation8 + $0x184] sm:$0xf] }
  0xb2   :  { %v8379_v31 = vld [vmem:[#allocation8 + $0xcdc] sm:$0xf0]  ;;  %v6242_v20 = vld [vmem:[#allocation8 + $0x520] sm:$0xf0] }
  0xb3   :  { %v7488_v32 = vld [vmem:[#allocation8 + $0xec0] sm:$0xf]  ;;  %v7233_v33 = vor.u32 %v8379_v31, %v7232_v30  ;;  %3841 = vmatpush.bf16.msrb.mxu1 %v6945_v29  ;;  %v5794_v29 = vld [vmem:[#allocation8 + $0x1a0] sm:$0xf0] }
  0xb4   :  { %v8443_v34 = vld [vmem:[#allocation8 + $0xedc] sm:$0xf0]  ;;  %v8191_v21 = vld [vmem:[#allocation8 + $0x704] sm:$0xf] }
  0xb5   :  { %v7489_v35 = vor.u32 %v8443_v34, %v7488_v32  ;;  %v6656_v36 = vld [vmem:[#allocation8 + $0x840] sm:$0xf]  ;;  %3854 = vmatpush.bf16.msrb.mxu2 %v7233_v33  ;;  %v8079_v32 = vld [vmem:[#allocation8 + $0x384] sm:$0xf] }
  0xb6   :  { %v8235_v37 = vld [vmem:[#allocation8 + $0x85c] sm:$0xf0]  ;;  %v6050_v33 = vld [vmem:[#allocation8 + $0x3a0] sm:$0xf0] }
  0xb7   :  { %v6657_v38 = vor.u32 %v8235_v37, %v6656_v36  ;;  %v6912_v39 = vld [vmem:[#allocation8 + $0xa40] sm:$0xf]  ;;  %3868 = vmatpush.bf16.msrb.mxu3 %v7489_v35 }
  0xb8   :  { %v8299_v40 = vld [vmem:[#allocation8 + $0xa5c] sm:$0xf0] }
  0xb9   :  { %v6913_v42 = vor.u32 %v8299_v40, %v6912_v39  ;;  %v7200_v41 = vld [vmem:[#allocation8 + $0xc80] sm:$0xf]  ;;  %3828 = vmatpush.bf16.msrb.mxu0 %v6657_v38  ;;  %v5797_v38 = vor.u32 %v8015_v28, %v5794_v29  ;;  %v8151_v39 = vld [vmem:[#allocation8 + $0x5c4] sm:$0xf]  ;;  %v202_v28 = vperm.slane %v8846_v2, 4 }
  0xba   :  { %v8371_v43 = vld [vmem:[#allocation8 + $0xc9c] sm:$0xf0]  ;;  %v6338_v40 = vld [vmem:[#allocation8 + $0x5e0] sm:$0xf0] }
  0xbb   :  { %v7456_v44 = vld [vmem:[#allocation8 + $0xe80] sm:$0xf]  ;;  %v7201_v45 = vor.u32 %v8371_v43, %v7200_v41  ;;  %3842 = vmatpush.bf16.msrb.mxu1 %v6913_v42  ;;  %v8215_v42 = vld [vmem:[#allocation8 + $0x7c4] sm:$0xf]  ;;  %v6053_v43 = vor.u32 %v8079_v32, %v6050_v33  ;;  %v203_v33 = vperm.slane %v8846_v2, 5 }
  0xbc   :  { %v8435_v46 = vld [vmem:[#allocation8 + $0xe9c] sm:$0xf0]  ;;  %v5922_v32 = vld [vmem:[#allocation8 + $0x2a0] sm:$0xf0] }
  0xbd   :  { %v7457_v47 = vor.u32 %v8435_v46, %v7456_v44  ;;  %v6624_v48 = vld [vmem:[#allocation8 + $0x800] sm:$0xf]  ;;  %3855 = vmatpush.bf16.msrb.mxu2 %v7201_v45  ;;  %v6594_v44 = vld [vmem:[#allocation8 + $0x7e0] sm:$0xf0] }
  0xbe   :  { %v8227_v49 = vld [vmem:[#allocation8 + $0x81c] sm:$0xf0]  ;;  %v8007_v45 = vld [vmem:[#allocation8 + $0x144] sm:$0xf] }
  0xbf   :  { %v6880_v50 = vld [vmem:[#allocation8 + $0xa00] sm:$0xf]  ;;  %v6625_v51 = vor.u32 %v8227_v49, %v6624_v48  ;;  %3869 = vmatpush.bf16.msrb.mxu3 %v7457_v47  ;;  %v549_v3 = vpop.f32.mrf.mxu0  ;;  %v563_v5 = vpop.f32.mrf.mxu1  ;;  %v5762_v46 = vld [vmem:[#allocation8 + $0x160] sm:$0xf0] }
  0xc0   :  { %v8291_v52 = vld [vmem:[#allocation8 + $0xa1c] sm:$0xf0]  ;;  %v550_v7 = vadd.f32 %v549_v3, %v198_v4  ;;  %v564_v8 = vadd.f32 %v563_v5, %v199_v6  ;;  %v8071_v49 = vld [vmem:[#allocation8 + $0x344] sm:$0xf] }
  0xc1   :  { %v6881_v53 = vor.u32 %v8291_v52, %v6880_v50  ;;  %v7168_v54 = vld [vmem:[#allocation8 + $0xc40] sm:$0xf]  ;;  %3829 = vmatpush.bf16.msrb.mxu0 %v6625_v51  ;;  %v6018_v50 = vld [vmem:[#allocation8 + $0x360] sm:$0xf0] }
  0xc2   :  { %v8363_v55 = vld [vmem:[#allocation8 + $0xc5c] sm:$0xf0]  ;;  %v652_v12 = vmax.f32 %v550_v7, 0.0  ;;  %v653_v17 = vmax.f32 %v564_v8, 0.0  ;;  %v5986_v3 = vld [vmem:[#allocation8 + $0x320] sm:$0xf0] }
  0xc3   :  { %v7424_v56 = vld [vmem:[#allocation8 + $0xe40] sm:$0xf]  ;;  %3843 = vmatpush.bf16.msrb.mxu1 %v6881_v53  ;;  %v7169_v58 = vor.u32 %v8363_v55, %v7168_v54  ;;  %v6341_v53 = vor.u32 %v8151_v39, %v6338_v40  ;;  %v6597_v55 = vor.u32 %v8215_v42, %v6594_v44  ;;  %v8135_v7 = vld [vmem:[#allocation8 + $0x544] sm:$0xf] }
  0xc4   :  { %v8427_v57 = vld [vmem:[#allocation8 + $0xe5c] sm:$0xf0]  ;;  %v6274_v8 = vld [vmem:[#allocation8 + $0x560] sm:$0xf0] }
  0xc5   :  { %v7425_v59 = vor.u32 %v8427_v57, %v7424_v56  ;;  %3856 = vmatpush.bf16.msrb.mxu2 %v7169_v58  ;;  %v7136_v60 = vld [vmem:[#allocation8 + $0xc00] sm:$0xf]  ;;  %v5765_v56 = vor.u32 %v8007_v45, %v5762_v46  ;;  %v8143_v57 = vld [vmem:[#allocation8 + $0x584] sm:$0xf]  ;;  %v6277_v16 = vor.u32 %v8135_v7, %v6274_v8  ;;  %v204_v8 = vperm.slane %v8846_v2, 6 }
  0xc6   :  { %v8355_v61 = vld [vmem:[#allocation8 + $0xc1c] sm:$0xf0]  ;;  %v6306_v58 = vld [vmem:[#allocation8 + $0x5a0] sm:$0xf0] }
  0xc7   :  { %3870 = vmatpush.bf16.msrb.mxu3 %v7425_v59  ;;  %v7137_v62 = vor.u32 %v8355_v61, %v7136_v60  ;;  %v7392_v63 = vld [vmem:[#allocation8 + $0xe00] sm:$0xf]  ;;  %v591_v10 = vpop.f32.mrf.mxu3  ;;  %v551_v11 = vpop.f32.mrf.mxu0  ;;  %v8207_v59 = vld [vmem:[#allocation8 + $0x784] sm:$0xf]  ;;  %v6021_v61 = vor.u32 %v8071_v49, %v6018_v50 }
  0xc8   :  { %v8419_v0 = vld [vmem:[#allocation8 + $0xe1c] sm:$0xf0]  ;;  %v577_v9 = vpop.f32.mrf.mxu2  ;;  %v552_v13 = vadd.f32 %v551_v11, %v198_v4  ;;  %v565_v14 = vpop.f32.mrf.mxu1  ;;  %v592_v34 = vadd.f32 %v591_v10, %v201_v22  ;;  %v6309_v4 = vor.u32 %v8143_v57, %v6306_v58  ;;  %v6530_v11 = vld [vmem:[#allocation8 + $0x760] sm:$0xf0] }
  0xc9   :  { %v7393_v1 = vor.u32 %v8419_v0, %v7392_v63  ;;  %3857 = vmatpush.bf16.msrb.mxu2 %v7137_v62  ;;  %v566_v19 = vadd.f32 %v565_v14, %v199_v6  ;;  %v578_v30 = vadd.f32 %v577_v9, %v200_v18  ;;  %v6562_v62 = vld [vmem:[#allocation8 + $0x7a0] sm:$0xf0] }
  0xca   :  { %v660_v23 = vmax.f32 %v552_v13, 0.0  ;;  %v655_v51 = vmax.f32 %v592_v34, 0.0  ;;  %v7999_v63 = vld [vmem:[#allocation8 + $0x104] sm:$0xf]  ;;  %v6565_v5 = vor.u32 %v8207_v59, %v6562_v62 }
  0xcb   :  { %3871 = vmatpush.bf16.msrb.mxu3 %v7393_v1  ;;  %v661_v24 = vmax.f32 %v566_v19, 0.0  ;;  %v654_v47 = vmax.f32 %v578_v30, 0.0  ;;  %v5730_v0 = vld [vmem:[#allocation8 + $0x120] sm:$0xf0] }
  0xcc   :  { %v8852_v26 = vpack.c.bf16 %v660_v23, %v652_v12  ;;  %v8063_v1 = vld [vmem:[#allocation8 + $0x304] sm:$0xf]  ;;  %v5733_v6 = vor.u32 %v7999_v63, %v5730_v0 }
  0xcd   :  { %v8854_v31 = vpack.c.bf16 %v661_v24, %v653_v17  ;;  %v8199_v9 = vld [vmem:[#allocation8 + $0x744] sm:$0xf]  ;;  %v5989_v10 = vor.u32 %v8063_v1, %v5986_v3 }
  0xce   :  { %3774 = vmatmul.bf16.vlgmr.msra.gmra.mxu0 %v8852_v26  ;;  %v7991_v12 = vld [vmem:[#allocation8 + $0xc4] sm:$0xf]  ;;  %v6533_v17 = vor.u32 %v8199_v9, %v6530_v11 }
  0xcf   :  { %v593_v37 = vpop.f32.mrf.mxu3  ;;  %3788 = vmatmul.bf16.vlgmr.msra.gmra.mxu1 %v8854_v31  ;;  %3878 = vmatpush.bf16.msra.mxu0 %v5829_v25  ;;  %v5698_v13 = vld [vmem:[#allocation8 + $0xe0] sm:$0xf0] }
  0xd0   :  { %v579_v35 = vpop.f32.mrf.mxu2  ;;  %v594_v41 = vadd.f32 %v593_v37, %v201_v22  ;;  %3892 = vmatpush.bf16.msra.mxu1 %v6085_v27  ;;  %v8055_v14 = vld [vmem:[#allocation8 + $0x2c4] sm:$0xf] }
  0xd1   :  { %v580_v36 = vadd.f32 %v579_v35, %v200_v18  ;;  %v5701_v18 = vor.u32 %v7991_v12, %v5698_v13  ;;  %v8127_v19 = vld [vmem:[#allocation8 + $0x504] sm:$0xf]  ;;  %v5957_v23 = vor.u32 %v8055_v14, %v5954_v15  ;;  %v205_v13 = vperm.slane %v8846_v2, 7 }
  0xd2   :  { %v663_v52 = vmax.f32 %v594_v41, 0.0  ;;  %v6498_v24 = vld [vmem:[#allocation8 + $0x720] sm:$0xf0]  ;;  %v6245_v34 = vor.u32 %v8127_v19, %v6242_v20 }
  0xd3   :  { %v662_v48 = vmax.f32 %v580_v36, 0.0  ;;  %3879 = vmatpush.bf16.msra.mxu0 %v5797_v38  ;;  %v7983_v25 = vld [vmem:[#allocation8 + $0x84] sm:$0xf]  ;;  %v6501_v35 = vor.u32 %v8191_v21, %v6498_v24 }
  0xd4   :  { %v8860_v60 = vpack.c.bf16 %v663_v52, %v655_v51  ;;  %3893 = vmatpush.bf16.msra.mxu1 %v6053_v43  ;;  %v5666_v27 = vld [vmem:[#allocation8 + $0xa0] sm:$0xf0] }
  0xd5   :  { %v8858_v54 = vpack.c.bf16 %v662_v48, %v654_v47  ;;  %v8047_v30 = vld [vmem:[#allocation8 + $0x284] sm:$0xf]  ;;  %v5669_v36 = vor.u32 %v7983_v25, %v5666_v27 }
  0xd6   :  { %3816 = vmatmul.bf16.vlgmr.msra.gmra.mxu3 %v8860_v60  ;;  %v8119_v37 = vld [vmem:[#allocation8 + $0x4c4] sm:$0xf]  ;;  %v5925_v40 = vor.u32 %v8047_v30, %v5922_v32 }
  0xd7   :  { %3802 = vmatmul.bf16.vlgmr.msra.gmra.mxu2 %v8858_v54  ;;  %3920 = vmatpush.bf16.msra.mxu3 %v6597_v55  ;;  %v6210_v38 = vld [vmem:[#allocation8 + $0x4e0] sm:$0xf0] }
  0xd8   :  { %3906 = vmatpush.bf16.msra.mxu2 %v6341_v53  ;;  %3880 = vmatpush.bf16.msra.mxu0 %v5765_v56  ;;  %v8183_v39 = vld [vmem:[#allocation8 + $0x6c4] sm:$0xf]  ;;  %v6213_v48 = vor.u32 %v8119_v37, %v6210_v38 }
  0xd9   :  { %3894 = vmatpush.bf16.msra.mxu1 %v6021_v61  ;;  %v6466_v42 = vld [vmem:[#allocation8 + $0x6e0] sm:$0xf0] }
  0xda   :  { %v7975_v41 = vld [vmem:[#allocation8 + $0x44] sm:$0xf]  ;;  %v6469_v52 = vor.u32 %v8183_v39, %v6466_v42 }
  0xdb   :  { %3921 = vmatpush.bf16.msra.mxu3 %v6565_v5  ;;  %v5634_v43 = vld [vmem:[#allocation8 + $0x60] sm:$0xf0] }
  0xdc   :  { %3907 = vmatpush.bf16.msra.mxu2 %v6309_v4  ;;  %3881 = vmatpush.bf16.msra.mxu0 %v5733_v6  ;;  %v8039_v45 = vld [vmem:[#allocation8 + $0x244] sm:$0xf]  ;;  %v5637_v53 = vor.u32 %v7975_v41, %v5634_v43 }
  0xdd   :  { %3895 = vmatpush.bf16.msra.mxu1 %v5989_v10  ;;  %v5890_v46 = vld [vmem:[#allocation8 + $0x260] sm:$0xf0] }
  0xde   :  { %v8111_v49 = vld [vmem:[#allocation8 + $0x484] sm:$0xf]  ;;  %v5893_v61 = vor.u32 %v8039_v45, %v5890_v46 }
  0xdf   :  { %v605_v22 = vpop.f32.mrf.mxu0  ;;  %v619_v29 = vpop.f32.mrf.mxu1  ;;  %3922 = vmatpush.bf16.msra.mxu3 %v6533_v17  ;;  %v6178_v50 = vld [vmem:[#allocation8 + $0x4a0] sm:$0xf0] }
  0xe0   :  { %3908 = vmatpush.bf16.msra.mxu2 %v6277_v16  ;;  %3882 = vmatpush.bf16.msra.mxu0 %v5701_v18  ;;  %v606_v44 = vadd.f32 %v605_v22, %v202_v28  ;;  %v620_v47 = vadd.f32 %v619_v29, %v203_v33  ;;  %v8175_v55 = vld [vmem:[#allocation8 + $0x684] sm:$0xf]  ;;  %v6181_v10 = vor.u32 %v8111_v49, %v6178_v50 }
  0xe1   :  { %3896 = vmatpush.bf16.msra.mxu1 %v5957_v23  ;;  %v6434_v56 = vld [vmem:[#allocation8 + $0x6a0] sm:$0xf0] }
  0xe2   :  { %v7967_v57 = vld [vmem:[#allocation8 + $0x4] sm:$0xf]  ;;  %v656_v1 = vmax.f32 %v606_v44, 0.0  ;;  %v657_v7 = vmax.f32 %v620_v47, 0.0  ;;  %v6437_v15 = vor.u32 %v8175_v55, %v6434_v56 }
  0xe3   :  { %3923 = vmatpush.bf16.msra.mxu3 %v6501_v35  ;;  %v5602_v62 = vld [vmem:[#allocation8 + $0x20] sm:$0xf0] }
  0xe4   :  { %3909 = vmatpush.bf16.msra.mxu2 %v6245_v34  ;;  %3883 = vmatpush.bf16.msra.mxu0 %v5669_v36  ;;  %v8031_v63 = vld [vmem:[#allocation8 + $0x204] sm:$0xf]  ;;  %v5605_v16 = vor.u32 %v7967_v57, %v5602_v62 }
  0xe5   :  { %3897 = vmatpush.bf16.msra.mxu1 %v5925_v40  ;;  %v5858_v0 = vld [vmem:[#allocation8 + $0x220] sm:$0xf0] }
  0xe6   :  { %v8279_v5 = vld [vmem:[#allocation8 + $0x9c4] sm:$0xf]  ;;  %v5861_v20 = vor.u32 %v8031_v63, %v5858_v0 }
  0xe7   :  { %v633_v51 = vpop.f32.mrf.mxu2  ;;  %v647_v58 = vpop.f32.mrf.mxu3  ;;  %v6850_v6 = vld [vmem:[#allocation8 + $0x9e0] sm:$0xf0]  ;;  %3924 = vmatpush.bf16.msra.mxu3 %v6469_v52 }
  0xe8   :  { %v607_v59 = vpop.f32.mrf.mxu0  ;;  %v621_v4 = vpop.f32.mrf.mxu1  ;;  %3910 = vmatpush.bf16.msra.mxu2 %v6213_v48  ;;  %v8343_v11 = vld [vmem:[#allocation8 + $0xbc4] sm:$0xf]  ;;  %3884 = vmatpush.bf16.msra.mxu0 %v5637_v53  ;;  %v6853_v24 = vor.u32 %v8279_v5, %v6850_v6  ;;  %v634_v25 = vadd.f32 %v633_v51, %v204_v8 }
  0xe9   :  { %v608_v3 = vadd.f32 %v607_v59, %v202_v28  ;;  %v622_v9 = vadd.f32 %v621_v4, %v203_v33  ;;  %v7106_v12 = vld [vmem:[#allocation8 + $0xbe0] sm:$0xf0]  ;;  %3898 = vmatpush.bf16.msra.mxu1 %v5893_v61  ;;  %v648_v33 = vadd.f32 %v647_v58, %v205_v13 }
  0xea   :  { %v8103_v17 = vld [vmem:[#allocation8 + $0x444] sm:$0xf]  ;;  %v7109_v2 = vor.u32 %v8343_v11, %v7106_v12  ;;  %v658_v49 = vmax.f32 %v634_v25, 0.0 }
  0xeb   :  { %v664_v14 = vmax.f32 %v608_v3, 0.0  ;;  %v6146_v18 = vld [vmem:[#allocation8 + $0x460] sm:$0xf0]  ;;  %v665_v19 = vmax.f32 %v622_v9, 0.0  ;;  %3925 = vmatpush.bf16.msra.mxu3 %v6437_v15  ;;  %v659_v56 = vmax.f32 %v648_v33, 0.0 }
  0xec   :  { %v8167_v21 = vld [vmem:[#allocation8 + $0x644] sm:$0xf]  ;;  %3911 = vmatpush.bf16.msra.mxu2 %v6181_v10  ;;  %v6149_v28 = vor.u32 %v8103_v17, %v6146_v18  ;;  %3885 = vmatpush.bf16.msra.mxu0 %v5605_v16 }
  0xed   :  { %v6402_v22 = vld [vmem:[#allocation8 + $0x660] sm:$0xf0]  ;;  %v8868_v23 = vpack.c.bf16 %v664_v14, %v656_v1  ;;  %v8870_v27 = vpack.c.bf16 %v665_v19, %v657_v7  ;;  %3899 = vmatpush.bf16.msra.mxu1 %v5861_v20 }
  0xee   :  { %v8271_v29 = vld [vmem:[#allocation8 + $0x984] sm:$0xf]  ;;  %v6405_v35 = vor.u32 %v8167_v21, %v6402_v22 }
  0xef   :  { %v6818_v30 = vld [vmem:[#allocation8 + $0x9a0] sm:$0xf0]  ;;  %v635_v34 = vpop.f32.mrf.mxu2  ;;  %v649_v40 = vpop.f32.mrf.mxu3  ;;  %3830 = vmatmul.bf16.vlgmr.msrb.gmra.mxu0 %v8868_v23  ;;  %3844 = vmatmul.bf16.vlgmr.msrb.gmra.mxu1 %v8870_v27 }
  0xf0   :  { %v8335_v32 = vld [vmem:[#allocation8 + $0xb84] sm:$0xf]  ;;  %v636_v39 = vadd.f32 %v635_v34, %v204_v8  ;;  %v650_v44 = vadd.f32 %v649_v40, %v205_v13  ;;  %3934 = vmatpush.bf16.msrb.mxu0 %v6853_v24  ;;  %v6821_v45 = vor.u32 %v8271_v29, %v6818_v30  ;;  %3912 = vmatpush.bf16.msra.mxu2 %v6149_v28 }
  0xf1   :  { %v7074_v36 = vld [vmem:[#allocation8 + $0xba0] sm:$0xf0]  ;;  %3948 = vmatpush.bf16.msrb.mxu1 %v7109_v2  ;;  %3926 = vmatpush.bf16.msra.mxu3 %v6405_v35 }
  0xf2   :  { %v8095_v37 = vld [vmem:[#allocation8 + $0x404] sm:$0xf]  ;;  %v666_v50 = vmax.f32 %v636_v39, 0.0  ;;  %v7077_v51 = vor.u32 %v8335_v32, %v7074_v36  ;;  %v667_v57 = vmax.f32 %v650_v44, 0.0 }
  0xf3   :  { %v6114_v38 = vld [vmem:[#allocation8 + $0x420] sm:$0xf0] }
  0xf4   :  { %v8159_v42 = vld [vmem:[#allocation8 + $0x604] sm:$0xf]  ;;  %v6117_v52 = vor.u32 %v8095_v37, %v6114_v38  ;;  %v8874_v62 = vpack.c.bf16 %v666_v50, %v658_v49  ;;  %v8876_v0 = vpack.c.bf16 %v667_v57, %v659_v56  ;;  %3935 = vmatpush.bf16.msrb.mxu0 %v6821_v45 }
  0xf5   :  { %v6370_v41 = vld [vmem:[#allocation8 + $0x620] sm:$0xf0]  ;;  %3949 = vmatpush.bf16.msrb.mxu1 %v7077_v51 }
  0xf6   :  { %v8407_v43 = vld [vmem:[#allocation8 + $0xdc4] sm:$0xf]  ;;  %v6373_v58 = vor.u32 %v8159_v42, %v6370_v41  ;;  %3913 = vmatpush.bf16.msra.mxu2 %v6117_v52  ;;  %3872 = vmatmul.bf16.vlgmr.msrb.gmra.mxu3 %v8876_v0 }
  0xf7   :  { %v7362_v46 = vld [vmem:[#allocation8 + $0xde0] sm:$0xf0]  ;;  %3858 = vmatmul.bf16.vlgmr.msrb.gmra.mxu2 %v8874_v62 }
  0xf8   :  { %v8471_v47 = vld [vmem:[#allocation8 + $0xfc4] sm:$0xf]  ;;  %v7365_v63 = vor.u32 %v8407_v43, %v7362_v46  ;;  %3927 = vmatpush.bf16.msra.mxu3 %v6373_v58 }
  0xf9   :  { %v7618_v48 = vld [vmem:[#allocation8 + $0xfe0] sm:$0xf0] }
  0xfa   :  { %v8263_v53 = vld [vmem:[#allocation8 + $0x944] sm:$0xf]  ;;  %v7621_v1 = vor.u32 %v8471_v47, %v7618_v48  ;;  %3962 = vmatpush.bf16.msrb.mxu2 %v7365_v63 }
  0xfb   :  { %v6786_v55 = vld [vmem:[#allocation8 + $0x960] sm:$0xf0] }
  0xfc   :  { %v8327_v59 = vld [vmem:[#allocation8 + $0xb44] sm:$0xf]  ;;  %v6789_v3 = vor.u32 %v8263_v53, %v6786_v55  ;;  %3976 = vmatpush.bf16.msrb.mxu3 %v7621_v1 }
  0xfd   :  { %v7042_v61 = vld [vmem:[#allocation8 + $0xb60] sm:$0xf0] }
  0xfe   :  { %v8399_v4 = vld [vmem:[#allocation8 + $0xd84] sm:$0xf]  ;;  %v7045_v7 = vor.u32 %v8327_v59, %v7042_v61  ;;  %3936 = vmatpush.bf16.msrb.mxu0 %v6789_v3 }
  0xff   :  { %v7330_v5 = vld [vmem:[#allocation8 + $0xda0] sm:$0xf0]  ;;  %3886 = vmatmul.bf16.vlgmr.msra.gmra.mxu0 %v8852_v26  ;;  %3900 = vmatmul.bf16.vlgmr.msra.gmra.mxu1 %v8854_v31 }
 0x100   :  { %v8463_v6 = vld [vmem:[#allocation8 + $0xf84] sm:$0xf]  ;;  %v7333_v13 = vor.u32 %v8399_v4, %v7330_v5  ;;  %3950 = vmatpush.bf16.msrb.mxu1 %v7045_v7  ;;  %v5832_v5 = vld [vmem:[#allocation8 + $0x1c8] sm:$0xf] }
 0x101   :  { %v7586_v8 = vld [vmem:[#allocation8 + $0xfa0] sm:$0xf0]  ;;  %v8028_v7 = vld [vmem:[#allocation8 + $0x1e4] sm:$0xf0] }
 0x102   :  { %v8255_v9 = vld [vmem:[#allocation8 + $0x904] sm:$0xf]  ;;  %v7589_v14 = vor.u32 %v8463_v6, %v7586_v8  ;;  %3963 = vmatpush.bf16.msrb.mxu2 %v7333_v13  ;;  %v6088_v8 = vld [vmem:[#allocation8 + $0x3c8] sm:$0xf] }
 0x103   :  { %v6754_v10 = vld [vmem:[#allocation8 + $0x920] sm:$0xf0] }
 0x104   :  { %v8319_v11 = vld [vmem:[#allocation8 + $0xb04] sm:$0xf]  ;;  %v6757_v15 = vor.u32 %v8255_v9, %v6754_v10  ;;  %3977 = vmatpush.bf16.msrb.mxu3 %v7589_v14  ;;  %v8092_v9 = vld [vmem:[#allocation8 + $0x3e4] sm:$0xf0] }
 0x105   :  { %v7010_v12 = vld [vmem:[#allocation8 + $0xb20] sm:$0xf0] }
 0x106   :  { %v8391_v16 = vld [vmem:[#allocation8 + $0xd44] sm:$0xf]  ;;  %v7013_v18 = vor.u32 %v8319_v11, %v7010_v12  ;;  %3937 = vmatpush.bf16.msrb.mxu0 %v6757_v15  ;;  %3928 = vmatmul.bf16.vlgmr.msra.gmra.mxu3 %v8860_v60 }
 0x107   :  { %v7298_v17 = vld [vmem:[#allocation8 + $0xd60] sm:$0xf0]  ;;  %3914 = vmatmul.bf16.vlgmr.msra.gmra.mxu2 %v8858_v54 }
 0x108   :  { %v8455_v19 = vld [vmem:[#allocation8 + $0xf44] sm:$0xf]  ;;  %v7301_v2 = vor.u32 %v8391_v16, %v7298_v17  ;;  %3951 = vmatpush.bf16.msrb.mxu1 %v7013_v18  ;;  %v5833_v17 = vor.u32 %v8028_v7, %v5832_v5  ;;  %v6089_v18 = vor.u32 %v8092_v9, %v6088_v8  ;;  %v5704_v5 = vld [vmem:[#allocation8 + $0xc8] sm:$0xf] }
 0x109   :  { %v7554_v20 = vld [vmem:[#allocation8 + $0xf60] sm:$0xf0]  ;;  %v5960_v7 = vld [vmem:[#allocation8 + $0x2c8] sm:$0xf] }
 0x10a   :  { %v8247_v21 = vld [vmem:[#allocation8 + $0x8c4] sm:$0xf]  ;;  %v7557_v28 = vor.u32 %v8455_v19, %v7554_v20  ;;  %3964 = vmatpush.bf16.msrb.mxu2 %v7301_v2  ;;  %v5800_v19 = vld [vmem:[#allocation8 + $0x188] sm:$0xf] }
 0x10b   :  { %v6722_v22 = vld [vmem:[#allocation8 + $0x8e0] sm:$0xf0]  ;;  %v8060_v8 = vld [vmem:[#allocation8 + $0x2e4] sm:$0xf0] }
 0x10c   :  { %v8311_v24 = vld [vmem:[#allocation8 + $0xac4] sm:$0xf]  ;;  %v6725_v32 = vor.u32 %v8247_v21, %v6722_v22  ;;  %3978 = vmatpush.bf16.msrb.mxu3 %v7557_v28  ;;  %v8020_v21 = vld [vmem:[#allocation8 + $0x1a4] sm:$0xf0] }
 0x10d   :  { %v6978_v25 = vld [vmem:[#allocation8 + $0xae0] sm:$0xf0]  ;;  %v6056_v22 = vld [vmem:[#allocation8 + $0x388] sm:$0xf] }
 0x10e   :  { %v8383_v29 = vld [vmem:[#allocation8 + $0xd04] sm:$0xf]  ;;  %v6981_v33 = vor.u32 %v8311_v24, %v6978_v25  ;;  %3938 = vmatpush.bf16.msrb.mxu0 %v6725_v32  ;;  %v8084_v24 = vld [vmem:[#allocation8 + $0x3a4] sm:$0xf0] }
 0x10f   :  { %v7266_v30 = vld [vmem:[#allocation8 + $0xd20] sm:$0xf0]  ;;  %v6344_v32 = vld [vmem:[#allocation8 + $0x5c8] sm:$0xf] }
 0x110   :  { %v8447_v34 = vld [vmem:[#allocation8 + $0xf04] sm:$0xf]  ;;  %v7269_v40 = vor.u32 %v8383_v29, %v7266_v30  ;;  %3952 = vmatpush.bf16.msrb.mxu1 %v6981_v33  ;;  %v8156_v33 = vld [vmem:[#allocation8 + $0x5e4] sm:$0xf0] }
 0x111   :  { %v7522_v35 = vld [vmem:[#allocation8 + $0xf20] sm:$0xf0] }
 0x112   :  { %v8239_v36 = vld [vmem:[#allocation8 + $0x884] sm:$0xf]  ;;  %v7525_v42 = vor.u32 %v8447_v34, %v7522_v35  ;;  %3965 = vmatpush.bf16.msrb.mxu2 %v7269_v40  ;;  %v5801_v34 = vor.u32 %v8020_v21, %v5800_v19  ;;  %v6057_v35 = vor.u32 %v8084_v24, %v6056_v22  ;;  %v8012_v40 = vld [vmem:[#allocation8 + $0x164] sm:$0xf0] }
 0x113   :  { %v6690_v37 = vld [vmem:[#allocation8 + $0x8a0] sm:$0xf0]  ;;  %v5928_v19 = vld [vmem:[#allocation8 + $0x288] sm:$0xf] }
 0x114   :  { %v8303_v38 = vld [vmem:[#allocation8 + $0xa84] sm:$0xf]  ;;  %v6693_v44 = vor.u32 %v8239_v36, %v6690_v37  ;;  %3979 = vmatpush.bf16.msrb.mxu3 %v7525_v42  ;;  %v6600_v36 = vld [vmem:[#allocation8 + $0x7c8] sm:$0xf] }
 0x115   :  { %v6946_v39 = vld [vmem:[#allocation8 + $0xaa0] sm:$0xf0]  ;;  %v8220_v37 = vld [vmem:[#allocation8 + $0x7e4] sm:$0xf0] }
 0x116   :  { %v8375_v41 = vld [vmem:[#allocation8 + $0xcc4] sm:$0xf]  ;;  %v6949_v45 = vor.u32 %v8303_v38, %v6946_v39  ;;  %3939 = vmatpush.bf16.msrb.mxu0 %v6693_v44  ;;  %v5768_v38 = vld [vmem:[#allocation8 + $0x148] sm:$0xf]  ;;  %v6345_v44 = vor.u32 %v8156_v33, %v6344_v32 }
 0x117   :  { %v7234_v43 = vld [vmem:[#allocation8 + $0xce0] sm:$0xf0]  ;;  %v6024_v42 = vld [vmem:[#allocation8 + $0x348] sm:$0xf] }
 0x118   :  { %v8439_v46 = vld [vmem:[#allocation8 + $0xec4] sm:$0xf]  ;;  %v7237_v52 = vor.u32 %v8375_v41, %v7234_v43  ;;  %3953 = vmatpush.bf16.msrb.mxu1 %v6949_v45  ;;  %v8076_v41 = vld [vmem:[#allocation8 + $0x364] sm:$0xf0]  ;;  %v6601_v45 = vor.u32 %v8220_v37, %v6600_v36 }
 0x119   :  { %v7490_v47 = vld [vmem:[#allocation8 + $0xee0] sm:$0xf0]  ;;  %v6216_v24 = vld [vmem:[#allocation8 + $0x4c8] sm:$0xf] }
 0x11a   :  { %v8231_v48 = vld [vmem:[#allocation8 + $0x844] sm:$0xf]  ;;  %v7493_v53 = vor.u32 %v8439_v46, %v7490_v47  ;;  %3966 = vmatpush.bf16.msrb.mxu2 %v7237_v52  ;;  %v6312_v46 = vld [vmem:[#allocation8 + $0x588] sm:$0xf] }
 0x11b   :  { %v6658_v49 = vld [vmem:[#allocation8 + $0x860] sm:$0xf0]  ;;  %v8148_v47 = vld [vmem:[#allocation8 + $0x5a4] sm:$0xf0] }
 0x11c   :  { %v8295_v50 = vld [vmem:[#allocation8 + $0xa44] sm:$0xf]  ;;  %v6661_v58 = vor.u32 %v8231_v48, %v6658_v49  ;;  %3980 = vmatpush.bf16.msrb.mxu3 %v7493_v53  ;;  %v5769_v48 = vor.u32 %v8012_v40, %v5768_v38  ;;  %v6025_v49 = vor.u32 %v8076_v41, %v6024_v42  ;;  %v5736_v52 = vld [vmem:[#allocation8 + $0x108] sm:$0xf] }
 0x11d   :  { %v6914_v51 = vld [vmem:[#allocation8 + $0xa60] sm:$0xf0]  ;;  %v8004_v53 = vld [vmem:[#allocation8 + $0x124] sm:$0xf0] }
 0x11e   :  { %v8367_v55 = vld [vmem:[#allocation8 + $0xc84] sm:$0xf]  ;;  %v6917_v59 = vor.u32 %v8295_v50, %v6914_v51  ;;  %3940 = vmatpush.bf16.msrb.mxu0 %v6661_v58  ;;  %v6568_v50 = vld [vmem:[#allocation8 + $0x788] sm:$0xf] }
 0x11f   :  { %v7202_v56 = vld [vmem:[#allocation8 + $0xca0] sm:$0xf0]  ;;  %v8212_v51 = vld [vmem:[#allocation8 + $0x7a4] sm:$0xf0] }
 0x120   :  { %v8431_v57 = vld [vmem:[#allocation8 + $0xe84] sm:$0xf]  ;;  %v7205_v6 = vor.u32 %v8367_v55, %v7202_v56  ;;  %3954 = vmatpush.bf16.msrb.mxu1 %v6917_v59  ;;  %v5992_v55 = vld [vmem:[#allocation8 + $0x308] sm:$0xf]  ;;  %v6569_v58 = vor.u32 %v8212_v51, %v6568_v50 }
 0x121   :  { %v7458_v61 = vld [vmem:[#allocation8 + $0xea0] sm:$0xf0]  ;;  %v8068_v56 = vld [vmem:[#allocation8 + $0x324] sm:$0xf0] }
 0x122   :  { %v8223_v63 = vld [vmem:[#allocation8 + $0x804] sm:$0xf]  ;;  %v7461_v10 = vor.u32 %v8431_v57, %v7458_v61  ;;  %3967 = vmatpush.bf16.msrb.mxu2 %v7205_v6  ;;  %v6313_v57 = vor.u32 %v8148_v47, %v6312_v46  ;;  %v6280_v59 = vld [vmem:[#allocation8 + $0x548] sm:$0xf] }
 0x123   :  { %v6626_v1 = vld [vmem:[#allocation8 + $0x820] sm:$0xf0]  ;;  %v8140_v61 = vld [vmem:[#allocation8 + $0x564] sm:$0xf0] }
 0x124   :  { %v8287_v3 = vld [vmem:[#allocation8 + $0xa04] sm:$0xf]  ;;  %v6629_v13 = vor.u32 %v8223_v63, %v6626_v1  ;;  %3981 = vmatpush.bf16.msrb.mxu3 %v7461_v10  ;;  %v5737_v63 = vor.u32 %v8004_v53, %v5736_v52  ;;  %v5993_v1 = vor.u32 %v8068_v56, %v5992_v55  ;;  %v7996_v6 = vld [vmem:[#allocation8 + $0xe4] sm:$0xf0]  ;;  %v6281_v9 = vor.u32 %v8140_v61, %v6280_v59 }
 0x125   :  { %v6882_v4 = vld [vmem:[#allocation8 + $0xa20] sm:$0xf0]  ;;  %v5640_v32 = vld [vmem:[#allocation8 + $0x48] sm:$0xf] }
 0x126   :  { %v8359_v11 = vld [vmem:[#allocation8 + $0xc44] sm:$0xf]  ;;  %v6885_v14 = vor.u32 %v8287_v3, %v6882_v4  ;;  %3941 = vmatpush.bf16.msrb.mxu0 %v6629_v13  ;;  %v6536_v3 = vld [vmem:[#allocation8 + $0x748] sm:$0xf]  ;;  %v5705_v13 = vor.u32 %v7996_v6, %v5704_v5 }
 0x127   :  { %v7170_v12 = vld [vmem:[#allocation8 + $0xc60] sm:$0xf0]  ;;  %v8204_v4 = vld [vmem:[#allocation8 + $0x764] sm:$0xf0] }
 0x128   :  { %v8423_v15 = vld [vmem:[#allocation8 + $0xe44] sm:$0xf]  ;;  %v7173_v20 = vor.u32 %v8359_v11, %v7170_v12  ;;  %3955 = vmatpush.bf16.msrb.mxu1 %v6885_v14  ;;  %v6537_v10 = vor.u32 %v8204_v4, %v6536_v3  ;;  %v6248_v11 = vld [vmem:[#allocation8 + $0x508] sm:$0xf]  ;;  %v5961_v14 = vor.u32 %v8060_v8, %v5960_v7 }
 0x129   :  { %v7426_v16 = vld [vmem:[#allocation8 + $0xe60] sm:$0xf0]  ;;  %3942 = vmatmul.bf16.vlgmr.msrb.gmra.mxu0 %v8868_v23  ;;  %v8132_v12 = vld [vmem:[#allocation8 + $0x524] sm:$0xf0] }
 0x12a   :  { %v7429_v25 = vor.u32 %v8423_v15, %v7426_v16  ;;  %v8351_v2 = vld [vmem:[#allocation8 + $0xc04] sm:$0xf]  ;;  %3990 = vmatpush.bf16.msra.mxu0 %v5833_v17  ;;  %3968 = vmatpush.bf16.msrb.mxu2 %v7173_v20  ;;  %v6504_v15 = vld [vmem:[#allocation8 + $0x708] sm:$0xf]  ;;  %v6249_v21 = vor.u32 %v8132_v12, %v6248_v11 }
 0x12b   :  { %v7138_v28 = vld [vmem:[#allocation8 + $0xc20] sm:$0xf0]  ;;  %3956 = vmatmul.bf16.vlgmr.msrb.gmra.mxu1 %v8870_v27  ;;  %v8196_v16 = vld [vmem:[#allocation8 + $0x724] sm:$0xf0] }
 0x12c   :  { %v8415_v29 = vld [vmem:[#allocation8 + $0xe04] sm:$0xf]  ;;  %4004 = vmatpush.bf16.msra.mxu1 %v6089_v18  ;;  %v7141_v39 = vor.u32 %v8351_v2, %v7138_v28  ;;  %3982 = vmatpush.bf16.msrb.mxu3 %v7429_v25  ;;  %v5672_v17 = vld [vmem:[#allocation8 + $0x88] sm:$0xf]  ;;  %v6505_v22 = vor.u32 %v8196_v16, %v6504_v15 }
 0x12d   :  { %v7394_v30 = vld [vmem:[#allocation8 + $0xe20] sm:$0xf0]  ;;  %v7988_v18 = vld [vmem:[#allocation8 + $0xa4] sm:$0xf0] }
 0x12e   :  { %v7397_v43 = vor.u32 %v8415_v29, %v7394_v30  ;;  %3991 = vmatpush.bf16.msra.mxu0 %v5801_v34  ;;  %3969 = vmatpush.bf16.msrb.mxu2 %v7141_v39  ;;  %v8052_v20 = vld [vmem:[#allocation8 + $0x2a4] sm:$0xf0]  ;;  %v5673_v2 = vor.u32 %v7988_v18, %v5672_v17 }
 0x12f   :  { %v8124_v25 = vld [vmem:[#allocation8 + $0x4e4] sm:$0xf0]  ;;  %v5929_v28 = vor.u32 %v8052_v20, %v5928_v19 }
 0x130   :  { %4005 = vmatpush.bf16.msra.mxu1 %v6057_v35  ;;  %3983 = vmatpush.bf16.msrb.mxu3 %v7397_v43  ;;  %v6472_v29 = vld [vmem:[#allocation8 + $0x6c8] sm:$0xf]  ;;  %v6217_v36 = vor.u32 %v8124_v25, %v6216_v24 }
 0x131   :  { %3970 = vmatmul.bf16.vlgmr.msrb.gmra.mxu2 %v8874_v62  ;;  %v8188_v30 = vld [vmem:[#allocation8 + $0x6e4] sm:$0xf0] }
 0x132   :  { %4018 = vmatpush.bf16.msra.mxu2 %v6345_v44  ;;  %3992 = vmatpush.bf16.msra.mxu0 %v5769_v48  ;;  %v7980_v33 = vld [vmem:[#allocation8 + $0x64] sm:$0xf0]  ;;  %v6473_v37 = vor.u32 %v8188_v30, %v6472_v29 }
 0x133   :  { %3984 = vmatmul.bf16.vlgmr.msrb.gmra.mxu3 %v8876_v0  ;;  %v5896_v34 = vld [vmem:[#allocation8 + $0x248] sm:$0xf]  ;;  %v5641_v42 = vor.u32 %v7980_v33, %v5640_v32 }
 0x134   :  { %4032 = vmatpush.bf16.msra.mxu3 %v6601_v45  ;;  %4006 = vmatpush.bf16.msra.mxu1 %v6025_v49  ;;  %v8044_v35 = vld [vmem:[#allocation8 + $0x264] sm:$0xf0] }
 0x135   :  { %v6184_v38 = vld [vmem:[#allocation8 + $0x488] sm:$0xf]  ;;  %v5897_v41 = vor.u32 %v8044_v35, %v5896_v34 }
 0x136   :  { %4019 = vmatpush.bf16.msra.mxu2 %v6313_v57  ;;  %3993 = vmatpush.bf16.msra.mxu0 %v5737_v63  ;;  %v8116_v39 = vld [vmem:[#allocation8 + $0x4a4] sm:$0xf0] }
 0x137   :  { %v6440_v40 = vld [vmem:[#allocation8 + $0x688] sm:$0xf]  ;;  %v6185_v49 = vor.u32 %v8116_v39, %v6184_v38 }
 0x138   :  { %4033 = vmatpush.bf16.msra.mxu3 %v6569_v58  ;;  %4007 = vmatpush.bf16.msra.mxu1 %v5993_v1  ;;  %v8180_v43 = vld [vmem:[#allocation8 + $0x6a4] sm:$0xf0] }
 0x139   :  { %v5608_v44 = vld [vmem:[#allocation8 + $0x8] sm:$0xf]  ;;  %v6441_v53 = vor.u32 %v8180_v43, %v6440_v40 }
 0x13a   :  { %4020 = vmatpush.bf16.msra.mxu2 %v6281_v9  ;;  %3994 = vmatpush.bf16.msra.mxu0 %v5705_v13  ;;  %v7972_v45 = vld [vmem:[#allocation8 + $0x24] sm:$0xf0] }
 0x13b   :  { %v5864_v46 = vld [vmem:[#allocation8 + $0x208] sm:$0xf]  ;;  %v5609_v57 = vor.u32 %v7972_v45, %v5608_v44 }
 0x13c   :  { %4034 = vmatpush.bf16.msra.mxu3 %v6537_v10  ;;  %4008 = vmatpush.bf16.msra.mxu1 %v5961_v14  ;;  %v8036_v47 = vld [vmem:[#allocation8 + $0x224] sm:$0xf0] }
 0x13d   :  { %v6856_v48 = vld [vmem:[#allocation8 + $0x9c8] sm:$0xf]  ;;  %v5865_v58 = vor.u32 %v8036_v47, %v5864_v46 }
 0x13e   :  { %4021 = vmatpush.bf16.msra.mxu2 %v6249_v21  ;;  %3995 = vmatpush.bf16.msra.mxu0 %v5673_v2  ;;  %v8284_v50 = vld [vmem:[#allocation8 + $0x9e4] sm:$0xf0] }
 0x13f   :  { %v7112_v51 = vld [vmem:[#allocation8 + $0xbc8] sm:$0xf]  ;;  %v6857_v63 = vor.u32 %v8284_v50, %v6856_v48 }
 0x140   :  { %4035 = vmatpush.bf16.msra.mxu3 %v6505_v22  ;;  %4009 = vmatpush.bf16.msra.mxu1 %v5929_v28  ;;  %v8348_v52 = vld [vmem:[#allocation8 + $0xbe4] sm:$0xf0] }
 0x141   :  { %v6152_v55 = vld [vmem:[#allocation8 + $0x448] sm:$0xf]  ;;  %v7113_v1 = vor.u32 %v8348_v52, %v7112_v51 }
 0x142   :  { %4022 = vmatpush.bf16.msra.mxu2 %v6217_v36  ;;  %v8108_v56 = vld [vmem:[#allocation8 + $0x464] sm:$0xf0]  ;;  %3996 = vmatpush.bf16.msra.mxu0 %v5641_v42 }
 0x143   :  { %v6408_v59 = vld [vmem:[#allocation8 + $0x648] sm:$0xf]  ;;  %v6153_v4 = vor.u32 %v8108_v56, %v6152_v55 }
 0x144   :  { %4036 = vmatpush.bf16.msra.mxu3 %v6473_v37  ;;  %4010 = vmatpush.bf16.msra.mxu1 %v5897_v41  ;;  %v8172_v61 = vld [vmem:[#allocation8 + $0x664] sm:$0xf0] }
 0x145   :  { %v6824_v3 = vld [vmem:[#allocation8 + $0x988] sm:$0xf]  ;;  %v6409_v8 = vor.u32 %v8172_v61, %v6408_v59 }
 0x146   :  { %4023 = vmatpush.bf16.msra.mxu2 %v6185_v49  ;;  %v8276_v5 = vld [vmem:[#allocation8 + $0x9a4] sm:$0xf0]  ;;  %3997 = vmatpush.bf16.msra.mxu0 %v5609_v57 }
 0x147   :  { %v7080_v6 = vld [vmem:[#allocation8 + $0xb88] sm:$0xf]  ;;  %v6825_v15 = vor.u32 %v8276_v5, %v6824_v3 }
 0x148   :  { %v8340_v7 = vld [vmem:[#allocation8 + $0xba4] sm:$0xf0]  ;;  %4037 = vmatpush.bf16.msra.mxu3 %v6441_v53  ;;  %4011 = vmatpush.bf16.msra.mxu1 %v5865_v58 }
 0x149   :  { %v6120_v9 = vld [vmem:[#allocation8 + $0x408] sm:$0xf]  ;;  %v7081_v16 = vor.u32 %v8340_v7, %v7080_v6  ;;  %3998 = vmatmul.bf16.vlgmr.msra.gmra.mxu0 %v8852_v26 }
 0x14a   :  { %v8100_v10 = vld [vmem:[#allocation8 + $0x424] sm:$0xf0]  ;;  %4046 = vmatpush.bf16.msrb.mxu0 %v6857_v63  ;;  %4024 = vmatpush.bf16.msra.mxu2 %v6153_v4 }
 0x14b   :  { %v6376_v11 = vld [vmem:[#allocation8 + $0x608] sm:$0xf]  ;;  %v6121_v19 = vor.u32 %v8100_v10, %v6120_v9  ;;  %4012 = vmatmul.bf16.vlgmr.msra.gmra.mxu1 %v8854_v31 }
 0x14c   :  { %v8164_v12 = vld [vmem:[#allocation8 + $0x624] sm:$0xf0]  ;;  %4060 = vmatpush.bf16.msrb.mxu1 %v7113_v1  ;;  %4038 = vmatpush.bf16.msra.mxu3 %v6409_v8 }
 0x14d   :  { %v7368_v13 = vld [vmem:[#allocation8 + $0xdc8] sm:$0xf]  ;;  %v6377_v22 = vor.u32 %v8164_v12, %v6376_v11 }
 0x14e   :  { %v8412_v14 = vld [vmem:[#allocation8 + $0xde4] sm:$0xf0]  ;;  %4047 = vmatpush.bf16.msrb.mxu0 %v6825_v15  ;;  %4025 = vmatpush.bf16.msra.mxu2 %v6121_v19 }
 0x14f   :  { %v7624_v17 = vld [vmem:[#allocation8 + $0xfc8] sm:$0xf]  ;;  %v7369_v24 = vor.u32 %v8412_v14, %v7368_v13 }
 0x150   :  { %v8476_v18 = vld [vmem:[#allocation8 + $0xfe4] sm:$0xf0]  ;;  %4061 = vmatpush.bf16.msrb.mxu1 %v7081_v16  ;;  %4039 = vmatpush.bf16.msra.mxu3 %v6377_v22 }
 0x151   :  { %v6792_v20 = vld [vmem:[#allocation8 + $0x948] sm:$0xf]  ;;  %v7625_v28 = vor.u32 %v8476_v18, %v7624_v17  ;;  %4026 = vmatmul.bf16.vlgmr.msra.gmra.mxu2 %v8858_v54 }
 0x152   :  { %v8268_v21 = vld [vmem:[#allocation8 + $0x964] sm:$0xf0]  ;;  %4074 = vmatpush.bf16.msrb.mxu2 %v7369_v24 }
 0x153   :  { %v7048_v25 = vld [vmem:[#allocation8 + $0xb48] sm:$0xf]  ;;  %v6793_v32 = vor.u32 %v8268_v21, %v6792_v20  ;;  %4040 = vmatmul.bf16.vlgmr.msra.gmra.mxu3 %v8860_v60 }
 0x154   :  { %v8332_v2 = vld [vmem:[#allocation8 + $0xb64] sm:$0xf0]  ;;  %4088 = vmatpush.bf16.msrb.mxu3 %v7625_v28 }
 0x155   :  { %v7336_v29 = vld [vmem:[#allocation8 + $0xd88] sm:$0xf]  ;;  %v7049_v35 = vor.u32 %v8332_v2, %v7048_v25  ;;  %4048 = vmatpush.bf16.msrb.mxu0 %v6793_v32 }
 0x156   :  { %v8404_v30 = vld [vmem:[#allocation8 + $0xda4] sm:$0xf0] }
 0x157   :  { %v7592_v33 = vld [vmem:[#allocation8 + $0xf88] sm:$0xf]  ;;  %v7337_v38 = vor.u32 %v8404_v30, %v7336_v29  ;;  %4062 = vmatpush.bf16.msrb.mxu1 %v7049_v35  ;;  %v8088_v35 = vld [vmem:[#allocation8 + $0x3cc] sm:$0xf] }
 0x158   :  { %v8468_v34 = vld [vmem:[#allocation8 + $0xfa4] sm:$0xf0] }
 0x159   :  { %v6760_v36 = vld [vmem:[#allocation8 + $0x908] sm:$0xf]  ;;  %v7593_v42 = vor.u32 %v8468_v34, %v7592_v33  ;;  %4075 = vmatpush.bf16.msrb.mxu2 %v7337_v38  ;;  %v8024_v33 = vld [vmem:[#allocation8 + $0x1cc] sm:$0xf] }
 0x15a   :  { %v8260_v37 = vld [vmem:[#allocation8 + $0x924] sm:$0xf0]  ;;  %v5834_v34 = vld [vmem:[#allocation8 + $0x1e8] sm:$0xf0] }
 0x15b   :  { %v7016_v39 = vld [vmem:[#allocation8 + $0xb08] sm:$0xf]  ;;  %v6761_v44 = vor.u32 %v8260_v37, %v6760_v36  ;;  %4089 = vmatpush.bf16.msrb.mxu3 %v7593_v42  ;;  %v6090_v37 = vld [vmem:[#allocation8 + $0x3e8] sm:$0xf0] }
 0x15c   :  { %v8324_v40 = vld [vmem:[#allocation8 + $0xb24] sm:$0xf0] }
 0x15d   :  { %v7304_v41 = vld [vmem:[#allocation8 + $0xd48] sm:$0xf]  ;;  %v7017_v47 = vor.u32 %v8324_v40, %v7016_v39  ;;  %4049 = vmatpush.bf16.msrb.mxu0 %v6761_v44  ;;  %v5837_v44 = vor.u32 %v8024_v33, %v5834_v34  ;;  %v8200_v34 = vld [vmem:[#allocation8 + $0x74c] sm:$0xf] }
 0x15e   :  { %v8396_v43 = vld [vmem:[#allocation8 + $0xd64] sm:$0xf0] }
 0x15f   :  { %v7560_v45 = vld [vmem:[#allocation8 + $0xf48] sm:$0xf]  ;;  %v7305_v50 = vor.u32 %v8396_v43, %v7304_v41  ;;  %4063 = vmatpush.bf16.msrb.mxu1 %v7017_v47 }
 0x160   :  { %v8460_v46 = vld [vmem:[#allocation8 + $0xf64] sm:$0xf0] }
 0x161   :  { %v6728_v48 = vld [vmem:[#allocation8 + $0x8c8] sm:$0xf]  ;;  %v7561_v53 = vor.u32 %v8460_v46, %v7560_v45  ;;  %4076 = vmatpush.bf16.msrb.mxu2 %v7305_v50  ;;  %v8016_v45 = vld [vmem:[#allocation8 + $0x18c] sm:$0xf]  ;;  %v6093_v46 = vor.u32 %v8088_v35, %v6090_v37 }
 0x162   :  { %v8252_v49 = vld [vmem:[#allocation8 + $0x8e4] sm:$0xf0]  ;;  %v6058_v50 = vld [vmem:[#allocation8 + $0x3a8] sm:$0xf0] }
 0x163   :  { %v6984_v51 = vld [vmem:[#allocation8 + $0xac8] sm:$0xf]  ;;  %v6729_v57 = vor.u32 %v8252_v49, %v6728_v48  ;;  %4090 = vmatpush.bf16.msrb.mxu3 %v7561_v53  ;;  %v5802_v48 = vld [vmem:[#allocation8 + $0x1a8] sm:$0xf0] }
 0x164   :  { %v8316_v52 = vld [vmem:[#allocation8 + $0xae4] sm:$0xf0]  ;;  %v8080_v49 = vld [vmem:[#allocation8 + $0x38c] sm:$0xf] }
 0x165   :  { %v7272_v55 = vld [vmem:[#allocation8 + $0xd08] sm:$0xf]  ;;  %v6985_v61 = vor.u32 %v8316_v52, %v6984_v51  ;;  %4050 = vmatpush.bf16.msrb.mxu0 %v6729_v57  ;;  %v8152_v57 = vld [vmem:[#allocation8 + $0x5cc] sm:$0xf] }
 0x166   :  { %v8388_v56 = vld [vmem:[#allocation8 + $0xd24] sm:$0xf0]  ;;  %v6538_v35 = vld [vmem:[#allocation8 + $0x768] sm:$0xf0] }
 0x167   :  { %v7528_v58 = vld [vmem:[#allocation8 + $0xf08] sm:$0xf]  ;;  %v7273_v3 = vor.u32 %v8388_v56, %v7272_v55  ;;  %4064 = vmatpush.bf16.msrb.mxu1 %v6985_v61  ;;  %v8216_v61 = vld [vmem:[#allocation8 + $0x7cc] sm:$0xf] }
 0x168   :  { %v8452_v59 = vld [vmem:[#allocation8 + $0xf24] sm:$0xf0] }
 0x169   :  { %v6696_v63 = vld [vmem:[#allocation8 + $0x888] sm:$0xf]  ;;  %v7529_v6 = vor.u32 %v8452_v59, %v7528_v58  ;;  %4077 = vmatpush.bf16.msrb.mxu2 %v7273_v3  ;;  %v6346_v58 = vld [vmem:[#allocation8 + $0x5e8] sm:$0xf0]  ;;  %v5805_v59 = vor.u32 %v8016_v45, %v5802_v48  ;;  %v6061_v3 = vor.u32 %v8080_v49, %v6058_v50 }
 0x16a   :  { %v8244_v1 = vld [vmem:[#allocation8 + $0x8a4] sm:$0xf0]  ;;  %v6250_v45 = vld [vmem:[#allocation8 + $0x528] sm:$0xf0] }
 0x16b   :  { %v6952_v4 = vld [vmem:[#allocation8 + $0xa88] sm:$0xf]  ;;  %v6697_v9 = vor.u32 %v8244_v1, %v6696_v63  ;;  %4091 = vmatpush.bf16.msrb.mxu3 %v7529_v6  ;;  %v6602_v63 = vld [vmem:[#allocation8 + $0x7e8] sm:$0xf0]  ;;  %v8892_v1 = vld [vmem:[#allocation10] sm:$0xff] }
 0x16c   :  { %v8308_v5 = vld [vmem:[#allocation8 + $0xaa4] sm:$0xf0]  ;;  %v5770_v6 = vld [vmem:[#allocation8 + $0x168] sm:$0xf0] }
 0x16d   :  { %v7240_v7 = vld [vmem:[#allocation8 + $0xcc8] sm:$0xf]  ;;  %v6953_v12 = vor.u32 %v8308_v5, %v6952_v4  ;;  %4051 = vmatpush.bf16.msrb.mxu0 %v6697_v9  ;;  %v8008_v5 = vld [vmem:[#allocation8 + $0x14c] sm:$0xf] }
 0x16e   :  { %v8380_v8 = vld [vmem:[#allocation8 + $0xce4] sm:$0xf0]  ;;  %v8072_v9 = vld [vmem:[#allocation8 + $0x34c] sm:$0xf] }
 0x16f   :  { %v7496_v10 = vld [vmem:[#allocation8 + $0xec8] sm:$0xf]  ;;  %v7241_v15 = vor.u32 %v8380_v8, %v7240_v7  ;;  %4065 = vmatpush.bf16.msrb.mxu1 %v6953_v12  ;;  %v6349_v8 = vor.u32 %v8152_v57, %v6346_v58  ;;  %v9170_v12 = vperm.slane %v8892_v1, 0  ;;  %v6506_v48 = vld [vmem:[#allocation8 + $0x728] sm:$0xf0] }
 0x170   :  { %v8444_v11 = vld [vmem:[#allocation8 + $0xee4] sm:$0xf0]  ;;  %v7984_v50 = vld [vmem:[#allocation8 + $0x8c] sm:$0xf] }
 0x171   :  { %v6664_v13 = vld [vmem:[#allocation8 + $0x848] sm:$0xf]  ;;  %v7497_v18 = vor.u32 %v8444_v11, %v7496_v10  ;;  %4078 = vmatpush.bf16.msrb.mxu2 %v7241_v15  ;;  %v6026_v10 = vld [vmem:[#allocation8 + $0x368] sm:$0xf0]  ;;  %v6605_v11 = vor.u32 %v8216_v61, %v6602_v63  ;;  %v5773_v15 = vor.u32 %v8008_v5, %v5770_v6 }
 0x172   :  { %v8236_v14 = vld [vmem:[#allocation8 + $0x864] sm:$0xf0]  ;;  %v8120_v57 = vld [vmem:[#allocation8 + $0x4cc] sm:$0xf] }
 0x173   :  { %v6920_v16 = vld [vmem:[#allocation8 + $0xa48] sm:$0xf]  ;;  %v6665_v21 = vor.u32 %v8236_v14, %v6664_v13  ;;  %4092 = vmatpush.bf16.msrb.mxu3 %v7497_v18  ;;  %v8144_v13 = vld [vmem:[#allocation8 + $0x58c] sm:$0xf]  ;;  %v6029_v18 = vor.u32 %v8072_v9, %v6026_v10  ;;  %v3803_v9 = vpop.f32.mrf.mxu2 }
 0x174   :  { %v8300_v17 = vld [vmem:[#allocation8 + $0xa64] sm:$0xf0]  ;;  %v6314_v14 = vld [vmem:[#allocation8 + $0x5a8] sm:$0xf0] }
 0x175   :  { %v7208_v19 = vld [vmem:[#allocation8 + $0xc88] sm:$0xf]  ;;  %v6921_v2 = vor.u32 %v8300_v17, %v6920_v16  ;;  %4052 = vmatpush.bf16.msrb.mxu0 %v6665_v21  ;;  %v8208_v16 = vld [vmem:[#allocation8 + $0x78c] sm:$0xf]  ;;  %v3775_v21 = vpop.f32.mrf.mxu0 }
 0x176   :  { %v8372_v20 = vld [vmem:[#allocation8 + $0xca4] sm:$0xf0]  ;;  %v6570_v17 = vld [vmem:[#allocation8 + $0x7a8] sm:$0xf0] }
 0x177   :  { %v7464_v22 = vld [vmem:[#allocation8 + $0xe88] sm:$0xf]  ;;  %v7209_v32 = vor.u32 %v8372_v20, %v7208_v19  ;;  %4066 = vmatpush.bf16.msrb.mxu1 %v6921_v2  ;;  %v8000_v19 = vld [vmem:[#allocation8 + $0x10c] sm:$0xf]  ;;  %v3776_v2 = vadd.f32 %v3775_v21, %v9170_v12  ;;  %v8082_v12 = vld [vmem:[#allocation8 + $0x39c] sm:$0xf] }
 0x178   :  { %v8436_v24 = vld [vmem:[#allocation8 + $0xea4] sm:$0xf0]  ;;  %v5738_v20 = vld [vmem:[#allocation8 + $0x128] sm:$0xf0] }
 0x179   :  { %v6632_v25 = vld [vmem:[#allocation8 + $0x808] sm:$0xf]  ;;  %v7465_v36 = vor.u32 %v8436_v24, %v7464_v22  ;;  %4079 = vmatpush.bf16.msrb.mxu2 %v7209_v32  ;;  %v6317_v22 = vor.u32 %v8144_v13, %v6314_v14  ;;  %v8064_v24 = vld [vmem:[#allocation8 + $0x30c] sm:$0xf]  ;;  %v3789_v32 = vpop.f32.mrf.mxu1  ;;  %v5741_v33 = vor.u32 %v8000_v19, %v5738_v20  ;;  %v3817_v19 = vpop.f32.mrf.mxu3 }
 0x17a   :  { %v8228_v28 = vld [vmem:[#allocation8 + $0x824] sm:$0xf0]  ;;  %v6218_v58 = vld [vmem:[#allocation8 + $0x4e8] sm:$0xf0] }
 0x17b   :  { %v6888_v29 = vld [vmem:[#allocation8 + $0xa08] sm:$0xf]  ;;  %v6633_v40 = vor.u32 %v8228_v28, %v6632_v25  ;;  %4093 = vmatpush.bf16.msrb.mxu3 %v7465_v36  ;;  %v5994_v25 = vld [vmem:[#allocation8 + $0x328] sm:$0xf0]  ;;  %v6573_v28 = vor.u32 %v8208_v16, %v6570_v17  ;;  %v3790_v36 = vadd.f32 %v3789_v32, %v3776_v2  ;;  %v6221_v6 = vor.u32 %v8120_v57, %v6218_v58 }
 0x17c   :  { %v8292_v30 = vld [vmem:[#allocation8 + $0xa24] sm:$0xf0]  ;;  %v5997_v37 = vor.u32 %v8064_v24, %v5994_v25  ;;  %v8184_v61 = vld [vmem:[#allocation8 + $0x6cc] sm:$0xf] }
 0x17d   :  { %v7176_v38 = vld [vmem:[#allocation8 + $0xc48] sm:$0xf]  ;;  %v6889_v43 = vor.u32 %v8292_v30, %v6888_v29  ;;  %4053 = vmatpush.bf16.msrb.mxu0 %v6633_v40  ;;  %v8136_v29 = vld [vmem:[#allocation8 + $0x54c] sm:$0xf]  ;;  %v3804_v14 = vadd.f32 %v3803_v9, %v3790_v36 }
 0x17e   :  { %v8364_v39 = vld [vmem:[#allocation8 + $0xc64] sm:$0xf0]  ;;  %v6282_v30 = vld [vmem:[#allocation8 + $0x568] sm:$0xf0] }
 0x17f   :  { %v7432_v42 = vld [vmem:[#allocation8 + $0xe48] sm:$0xf]  ;;  %v7177_v47 = vor.u32 %v8364_v39, %v7176_v38  ;;  %4067 = vmatpush.bf16.msrb.mxu1 %v6889_v43  ;;  %v7992_v38 = vld [vmem:[#allocation8 + $0xcc] sm:$0xf]  ;;  %v6285_v40 = vor.u32 %v8136_v29, %v6282_v30  ;;  %v6541_v43 = vor.u32 %v8200_v34, %v6538_v35  ;;  %v8901_v25 = vadd.f32 %v3817_v19, %v3804_v14 }
 0x180   :  { %v8428_v41 = vld [vmem:[#allocation8 + $0xe64] sm:$0xf0]  ;;  %4054 = vmatmul.bf16.vlgmr.msrb.gmra.mxu0 %v8868_v23  ;;  %v5706_v39 = vld [vmem:[#allocation8 + $0xe8] sm:$0xf0] }
 0x181   :  { %v7433_v51 = vor.u32 %v8428_v41, %v7432_v42  ;;  %v7144_v52 = vld [vmem:[#allocation8 + $0xc08] sm:$0xf]  ;;  %4102 = vmatpush.bf16.msra.mxu0 %v5837_v44  ;;  %4080 = vmatpush.bf16.msrb.mxu2 %v7177_v47  ;;  %v8056_v42 = vld [vmem:[#allocation8 + $0x2cc] sm:$0xf] }
 0x182   :  { %v8356_v53 = vld [vmem:[#allocation8 + $0xc24] sm:$0xf0]  ;;  %4068 = vmatmul.bf16.vlgmr.msrb.gmra.mxu1 %v8870_v27  ;;  %v5962_v41 = vld [vmem:[#allocation8 + $0x2e8] sm:$0xf0] }
 0x183   :  { %v7400_v55 = vld [vmem:[#allocation8 + $0xe08] sm:$0xf]  ;;  %4116 = vmatpush.bf16.msra.mxu1 %v6093_v46  ;;  %v7145_v4 = vor.u32 %v8356_v53, %v7144_v52  ;;  %4094 = vmatpush.bf16.msrb.mxu3 %v7433_v51  ;;  %v8128_v44 = vld [vmem:[#allocation8 + $0x50c] sm:$0xf]  ;;  %v5709_v46 = vor.u32 %v7992_v38, %v5706_v39  ;;  %v5965_v49 = vor.u32 %v8056_v42, %v5962_v41 }
 0x184   :  { %v8420_v56 = vld [vmem:[#allocation8 + $0xe24] sm:$0xf0]  ;;  %v8192_v47 = vld [vmem:[#allocation8 + $0x70c] sm:$0xf]  ;;  %v6253_v52 = vor.u32 %v8128_v44, %v6250_v45 }
 0x185   :  { %v7401_v7 = vor.u32 %v8420_v56, %v7400_v55  ;;  %4103 = vmatpush.bf16.msra.mxu0 %v5805_v59  ;;  %4081 = vmatpush.bf16.msrb.mxu2 %v7145_v4  ;;  %v5674_v51 = vld [vmem:[#allocation8 + $0xa8] sm:$0xf0]  ;;  %v6509_v56 = vor.u32 %v8192_v47, %v6506_v48 }
 0x186   :  { %v8048_v53 = vld [vmem:[#allocation8 + $0x28c] sm:$0xf]  ;;  %v5677_v59 = vor.u32 %v7984_v50, %v5674_v51  ;;  %v8903_v51 = vpop.f32.mrf.mxu0 }
 0x187   :  { %4117 = vmatpush.bf16.msra.mxu1 %v6061_v3  ;;  %4095 = vmatpush.bf16.msrb.mxu3 %v7401_v7  ;;  %v5930_v55 = vld [vmem:[#allocation8 + $0x2a8] sm:$0xf0] }
 0x188   :  { %4082 = vmatmul.bf16.vlgmr.msrb.gmra.mxu2 %v8874_v62  ;;  %v6474_v63 = vld [vmem:[#allocation8 + $0x6e8] sm:$0xf0]  ;;  %v5933_v3 = vor.u32 %v8048_v53, %v5930_v55 }
 0x189   :  { %4130 = vmatpush.bf16.msra.mxu2 %v6349_v8  ;;  %4104 = vmatpush.bf16.msra.mxu0 %v5773_v15  ;;  %v7976_v4 = vld [vmem:[#allocation8 + $0x4c] sm:$0xf]  ;;  %v6477_v10 = vor.u32 %v8184_v61, %v6474_v63 }
 0x18a   :  { %4096 = vmatmul.bf16.vlgmr.msrb.gmra.mxu3 %v8876_v0  ;;  %v5642_v5 = vld [vmem:[#allocation8 + $0x68] sm:$0xf0] }
 0x18b   :  { %4144 = vmatpush.bf16.msra.mxu3 %v6605_v11  ;;  %4118 = vmatpush.bf16.msra.mxu1 %v6029_v18  ;;  %v8040_v7 = vld [vmem:[#allocation8 + $0x24c] sm:$0xf]  ;;  %v5645_v15 = vor.u32 %v7976_v4, %v5642_v5 }
 0x18c   :  { %v5898_v8 = vld [vmem:[#allocation8 + $0x268] sm:$0xf0] }
 0x18d   :  { %4131 = vmatpush.bf16.msra.mxu2 %v6317_v22  ;;  %4105 = vmatpush.bf16.msra.mxu0 %v5741_v33  ;;  %v8112_v11 = vld [vmem:[#allocation8 + $0x48c] sm:$0xf]  ;;  %v5901_v20 = vor.u32 %v8040_v7, %v5898_v8 }
 0x18e   :  { %v6186_v13 = vld [vmem:[#allocation8 + $0x4a8] sm:$0xf0] }
 0x18f   :  { %4145 = vmatpush.bf16.msra.mxu3 %v6573_v28  ;;  %4119 = vmatpush.bf16.msra.mxu1 %v5997_v37  ;;  %v8176_v16 = vld [vmem:[#allocation8 + $0x68c] sm:$0xf]  ;;  %v6189_v2 = vor.u32 %v8112_v11, %v6186_v13 }
 0x190   :  { %v6442_v17 = vld [vmem:[#allocation8 + $0x6a8] sm:$0xf0] }
 0x191   :  { %4132 = vmatpush.bf16.msra.mxu2 %v6285_v40  ;;  %4106 = vmatpush.bf16.msra.mxu0 %v5709_v46  ;;  %v7968_v18 = vld [vmem:[#allocation8 + $0xc] sm:$0xf]  ;;  %v6445_v32 = vor.u32 %v8176_v16, %v6442_v17 }
 0x192   :  { %v5610_v21 = vld [vmem:[#allocation8 + $0x28] sm:$0xf0] }
 0x193   :  { %4146 = vmatpush.bf16.msra.mxu3 %v6541_v43  ;;  %4120 = vmatpush.bf16.msra.mxu1 %v5965_v49  ;;  %v8032_v22 = vld [vmem:[#allocation8 + $0x20c] sm:$0xf]  ;;  %v5613_v36 = vor.u32 %v7968_v18, %v5610_v21 }
 0x194   :  { %v5866_v24 = vld [vmem:[#allocation8 + $0x228] sm:$0xf0] }
 0x195   :  { %4133 = vmatpush.bf16.msra.mxu2 %v6253_v52  ;;  %4107 = vmatpush.bf16.msra.mxu0 %v5677_v59  ;;  %v8280_v28 = vld [vmem:[#allocation8 + $0x9cc] sm:$0xf]  ;;  %v5869_v39 = vor.u32 %v8032_v22, %v5866_v24  ;;  %v3831_v22 = vpop.f32.mrf.mxu0 }
 0x196   :  { %v6858_v29 = vld [vmem:[#allocation8 + $0x9e8] sm:$0xf0] }
 0x197   :  { %4147 = vmatpush.bf16.msra.mxu3 %v6509_v56  ;;  %4121 = vmatpush.bf16.msra.mxu1 %v5933_v3  ;;  %v8344_v30 = vld [vmem:[#allocation8 + $0xbcc] sm:$0xf]  ;;  %v6861_v40 = vor.u32 %v8280_v28, %v6858_v29  ;;  %v8905_v56 = vpop.f32.mrf.mxu1  ;;  %v3832_v29 = vadd.f32 %v3831_v22, %v8901_v25  ;;  %v8912_v25 = vpop.f32.mrf.mxu2 }
 0x198   :  { %v7114_v33 = vld [vmem:[#allocation8 + $0xbe8] sm:$0xf0] }
 0x199   :  { %4134 = vmatpush.bf16.msra.mxu2 %v6221_v6  ;;  %v8104_v34 = vld [vmem:[#allocation8 + $0x44c] sm:$0xf]  ;;  %4108 = vmatpush.bf16.msra.mxu0 %v5645_v15  ;;  %v7117_v41 = vor.u32 %v8344_v30, %v7114_v33 }
 0x19a   :  { %v6154_v35 = vld [vmem:[#allocation8 + $0x468] sm:$0xf0] }
 0x19b   :  { %4148 = vmatpush.bf16.msra.mxu3 %v6477_v10  ;;  %v8168_v37 = vld [vmem:[#allocation8 + $0x64c] sm:$0xf]  ;;  %4122 = vmatpush.bf16.msra.mxu1 %v5901_v20  ;;  %v6157_v43 = vor.u32 %v8104_v34, %v6154_v35 }
 0x19c   :  { %v6410_v38 = vld [vmem:[#allocation8 + $0x668] sm:$0xf0] }
 0x19d   :  { %v8272_v42 = vld [vmem:[#allocation8 + $0x98c] sm:$0xf]  ;;  %4135 = vmatpush.bf16.msra.mxu2 %v6189_v2  ;;  %v6413_v47 = vor.u32 %v8168_v37, %v6410_v38  ;;  %4109 = vmatpush.bf16.msra.mxu0 %v5613_v36 }
 0x19e   :  { %v6826_v44 = vld [vmem:[#allocation8 + $0x9a8] sm:$0xf0] }
 0x19f   :  { %v8336_v45 = vld [vmem:[#allocation8 + $0xb8c] sm:$0xf]  ;;  %4149 = vmatpush.bf16.msra.mxu3 %v6445_v32  ;;  %4123 = vmatpush.bf16.msra.mxu1 %v5869_v39  ;;  %v6829_v57 = vor.u32 %v8272_v42, %v6826_v44  ;;  %v3845_v30 = vpop.f32.mrf.mxu1 }
 0x1a0   :  { %v7082_v46 = vld [vmem:[#allocation8 + $0xba8] sm:$0xf0]  ;;  %4110 = vmatmul.bf16.vlgmr.msra.gmra.mxu0 %v8852_v26  ;;  %v3846_v38 = vadd.f32 %v3845_v30, %v3832_v29 }
 0x1a1   :  { %v8096_v48 = vld [vmem:[#allocation8 + $0x40c] sm:$0xf]  ;;  %4158 = vmatpush.bf16.msrb.mxu0 %v6861_v40  ;;  %4136 = vmatpush.bf16.msra.mxu2 %v6157_v43  ;;  %v7085_v61 = vor.u32 %v8336_v45, %v7082_v46 }
 0x1a2   :  { %v6122_v49 = vld [vmem:[#allocation8 + $0x428] sm:$0xf0]  ;;  %4124 = vmatmul.bf16.vlgmr.msra.gmra.mxu1 %v8854_v31 }
 0x1a3   :  { %v8160_v50 = vld [vmem:[#allocation8 + $0x60c] sm:$0xf]  ;;  %4172 = vmatpush.bf16.msrb.mxu1 %v7117_v41  ;;  %v6125_v63 = vor.u32 %v8096_v48, %v6122_v49  ;;  %4150 = vmatpush.bf16.msra.mxu3 %v6413_v47  ;;  %v8914_v48 = vpop.f32.mrf.mxu3 }
 0x1a4   :  { %v6378_v52 = vld [vmem:[#allocation8 + $0x628] sm:$0xf0] }
 0x1a5   :  { %v8408_v53 = vld [vmem:[#allocation8 + $0xdcc] sm:$0xf]  ;;  %v6381_v5 = vor.u32 %v8160_v50, %v6378_v52  ;;  %4159 = vmatpush.bf16.msrb.mxu0 %v6829_v57  ;;  %4137 = vmatpush.bf16.msra.mxu2 %v6125_v63 }
 0x1a6   :  { %v7370_v55 = vld [vmem:[#allocation8 + $0xde8] sm:$0xf0] }
 0x1a7   :  { %v8472_v58 = vld [vmem:[#allocation8 + $0xfcc] sm:$0xf]  ;;  %v7373_v6 = vor.u32 %v8408_v53, %v7370_v55  ;;  %4173 = vmatpush.bf16.msrb.mxu1 %v7085_v61  ;;  %4151 = vmatpush.bf16.msra.mxu3 %v6381_v5 }
 0x1a8   :  { %v7626_v59 = vld [vmem:[#allocation8 + $0xfe8] sm:$0xf0]  ;;  %4138 = vmatmul.bf16.vlgmr.msra.gmra.mxu2 %v8858_v54 }
 0x1a9   :  { %v8264_v3 = vld [vmem:[#allocation8 + $0x94c] sm:$0xf]  ;;  %v7629_v9 = vor.u32 %v8472_v58, %v7626_v59  ;;  %4186 = vmatpush.bf16.msrb.mxu2 %v7373_v6  ;;  %v8916_v58 = vpop.f32.mrf.mxu0 }
 0x1aa   :  { %v6794_v4 = vld [vmem:[#allocation8 + $0x968] sm:$0xf0]  ;;  %4152 = vmatmul.bf16.vlgmr.msra.gmra.mxu3 %v8860_v60 }
 0x1ab   :  { %v8328_v7 = vld [vmem:[#allocation8 + $0xb4c] sm:$0xf]  ;;  %v6797_v13 = vor.u32 %v8264_v3, %v6794_v4  ;;  %4200 = vmatpush.bf16.msrb.mxu3 %v7629_v9  ;;  %v8918_v3 = vpop.f32.mrf.mxu1 }
 0x1ac   :  { %v7050_v8 = vld [vmem:[#allocation8 + $0xb68] sm:$0xf0] }
 0x1ad   :  { %v8400_v10 = vld [vmem:[#allocation8 + $0xd8c] sm:$0xf]  ;;  %v7053_v16 = vor.u32 %v8328_v7, %v7050_v8  ;;  %4160 = vmatpush.bf16.msrb.mxu0 %v6797_v13 }
 0x1ae   :  { %v7338_v11 = vld [vmem:[#allocation8 + $0xda8] sm:$0xf0] }
 0x1af   :  { %v8464_v14 = vld [vmem:[#allocation8 + $0xf8c] sm:$0xf]  ;;  %v7341_v19 = vor.u32 %v8400_v10, %v7338_v11  ;;  %4174 = vmatpush.bf16.msrb.mxu1 %v7053_v16 }
 0x1b0   :  { %v7594_v15 = vld [vmem:[#allocation8 + $0xfa8] sm:$0xf0] }
 0x1b1   :  { %v8256_v17 = vld [vmem:[#allocation8 + $0x90c] sm:$0xf]  ;;  %v7597_v24 = vor.u32 %v8464_v14, %v7594_v15  ;;  %4187 = vmatpush.bf16.msrb.mxu2 %v7341_v19 }
 0x1b2   :  { %v6762_v18 = vld [vmem:[#allocation8 + $0x928] sm:$0xf0] }
 0x1b3   :  { %v8320_v20 = vld [vmem:[#allocation8 + $0xb0c] sm:$0xf]  ;;  %v6765_v32 = vor.u32 %v8256_v17, %v6762_v18  ;;  %4201 = vmatpush.bf16.msrb.mxu3 %v7597_v24  ;;  %v3859_v18 = vpop.f32.mrf.mxu2 }
 0x1b4   :  { %v7018_v21 = vld [vmem:[#allocation8 + $0xb28] sm:$0xf0]  ;;  %v3860_v24 = vadd.f32 %v3859_v18, %v3846_v38 }
 0x1b5   :  { %v8392_v2 = vld [vmem:[#allocation8 + $0xd4c] sm:$0xf]  ;;  %v7021_v35 = vor.u32 %v8320_v20, %v7018_v21  ;;  %4161 = vmatpush.bf16.msrb.mxu0 %v6765_v32  ;;  %v9171_v20 = vperm.slane %v8892_v1, 1 }
 0x1b6   :  { %v7306_v28 = vld [vmem:[#allocation8 + $0xd68] sm:$0xf0] }
 0x1b7   :  { %v8456_v33 = vld [vmem:[#allocation8 + $0xf4c] sm:$0xf]  ;;  %v7309_v39 = vor.u32 %v8392_v2, %v7306_v28  ;;  %4175 = vmatpush.bf16.msrb.mxu1 %v7021_v35  ;;  %v3873_v2 = vpop.f32.mrf.mxu3  ;;  %v8029_v35 = vld [vmem:[#allocation8 + $0x1ec] sm:$0xf0] }
 0x1b8   :  { %v7562_v34 = vld [vmem:[#allocation8 + $0xf68] sm:$0xf0] }
 0x1b9   :  { %v8248_v36 = vld [vmem:[#allocation8 + $0x8cc] sm:$0xf]  ;;  %v7565_v41 = vor.u32 %v8456_v33, %v7562_v34  ;;  %4188 = vmatpush.bf16.msrb.mxu2 %v7309_v39  ;;  %v5840_v34 = vld [vmem:[#allocation8 + $0x1d0] sm:$0xf]  ;;  %v3887_v39 = vpop.f32.mrf.mxu0 }
 0x1ba   :  { %v6730_v37 = vld [vmem:[#allocation8 + $0x8e8] sm:$0xf0]  ;;  %v3888_v38 = vadd.f32 %v3887_v39, %v9171_v20  ;;  %v8213_v39 = vld [vmem:[#allocation8 + $0x7ac] sm:$0xf0]  ;;  %v8358_v20 = vld [vmem:[#allocation8 + $0xc34] sm:$0xf0] }
 0x1bb   :  { %v8312_v40 = vld [vmem:[#allocation8 + $0xacc] sm:$0xf]  ;;  %v6733_v45 = vor.u32 %v8248_v36, %v6730_v37  ;;  %4202 = vmatpush.bf16.msrb.mxu3 %v7565_v41  ;;  %v6096_v36 = vld [vmem:[#allocation8 + $0x3d0] sm:$0xf]  ;;  %v8921_v37 = vadd.f32 %v3873_v2, %v3860_v24 }
 0x1bc   :  { %v6986_v42 = vld [vmem:[#allocation8 + $0xae8] sm:$0xf0] }
 0x1bd   :  { %v8384_v43 = vld [vmem:[#allocation8 + $0xd0c] sm:$0xf]  ;;  %v6989_v49 = vor.u32 %v8312_v40, %v6986_v42  ;;  %4162 = vmatpush.bf16.msrb.mxu0 %v6733_v45  ;;  %9172 = vst [vmem:[#allocation20_spill] sm:$0xff] %v8921_v37  ;;  %v8093_v42 = vld [vmem:[#allocation8 + $0x3ec] sm:$0xf0] }
 0x1be   :  { %v7274_v44 = vld [vmem:[#allocation8 + $0xd28] sm:$0xf0] }
 0x1bf   :  { %v8448_v46 = vld [vmem:[#allocation8 + $0xf0c] sm:$0xf]  ;;  %v7277_v53 = vor.u32 %v8384_v43, %v7274_v44  ;;  %4176 = vmatpush.bf16.msrb.mxu1 %v6989_v49  ;;  %v3901_v44 = vpop.f32.mrf.mxu1 }
 0x1c0   :  { %v7530_v47 = vld [vmem:[#allocation8 + $0xf28] sm:$0xf0] }
 0x1c1   :  { %v8240_v50 = vld [vmem:[#allocation8 + $0x88c] sm:$0xf]  ;;  %v7533_v59 = vor.u32 %v8448_v46, %v7530_v47  ;;  %4189 = vmatpush.bf16.msrb.mxu2 %v7277_v53  ;;  %v3902_v53 = vadd.f32 %v3901_v44, %v3888_v38  ;;  %v6000_v38 = vld [vmem:[#allocation8 + $0x310] sm:$0xf] }
 0x1c2   :  { %v6698_v52 = vld [vmem:[#allocation8 + $0x8a8] sm:$0xf0]  ;;  %v8069_v44 = vld [vmem:[#allocation8 + $0x32c] sm:$0xf0] }
 0x1c3   :  { %v8304_v55 = vld [vmem:[#allocation8 + $0xa8c] sm:$0xf]  ;;  %v6701_v4 = vor.u32 %v8240_v50, %v6698_v52  ;;  %4203 = vmatpush.bf16.msrb.mxu3 %v7533_v59  ;;  %v5841_v50 = vor.u32 %v8029_v35, %v5840_v34  ;;  %v5808_v52 = vld [vmem:[#allocation8 + $0x190] sm:$0xf] }
 0x1c4   :  { %v6954_v57 = vld [vmem:[#allocation8 + $0xaa8] sm:$0xf0]  ;;  %v8021_v59 = vld [vmem:[#allocation8 + $0x1ac] sm:$0xf0] }
 0x1c5   :  { %v8376_v61 = vld [vmem:[#allocation8 + $0xccc] sm:$0xf]  ;;  %v6957_v7 = vor.u32 %v8304_v55, %v6954_v57  ;;  %4163 = vmatpush.bf16.msrb.mxu0 %v6701_v4  ;;  %v6097_v55 = vor.u32 %v8093_v42, %v6096_v36  ;;  %v8149_v34 = vld [vmem:[#allocation8 + $0x5ac] sm:$0xf0] }
 0x1c6   :  { %v7242_v63 = vld [vmem:[#allocation8 + $0xce8] sm:$0xf0]  ;;  %v6576_v36 = vld [vmem:[#allocation8 + $0x790] sm:$0xf] }
 0x1c7   :  { %v8440_v5 = vld [vmem:[#allocation8 + $0xecc] sm:$0xf]  ;;  %v7245_v10 = vor.u32 %v8376_v61, %v7242_v63  ;;  %4177 = vmatpush.bf16.msrb.mxu1 %v6957_v7  ;;  %v6064_v61 = vld [vmem:[#allocation8 + $0x390] sm:$0xf] }
 0x1c8   :  { %v7498_v6 = vld [vmem:[#allocation8 + $0xee8] sm:$0xf0]  ;;  %v8085_v63 = vld [vmem:[#allocation8 + $0x3ac] sm:$0xf0] }
 0x1c9   :  { %v8232_v8 = vld [vmem:[#allocation8 + $0x84c] sm:$0xf]  ;;  %v7501_v14 = vor.u32 %v8440_v5, %v7498_v6  ;;  %4190 = vmatpush.bf16.msrb.mxu2 %v7245_v10  ;;  %v6352_v10 = vld [vmem:[#allocation8 + $0x5d0] sm:$0xf] }
 0x1ca   :  { %v6666_v9 = vld [vmem:[#allocation8 + $0x868] sm:$0xf0]  ;;  %v5744_v42 = vld [vmem:[#allocation8 + $0x110] sm:$0xf] }
 0x1cb   :  { %v8296_v11 = vld [vmem:[#allocation8 + $0xa4c] sm:$0xf]  ;;  %v6669_v19 = vor.u32 %v8232_v8, %v6666_v9  ;;  %4204 = vmatpush.bf16.msrb.mxu3 %v7501_v14  ;;  %v8925_v8 = vpop.f32.mrf.mxu2  ;;  %v5809_v14 = vor.u32 %v8021_v59, %v5808_v52  ;;  %v8205_v59 = vld [vmem:[#allocation8 + $0x76c] sm:$0xf0] }
 0x1cc   :  { %v6922_v13 = vld [vmem:[#allocation8 + $0xa68] sm:$0xf0] }
 0x1cd   :  { %v8368_v15 = vld [vmem:[#allocation8 + $0xc8c] sm:$0xf]  ;;  %v6925_v28 = vor.u32 %v8296_v11, %v6922_v13  ;;  %4164 = vmatpush.bf16.msrb.mxu0 %v6669_v19  ;;  %v8157_v11 = vld [vmem:[#allocation8 + $0x5ec] sm:$0xf0]  ;;  %v8927_v13 = vpop.f32.mrf.mxu3 }
 0x1ce   :  { %v7210_v16 = vld [vmem:[#allocation8 + $0xca8] sm:$0xf0]  ;;  %9173 = vst [vmem:[#allocation21_spill] sm:$0xff] %v8927_v13  ;;  %v5776_v19 = vld [vmem:[#allocation8 + $0x150] sm:$0xf]  ;;  %v6353_v2 = vor.u32 %v8157_v11, %v6352_v10 }
 0x1cf   :  { %v8432_v17 = vld [vmem:[#allocation8 + $0xe8c] sm:$0xf]  ;;  %v7213_v33 = vor.u32 %v8368_v15, %v7210_v16  ;;  %4178 = vmatpush.bf16.msrb.mxu1 %v6925_v28  ;;  %v6608_v15 = vld [vmem:[#allocation8 + $0x7d0] sm:$0xf]  ;;  %v8274_v13 = vld [vmem:[#allocation8 + $0x99c] sm:$0xf] }
 0x1d0   :  { %v7466_v21 = vld [vmem:[#allocation8 + $0xea8] sm:$0xf0]  ;;  %v8221_v16 = vld [vmem:[#allocation8 + $0x7ec] sm:$0xf0] }
 0x1d1   :  { %v8224_v22 = vld [vmem:[#allocation8 + $0x80c] sm:$0xf]  ;;  %v7469_v40 = vor.u32 %v8432_v17, %v7466_v21  ;;  %4191 = vmatpush.bf16.msrb.mxu2 %v7213_v33  ;;  %v6065_v17 = vor.u32 %v8085_v63, %v6064_v61  ;;  %v8013_v21 = vld [vmem:[#allocation8 + $0x16c] sm:$0xf0]  ;;  %v6001_v61 = vor.u32 %v8069_v44, %v6000_v38 }
 0x1d2   :  { %v6634_v29 = vld [vmem:[#allocation8 + $0x828] sm:$0xf0]  ;;  %v6032_v28 = vld [vmem:[#allocation8 + $0x350] sm:$0xf]  ;;  %v5777_v35 = vor.u32 %v8013_v21, %v5776_v19 }
 0x1d3   :  { %v8288_v30 = vld [vmem:[#allocation8 + $0xa0c] sm:$0xf]  ;;  %v6637_v45 = vor.u32 %v8224_v22, %v6634_v29  ;;  %4205 = vmatpush.bf16.msrb.mxu3 %v7469_v40  ;;  %v8930_v22 = vpop.f32.mrf.mxu0  ;;  %v8077_v29 = vld [vmem:[#allocation8 + $0x36c] sm:$0xf0] }
 0x1d4   :  { %v6890_v32 = vld [vmem:[#allocation8 + $0xa28] sm:$0xf0]  ;;  %v6320_v33 = vld [vmem:[#allocation8 + $0x590] sm:$0xf]  ;;  %v6033_v40 = vor.u32 %v8077_v29, %v6032_v28 }
 0x1d5   :  { %v8360_v41 = vld [vmem:[#allocation8 + $0xc4c] sm:$0xf]  ;;  %v6893_v49 = vor.u32 %v8288_v30, %v6890_v32  ;;  %4165 = vmatpush.bf16.msrb.mxu0 %v6637_v45  ;;  %v8933_v30 = vpop.f32.mrf.mxu1  ;;  %v6609_v32 = vor.u32 %v8221_v16, %v6608_v15  ;;  %v3915_v45 = vpop.f32.mrf.mxu2  ;;  %v5712_v63 = vld [vmem:[#allocation8 + $0xd0] sm:$0xf] }
 0x1d6   :  { %v7178_v43 = vld [vmem:[#allocation8 + $0xc68] sm:$0xf0]  ;;  %v3929_v52 = vpop.f32.mrf.mxu3  ;;  %v6256_v11 = vld [vmem:[#allocation8 + $0x510] sm:$0xf] }
 0x1d7   :  { %v8424_v46 = vld [vmem:[#allocation8 + $0xe4c] sm:$0xf]  ;;  %v7181_v57 = vor.u32 %v8360_v41, %v7178_v43  ;;  %4179 = vmatpush.bf16.msrb.mxu1 %v6893_v49  ;;  %v8005_v41 = vld [vmem:[#allocation8 + $0x12c] sm:$0xf0]  ;;  %v6321_v43 = vor.u32 %v8149_v34, %v6320_v33 }
 0x1d8   :  { %v7434_v47 = vld [vmem:[#allocation8 + $0xe68] sm:$0xf0]  ;;  %4166 = vmatmul.bf16.vlgmr.msrb.gmra.mxu0 %v8868_v23  ;;  %v8141_v49 = vld [vmem:[#allocation8 + $0x56c] sm:$0xf0] }
 0x1d9   :  { %v7437_v4 = vor.u32 %v8424_v46, %v7434_v47  ;;  %v8352_v5 = vld [vmem:[#allocation8 + $0xc0c] sm:$0xf]  ;;  %4214 = vmatpush.bf16.msra.mxu0 %v5841_v50  ;;  %4192 = vmatpush.bf16.msrb.mxu2 %v7181_v57  ;;  %v6577_v46 = vor.u32 %v8213_v39, %v6576_v36  ;;  %v6288_v47 = vld [vmem:[#allocation8 + $0x550] sm:$0xf]  ;;  %v3916_v50 = vadd.f32 %v3915_v45, %v3902_v53 }
 0x1da   :  { %v7146_v6 = vld [vmem:[#allocation8 + $0xc28] sm:$0xf0]  ;;  %4180 = vmatmul.bf16.vlgmr.msrb.gmra.mxu1 %v8870_v27  ;;  %v6544_v57 = vld [vmem:[#allocation8 + $0x750] sm:$0xf] }
 0x1db   :  { %v8416_v7 = vld [vmem:[#allocation8 + $0xe0c] sm:$0xf]  ;;  %4228 = vmatpush.bf16.msra.mxu1 %v6097_v55  ;;  %v7149_v18 = vor.u32 %v8352_v5, %v7146_v6  ;;  %4206 = vmatpush.bf16.msrb.mxu3 %v7437_v4  ;;  %v5745_v55 = vor.u32 %v8005_v41, %v5744_v42  ;;  %v7997_v4 = vld [vmem:[#allocation8 + $0xec] sm:$0xf0]  ;;  %v3930_v5 = vadd.f32 %v3929_v52, %v3916_v50  ;;  %v3943_v53 = vpop.f32.mrf.mxu0 }
 0x1dc   :  { %v7402_v9 = vld [vmem:[#allocation8 + $0xe28] sm:$0xf0]  ;;  %v6289_v6 = vor.u32 %v8141_v49, %v6288_v47  ;;  %v6545_v10 = vor.u32 %v8205_v59, %v6544_v57  ;;  %v5713_v16 = vor.u32 %v7997_v4, %v5712_v63  ;;  %v8053_v33 = vld [vmem:[#allocation8 + $0x2ac] sm:$0xf0] }
 0x1dd   :  { %v7405_v24 = vor.u32 %v8416_v7, %v7402_v9  ;;  %4215 = vmatpush.bf16.msra.mxu0 %v5809_v14  ;;  %4193 = vmatpush.bf16.msrb.mxu2 %v7149_v18  ;;  %v5968_v7 = vld [vmem:[#allocation8 + $0x2d0] sm:$0xf]  ;;  %v3944_v15 = vadd.f32 %v3943_v53, %v3930_v5  ;;  %v3957_v19 = vpop.f32.mrf.mxu1  ;;  %v8937_v34 = vpop.f32.mrf.mxu2 }
 0x1de   :  { %v8061_v9 = vld [vmem:[#allocation8 + $0x2ec] sm:$0xf0] }
 0x1df   :  { %4229 = vmatpush.bf16.msra.mxu1 %v6065_v17  ;;  %4207 = vmatpush.bf16.msrb.mxu3 %v7405_v24  ;;  %v8133_v14 = vld [vmem:[#allocation8 + $0x52c] sm:$0xf0]  ;;  %v5969_v21 = vor.u32 %v8061_v9, %v5968_v7  ;;  %v3958_v28 = vadd.f32 %v3957_v19, %v3944_v15 }
 0x1e0   :  { %4194 = vmatmul.bf16.vlgmr.msrb.gmra.mxu2 %v8874_v62  ;;  %v6512_v17 = vld [vmem:[#allocation8 + $0x710] sm:$0xf]  ;;  %v6257_v29 = vor.u32 %v8133_v14, %v6256_v11 }
 0x1e1   :  { %4242 = vmatpush.bf16.msra.mxu2 %v6353_v2  ;;  %4216 = vmatpush.bf16.msra.mxu0 %v5777_v35  ;;  %v8197_v18 = vld [vmem:[#allocation8 + $0x72c] sm:$0xf0] }
 0x1e2   :  { %4208 = vmatmul.bf16.vlgmr.msrb.gmra.mxu3 %v8876_v0  ;;  %v5680_v24 = vld [vmem:[#allocation8 + $0x90] sm:$0xf]  ;;  %v6513_v35 = vor.u32 %v8197_v18, %v6512_v17 }
 0x1e3   :  { %4256 = vmatpush.bf16.msra.mxu3 %v6609_v32  ;;  %4230 = vmatpush.bf16.msra.mxu1 %v6033_v40  ;;  %v7989_v2 = vld [vmem:[#allocation8 + $0xac] sm:$0xf0]  ;;  %v8939_v40 = vpop.f32.mrf.mxu3 }
 0x1e4   :  { %v5936_v32 = vld [vmem:[#allocation8 + $0x290] sm:$0xf]  ;;  %v5681_v42 = vor.u32 %v7989_v2, %v5680_v24 }
 0x1e5   :  { %4243 = vmatpush.bf16.msra.mxu2 %v6321_v43  ;;  %4217 = vmatpush.bf16.msra.mxu0 %v5745_v55  ;;  %v6224_v36 = vld [vmem:[#allocation8 + $0x4d0] sm:$0xf]  ;;  %v5937_v38 = vor.u32 %v8053_v33, %v5936_v32  ;;  %v3971_v18 = vpop.f32.mrf.mxu2 }
 0x1e6   :  { %v8125_v39 = vld [vmem:[#allocation8 + $0x4ec] sm:$0xf0]  ;;  %v3972_v2 = vadd.f32 %v3971_v18, %v3958_v28  ;;  %v8947_v18 = vpop.f32.mrf.mxu1 }
 0x1e7   :  { %4257 = vmatpush.bf16.msra.mxu3 %v6577_v46  ;;  %4231 = vmatpush.bf16.msra.mxu1 %v6001_v61  ;;  %v6480_v41 = vld [vmem:[#allocation8 + $0x6d0] sm:$0xf]  ;;  %v6225_v46 = vor.u32 %v8125_v39, %v6224_v36 }
 0x1e8   :  { %v8189_v43 = vld [vmem:[#allocation8 + $0x6ec] sm:$0xf0] }
 0x1e9   :  { %4244 = vmatpush.bf16.msra.mxu2 %v6289_v6  ;;  %4218 = vmatpush.bf16.msra.mxu0 %v5713_v16  ;;  %v5648_v44 = vld [vmem:[#allocation8 + $0x50] sm:$0xf]  ;;  %v6481_v50 = vor.u32 %v8189_v43, %v6480_v41 }
 0x1ea   :  { %v7981_v45 = vld [vmem:[#allocation8 + $0x6c] sm:$0xf0] }
 0x1eb   :  { %4258 = vmatpush.bf16.msra.mxu3 %v6545_v10  ;;  %4232 = vmatpush.bf16.msra.mxu1 %v5969_v21  ;;  %v5904_v47 = vld [vmem:[#allocation8 + $0x250] sm:$0xf]  ;;  %v5649_v57 = vor.u32 %v7981_v45, %v5648_v44 }
 0x1ec   :  { %v8045_v49 = vld [vmem:[#allocation8 + $0x26c] sm:$0xf0] }
 0x1ed   :  { %4245 = vmatpush.bf16.msra.mxu2 %v6257_v29  ;;  %v6192_v52 = vld [vmem:[#allocation8 + $0x490] sm:$0xf]  ;;  %4219 = vmatpush.bf16.msra.mxu0 %v5681_v42  ;;  %v5905_v4 = vor.u32 %v8045_v49, %v5904_v47 }
 0x1ee   :  { %v8117_v55 = vld [vmem:[#allocation8 + $0x4ac] sm:$0xf0] }
 0x1ef   :  { %4259 = vmatpush.bf16.msra.mxu3 %v6513_v35  ;;  %v6448_v59 = vld [vmem:[#allocation8 + $0x690] sm:$0xf]  ;;  %4233 = vmatpush.bf16.msra.mxu1 %v5937_v38  ;;  %v6193_v9 = vor.u32 %v8117_v55, %v6192_v52  ;;  %v3985_v35 = vpop.f32.mrf.mxu3 }
 0x1f0   :  { %v8181_v61 = vld [vmem:[#allocation8 + $0x6ac] sm:$0xf0]  ;;  %v8941_v38 = vadd.f32 %v3985_v35, %v3972_v2 }
 0x1f1   :  { %v5616_v63 = vld [vmem:[#allocation8 + $0x10] sm:$0xf]  ;;  %4246 = vmatpush.bf16.msra.mxu2 %v6225_v46  ;;  %v6449_v14 = vor.u32 %v8181_v61, %v6448_v59  ;;  %4220 = vmatpush.bf16.msra.mxu0 %v5649_v57 }
 0x1f2   :  { %v7973_v5 = vld [vmem:[#allocation8 + $0x2c] sm:$0xf0]  ;;  %9174 = vst [vmem:[#allocation22_spill] sm:$0xff] %v8941_v38 }
 0x1f3   :  { %v5872_v6 = vld [vmem:[#allocation8 + $0x210] sm:$0xf]  ;;  %4260 = vmatpush.bf16.msra.mxu3 %v6481_v50  ;;  %v5617_v19 = vor.u32 %v7973_v5, %v5616_v63  ;;  %4234 = vmatpush.bf16.msra.mxu1 %v5905_v4 }
 0x1f4   :  { %v8037_v7 = vld [vmem:[#allocation8 + $0x22c] sm:$0xf0] }
 0x1f5   :  { %v6864_v53 = vld [vmem:[#allocation8 + $0x9d0] sm:$0xf]  ;;  %v5873_v29 = vor.u32 %v8037_v7, %v5872_v6  ;;  %4247 = vmatpush.bf16.msra.mxu2 %v6193_v9  ;;  %4221 = vmatpush.bf16.msra.mxu0 %v5617_v19 }
 0x1f6   :  { %v8285_v10 = vld [vmem:[#allocation8 + $0x9ec] sm:$0xf0] }
 0x1f7   :  { %v7120_v11 = vld [vmem:[#allocation8 + $0xbd0] sm:$0xf]  ;;  %v6865_v32 = vor.u32 %v8285_v10, %v6864_v53  ;;  %4261 = vmatpush.bf16.msra.mxu3 %v6449_v14  ;;  %4235 = vmatpush.bf16.msra.mxu1 %v5873_v29  ;;  %v8944_v53 = vpop.f32.mrf.mxu0 }
 0x1f8   :  { %v8349_v15 = vld [vmem:[#allocation8 + $0xbec] sm:$0xf0]  ;;  %4222 = vmatmul.bf16.vlgmr.msra.gmra.mxu0 %v8852_v26 }
 0x1f9   :  { %v6160_v16 = vld [vmem:[#allocation8 + $0x450] sm:$0xf]  ;;  %v7121_v36 = vor.u32 %v8349_v15, %v7120_v11  ;;  %4270 = vmatpush.bf16.msrb.mxu0 %v6865_v32 }
 0x1fa   :  { %v8109_v17 = vld [vmem:[#allocation8 + $0x46c] sm:$0xf0]  ;;  %4236 = vmatmul.bf16.vlgmr.msra.gmra.mxu1 %v8854_v31 }
 0x1fb   :  { %v6416_v21 = vld [vmem:[#allocation8 + $0x650] sm:$0xf]  ;;  %v6161_v39 = vor.u32 %v8109_v17, %v6160_v16  ;;  %4284 = vmatpush.bf16.msrb.mxu1 %v7121_v36 }
 0x1fc   :  { %v8173_v24 = vld [vmem:[#allocation8 + $0x66c] sm:$0xf0] }
 0x1fd   :  { %v6832_v33 = vld [vmem:[#allocation8 + $0x990] sm:$0xf]  ;;  %v6417_v44 = vor.u32 %v8173_v24, %v6416_v21  ;;  %4248 = vmatpush.bf16.msra.mxu2 %v6161_v39  ;;  %v9169_v39 = vperm.slane %v8892_v1, 2 }
 0x1fe   :  { %v8277_v42 = vld [vmem:[#allocation8 + $0x9ac] sm:$0xf0] }
 0x1ff   :  { %v7088_v41 = vld [vmem:[#allocation8 + $0xb90] sm:$0xf]  ;;  %v6833_v52 = vor.u32 %v8277_v42, %v6832_v33  ;;  %4262 = vmatpush.bf16.msra.mxu3 %v6417_v44 }
 0x200   :  { %v8341_v43 = vld [vmem:[#allocation8 + $0xbac] sm:$0xf0] }
 0x201   :  { %v6128_v45 = vld [vmem:[#allocation8 + $0x410] sm:$0xf]  ;;  %v7089_v59 = vor.u32 %v8341_v43, %v7088_v41  ;;  %4271 = vmatpush.bf16.msrb.mxu0 %v6833_v52 }
 0x202   :  { %v8101_v46 = vld [vmem:[#allocation8 + $0x42c] sm:$0xf0] }
 0x203   :  { %v6384_v47 = vld [vmem:[#allocation8 + $0x610] sm:$0xf]  ;;  %v6129_v61 = vor.u32 %v8101_v46, %v6128_v45  ;;  %4285 = vmatpush.bf16.msrb.mxu1 %v7089_v59 }
 0x204   :  { %v8165_v28 = vld [vmem:[#allocation8 + $0x62c] sm:$0xf0] }
 0x205   :  { %v7376_v49 = vld [vmem:[#allocation8 + $0xdd0] sm:$0xf]  ;;  %v6385_v5 = vor.u32 %v8165_v28, %v6384_v47  ;;  %4249 = vmatpush.bf16.msra.mxu2 %v6129_v61 }
 0x206   :  { %v8413_v50 = vld [vmem:[#allocation8 + $0xdec] sm:$0xf0] }
 0x207   :  { %v7632_v55 = vld [vmem:[#allocation8 + $0xfd0] sm:$0xf]  ;;  %v7377_v6 = vor.u32 %v8413_v50, %v7376_v49  ;;  %4263 = vmatpush.bf16.msra.mxu3 %v6385_v5  ;;  %v3999_v50 = vpop.f32.mrf.mxu0  ;;  %v4013_v5 = vpop.f32.mrf.mxu1 }
 0x208   :  { %v8477_v57 = vld [vmem:[#allocation8 + $0xfec] sm:$0xf0]  ;;  %4250 = vmatmul.bf16.vlgmr.msra.gmra.mxu2 %v8858_v54  ;;  %v4000_v59 = vadd.f32 %v3999_v50, %v9169_v39 }
 0x209   :  { %v6800_v63 = vld [vmem:[#allocation8 + $0x950] sm:$0xf]  ;;  %v7633_v10 = vor.u32 %v8477_v57, %v7632_v55  ;;  %4298 = vmatpush.bf16.msrb.mxu2 %v7377_v6 }
 0x20a   :  { %v8269_v4 = vld [vmem:[#allocation8 + $0x96c] sm:$0xf0]  ;;  %4264 = vmatmul.bf16.vlgmr.msra.gmra.mxu3 %v8860_v60 }
 0x20b   :  { %v7056_v7 = vld [vmem:[#allocation8 + $0xb50] sm:$0xf]  ;;  %v6801_v15 = vor.u32 %v8269_v4, %v6800_v63  ;;  %4312 = vmatpush.bf16.msrb.mxu3 %v7633_v10  ;;  %v4014_v10 = vadd.f32 %v4013_v5, %v4000_v59  ;;  %v8089_v5 = vld [vmem:[#allocation8 + $0x3d4] sm:$0xf] }
 0x20c   :  { %v8333_v9 = vld [vmem:[#allocation8 + $0xb6c] sm:$0xf0] }
 0x20d   :  { %v7344_v11 = vld [vmem:[#allocation8 + $0xd90] sm:$0xf]  ;;  %v7057_v19 = vor.u32 %v8333_v9, %v7056_v7  ;;  %4272 = vmatpush.bf16.msrb.mxu0 %v6801_v15 }
 0x20e   :  { %v8405_v14 = vld [vmem:[#allocation8 + $0xdac] sm:$0xf0] }
 0x20f   :  { %v7600_v16 = vld [vmem:[#allocation8 + $0xf90] sm:$0xf]  ;;  %v7345_v2 = vor.u32 %v8405_v14, %v7344_v11  ;;  %4286 = vmatpush.bf16.msrb.mxu1 %v7057_v19 }
 0x210   :  { %v8469_v17 = vld [vmem:[#allocation8 + $0xfac] sm:$0xf0] }
 0x211   :  { %v6768_v21 = vld [vmem:[#allocation8 + $0x910] sm:$0xf]  ;;  %v7601_v33 = vor.u32 %v8469_v17, %v7600_v16  ;;  %4299 = vmatpush.bf16.msrb.mxu2 %v7345_v2  ;;  %v8954_v16 = vpop.f32.mrf.mxu2 }
 0x212   :  { %v8261_v24 = vld [vmem:[#allocation8 + $0x92c] sm:$0xf0] }
 0x213   :  { %v7024_v29 = vld [vmem:[#allocation8 + $0xb10] sm:$0xf]  ;;  %v6769_v42 = vor.u32 %v8261_v24, %v6768_v21  ;;  %4313 = vmatpush.bf16.msrb.mxu3 %v7601_v33 }
 0x214   :  { %v8325_v32 = vld [vmem:[#allocation8 + $0xb2c] sm:$0xf0] }
 0x215   :  { %v7312_v35 = vld [vmem:[#allocation8 + $0xd50] sm:$0xf]  ;;  %v7025_v44 = vor.u32 %v8325_v32, %v7024_v29  ;;  %4273 = vmatpush.bf16.msrb.mxu0 %v6769_v42  ;;  %v8956_v32 = vpop.f32.mrf.mxu3 }
 0x216   :  { %v8397_v36 = vld [vmem:[#allocation8 + $0xd6c] sm:$0xf0]  ;;  %9175 = vst [vmem:[#allocation23_spill] sm:$0xff] %v8956_v32 }
 0x217   :  { %v7568_v41 = vld [vmem:[#allocation8 + $0xf50] sm:$0xf]  ;;  %v7313_v47 = vor.u32 %v8397_v36, %v7312_v35  ;;  %4287 = vmatpush.bf16.msrb.mxu1 %v7025_v44 }
 0x218   :  { %v8461_v43 = vld [vmem:[#allocation8 + $0xf6c] sm:$0xf0] }
 0x219   :  { %v6736_v45 = vld [vmem:[#allocation8 + $0x8d0] sm:$0xf]  ;;  %v7569_v52 = vor.u32 %v8461_v43, %v7568_v41  ;;  %4300 = vmatpush.bf16.msrb.mxu2 %v7313_v47 }
 0x21a   :  { %v8253_v46 = vld [vmem:[#allocation8 + $0x8ec] sm:$0xf0] }
 0x21b   :  { %v6992_v28 = vld [vmem:[#allocation8 + $0xad0] sm:$0xf]  ;;  %v6737_v61 = vor.u32 %v8253_v46, %v6736_v45  ;;  %4314 = vmatpush.bf16.msrb.mxu3 %v7569_v52 }
 0x21c   :  { %v8317_v49 = vld [vmem:[#allocation8 + $0xaec] sm:$0xf0] }
 0x21d   :  { %v7280_v55 = vld [vmem:[#allocation8 + $0xd10] sm:$0xf]  ;;  %v6993_v6 = vor.u32 %v8317_v49, %v6992_v28  ;;  %4274 = vmatpush.bf16.msrb.mxu0 %v6737_v61 }
 0x21e   :  { %v8389_v57 = vld [vmem:[#allocation8 + $0xd2c] sm:$0xf0] }
 0x21f   :  { %v7536_v63 = vld [vmem:[#allocation8 + $0xf10] sm:$0xf]  ;;  %v7281_v11 = vor.u32 %v8389_v57, %v7280_v55  ;;  %4288 = vmatpush.bf16.msrb.mxu1 %v6993_v6  ;;  %v4027_v6 = vpop.f32.mrf.mxu2 }
 0x220   :  { %v8453_v4 = vld [vmem:[#allocation8 + $0xf2c] sm:$0xf0] }
 0x221   :  { %v6704_v7 = vld [vmem:[#allocation8 + $0x890] sm:$0xf]  ;;  %v7537_v17 = vor.u32 %v8453_v4, %v7536_v63  ;;  %4301 = vmatpush.bf16.msrb.mxu2 %v7281_v11  ;;  %v8025_v63 = vld [vmem:[#allocation8 + $0x1d4] sm:$0xf] }
 0x222   :  { %v8245_v9 = vld [vmem:[#allocation8 + $0x8ac] sm:$0xf0]  ;;  %v5842_v4 = vld [vmem:[#allocation8 + $0x1f0] sm:$0xf0] }
 0x223   :  { %v6960_v14 = vld [vmem:[#allocation8 + $0xa90] sm:$0xf]  ;;  %v6705_v24 = vor.u32 %v8245_v9, %v6704_v7  ;;  %4315 = vmatpush.bf16.msrb.mxu3 %v7537_v17  ;;  %v6098_v9 = vld [vmem:[#allocation8 + $0x3f0] sm:$0xf0] }
 0x224   :  { %v8309_v15 = vld [vmem:[#allocation8 + $0xaac] sm:$0xf0] }
 0x225   :  { %v7248_v19 = vld [vmem:[#allocation8 + $0xcd0] sm:$0xf]  ;;  %v6961_v33 = vor.u32 %v8309_v15, %v6960_v14  ;;  %4275 = vmatpush.bf16.msrb.mxu0 %v6705_v24  ;;  %v4028_v15 = vadd.f32 %v4027_v6, %v4014_v10  ;;  %v4041_v24 = vpop.f32.mrf.mxu3 }
 0x226   :  { %v8381_v21 = vld [vmem:[#allocation8 + $0xcec] sm:$0xf0] }
 0x227   :  { %v7504_v2 = vld [vmem:[#allocation8 + $0xed0] sm:$0xf]  ;;  %v7249_v42 = vor.u32 %v8381_v21, %v7248_v19  ;;  %4289 = vmatpush.bf16.msrb.mxu1 %v6961_v33  ;;  %v8017_v33 = vld [vmem:[#allocation8 + $0x194] sm:$0xf] }
 0x228   :  { %v8445_v29 = vld [vmem:[#allocation8 + $0xeec] sm:$0xf0] }
 0x229   :  { %v6672_v35 = vld [vmem:[#allocation8 + $0x850] sm:$0xf]  ;;  %v7505_v44 = vor.u32 %v8445_v29, %v7504_v2  ;;  %4302 = vmatpush.bf16.msrb.mxu2 %v7249_v42  ;;  %v5845_v29 = vor.u32 %v8025_v63, %v5842_v4  ;;  %v8009_v63 = vld [vmem:[#allocation8 + $0x154] sm:$0xf] }
 0x22a   :  { %v8237_v36 = vld [vmem:[#allocation8 + $0x86c] sm:$0xf0]  ;;  %v5778_v4 = vld [vmem:[#allocation8 + $0x170] sm:$0xf0] }
 0x22b   :  { %v6928_v41 = vld [vmem:[#allocation8 + $0xa50] sm:$0xf]  ;;  %v6673_v47 = vor.u32 %v8237_v36, %v6672_v35  ;;  %4316 = vmatpush.bf16.msrb.mxu3 %v7505_v44  ;;  %v8958_v35 = vadd.f32 %v4041_v24, %v4028_v15  ;;  %v6101_v36 = vor.u32 %v8089_v5, %v6098_v9  ;;  %v6066_v44 = vld [vmem:[#allocation8 + $0x3b0] sm:$0xf0] }
 0x22c   :  { %v8301_v43 = vld [vmem:[#allocation8 + $0xa6c] sm:$0xf0]  ;;  %v6034_v9 = vld [vmem:[#allocation8 + $0x370] sm:$0xf0] }
 0x22d   :  { %v7216_v45 = vld [vmem:[#allocation8 + $0xc90] sm:$0xf]  ;;  %v6929_v52 = vor.u32 %v8301_v43, %v6928_v41  ;;  %4276 = vmatpush.bf16.msrb.mxu0 %v6673_v47  ;;  %v5810_v41 = vld [vmem:[#allocation8 + $0x1b0] sm:$0xf0] }
 0x22e   :  { %v8373_v46 = vld [vmem:[#allocation8 + $0xcac] sm:$0xf0]  ;;  %v8081_v43 = vld [vmem:[#allocation8 + $0x394] sm:$0xf] }
 0x22f   :  { %v7472_v28 = vld [vmem:[#allocation8 + $0xe90] sm:$0xf]  ;;  %v7217_v61 = vor.u32 %v8373_v46, %v7216_v45  ;;  %4290 = vmatpush.bf16.msrb.mxu1 %v6929_v52  ;;  %v5813_v52 = vor.u32 %v8017_v33, %v5810_v41  ;;  %v8145_v15 = vld [vmem:[#allocation8 + $0x594] sm:$0xf] }
 0x230   :  { %v8437_v49 = vld [vmem:[#allocation8 + $0xeac] sm:$0xf0]  ;;  %v6578_v24 = vld [vmem:[#allocation8 + $0x7b0] sm:$0xf0] }
 0x231   :  { %v6640_v50 = vld [vmem:[#allocation8 + $0x810] sm:$0xf]  ;;  %v7473_v7 = vor.u32 %v8437_v49, %v7472_v28  ;;  %4303 = vmatpush.bf16.msrb.mxu2 %v7217_v61  ;;  %v8153_v49 = vld [vmem:[#allocation8 + $0x5d4] sm:$0xf] }
 0x232   :  { %v8229_v55 = vld [vmem:[#allocation8 + $0x82c] sm:$0xf0]  ;;  %v8001_v33 = vld [vmem:[#allocation8 + $0x114] sm:$0xf] }
 0x233   :  { %v6896_v57 = vld [vmem:[#allocation8 + $0xa10] sm:$0xf]  ;;  %v6641_v17 = vor.u32 %v8229_v55, %v6640_v50  ;;  %4317 = vmatpush.bf16.msrb.mxu3 %v7473_v7  ;;  %v6354_v50 = vld [vmem:[#allocation8 + $0x5f0] sm:$0xf0] }
 0x234   :  { %v8293_v59 = vld [vmem:[#allocation8 + $0xa2c] sm:$0xf0]  ;;  %v8217_v55 = vld [vmem:[#allocation8 + $0x7d4] sm:$0xf]  ;;  %v6357_v6 = vor.u32 %v8153_v49, %v6354_v50 }
 0x235   :  { %v7184_v11 = vld [vmem:[#allocation8 + $0xc50] sm:$0xf]  ;;  %v6897_v2 = vor.u32 %v8293_v59, %v6896_v57  ;;  %4277 = vmatpush.bf16.msrb.mxu0 %v6641_v17  ;;  %v6610_v57 = vld [vmem:[#allocation8 + $0x7f0] sm:$0xf0]  ;;  %v6069_v59 = vor.u32 %v8081_v43, %v6066_v44 }
 0x236   :  { %v8365_v14 = vld [vmem:[#allocation8 + $0xc6c] sm:$0xf0]  ;;  %v8073_v7 = vld [vmem:[#allocation8 + $0x354] sm:$0xf] }
 0x237   :  { %v7440_v19 = vld [vmem:[#allocation8 + $0xe50] sm:$0xf]  ;;  %v7185_v42 = vor.u32 %v8365_v14, %v7184_v11  ;;  %4291 = vmatpush.bf16.msrb.mxu1 %v6897_v2  ;;  %v8961_v11 = vpop.f32.mrf.mxu0  ;;  %v6613_v14 = vor.u32 %v8217_v55, %v6610_v57  ;;  %v6322_v17 = vld [vmem:[#allocation8 + $0x5b0] sm:$0xf0]  ;;  %v8964_v2 = vpop.f32.mrf.mxu1 }
 0x238   :  { %v8429_v21 = vld [vmem:[#allocation8 + $0xe6c] sm:$0xf0]  ;;  %4278 = vmatmul.bf16.vlgmr.msrb.gmra.mxu0 %v8868_v23  ;;  %v8065_v41 = vld [vmem:[#allocation8 + $0x314] sm:$0xf] }
 0x239   :  { %v7441_v45 = vor.u32 %v8429_v21, %v7440_v19  ;;  %v7152_v10 = vld [vmem:[#allocation8 + $0xc10] sm:$0xf]  ;;  %4326 = vmatpush.bf16.msra.mxu0 %v5845_v29  ;;  %4304 = vmatpush.bf16.msrb.mxu2 %v7185_v42  ;;  %v5781_v19 = vor.u32 %v8009_v63, %v5778_v4  ;;  %v8209_v21 = vld [vmem:[#allocation8 + $0x794] sm:$0xf]  ;;  %v6037_v29 = vor.u32 %v8073_v7, %v6034_v9 }
 0x23a   :  { %v8357_v46 = vld [vmem:[#allocation8 + $0xc2c] sm:$0xf0]  ;;  %4292 = vmatmul.bf16.vlgmr.msrb.gmra.mxu1 %v8870_v27  ;;  %v6325_v42 = vor.u32 %v8145_v15, %v6322_v17  ;;  %v6002_v43 = vld [vmem:[#allocation8 + $0x330] sm:$0xf0]  ;;  %v6581_v44 = vor.u32 %v8209_v21, %v6578_v24 }
 0x23b   :  { %v7408_v47 = vld [vmem:[#allocation8 + $0xe10] sm:$0xf]  ;;  %4340 = vmatpush.bf16.msra.mxu1 %v6101_v36  ;;  %v7153_v61 = vor.u32 %v8357_v46, %v7152_v10  ;;  %4318 = vmatpush.bf16.msrb.mxu3 %v7441_v45  ;;  %v5746_v36 = vld [vmem:[#allocation8 + $0x130] sm:$0xf0]  ;;  %v6005_v49 = vor.u32 %v8065_v41, %v6002_v43 }
 0x23c   :  { %v8421_v28 = vld [vmem:[#allocation8 + $0xe2c] sm:$0xf0]  ;;  %v8137_v45 = vld [vmem:[#allocation8 + $0x554] sm:$0xf]  ;;  %v5749_v46 = vor.u32 %v8001_v33, %v5746_v36 }
 0x23d   :  { %v7409_v5 = vor.u32 %v8421_v28, %v7408_v47  ;;  %4327 = vmatpush.bf16.msra.mxu0 %v5813_v52  ;;  %4305 = vmatpush.bf16.msrb.mxu2 %v7153_v61  ;;  %v6290_v10 = vld [vmem:[#allocation8 + $0x570] sm:$0xf0] }
 0x23e   :  { %v8201_v47 = vld [vmem:[#allocation8 + $0x754] sm:$0xf]  ;;  %v6293_v55 = vor.u32 %v8137_v45, %v6290_v10 }
 0x23f   :  { %4341 = vmatpush.bf16.msra.mxu1 %v6069_v59  ;;  %4319 = vmatpush.bf16.msrb.mxu3 %v7409_v5  ;;  %v6546_v28 = vld [vmem:[#allocation8 + $0x770] sm:$0xf0]  ;;  %v4055_v61 = vpop.f32.mrf.mxu0  ;;  %v4069_v15 = vpop.f32.mrf.mxu1 }
 0x240   :  { %4306 = vmatmul.bf16.vlgmr.msrb.gmra.mxu2 %v8874_v62  ;;  %v7993_v50 = vld [vmem:[#allocation8 + $0xd4] sm:$0xf]  ;;  %v6549_v63 = vor.u32 %v8201_v47, %v6546_v28 }
 0x241   :  { %4354 = vmatpush.bf16.msra.mxu2 %v6357_v6  ;;  %4328 = vmatpush.bf16.msra.mxu0 %v5781_v19  ;;  %v5714_v52 = vld [vmem:[#allocation8 + $0xf0] sm:$0xf0]  ;;  %v4056_v6 = vadd.f32 %v4055_v61, %v8958_v35 }
 0x242   :  { %4320 = vmatmul.bf16.vlgmr.msrb.gmra.mxu3 %v8876_v0  ;;  %v8057_v57 = vld [vmem:[#allocation8 + $0x2d4] sm:$0xf]  ;;  %v5717_v7 = vor.u32 %v7993_v50, %v5714_v52 }
 0x243   :  { %4368 = vmatpush.bf16.msra.mxu3 %v6613_v14  ;;  %4342 = vmatpush.bf16.msra.mxu1 %v6037_v29  ;;  %v5970_v59 = vld [vmem:[#allocation8 + $0x2f0] sm:$0xf0]  ;;  %v4070_v24 = vadd.f32 %v4069_v15, %v4056_v6 }
 0x244   :  { %v8129_v4 = vld [vmem:[#allocation8 + $0x514] sm:$0xf]  ;;  %v5973_v17 = vor.u32 %v8057_v57, %v5970_v59 }
 0x245   :  { %4355 = vmatpush.bf16.msra.mxu2 %v6325_v42  ;;  %v6258_v5 = vld [vmem:[#allocation8 + $0x530] sm:$0xf0]  ;;  %4329 = vmatpush.bf16.msra.mxu0 %v5749_v46  ;;  %v8969_v42 = vpop.f32.mrf.mxu2  ;;  %v8971_v46 = vpop.f32.mrf.mxu3 }
 0x246   :  { %v8193_v9 = vld [vmem:[#allocation8 + $0x714] sm:$0xf]  ;;  %v6261_v29 = vor.u32 %v8129_v4, %v6258_v5 }
 0x247   :  { %4369 = vmatpush.bf16.msra.mxu3 %v6581_v44  ;;  %v6514_v14 = vld [vmem:[#allocation8 + $0x730] sm:$0xf0]  ;;  %4343 = vmatpush.bf16.msra.mxu1 %v6005_v49 }
 0x248   :  { %v7985_v19 = vld [vmem:[#allocation8 + $0x94] sm:$0xf]  ;;  %v6517_v41 = vor.u32 %v8193_v9, %v6514_v14 }
 0x249   :  { %v5682_v21 = vld [vmem:[#allocation8 + $0xb0] sm:$0xf0]  ;;  %4356 = vmatpush.bf16.msra.mxu2 %v6293_v55  ;;  %4330 = vmatpush.bf16.msra.mxu0 %v5717_v7 }
 0x24a   :  { %v8049_v33 = vld [vmem:[#allocation8 + $0x294] sm:$0xf]  ;;  %v5685_v44 = vor.u32 %v7985_v19, %v5682_v21 }
 0x24b   :  { %v5938_v36 = vld [vmem:[#allocation8 + $0x2b0] sm:$0xf0]  ;;  %4370 = vmatpush.bf16.msra.mxu3 %v6549_v63  ;;  %4344 = vmatpush.bf16.msra.mxu1 %v5973_v17 }
 0x24c   :  { %v8121_v43 = vld [vmem:[#allocation8 + $0x4d4] sm:$0xf]  ;;  %v5941_v47 = vor.u32 %v8049_v33, %v5938_v36 }
 0x24d   :  { %v6226_v35 = vld [vmem:[#allocation8 + $0x4f0] sm:$0xf0]  ;;  %4357 = vmatpush.bf16.msra.mxu2 %v6261_v29  ;;  %4331 = vmatpush.bf16.msra.mxu0 %v5685_v44  ;;  %v4083_v33 = vpop.f32.mrf.mxu2 }
 0x24e   :  { %v8185_v45 = vld [vmem:[#allocation8 + $0x6d4] sm:$0xf]  ;;  %v6229_v50 = vor.u32 %v8121_v43, %v6226_v35  ;;  %v4084_v44 = vadd.f32 %v4083_v33, %v4070_v24 }
 0x24f   :  { %v6482_v10 = vld [vmem:[#allocation8 + $0x6f0] sm:$0xf0]  ;;  %4371 = vmatpush.bf16.msra.mxu3 %v6517_v41  ;;  %4345 = vmatpush.bf16.msra.mxu1 %v5941_v47 }
 0x250   :  { %v7977_v28 = vld [vmem:[#allocation8 + $0x54] sm:$0xf]  ;;  %v6485_v57 = vor.u32 %v8185_v45, %v6482_v10 }
 0x251   :  { %v5650_v49 = vld [vmem:[#allocation8 + $0x70] sm:$0xf0]  ;;  %4358 = vmatpush.bf16.msra.mxu2 %v6229_v50 }
 0x252   :  { %v8041_v52 = vld [vmem:[#allocation8 + $0x254] sm:$0xf]  ;;  %v5653_v63 = vor.u32 %v7977_v28, %v5650_v49  ;;  %v4097_v28 = vpop.f32.mrf.mxu3 }
 0x253   :  { %v5906_v55 = vld [vmem:[#allocation8 + $0x270] sm:$0xf0]  ;;  %4372 = vmatpush.bf16.msra.mxu3 %v6485_v57 }
 0x254   :  { %v8113_v59 = vld [vmem:[#allocation8 + $0x494] sm:$0xf]  ;;  %v5909_v7 = vor.u32 %v8041_v52, %v5906_v55  ;;  %4332 = vmatpush.bf16.msra.mxu0 %v5653_v63  ;;  %v8973_v55 = vadd.f32 %v4097_v28, %v4084_v44 }
 0x255   :  { %v6194_v61 = vld [vmem:[#allocation8 + $0x4b0] sm:$0xf0] }
 0x256   :  { %v8177_v4 = vld [vmem:[#allocation8 + $0x694] sm:$0xf]  ;;  %v6197_v17 = vor.u32 %v8113_v59, %v6194_v61  ;;  %4346 = vmatpush.bf16.msra.mxu1 %v5909_v7  ;;  %9176 = vst [vmem:[#allocation24_spill] sm:$0xff] %v8973_v55  ;;  %v6362_v55 = vld [vmem:[#allocation8 + $0x5f8] sm:$0xf0] }
 0x257   :  { %v6450_v5 = vld [vmem:[#allocation8 + $0x6b0] sm:$0xf0] }
 0x258   :  { %v7969_v6 = vld [vmem:[#allocation8 + $0x14] sm:$0xf]  ;;  %v6453_v36 = vor.u32 %v8177_v4, %v6450_v5  ;;  %4359 = vmatpush.bf16.msra.mxu2 %v6197_v17 }
 0x259   :  { %v5618_v9 = vld [vmem:[#allocation8 + $0x30] sm:$0xf0] }
 0x25a   :  { %v8033_v14 = vld [vmem:[#allocation8 + $0x214] sm:$0xf]  ;;  %v5621_v45 = vor.u32 %v7969_v6, %v5618_v9  ;;  %4373 = vmatpush.bf16.msra.mxu3 %v6453_v36  ;;  %v8995_v38 = vpop.f32.mrf.mxu3 }
 0x25b   :  { %v5874_v15 = vld [vmem:[#allocation8 + $0x230] sm:$0xf0]  ;;  %9179 = vst [vmem:[#allocation27_spill] sm:$0xff] %v8995_v38 }
 0x25c   :  { %v8281_v19 = vld [vmem:[#allocation8 + $0x9d4] sm:$0xf]  ;;  %v5877_v49 = vor.u32 %v8033_v14, %v5874_v15  ;;  %4333 = vmatpush.bf16.msra.mxu0 %v5621_v45 }
 0x25d   :  { %v6866_v21 = vld [vmem:[#allocation8 + $0x9f0] sm:$0xf0] }
 0x25e   :  { %v8345_v29 = vld [vmem:[#allocation8 + $0xbd4] sm:$0xf]  ;;  %v6869_v52 = vor.u32 %v8281_v19, %v6866_v21  ;;  %4347 = vmatpush.bf16.msra.mxu1 %v5877_v49 }
 0x25f   :  { %v7122_v41 = vld [vmem:[#allocation8 + $0xbf0] sm:$0xf0]  ;;  %4334 = vmatmul.bf16.vlgmr.msra.gmra.mxu0 %v8852_v26 }
 0x260   :  { %v8105_v43 = vld [vmem:[#allocation8 + $0x454] sm:$0xf]  ;;  %v7125_v59 = vor.u32 %v8345_v29, %v7122_v41  ;;  %4382 = vmatpush.bf16.msrb.mxu0 %v6869_v52 }
 0x261   :  { %v6162_v35 = vld [vmem:[#allocation8 + $0x470] sm:$0xf0]  ;;  %4348 = vmatmul.bf16.vlgmr.msra.gmra.mxu1 %v8854_v31 }
 0x262   :  { %v8169_v10 = vld [vmem:[#allocation8 + $0x654] sm:$0xf]  ;;  %v6165_v57 = vor.u32 %v8105_v43, %v6162_v35  ;;  %4396 = vmatpush.bf16.msrb.mxu1 %v7125_v59 }
 0x263   :  { %v6418_v47 = vld [vmem:[#allocation8 + $0x670] sm:$0xf0] }
 0x264   :  { %v8273_v50 = vld [vmem:[#allocation8 + $0x994] sm:$0xf]  ;;  %v6421_v39 = vor.u32 %v8169_v10, %v6418_v47  ;;  %4360 = vmatpush.bf16.msra.mxu2 %v6165_v57 }
 0x265   :  { %v6834_v61 = vld [vmem:[#allocation8 + $0x9b0] sm:$0xf0] }
 0x266   :  { %v8337_v4 = vld [vmem:[#allocation8 + $0xb94] sm:$0xf]  ;;  %v6837_v14 = vor.u32 %v8273_v50, %v6834_v61  ;;  %4374 = vmatpush.bf16.msra.mxu3 %v6421_v39 }
 0x267   :  { %v7090_v5 = vld [vmem:[#allocation8 + $0xbb0] sm:$0xf0] }
 0x268   :  { %v8097_v24 = vld [vmem:[#allocation8 + $0x414] sm:$0xf]  ;;  %v7093_v17 = vor.u32 %v8337_v4, %v7090_v5  ;;  %4383 = vmatpush.bf16.msrb.mxu0 %v6837_v14 }
 0x269   :  { %v6130_v63 = vld [vmem:[#allocation8 + $0x430] sm:$0xf0] }
 0x26a   :  { %v8161_v6 = vld [vmem:[#allocation8 + $0x614] sm:$0xf]  ;;  %v6133_v21 = vor.u32 %v8097_v24, %v6130_v63  ;;  %4397 = vmatpush.bf16.msrb.mxu1 %v7093_v17 }
 0x26b   :  { %v6386_v9 = vld [vmem:[#allocation8 + $0x630] sm:$0xf0] }
 0x26c   :  { %v8409_v33 = vld [vmem:[#allocation8 + $0xdd4] sm:$0xf]  ;;  %v6389_v36 = vor.u32 %v8161_v6, %v6386_v9  ;;  %4361 = vmatpush.bf16.msra.mxu2 %v6133_v21 }
 0x26d   :  { %v7378_v7 = vld [vmem:[#allocation8 + $0xdf0] sm:$0xf0] }
 0x26e   :  { %v8473_v15 = vld [vmem:[#allocation8 + $0xfd4] sm:$0xf]  ;;  %v7381_v43 = vor.u32 %v8409_v33, %v7378_v7  ;;  %4375 = vmatpush.bf16.msra.mxu3 %v6389_v36 }
 0x26f   :  { %v7634_v19 = vld [vmem:[#allocation8 + $0xff0] sm:$0xf0]  ;;  %4362 = vmatmul.bf16.vlgmr.msra.gmra.mxu2 %v8858_v54 }
 0x270   :  { %v8265_v29 = vld [vmem:[#allocation8 + $0x954] sm:$0xf]  ;;  %v7637_v45 = vor.u32 %v8473_v15, %v7634_v19  ;;  %4410 = vmatpush.bf16.msrb.mxu2 %v7381_v43 }
 0x271   :  { %v6802_v41 = vld [vmem:[#allocation8 + $0x970] sm:$0xf0]  ;;  %4376 = vmatmul.bf16.vlgmr.msra.gmra.mxu3 %v8860_v60 }
 0x272   :  { %v8329_v35 = vld [vmem:[#allocation8 + $0xb54] sm:$0xf]  ;;  %v6805_v28 = vor.u32 %v8265_v29, %v6802_v41  ;;  %4424 = vmatpush.bf16.msrb.mxu3 %v7637_v45 }
 0x273   :  { %v7058_v44 = vld [vmem:[#allocation8 + $0xb70] sm:$0xf0] }
 0x274   :  { %v8401_v10 = vld [vmem:[#allocation8 + $0xd94] sm:$0xf]  ;;  %v7061_v50 = vor.u32 %v8329_v35, %v7058_v44  ;;  %4384 = vmatpush.bf16.msrb.mxu0 %v6805_v28 }
 0x275   :  { %v7346_v47 = vld [vmem:[#allocation8 + $0xdb0] sm:$0xf0] }
 0x276   :  { %v8465_v49 = vld [vmem:[#allocation8 + $0xf94] sm:$0xf]  ;;  %v7349_v57 = vor.u32 %v8401_v10, %v7346_v47  ;;  %4398 = vmatpush.bf16.msrb.mxu1 %v7061_v50 }
 0x277   :  { %v7602_v52 = vld [vmem:[#allocation8 + $0xfb0] sm:$0xf0] }
 0x278   :  { %v8257_v59 = vld [vmem:[#allocation8 + $0x914] sm:$0xf]  ;;  %v7605_v5 = vor.u32 %v8465_v49, %v7602_v52  ;;  %4411 = vmatpush.bf16.msrb.mxu2 %v7349_v57 }
 0x279   :  { %v6770_v39 = vld [vmem:[#allocation8 + $0x930] sm:$0xf0] }
 0x27a   :  { %v8321_v61 = vld [vmem:[#allocation8 + $0xb14] sm:$0xf]  ;;  %v6773_v6 = vor.u32 %v8257_v59, %v6770_v39  ;;  %4425 = vmatpush.bf16.msrb.mxu3 %v7605_v5 }
 0x27b   :  { %v7026_v4 = vld [vmem:[#allocation8 + $0xb30] sm:$0xf0] }
 0x27c   :  { %v8393_v24 = vld [vmem:[#allocation8 + $0xd54] sm:$0xf]  ;;  %v7029_v7 = vor.u32 %v8321_v61, %v7026_v4  ;;  %4385 = vmatpush.bf16.msrb.mxu0 %v6773_v6 }
 0x27d   :  { %v7314_v63 = vld [vmem:[#allocation8 + $0xd70] sm:$0xf0] }
 0x27e   :  { %v8457_v9 = vld [vmem:[#allocation8 + $0xf54] sm:$0xf]  ;;  %v7317_v19 = vor.u32 %v8393_v24, %v7314_v63  ;;  %4399 = vmatpush.bf16.msrb.mxu1 %v7029_v7 }
 0x27f   :  { %v7570_v33 = vld [vmem:[#allocation8 + $0xf70] sm:$0xf0] }
 0x280   :  { %v8249_v14 = vld [vmem:[#allocation8 + $0x8d4] sm:$0xf]  ;;  %v7573_v29 = vor.u32 %v8457_v9, %v7570_v33  ;;  %4412 = vmatpush.bf16.msrb.mxu2 %v7317_v19 }
 0x281   :  { %v6738_v15 = vld [vmem:[#allocation8 + $0x8f0] sm:$0xf0] }
 0x282   :  { %v8313_v17 = vld [vmem:[#allocation8 + $0xad4] sm:$0xf]  ;;  %v6741_v43 = vor.u32 %v8249_v14, %v6738_v15  ;;  %4426 = vmatpush.bf16.msrb.mxu3 %v7573_v29 }
 0x283   :  { %v6994_v21 = vld [vmem:[#allocation8 + $0xaf0] sm:$0xf0] }
 0x284   :  { %v8385_v41 = vld [vmem:[#allocation8 + $0xd14] sm:$0xf]  ;;  %v6997_v45 = vor.u32 %v8313_v17, %v6994_v21  ;;  %4386 = vmatpush.bf16.msrb.mxu0 %v6741_v43 }
 0x285   :  { %v7282_v36 = vld [vmem:[#allocation8 + $0xd30] sm:$0xf0] }
 0x286   :  { %v8449_v35 = vld [vmem:[#allocation8 + $0xf14] sm:$0xf]  ;;  %v7285_v28 = vor.u32 %v8385_v41, %v7282_v36  ;;  %4400 = vmatpush.bf16.msrb.mxu1 %v6997_v45  ;;  %v5848_v45 = vld [vmem:[#allocation8 + $0x1d8] sm:$0xf] }
 0x287   :  { %v7538_v44 = vld [vmem:[#allocation8 + $0xf30] sm:$0xf0] }
 0x288   :  { %v8241_v10 = vld [vmem:[#allocation8 + $0x894] sm:$0xf]  ;;  %v7541_v50 = vor.u32 %v8449_v35, %v7538_v44  ;;  %4413 = vmatpush.bf16.msrb.mxu2 %v7285_v28 }
 0x289   :  { %v6706_v47 = vld [vmem:[#allocation8 + $0x8b0] sm:$0xf0] }
 0x28a   :  { %v8305_v49 = vld [vmem:[#allocation8 + $0xa94] sm:$0xf]  ;;  %v6709_v57 = vor.u32 %v8241_v10, %v6706_v47  ;;  %4427 = vmatpush.bf16.msrb.mxu3 %v7541_v50  ;;  %v8030_v10 = vld [vmem:[#allocation8 + $0x1f4] sm:$0xf0] }
 0x28b   :  { %v6962_v52 = vld [vmem:[#allocation8 + $0xab0] sm:$0xf0]  ;;  %v6104_v47 = vld [vmem:[#allocation8 + $0x3d8] sm:$0xf] }
 0x28c   :  { %v8377_v59 = vld [vmem:[#allocation8 + $0xcd4] sm:$0xf]  ;;  %v6965_v5 = vor.u32 %v8305_v49, %v6962_v52  ;;  %4387 = vmatpush.bf16.msrb.mxu0 %v6709_v57  ;;  %v8094_v49 = vld [vmem:[#allocation8 + $0x3f4] sm:$0xf0] }
 0x28d   :  { %v7250_v39 = vld [vmem:[#allocation8 + $0xcf0] sm:$0xf0] }
 0x28e   :  { %v8441_v61 = vld [vmem:[#allocation8 + $0xed4] sm:$0xf]  ;;  %v7253_v6 = vor.u32 %v8377_v59, %v7250_v39  ;;  %4401 = vmatpush.bf16.msrb.mxu1 %v6965_v5  ;;  %v5816_v5 = vld [vmem:[#allocation8 + $0x198] sm:$0xf] }
 0x28f   :  { %v7506_v4 = vld [vmem:[#allocation8 + $0xef0] sm:$0xf0] }
 0x290   :  { %v8233_v24 = vld [vmem:[#allocation8 + $0x854] sm:$0xf]  ;;  %v7509_v7 = vor.u32 %v8441_v61, %v7506_v4  ;;  %4414 = vmatpush.bf16.msrb.mxu2 %v7253_v6  ;;  %v5849_v4 = vor.u32 %v8030_v10, %v5848_v45  ;;  %v8022_v6 = vld [vmem:[#allocation8 + $0x1b4] sm:$0xf0] }
 0x291   :  { %v6674_v63 = vld [vmem:[#allocation8 + $0x870] sm:$0xf0]  ;;  %v5784_v45 = vld [vmem:[#allocation8 + $0x158] sm:$0xf] }
 0x292   :  { %v8297_v9 = vld [vmem:[#allocation8 + $0xa54] sm:$0xf]  ;;  %v6677_v19 = vor.u32 %v8233_v24, %v6674_v63  ;;  %4428 = vmatpush.bf16.msrb.mxu3 %v7509_v7  ;;  %v6105_v24 = vor.u32 %v8094_v49, %v6104_v47  ;;  %v8014_v10 = vld [vmem:[#allocation8 + $0x174] sm:$0xf0] }
 0x293   :  { %v6930_v33 = vld [vmem:[#allocation8 + $0xa70] sm:$0xf0]  ;;  %v6040_v49 = vld [vmem:[#allocation8 + $0x358] sm:$0xf] }
 0x294   :  { %v8369_v14 = vld [vmem:[#allocation8 + $0xc94] sm:$0xf]  ;;  %v6933_v41 = vor.u32 %v8297_v9, %v6930_v33  ;;  %4388 = vmatpush.bf16.msrb.mxu0 %v6677_v19  ;;  %v6072_v9 = vld [vmem:[#allocation8 + $0x398] sm:$0xf] }
 0x295   :  { %v7218_v15 = vld [vmem:[#allocation8 + $0xcb0] sm:$0xf0]  ;;  %v8086_v33 = vld [vmem:[#allocation8 + $0x3b4] sm:$0xf0] }
 0x296   :  { %v8433_v17 = vld [vmem:[#allocation8 + $0xe94] sm:$0xf]  ;;  %v7221_v44 = vor.u32 %v8369_v14, %v7218_v15  ;;  %4402 = vmatpush.bf16.msrb.mxu1 %v6933_v41  ;;  %v5817_v41 = vor.u32 %v8022_v6, %v5816_v5 }
 0x297   :  { %v7474_v21 = vld [vmem:[#allocation8 + $0xeb0] sm:$0xf0] }
 0x298   :  { %v8225_v29 = vld [vmem:[#allocation8 + $0x814] sm:$0xf]  ;;  %v7477_v28 = vor.u32 %v8433_v17, %v7474_v21  ;;  %4415 = vmatpush.bf16.msrb.mxu2 %v7221_v44  ;;  %v6360_v21 = vld [vmem:[#allocation8 + $0x5d8] sm:$0xf] }
 0x299   :  { %v6642_v36 = vld [vmem:[#allocation8 + $0x830] sm:$0xf0] }
 0x29a   :  { %v8289_v43 = vld [vmem:[#allocation8 + $0xa14] sm:$0xf]  ;;  %v6645_v59 = vor.u32 %v8225_v29, %v6642_v36  ;;  %4429 = vmatpush.bf16.msrb.mxu3 %v7477_v28  ;;  %v8158_v29 = vld [vmem:[#allocation8 + $0x5f4] sm:$0xf0] }
 0x29b   :  { %v6898_v35 = vld [vmem:[#allocation8 + $0xa30] sm:$0xf0]  ;;  %v6616_v36 = vld [vmem:[#allocation8 + $0x7d8] sm:$0xf]  ;;  %v6361_v28 = vor.u32 %v8158_v29, %v6360_v21 }
 0x29c   :  { %v8361_v52 = vld [vmem:[#allocation8 + $0xc54] sm:$0xf]  ;;  %v6901_v61 = vor.u32 %v8289_v43, %v6898_v35  ;;  %4389 = vmatpush.bf16.msrb.mxu0 %v6645_v59  ;;  %v8222_v43 = vld [vmem:[#allocation8 + $0x7f4] sm:$0xf0]  ;;  %v6073_v35 = vor.u32 %v8086_v33, %v6072_v9 }
 0x29d   :  { %v7186_v50 = vld [vmem:[#allocation8 + $0xc70] sm:$0xf0]  ;;  %v6328_v59 = vld [vmem:[#allocation8 + $0x598] sm:$0xf] }
 0x29e   :  { %v8425_v39 = vld [vmem:[#allocation8 + $0xe54] sm:$0xf]  ;;  %v7189_v63 = vor.u32 %v8361_v52, %v7186_v50  ;;  %4403 = vmatpush.bf16.msrb.mxu1 %v6901_v61  ;;  %v8078_v52 = vld [vmem:[#allocation8 + $0x374] sm:$0xf0]  ;;  %v6617_v50 = vor.u32 %v8222_v43, %v6616_v36 }
 0x29f   :  { %v7442_v57 = vld [vmem:[#allocation8 + $0xe70] sm:$0xf0]  ;;  %4390 = vmatmul.bf16.vlgmr.msrb.gmra.mxu0 %v8868_v23  ;;  %v6584_v61 = vld [vmem:[#allocation8 + $0x798] sm:$0xf]  ;;  %v6041_v5 = vor.u32 %v8078_v52, %v6040_v49 }
 0x2a0   :  { %v7445_v7 = vor.u32 %v8425_v39, %v7442_v57  ;;  %v8353_v14 = vld [vmem:[#allocation8 + $0xc14] sm:$0xf]  ;;  %4438 = vmatpush.bf16.msra.mxu0 %v5849_v4  ;;  %4416 = vmatpush.bf16.msrb.mxu2 %v7189_v63  ;;  %v8150_v39 = vld [vmem:[#allocation8 + $0x5b4] sm:$0xf0]  ;;  %v5785_v57 = vor.u32 %v8014_v10, %v5784_v45 }
 0x2a1   :  { %v7154_v15 = vld [vmem:[#allocation8 + $0xc30] sm:$0xf0]  ;;  %4404 = vmatmul.bf16.vlgmr.msrb.gmra.mxu1 %v8870_v27  ;;  %v8214_v4 = vld [vmem:[#allocation8 + $0x7b4] sm:$0xf0]  ;;  %v6329_v6 = vor.u32 %v8150_v39, %v6328_v59 }
 0x2a2   :  { %v8417_v17 = vld [vmem:[#allocation8 + $0xe14] sm:$0xf]  ;;  %4452 = vmatpush.bf16.msra.mxu1 %v6105_v24  ;;  %v7157_v44 = vor.u32 %v8353_v14, %v7154_v15  ;;  %4430 = vmatpush.bf16.msrb.mxu3 %v7445_v7  ;;  %v5752_v24 = vld [vmem:[#allocation8 + $0x118] sm:$0xf]  ;;  %v6585_v7 = vor.u32 %v8214_v4, %v6584_v61 }
 0x2a3   :  { %v7410_v19 = vld [vmem:[#allocation8 + $0xe30] sm:$0xf0]  ;;  %v8006_v63 = vld [vmem:[#allocation8 + $0x134] sm:$0xf0] }
 0x2a4   :  { %v7413_v47 = vor.u32 %v8417_v17, %v7410_v19  ;;  %4439 = vmatpush.bf16.msra.mxu0 %v5817_v41  ;;  %4417 = vmatpush.bf16.msrb.mxu2 %v7157_v44  ;;  %v6008_v9 = vld [vmem:[#allocation8 + $0x318] sm:$0xf]  ;;  %v5753_v17 = vor.u32 %v8006_v63, %v5752_v24 }
 0x2a5   :  { %v8070_v33 = vld [vmem:[#allocation8 + $0x334] sm:$0xf0] }
 0x2a6   :  { %4453 = vmatpush.bf16.msra.mxu1 %v6073_v35  ;;  %4431 = vmatpush.bf16.msrb.mxu3 %v7413_v47  ;;  %v6296_v14 = vld [vmem:[#allocation8 + $0x558] sm:$0xf]  ;;  %v6009_v29 = vor.u32 %v8070_v33, %v6008_v9 }
 0x2a7   :  { %v8142_v15 = vld [vmem:[#allocation8 + $0x574] sm:$0xf0]  ;;  %4418 = vmatmul.bf16.vlgmr.msrb.gmra.mxu2 %v8874_v62 }
 0x2a8   :  { %4466 = vmatpush.bf16.msra.mxu2 %v6361_v28  ;;  %4440 = vmatpush.bf16.msra.mxu0 %v5785_v57  ;;  %v6552_v19 = vld [vmem:[#allocation8 + $0x758] sm:$0xf]  ;;  %v6297_v43 = vor.u32 %v8142_v15, %v6296_v14 }
 0x2a9   :  { %v8206_v21 = vld [vmem:[#allocation8 + $0x774] sm:$0xf0]  ;;  %4432 = vmatmul.bf16.vlgmr.msrb.gmra.mxu3 %v8876_v0 }
 0x2aa   :  { %4480 = vmatpush.bf16.msra.mxu3 %v6617_v50  ;;  %4454 = vmatpush.bf16.msra.mxu1 %v6041_v5  ;;  %v5720_v41 = vld [vmem:[#allocation8 + $0xd8] sm:$0xf]  ;;  %v6553_v45 = vor.u32 %v8206_v21, %v6552_v19 }
 0x2ab   :  { %v7998_v36 = vld [vmem:[#allocation8 + $0xf4] sm:$0xf0] }
 0x2ac   :  { %4467 = vmatpush.bf16.msra.mxu2 %v6329_v6  ;;  %v5976_v35 = vld [vmem:[#allocation8 + $0x2d8] sm:$0xf]  ;;  %4441 = vmatpush.bf16.msra.mxu0 %v5753_v17  ;;  %v5721_v28 = vor.u32 %v7998_v36, %v5720_v41 }
 0x2ad   :  { %v8062_v44 = vld [vmem:[#allocation8 + $0x2f4] sm:$0xf0] }
 0x2ae   :  { %4481 = vmatpush.bf16.msra.mxu3 %v6585_v7  ;;  %v6264_v10 = vld [vmem:[#allocation8 + $0x518] sm:$0xf]  ;;  %4455 = vmatpush.bf16.msra.mxu1 %v6009_v29  ;;  %v5977_v50 = vor.u32 %v8062_v44, %v5976_v35 }
 0x2af   :  { %v8134_v47 = vld [vmem:[#allocation8 + $0x534] sm:$0xf0] }
 0x2b0   :  { %v6520_v49 = vld [vmem:[#allocation8 + $0x718] sm:$0xf]  ;;  %4468 = vmatpush.bf16.msra.mxu2 %v6297_v43  ;;  %v6265_v57 = vor.u32 %v8134_v47, %v6264_v10  ;;  %4442 = vmatpush.bf16.msra.mxu0 %v5721_v28 }
 0x2b1   :  { %v8198_v52 = vld [vmem:[#allocation8 + $0x734] sm:$0xf0] }
 0x2b2   :  { %v5688_v59 = vld [vmem:[#allocation8 + $0x98] sm:$0xf]  ;;  %4482 = vmatpush.bf16.msra.mxu3 %v6553_v45  ;;  %v6521_v5 = vor.u32 %v8198_v52, %v6520_v49  ;;  %4456 = vmatpush.bf16.msra.mxu1 %v5977_v50 }
 0x2b3   :  { %v7990_v39 = vld [vmem:[#allocation8 + $0xb4] sm:$0xf0] }
 0x2b4   :  { %v5944_v61 = vld [vmem:[#allocation8 + $0x298] sm:$0xf]  ;;  %v5689_v6 = vor.u32 %v7990_v39, %v5688_v59  ;;  %4469 = vmatpush.bf16.msra.mxu2 %v6265_v57 }
 0x2b5   :  { %v8054_v4 = vld [vmem:[#allocation8 + $0x2b4] sm:$0xf0] }
 0x2b6   :  { %v6232_v24 = vld [vmem:[#allocation8 + $0x4d8] sm:$0xf]  ;;  %v5945_v7 = vor.u32 %v8054_v4, %v5944_v61  ;;  %4483 = vmatpush.bf16.msra.mxu3 %v6521_v5  ;;  %4443 = vmatpush.bf16.msra.mxu0 %v5689_v6 }
 0x2b7   :  { %v8126_v63 = vld [vmem:[#allocation8 + $0x4f4] sm:$0xf0] }
 0x2b8   :  { %v6488_v9 = vld [vmem:[#allocation8 + $0x6d8] sm:$0xf]  ;;  %v6233_v17 = vor.u32 %v8126_v63, %v6232_v24  ;;  %4457 = vmatpush.bf16.msra.mxu1 %v5945_v7 }
 0x2b9   :  { %v8190_v33 = vld [vmem:[#allocation8 + $0x6f4] sm:$0xf0] }
 0x2ba   :  { %v5656_v14 = vld [vmem:[#allocation8 + $0x58] sm:$0xf]  ;;  %v6489_v29 = vor.u32 %v8190_v33, %v6488_v9  ;;  %4470 = vmatpush.bf16.msra.mxu2 %v6233_v17 }
 0x2bb   :  { %v7982_v15 = vld [vmem:[#allocation8 + $0x74] sm:$0xf0] }
 0x2bc   :  { %v5912_v19 = vld [vmem:[#allocation8 + $0x258] sm:$0xf]  ;;  %v5657_v43 = vor.u32 %v7982_v15, %v5656_v14  ;;  %4484 = vmatpush.bf16.msra.mxu3 %v6489_v29 }
 0x2bd   :  { %v8046_v21 = vld [vmem:[#allocation8 + $0x274] sm:$0xf0] }
 0x2be   :  { %v6200_v41 = vld [vmem:[#allocation8 + $0x498] sm:$0xf]  ;;  %v5913_v10 = vor.u32 %v8046_v21, %v5912_v19  ;;  %4444 = vmatpush.bf16.msra.mxu0 %v5657_v43 }
 0x2bf   :  { %v8118_v36 = vld [vmem:[#allocation8 + $0x4b4] sm:$0xf0] }
 0x2c0   :  { %v6456_v35 = vld [vmem:[#allocation8 + $0x698] sm:$0xf]  ;;  %v6201_v52 = vor.u32 %v8118_v36, %v6200_v41  ;;  %4458 = vmatpush.bf16.msra.mxu1 %v5913_v10 }
 0x2c1   :  { %v8182_v44 = vld [vmem:[#allocation8 + $0x6b4] sm:$0xf0] }
 0x2c2   :  { %v5624_v45 = vld [vmem:[#allocation8 + $0x18] sm:$0xf]  ;;  %v6457_v57 = vor.u32 %v8182_v44, %v6456_v35  ;;  %4471 = vmatpush.bf16.msra.mxu2 %v6201_v52 }
 0x2c3   :  { %v7974_v47 = vld [vmem:[#allocation8 + $0x34] sm:$0xf0] }
 0x2c4   :  { %v5880_v28 = vld [vmem:[#allocation8 + $0x218] sm:$0xf]  ;;  %v5625_v24 = vor.u32 %v7974_v47, %v5624_v45  ;;  %4485 = vmatpush.bf16.msra.mxu3 %v6457_v57 }
 0x2c5   :  { %v8038_v49 = vld [vmem:[#allocation8 + $0x234] sm:$0xf0] }
 0x2c6   :  { %v6872_v50 = vld [vmem:[#allocation8 + $0x9d8] sm:$0xf]  ;;  %v5881_v9 = vor.u32 %v8038_v49, %v5880_v28  ;;  %4445 = vmatpush.bf16.msra.mxu0 %v5625_v24 }
 0x2c7   :  { %v8286_v59 = vld [vmem:[#allocation8 + $0x9f4] sm:$0xf0] }
 0x2c8   :  { %v7128_v39 = vld [vmem:[#allocation8 + $0xbd8] sm:$0xf]  ;;  %v6873_v33 = vor.u32 %v8286_v59, %v6872_v50  ;;  %4459 = vmatpush.bf16.msra.mxu1 %v5881_v9 }
 0x2c9   :  { %v8350_v61 = vld [vmem:[#allocation8 + $0xbf4] sm:$0xf0]  ;;  %4446 = vmatmul.bf16.vlgmr.msra.gmra.mxu0 %v8852_v26 }
 0x2ca   :  { %v6168_v4 = vld [vmem:[#allocation8 + $0x458] sm:$0xf]  ;;  %v7129_v14 = vor.u32 %v8350_v61, %v7128_v39  ;;  %4494 = vmatpush.bf16.msrb.mxu0 %v6873_v33 }
 0x2cb   :  { %v8110_v5 = vld [vmem:[#allocation8 + $0x474] sm:$0xf0]  ;;  %4460 = vmatmul.bf16.vlgmr.msra.gmra.mxu1 %v8854_v31 }
 0x2cc   :  { %v6424_v63 = vld [vmem:[#allocation8 + $0x658] sm:$0xf]  ;;  %v6169_v15 = vor.u32 %v8110_v5, %v6168_v4  ;;  %4508 = vmatpush.bf16.msrb.mxu1 %v7129_v14 }
 0x2cd   :  { %v8174_v6 = vld [vmem:[#allocation8 + $0x674] sm:$0xf0] }
 0x2ce   :  { %v6840_v7 = vld [vmem:[#allocation8 + $0x998] sm:$0xf]  ;;  %v6425_v29 = vor.u32 %v8174_v6, %v6424_v63  ;;  %4472 = vmatpush.bf16.msra.mxu2 %v6169_v15 }
 0x2cf   :  { %v8278_v17 = vld [vmem:[#allocation8 + $0x9b4] sm:$0xf0] }
 0x2d0   :  { %v7096_v19 = vld [vmem:[#allocation8 + $0xb98] sm:$0xf]  ;;  %v6841_v10 = vor.u32 %v8278_v17, %v6840_v7  ;;  %4486 = vmatpush.bf16.msra.mxu3 %v6425_v29 }
 0x2d1   :  { %v8342_v21 = vld [vmem:[#allocation8 + $0xbb4] sm:$0xf0] }
 0x2d2   :  { %v6136_v41 = vld [vmem:[#allocation8 + $0x418] sm:$0xf]  ;;  %v7097_v49 = vor.u32 %v8342_v21, %v7096_v19  ;;  %4495 = vmatpush.bf16.msrb.mxu0 %v6841_v10 }
 0x2d3   :  { %v8102_v36 = vld [vmem:[#allocation8 + $0x434] sm:$0xf0] }
 0x2d4   :  { %v6392_v35 = vld [vmem:[#allocation8 + $0x618] sm:$0xf]  ;;  %v6137_v52 = vor.u32 %v8102_v36, %v6136_v41  ;;  %4509 = vmatpush.bf16.msrb.mxu1 %v7097_v49 }
 0x2d5   :  { %v8166_v43 = vld [vmem:[#allocation8 + $0x634] sm:$0xf0] }
 0x2d6   :  { %v7384_v44 = vld [vmem:[#allocation8 + $0xdd8] sm:$0xf]  ;;  %v6393_v39 = vor.u32 %v8166_v43, %v6392_v35  ;;  %4473 = vmatpush.bf16.msra.mxu2 %v6137_v52 }
 0x2d7   :  { %v8414_v45 = vld [vmem:[#allocation8 + $0xdf4] sm:$0xf0] }
 0x2d8   :  { %v7640_v47 = vld [vmem:[#allocation8 + $0xfd8] sm:$0xf]  ;;  %v7385_v57 = vor.u32 %v8414_v45, %v7384_v44  ;;  %4487 = vmatpush.bf16.msra.mxu3 %v6393_v39 }
 0x2d9   :  { %v8478_v28 = vld [vmem:[#allocation8 + $0xff4] sm:$0xf0]  ;;  %4474 = vmatmul.bf16.vlgmr.msra.gmra.mxu2 %v8858_v54 }
 0x2da   :  { %v6808_v50 = vld [vmem:[#allocation8 + $0x958] sm:$0xf]  ;;  %v7641_v5 = vor.u32 %v8478_v28, %v7640_v47  ;;  %4522 = vmatpush.bf16.msrb.mxu2 %v7385_v57 }
 0x2db   :  { %v8270_v59 = vld [vmem:[#allocation8 + $0x974] sm:$0xf0]  ;;  %4488 = vmatmul.bf16.vlgmr.msra.gmra.mxu3 %v8860_v60 }
 0x2dc   :  { %v7064_v61 = vld [vmem:[#allocation8 + $0xb58] sm:$0xf]  ;;  %v6809_v6 = vor.u32 %v8270_v59, %v6808_v50  ;;  %4536 = vmatpush.bf16.msrb.mxu3 %v7641_v5 }
 0x2dd   :  { %v8334_v4 = vld [vmem:[#allocation8 + $0xb74] sm:$0xf0] }
 0x2de   :  { %v7352_v24 = vld [vmem:[#allocation8 + $0xd98] sm:$0xf]  ;;  %v7065_v7 = vor.u32 %v8334_v4, %v7064_v61  ;;  %4496 = vmatpush.bf16.msrb.mxu0 %v6809_v6 }
 0x2df   :  { %v8406_v63 = vld [vmem:[#allocation8 + $0xdb4] sm:$0xf0] }
 0x2e0   :  { %v7608_v9 = vld [vmem:[#allocation8 + $0xf98] sm:$0xf]  ;;  %v7353_v17 = vor.u32 %v8406_v63, %v7352_v24  ;;  %4510 = vmatpush.bf16.msrb.mxu1 %v7065_v7 }
 0x2e1   :  { %v8470_v33 = vld [vmem:[#allocation8 + $0xfb4] sm:$0xf0] }
 0x2e2   :  { %v6776_v14 = vld [vmem:[#allocation8 + $0x918] sm:$0xf]  ;;  %v7609_v29 = vor.u32 %v8470_v33, %v7608_v9  ;;  %4523 = vmatpush.bf16.msrb.mxu2 %v7353_v17 }
 0x2e3   :  { %v8262_v15 = vld [vmem:[#allocation8 + $0x934] sm:$0xf0] }
 0x2e4   :  { %v7032_v19 = vld [vmem:[#allocation8 + $0xb18] sm:$0xf]  ;;  %v6777_v35 = vor.u32 %v8262_v15, %v6776_v14  ;;  %4537 = vmatpush.bf16.msrb.mxu3 %v7609_v29  ;;  %v8987_v29 = vpop.f32.mrf.mxu0 }
 0x2e5   :  { %v8326_v21 = vld [vmem:[#allocation8 + $0xb34] sm:$0xf0] }
 0x2e6   :  { %v7320_v41 = vld [vmem:[#allocation8 + $0xd58] sm:$0xf]  ;;  %v7033_v45 = vor.u32 %v8326_v21, %v7032_v19  ;;  %4497 = vmatpush.bf16.msrb.mxu0 %v6777_v35 }
 0x2e7   :  { %v8398_v36 = vld [vmem:[#allocation8 + $0xd74] sm:$0xf0] }
 0x2e8   :  { %v7576_v43 = vld [vmem:[#allocation8 + $0xf58] sm:$0xf]  ;;  %v7321_v28 = vor.u32 %v8398_v36, %v7320_v41  ;;  %4511 = vmatpush.bf16.msrb.mxu1 %v7033_v45 }
 0x2e9   :  { %v8462_v44 = vld [vmem:[#allocation8 + $0xf74] sm:$0xf0] }
 0x2ea   :  { %v6744_v10 = vld [vmem:[#allocation8 + $0x8d8] sm:$0xf]  ;;  %v7577_v50 = vor.u32 %v8462_v44, %v7576_v43  ;;  %4524 = vmatpush.bf16.msrb.mxu2 %v7321_v28 }
 0x2eb   :  { %v8254_v47 = vld [vmem:[#allocation8 + $0x8f4] sm:$0xf0] }
 0x2ec   :  { %v7000_v49 = vld [vmem:[#allocation8 + $0xad8] sm:$0xf]  ;;  %v6745_v57 = vor.u32 %v8254_v47, %v6744_v10  ;;  %4538 = vmatpush.bf16.msrb.mxu3 %v7577_v50 }
 0x2ed   :  { %v8318_v52 = vld [vmem:[#allocation8 + $0xaf4] sm:$0xf0] }
 0x2ee   :  { %v7288_v59 = vld [vmem:[#allocation8 + $0xd18] sm:$0xf]  ;;  %v7001_v5 = vor.u32 %v8318_v52, %v7000_v49  ;;  %4498 = vmatpush.bf16.msrb.mxu0 %v6745_v57 }
 0x2ef   :  { %v8390_v39 = vld [vmem:[#allocation8 + $0xd34] sm:$0xf0] }
 0x2f0   :  { %v7544_v61 = vld [vmem:[#allocation8 + $0xf18] sm:$0xf]  ;;  %v7289_v6 = vor.u32 %v8390_v39, %v7288_v59  ;;  %4512 = vmatpush.bf16.msrb.mxu1 %v7001_v5 }
 0x2f1   :  { %v8454_v4 = vld [vmem:[#allocation8 + $0xf34] sm:$0xf0] }
 0x2f2   :  { %v6712_v24 = vld [vmem:[#allocation8 + $0x898] sm:$0xf]  ;;  %v7545_v7 = vor.u32 %v8454_v4, %v7544_v61  ;;  %4525 = vmatpush.bf16.msrb.mxu2 %v7289_v6  ;;  %v8090_v6 = vld [vmem:[#allocation8 + $0x3dc] sm:$0xf] }
 0x2f3   :  { %v8246_v63 = vld [vmem:[#allocation8 + $0x8b4] sm:$0xf0] }
 0x2f4   :  { %v6968_v9 = vld [vmem:[#allocation8 + $0xa98] sm:$0xf]  ;;  %v6713_v17 = vor.u32 %v8246_v63, %v6712_v24  ;;  %4539 = vmatpush.bf16.msrb.mxu3 %v7545_v7  ;;  %v8026_v24 = vld [vmem:[#allocation8 + $0x1dc] sm:$0xf] }
 0x2f5   :  { %v8310_v33 = vld [vmem:[#allocation8 + $0xab4] sm:$0xf0]  ;;  %v5850_v63 = vld [vmem:[#allocation8 + $0x1f8] sm:$0xf0] }
 0x2f6   :  { %v7256_v14 = vld [vmem:[#allocation8 + $0xcd8] sm:$0xf]  ;;  %v6969_v41 = vor.u32 %v8310_v33, %v6968_v9  ;;  %4499 = vmatpush.bf16.msrb.mxu0 %v6713_v17  ;;  %v8989_v9 = vpop.f32.mrf.mxu1  ;;  %v8991_v33 = vpop.f32.mrf.mxu2 }
 0x2f7   :  { %v8382_v15 = vld [vmem:[#allocation8 + $0xcf4] sm:$0xf0]  ;;  %9177 = vst [vmem:[#allocation25_spill] sm:$0xff] %v8989_v9  ;;  %v8106_v9 = vld [vmem:[#allocation8 + $0x45c] sm:$0xf] }
 0x2f8   :  { %v7512_v19 = vld [vmem:[#allocation8 + $0xed8] sm:$0xf]  ;;  %v7257_v43 = vor.u32 %v8382_v15, %v7256_v14  ;;  %4513 = vmatpush.bf16.msrb.mxu1 %v6969_v41  ;;  %9178 = vst [vmem:[#allocation26_spill] sm:$0xff] %v8991_v33  ;;  %v6106_v14 = vld [vmem:[#allocation8 + $0x3f8] sm:$0xf0] }
 0x2f9   :  { %v8446_v21 = vld [vmem:[#allocation8 + $0xef4] sm:$0xf0]  ;;  %v5626_v33 = vld [vmem:[#allocation8 + $0x38] sm:$0xf0] }
 0x2fa   :  { %v6680_v36 = vld [vmem:[#allocation8 + $0x858] sm:$0xf]  ;;  %v7513_v10 = vor.u32 %v8446_v21, %v7512_v19  ;;  %4526 = vmatpush.bf16.msrb.mxu2 %v7257_v43  ;;  %v5853_v43 = vor.u32 %v8026_v24, %v5850_v63  ;;  %v8010_v63 = vld [vmem:[#allocation8 + $0x15c] sm:$0xf] }
 0x2fb   :  { %v8238_v35 = vld [vmem:[#allocation8 + $0x874] sm:$0xf0] }
 0x2fc   :  { %v6936_v44 = vld [vmem:[#allocation8 + $0xa58] sm:$0xf]  ;;  %v6681_v49 = vor.u32 %v8238_v35, %v6680_v36  ;;  %4540 = vmatpush.bf16.msrb.mxu3 %v7513_v10  ;;  %v8993_v36 = vpop.f32.mrf.mxu0  ;;  %v6074_v10 = vld [vmem:[#allocation8 + $0x3b8] sm:$0xf0] }
 0x2fd   :  { %v8302_v45 = vld [vmem:[#allocation8 + $0xa74] sm:$0xf0] }
 0x2fe   :  { %v7224_v47 = vld [vmem:[#allocation8 + $0xc98] sm:$0xf]  ;;  %v6937_v39 = vor.u32 %v8302_v45, %v6936_v44  ;;  %4500 = vmatpush.bf16.msrb.mxu0 %v6681_v49  ;;  %v8018_v44 = vld [vmem:[#allocation8 + $0x19c] sm:$0xf]  ;;  %v6109_v45 = vor.u32 %v8090_v6, %v6106_v14  ;;  %v8999_v14 = vpop.f32.mrf.mxu2 }
 0x2ff   :  { %v8374_v28 = vld [vmem:[#allocation8 + $0xcb4] sm:$0xf0]  ;;  %v5786_v6 = vld [vmem:[#allocation8 + $0x178] sm:$0xf0] }
 0x300   :  { %v7480_v52 = vld [vmem:[#allocation8 + $0xe98] sm:$0xf]  ;;  %v7225_v5 = vor.u32 %v8374_v28, %v7224_v47  ;;  %4514 = vmatpush.bf16.msrb.mxu1 %v6937_v39  ;;  %v5818_v28 = vld [vmem:[#allocation8 + $0x1b8] sm:$0xf0] }
 0x301   :  { %v8438_v50 = vld [vmem:[#allocation8 + $0xeb4] sm:$0xf0]  ;;  %v5821_v39 = vor.u32 %v8018_v44, %v5818_v28  ;;  %v6586_v44 = vld [vmem:[#allocation8 + $0x7b8] sm:$0xf0] }
 0x302   :  { %v6648_v59 = vld [vmem:[#allocation8 + $0x818] sm:$0xf]  ;;  %v7481_v7 = vor.u32 %v8438_v50, %v7480_v52  ;;  %4527 = vmatpush.bf16.msrb.mxu2 %v7225_v5  ;;  %v6077_v5 = vor.u32 %v8082_v12, %v6074_v10  ;;  %v5789_v12 = vor.u32 %v8010_v63, %v5786_v6  ;;  %v5754_v28 = vld [vmem:[#allocation8 + $0x138] sm:$0xf0] }
 0x303   :  { %v8230_v57 = vld [vmem:[#allocation8 + $0x834] sm:$0xf0]  ;;  %v7994_v63 = vld [vmem:[#allocation8 + $0xdc] sm:$0xf] }
 0x304   :  { %v6904_v61 = vld [vmem:[#allocation8 + $0xa18] sm:$0xf]  ;;  %v6649_v19 = vor.u32 %v8230_v57, %v6648_v59  ;;  %4541 = vmatpush.bf16.msrb.mxu3 %v7481_v7  ;;  %v8154_v57 = vld [vmem:[#allocation8 + $0x5dc] sm:$0xf]  ;;  %v8997_v7 = vpop.f32.mrf.mxu1  ;;  %v9003_v10 = vpop.f32.mrf.mxu0 }
 0x305   :  { %v8294_v4 = vld [vmem:[#allocation8 + $0xa34] sm:$0xf0]  ;;  %v5722_v6 = vld [vmem:[#allocation8 + $0xf8] sm:$0xf0] }
 0x306   :  { %v7192_v15 = vld [vmem:[#allocation8 + $0xc58] sm:$0xf]  ;;  %v6905_v35 = vor.u32 %v8294_v4, %v6904_v61  ;;  %4501 = vmatpush.bf16.msrb.mxu0 %v6649_v19  ;;  %v8218_v61 = vld [vmem:[#allocation8 + $0x7dc] sm:$0xf] }
 0x307   :  { %v8366_v17 = vld [vmem:[#allocation8 + $0xc74] sm:$0xf0]  ;;  %v6618_v4 = vld [vmem:[#allocation8 + $0x7f8] sm:$0xf0] }
 0x308   :  { %v7448_v21 = vld [vmem:[#allocation8 + $0xe58] sm:$0xf]  ;;  %v7193_v47 = vor.u32 %v8366_v17, %v7192_v15  ;;  %4515 = vmatpush.bf16.msrb.mxu1 %v6905_v35  ;;  %v6365_v17 = vor.u32 %v8154_v57, %v6362_v55  ;;  %v8074_v19 = vld [vmem:[#allocation8 + $0x35c] sm:$0xf] }
 0x309   :  { %v8430_v41 = vld [vmem:[#allocation8 + $0xe74] sm:$0xf0]  ;;  %4502 = vmatmul.bf16.vlgmr.msrb.gmra.mxu0 %v8868_v23  ;;  %v8146_v35 = vld [vmem:[#allocation8 + $0x59c] sm:$0xf] }
 0x30a   :  { %v7449_v52 = vor.u32 %v8430_v41, %v7448_v21  ;;  %v7160_v50 = vld [vmem:[#allocation8 + $0xc18] sm:$0xf]  ;;  %4550 = vmatpush.bf16.msra.mxu0 %v5853_v43  ;;  %4528 = vmatpush.bf16.msrb.mxu2 %v7193_v47  ;;  %v6042_v21 = vld [vmem:[#allocation8 + $0x378] sm:$0xf0]  ;;  %v6621_v41 = vor.u32 %v8218_v61, %v6618_v4 }
 0x30b   :  { %v7416_v49 = vld [vmem:[#allocation8 + $0xe18] sm:$0xf]  ;;  %v7161_v24 = vor.u32 %v8358_v20, %v7160_v50  ;;  %4516 = vmatmul.bf16.vlgmr.msrb.gmra.mxu1 %v8870_v27  ;;  %v6330_v43 = vld [vmem:[#allocation8 + $0x5b8] sm:$0xf0] }
 0x30c   :  { %v8422_v59 = vld [vmem:[#allocation8 + $0xe34] sm:$0xf0]  ;;  %4564 = vmatpush.bf16.msra.mxu1 %v6109_v45  ;;  %4542 = vmatpush.bf16.msrb.mxu3 %v7449_v52  ;;  %v8210_v20 = vld [vmem:[#allocation8 + $0x79c] sm:$0xf]  ;;  %v6045_v45 = vor.u32 %v8074_v19, %v6042_v21  ;;  %v6333_v55 = vor.u32 %v8146_v35, %v6330_v43  ;;  %v9009_v43 = vpop.f32.mrf.mxu1 }
 0x30d   :  { %v7417_v15 = vor.u32 %v8422_v59, %v7416_v49  ;;  %v8002_v47 = vld [vmem:[#allocation8 + $0x11c] sm:$0xf]  ;;  %v6589_v49 = vor.u32 %v8210_v20, %v6586_v44  ;;  %v5725_v20 = vor.u32 %v7994_v63, %v5722_v6 }
 0x30e   :  { %4551 = vmatpush.bf16.msra.mxu0 %v5821_v39  ;;  %4529 = vmatpush.bf16.msrb.mxu2 %v7161_v24  ;;  %v8066_v52 = vld [vmem:[#allocation8 + $0x31c] sm:$0xf]  ;;  %v9005_v39 = vpop.f32.mrf.mxu3  ;;  %v5757_v61 = vor.u32 %v8002_v47, %v5754_v28 }
 0x30f   :  { %v6010_v50 = vld [vmem:[#allocation8 + $0x338] sm:$0xf0]  ;;  %9180 = vst [vmem:[#allocation28_spill] sm:$0xff] %v9005_v39 }
 0x310   :  { %4565 = vmatpush.bf16.msra.mxu1 %v6077_v5  ;;  %4543 = vmatpush.bf16.msrb.mxu3 %v7417_v15  ;;  %v8138_v59 = vld [vmem:[#allocation8 + $0x55c] sm:$0xf]  ;;  %v6013_v24 = vor.u32 %v8066_v52, %v6010_v50 }
 0x311   :  { %v6298_v57 = vld [vmem:[#allocation8 + $0x578] sm:$0xf0]  ;;  %4530 = vmatmul.bf16.vlgmr.msrb.gmra.mxu2 %v8874_v62 }
 0x312   :  { %4578 = vmatpush.bf16.msra.mxu2 %v6365_v17  ;;  %4552 = vmatpush.bf16.msra.mxu0 %v5789_v12  ;;  %v8202_v4 = vld [vmem:[#allocation8 + $0x75c] sm:$0xf]  ;;  %v6301_v15 = vor.u32 %v8138_v59, %v6298_v57  ;;  %v9011_v12 = vpop.f32.mrf.mxu2 }
 0x313   :  { %v6554_v5 = vld [vmem:[#allocation8 + $0x778] sm:$0xf0]  ;;  %4544 = vmatmul.bf16.vlgmr.msrb.gmra.mxu3 %v8876_v0 }
 0x314   :  { %4592 = vmatpush.bf16.msra.mxu3 %v6621_v41  ;;  %4566 = vmatpush.bf16.msra.mxu1 %v6045_v45  ;;  %v8058_v17 = vld [vmem:[#allocation8 + $0x2dc] sm:$0xf]  ;;  %v6557_v21 = vor.u32 %v8202_v4, %v6554_v5 }
 0x315   :  { %v5978_v19 = vld [vmem:[#allocation8 + $0x2f8] sm:$0xf0] }
 0x316   :  { %4579 = vmatpush.bf16.msra.mxu2 %v6333_v55  ;;  %v8130_v41 = vld [vmem:[#allocation8 + $0x51c] sm:$0xf]  ;;  %4553 = vmatpush.bf16.msra.mxu0 %v5757_v61  ;;  %v5981_v45 = vor.u32 %v8058_v17, %v5978_v19  ;;  %v9013_v55 = vpop.f32.mrf.mxu0  ;;  %v9015_v19 = vpop.f32.mrf.mxu3 }
 0x317   :  { %v6266_v35 = vld [vmem:[#allocation8 + $0x538] sm:$0xf0]  ;;  %9181 = vst [vmem:[#allocation29_spill] sm:$0xff] %v9013_v55 }
 0x318   :  { %4593 = vmatpush.bf16.msra.mxu3 %v6589_v49  ;;  %v8194_v44 = vld [vmem:[#allocation8 + $0x71c] sm:$0xf]  ;;  %4567 = vmatpush.bf16.msra.mxu1 %v6013_v24  ;;  %v6269_v50 = vor.u32 %v8130_v41, %v6266_v35 }
 0x319   :  { %v6522_v47 = vld [vmem:[#allocation8 + $0x738] sm:$0xf0] }
 0x31a   :  { %v7986_v28 = vld [vmem:[#allocation8 + $0x9c] sm:$0xf]  ;;  %4580 = vmatpush.bf16.msra.mxu2 %v6301_v15  ;;  %v6525_v57 = vor.u32 %v8194_v44, %v6522_v47  ;;  %4554 = vmatpush.bf16.msra.mxu0 %v5725_v20  ;;  %v9017_v47 = vpop.f32.mrf.mxu1  ;;  %v9019_v20 = vpop.f32.mrf.mxu2 }
 0x31b   :  { %v5690_v52 = vld [vmem:[#allocation8 + $0xb8] sm:$0xf0]  ;;  %9182 = vst [vmem:[#allocation30_spill] sm:$0xff] %v9017_v47 }
 0x31c   :  { %v8050_v49 = vld [vmem:[#allocation8 + $0x29c] sm:$0xf]  ;;  %4594 = vmatpush.bf16.msra.mxu3 %v6557_v21  ;;  %v5693_v38 = vor.u32 %v7986_v28, %v5690_v52  ;;  %4568 = vmatpush.bf16.msra.mxu1 %v5981_v45  ;;  %9183 = vst [vmem:[#allocation31_spill] sm:$0xff] %v9019_v20 }
 0x31d   :  { %v5946_v59 = vld [vmem:[#allocation8 + $0x2b8] sm:$0xf0] }
 0x31e   :  { %v8122_v4 = vld [vmem:[#allocation8 + $0x4dc] sm:$0xf]  ;;  %v5949_v6 = vor.u32 %v8050_v49, %v5946_v59  ;;  %4581 = vmatpush.bf16.msra.mxu2 %v6269_v50  ;;  %4555 = vmatpush.bf16.msra.mxu0 %v5693_v38  ;;  %v9021_v38 = vpop.f32.mrf.mxu0 }
 0x31f   :  { %v6234_v5 = vld [vmem:[#allocation8 + $0x4f8] sm:$0xf0]  ;;  %9184 = vst [vmem:[#allocation32_spill] sm:$0xff] %v9021_v38 }
 0x320   :  { %v8186_v61 = vld [vmem:[#allocation8 + $0x6dc] sm:$0xf]  ;;  %v6237_v37 = vor.u32 %v8122_v4, %v6234_v5  ;;  %4595 = vmatpush.bf16.msra.mxu3 %v6525_v57  ;;  %4569 = vmatpush.bf16.msra.mxu1 %v5949_v6 }
 0x321   :  { %v6490_v63 = vld [vmem:[#allocation8 + $0x6f8] sm:$0xf0] }
 0x322   :  { %v7978_v24 = vld [vmem:[#allocation8 + $0x5c] sm:$0xf]  ;;  %v6493_v35 = vor.u32 %v8186_v61, %v6490_v63  ;;  %4582 = vmatpush.bf16.msra.mxu2 %v6237_v37  ;;  %v9023_v37 = vpop.f32.mrf.mxu3 }
 0x323   :  { %v5658_v17 = vld [vmem:[#allocation8 + $0x78] sm:$0xf0] }
 0x324   :  { %v8042_v15 = vld [vmem:[#allocation8 + $0x25c] sm:$0xf]  ;;  %v5661_v28 = vor.u32 %v7978_v24, %v5658_v17  ;;  %4596 = vmatpush.bf16.msra.mxu3 %v6493_v35 }
 0x325   :  { %v5914_v41 = vld [vmem:[#allocation8 + $0x278] sm:$0xf0] }
 0x326   :  { %v8114_v21 = vld [vmem:[#allocation8 + $0x49c] sm:$0xf]  ;;  %v5917_v59 = vor.u32 %v8042_v15, %v5914_v41  ;;  %4556 = vmatpush.bf16.msra.mxu0 %v5661_v28 }
 0x327   :  { %v6202_v44 = vld [vmem:[#allocation8 + $0x4b8] sm:$0xf0] }
 0x328   :  { %v8178_v45 = vld [vmem:[#allocation8 + $0x69c] sm:$0xf]  ;;  %v6205_v5 = vor.u32 %v8114_v21, %v6202_v44  ;;  %4570 = vmatpush.bf16.msra.mxu1 %v5917_v59 }
 0x329   :  { %v6458_v52 = vld [vmem:[#allocation8 + $0x6b8] sm:$0xf0] }
 0x32a   :  { %v7970_v49 = vld [vmem:[#allocation8 + $0x1c] sm:$0xf]  ;;  %v6461_v32 = vor.u32 %v8178_v45, %v6458_v52  ;;  %4583 = vmatpush.bf16.msra.mxu2 %v6205_v5  ;;  %v9025_v5 = vpop.f32.mrf.mxu1 }
 0x32b   :  { %v8034_v50 = vld [vmem:[#allocation8 + $0x21c] sm:$0xf]  ;;  %v5629_v24 = vor.u32 %v7970_v49, %v5626_v33 }
 0x32c   :  { %v5882_v4 = vld [vmem:[#allocation8 + $0x238] sm:$0xf0]  ;;  %4597 = vmatpush.bf16.msra.mxu3 %v6461_v32 }
 0x32d   :  { %v8282_v57 = vld [vmem:[#allocation8 + $0x9dc] sm:$0xf]  ;;  %v5885_v15 = vor.u32 %v8034_v50, %v5882_v4  ;;  %4557 = vmatpush.bf16.msra.mxu0 %v5629_v24 }
 0x32e   :  { %v6874_v61 = vld [vmem:[#allocation8 + $0x9f8] sm:$0xf0] }
 0x32f   :  { %v8346_v63 = vld [vmem:[#allocation8 + $0xbdc] sm:$0xf]  ;;  %v6877_v41 = vor.u32 %v8282_v57, %v6874_v61  ;;  %4571 = vmatpush.bf16.msra.mxu1 %v5885_v15 }
 0x330   :  { %v7130_v47 = vld [vmem:[#allocation8 + $0xbf8] sm:$0xf0]  ;;  %4558 = vmatmul.bf16.vlgmr.msra.gmra.mxu0 %v8852_v26 }
 0x331   :  { %v6170_v20 = vld [vmem:[#allocation8 + $0x478] sm:$0xf0]  ;;  %v7133_v21 = vor.u32 %v8346_v63, %v7130_v47  ;;  %4606 = vmatpush.bf16.msrb.mxu0 %v6877_v41 }
 0x332   :  { %v8170_v17 = vld [vmem:[#allocation8 + $0x65c] sm:$0xf]  ;;  %v6173_v44 = vor.u32 %v8106_v9, %v6170_v20  ;;  %v9027_v9 = vpop.f32.mrf.mxu2  ;;  %4572 = vmatmul.bf16.vlgmr.msra.gmra.mxu1 %v8854_v31 }
 0x333   :  { %v6426_v6 = vld [vmem:[#allocation8 + $0x678] sm:$0xf0]  ;;  %4620 = vmatpush.bf16.msrb.mxu1 %v7133_v21 }
 0x334   :  { %v6842_v35 = vld [vmem:[#allocation8 + $0x9b8] sm:$0xf0]  ;;  %v6429_v55 = vor.u32 %v8170_v17, %v6426_v6  ;;  %4584 = vmatpush.bf16.msra.mxu2 %v6173_v44 }
 0x335   :  { %v8338_v45 = vld [vmem:[#allocation8 + $0xb9c] sm:$0xf]  ;;  %v6845_v50 = vor.u32 %v8274_v13, %v6842_v35  ;;  %v9030_v13 = vpop.f32.mrf.mxu0 }
 0x336   :  { %v7098_v52 = vld [vmem:[#allocation8 + $0xbb8] sm:$0xf0]  ;;  %4598 = vmatpush.bf16.msra.mxu3 %v6429_v55 }
 0x337   :  { %v8098_v39 = vld [vmem:[#allocation8 + $0x41c] sm:$0xf]  ;;  %v7101_v32 = vor.u32 %v8338_v45, %v7098_v52  ;;  %4607 = vmatpush.bf16.msrb.mxu0 %v6845_v50 }
 0x338   :  { %v6138_v38 = vld [vmem:[#allocation8 + $0x438] sm:$0xf0] }
 0x339   :  { %v8162_v28 = vld [vmem:[#allocation8 + $0x61c] sm:$0xf]  ;;  %v6141_v47 = vor.u32 %v8098_v39, %v6138_v38  ;;  %4621 = vmatpush.bf16.msrb.mxu1 %v7101_v32  ;;  %v9036_v32 = vpop.f32.mrf.mxu1 }
 0x33a   :  { %v6394_v33 = vld [vmem:[#allocation8 + $0x638] sm:$0xf0] }
 0x33b   :  { %v8410_v49 = vld [vmem:[#allocation8 + $0xddc] sm:$0xf]  ;;  %v6397_v63 = vor.u32 %v8162_v28, %v6394_v33  ;;  %4585 = vmatpush.bf16.msra.mxu2 %v6141_v47  ;;  %v9033_v33 = vpop.f32.mrf.mxu3  ;;  %v9038_v47 = vpop.f32.mrf.mxu2 }
 0x33c   :  { %v7386_v59 = vld [vmem:[#allocation8 + $0xdf8] sm:$0xf0]  ;;  %9185 = vst [vmem:[#allocation33_spill] sm:$0xff] %v9038_v47 }
 0x33d   :  { %v8474_v4 = vld [vmem:[#allocation8 + $0xfdc] sm:$0xf]  ;;  %v7389_v24 = vor.u32 %v8410_v49, %v7386_v59  ;;  %4599 = vmatpush.bf16.msra.mxu3 %v6397_v63 }
 0x33e   :  { %v7642_v57 = vld [vmem:[#allocation8 + $0xff8] sm:$0xf0]  ;;  %4586 = vmatmul.bf16.vlgmr.msra.gmra.mxu2 %v8858_v54 }
 0x33f   :  { %v8266_v20 = vld [vmem:[#allocation8 + $0x95c] sm:$0xf]  ;;  %v7645_v15 = vor.u32 %v8474_v4, %v7642_v57  ;;  %4634 = vmatpush.bf16.msrb.mxu2 %v7389_v24 }
 0x340   :  { %v6810_v61 = vld [vmem:[#allocation8 + $0x978] sm:$0xf0]  ;;  %4600 = vmatmul.bf16.vlgmr.msra.gmra.mxu3 %v8860_v60 }
 0x341   :  { %v8330_v17 = vld [vmem:[#allocation8 + $0xb5c] sm:$0xf]  ;;  %v6813_v21 = vor.u32 %v8266_v20, %v6810_v61  ;;  %4648 = vmatpush.bf16.msrb.mxu3 %v7645_v15 }
 0x342   :  { %v7066_v6 = vld [vmem:[#allocation8 + $0xb78] sm:$0xf0] }
 0x343   :  { %v8402_v41 = vld [vmem:[#allocation8 + $0xd9c] sm:$0xf]  ;;  %v7069_v55 = vor.u32 %v8330_v17, %v7066_v6  ;;  %4608 = vmatpush.bf16.msrb.mxu0 %v6813_v21 }
 0x344   :  { %v7354_v35 = vld [vmem:[#allocation8 + $0xdb8] sm:$0xf0] }
 0x345   :  { %v8466_v44 = vld [vmem:[#allocation8 + $0xf9c] sm:$0xf]  ;;  %v7357_v45 = vor.u32 %v8402_v41, %v7354_v35  ;;  %4622 = vmatpush.bf16.msrb.mxu1 %v7069_v55 }
 0x346   :  { %v7610_v39 = vld [vmem:[#allocation8 + $0xfb8] sm:$0xf0] }
 0x347   :  { %v8258_v38 = vld [vmem:[#allocation8 + $0x91c] sm:$0xf]  ;;  %v7613_v31 = vor.u32 %v8466_v44, %v7610_v39  ;;  %4635 = vmatpush.bf16.msrb.mxu2 %v7357_v45  ;;  %v9041_v39 = vpop.f32.mrf.mxu0 }
 0x348   :  { %v6778_v26 = vld [vmem:[#allocation8 + $0x938] sm:$0xf0] }
 0x349   :  { %v8322_v52 = vld [vmem:[#allocation8 + $0xb1c] sm:$0xf]  ;;  %v6781_v50 = vor.u32 %v8258_v38, %v6778_v26  ;;  %4649 = vmatpush.bf16.msrb.mxu3 %v7613_v31 }
 0x34a   :  { %v7034_v28 = vld [vmem:[#allocation8 + $0xb38] sm:$0xf0] }
 0x34b   :  { %v8394_v49 = vld [vmem:[#allocation8 + $0xd5c] sm:$0xf]  ;;  %v7037_v20 = vor.u32 %v8322_v52, %v7034_v28  ;;  %4609 = vmatpush.bf16.msrb.mxu0 %v6781_v50  ;;  %v9043_v28 = vpop.f32.mrf.mxu3 }
 0x34c   :  { %v7322_v59 = vld [vmem:[#allocation8 + $0xd78] sm:$0xf0]  ;;  %9186 = vst [vmem:[#allocation34_spill] sm:$0xff] %v9043_v28 }
 0x34d   :  { %v8458_v4 = vld [vmem:[#allocation8 + $0xf5c] sm:$0xf]  ;;  %v7325_v24 = vor.u32 %v8394_v49, %v7322_v59  ;;  %4623 = vmatpush.bf16.msrb.mxu1 %v7037_v20 }
 0x34e   :  { %v7578_v57 = vld [vmem:[#allocation8 + $0xf78] sm:$0xf0] }
 0x34f   :  { %v8250_v61 = vld [vmem:[#allocation8 + $0x8dc] sm:$0xf]  ;;  %v7581_v54 = vor.u32 %v8458_v4, %v7578_v57  ;;  %4636 = vmatpush.bf16.msrb.mxu2 %v7325_v24 }
 0x350   :  { %v6746_v63 = vld [vmem:[#allocation8 + $0x8f8] sm:$0xf0] }
 0x351   :  { %v8314_v17 = vld [vmem:[#allocation8 + $0xadc] sm:$0xf]  ;;  %v6749_v35 = vor.u32 %v8250_v61, %v6746_v63  ;;  %4650 = vmatpush.bf16.msrb.mxu3 %v7581_v54 }
 0x352   :  { %v7002_v6 = vld [vmem:[#allocation8 + $0xaf8] sm:$0xf0] }
 0x353   :  { %v8386_v15 = vld [vmem:[#allocation8 + $0xd1c] sm:$0xf]  ;;  %v7005_v60 = vor.u32 %v8314_v17, %v7002_v6  ;;  %4610 = vmatpush.bf16.msrb.mxu0 %v6749_v35 }
 0x354   :  { %v7290_v41 = vld [vmem:[#allocation8 + $0xd38] sm:$0xf0] }
 0x355   :  { %v8450_v21 = vld [vmem:[#allocation8 + $0xf1c] sm:$0xf]  ;;  %v7293_v26 = vor.u32 %v8386_v15, %v7290_v41  ;;  %4624 = vmatpush.bf16.msrb.mxu1 %v7005_v60  ;;  %v9045_v15 = vpop.f32.mrf.mxu1  ;;  %v9047_v41 = vpop.f32.mrf.mxu2 }
 0x356   :  { %v7546_v44 = vld [vmem:[#allocation8 + $0xf38] sm:$0xf0]  ;;  %v9049_v60 = vpop.f32.mrf.mxu0 }
 0x357   :  { %v8242_v55 = vld [vmem:[#allocation8 + $0x89c] sm:$0xf]  ;;  %v7549_v31 = vor.u32 %v8450_v21, %v7546_v44  ;;  %4637 = vmatpush.bf16.msrb.mxu2 %v7293_v26  ;;  %9187 = vst [vmem:[#allocation35_spill] sm:$0xff] %v9049_v60 }
 0x358   :  { %v6714_v38 = vld [vmem:[#allocation8 + $0x8b8] sm:$0xf0] }
 0x359   :  { %v8306_v45 = vld [vmem:[#allocation8 + $0xa9c] sm:$0xf]  ;;  %v6717_v50 = vor.u32 %v8242_v55, %v6714_v38  ;;  %4651 = vmatpush.bf16.msrb.mxu3 %v7549_v31 }
 0x35a   :  { %v6970_v52 = vld [vmem:[#allocation8 + $0xab8] sm:$0xf0] }
 0x35b   :  { %v8378_v49 = vld [vmem:[#allocation8 + $0xcdc] sm:$0xf]  ;;  %v6973_v61 = vor.u32 %v8306_v45, %v6970_v52  ;;  %4611 = vmatpush.bf16.msrb.mxu0 %v6717_v50 }
 0x35c   :  { %v7258_v59 = vld [vmem:[#allocation8 + $0xcf8] sm:$0xf0] }
 0x35d   :  { %v8442_v4 = vld [vmem:[#allocation8 + $0xedc] sm:$0xf]  ;;  %v7261_v17 = vor.u32 %v8378_v49, %v7258_v59  ;;  %4625 = vmatpush.bf16.msrb.mxu1 %v6973_v61  ;;  %v8486_v61 = vld [vmem:[#allocation11 + $0x38] sm:$0xff] }
 0x35e   :  { %v7514_v57 = vld [vmem:[#allocation8 + $0xef8] sm:$0xf0] }
 0x35f   :  { %v8234_v20 = vld [vmem:[#allocation8 + $0x85c] sm:$0xf]  ;;  %v7517_v54 = vor.u32 %v8442_v4, %v7514_v57  ;;  %4638 = vmatpush.bf16.msrb.mxu2 %v7261_v17  ;;  %v9188_v17 = vperm.slane %v8892_v1, 1 }
 0x360   :  { %v6682_v63 = vld [vmem:[#allocation8 + $0x878] sm:$0xf0] }
 0x361   :  { %v8298_v24 = vld [vmem:[#allocation8 + $0xa5c] sm:$0xf]  ;;  %v6685_v35 = vor.u32 %v8234_v20, %v6682_v63  ;;  %4652 = vmatpush.bf16.msrb.mxu3 %v7517_v54  ;;  %v9051_v63 = vpop.f32.mrf.mxu3  ;;  %v9056_v54 = vpop.f32.mrf.mxu1 }
 0x362   :  { %v6938_v6 = vld [vmem:[#allocation8 + $0xa78] sm:$0xf0] }
 0x363   :  { %v8370_v21 = vld [vmem:[#allocation8 + $0xc9c] sm:$0xf]  ;;  %v6941_v45 = vor.u32 %v8298_v24, %v6938_v6  ;;  %4612 = vmatpush.bf16.msrb.mxu0 %v6685_v35  ;;  %v8494_v24 = vld [vmem:[#allocation11 + $0x78] sm:$0xff] }
 0x364   :  { %v7226_v44 = vld [vmem:[#allocation8 + $0xcb8] sm:$0xf0] }
 0x365   :  { %v8434_v55 = vld [vmem:[#allocation8 + $0xe9c] sm:$0xf]  ;;  %v7229_v49 = vor.u32 %v8370_v21, %v7226_v44  ;;  %4626 = vmatpush.bf16.msrb.mxu1 %v6941_v45  ;;  %v3890_v21 = vadd.f32 %v8930_v22, %v9188_v17  ;;  %v9058_v44 = vpop.f32.mrf.mxu2 }
 0x366   :  { %v7482_v38 = vld [vmem:[#allocation8 + $0xeb8] sm:$0xf0] }
 0x367   :  { %v8226_v26 = vld [vmem:[#allocation8 + $0x81c] sm:$0xf]  ;;  %v7485_v47 = vor.u32 %v8434_v55, %v7482_v38  ;;  %4639 = vmatpush.bf16.msrb.mxu2 %v7229_v49 }
 0x368   :  { %v6650_v52 = vld [vmem:[#allocation8 + $0x838] sm:$0xf0] }
 0x369   :  { %v8290_v59 = vld [vmem:[#allocation8 + $0xa1c] sm:$0xf]  ;;  %v6653_v57 = vor.u32 %v8226_v26, %v6650_v52  ;;  %4653 = vmatpush.bf16.msrb.mxu3 %v7485_v47  ;;  %v9189_v26 = vperm.slane %v8892_v1, 0  ;;  %v9064_v47 = vpop.f32.mrf.mxu0 }
 0x36a   :  { %v6906_v28 = vld [vmem:[#allocation8 + $0xa38] sm:$0xf0] }
 0x36b   :  { %v8362_v31 = vld [vmem:[#allocation8 + $0xc5c] sm:$0xf]  ;;  %v6909_v60 = vor.u32 %v8290_v59, %v6906_v28  ;;  %v3778_v28 = vadd.f32 %v8903_v51, %v9189_v26  ;;  %4613 = vmatpush.bf16.msrb.mxu0 %v6653_v57  ;;  %v8491_v26 = vld [vmem:[#allocation11 + $0x60] sm:$0xff] }
 0x36c   :  { %v7194_v4 = vld [vmem:[#allocation8 + $0xc78] sm:$0xf0] }
 0x36d   :  { %v8426_v50 = vld [vmem:[#allocation8 + $0xe5c] sm:$0xf]  ;;  %v7197_v6 = vor.u32 %v8362_v31, %v7194_v4  ;;  %4627 = vmatpush.bf16.msrb.mxu1 %v6909_v60  ;;  %v3904_v31 = vadd.f32 %v8933_v30, %v3890_v21  ;;  %v3792_v51 = vadd.f32 %v8905_v56, %v3778_v28  ;;  %v8510_v60 = vld [vmem:[#allocation11 + $0xf8] sm:$0xff]  ;;  %v8484_v30 = vld [vmem:[#allocation11 + $0x28] sm:$0xff] }
 0x36e   :  { %v7450_v20 = vld [vmem:[#allocation8 + $0xe78] sm:$0xf0]  ;;  %4614 = vmatmul.bf16.vlgmr.msrb.gmra.mxu0 %v8868_v23  ;;  %v9190_v23 = vperm.slane %v8892_v1, 2  ;;  %v8483_v1 = vld [vmem:[#allocation11 + $0x20] sm:$0xff] }
 0x36f   :  { %v7453_v35 = vor.u32 %v8426_v50, %v7450_v20  ;;  %v8354_v55 = vld [vmem:[#allocation8 + $0xc1c] sm:$0xf]  ;;  %5202 = vmatpush.bf16.msra.mxu0 %v8486_v61  ;;  %4640 = vmatpush.bf16.msrb.mxu2 %v7197_v6  ;;  %v8502_v50 = vld [vmem:[#allocation11 + $0xb8] sm:$0xff]  ;;  %v3918_v57 = vadd.f32 %v8937_v34, %v3904_v31  ;;  %v3806_v6 = vadd.f32 %v8912_v25, %v3792_v51  ;;  %v9084_v25 = vpop.f32.mrf.mxu2 }
 0x370   :  { %v7162_v38 = vld [vmem:[#allocation8 + $0xc38] sm:$0xf0]  ;;  %4628 = vmatmul.bf16.vlgmr.msrb.gmra.mxu1 %v8870_v27  ;;  %v9070_v20 = vld [vmem:[#allocation10] sm:$0xff]  ;;  %v4002_v17 = vadd.f32 %v8961_v11, %v9190_v23  ;;  %v8492_v27 = vld [vmem:[#allocation11 + $0x68] sm:$0xff] }
 0x371   :  { %v8418_v45 = vld [vmem:[#allocation8 + $0xe1c] sm:$0xf]  ;;  %5216 = vmatpush.bf16.msra.mxu1 %v8494_v24  ;;  %v7165_v59 = vor.u32 %v8354_v55, %v7162_v38  ;;  %4654 = vmatpush.bf16.msrb.mxu3 %v7453_v35  ;;  %v1193_v61 = vperm.slane %v9070_v20, 3  ;;  %v9073_v24 = vpop.f32.mrf.mxu3  ;;  %v3932_v35 = vadd.f32 %v8939_v40, %v3918_v57  ;;  %v9082_v38 = vpop.f32.mrf.mxu1  ;;  %v3820_v11 = vadd.f32 %v8914_v48, %v3806_v6  ;;  %v8506_v6 = vld [vmem:[#allocation11 + $0xd8] sm:$0xff] }
 0x372   :  { %v7418_v52 = vld [vmem:[#allocation8 + $0xe38] sm:$0xf0]  ;;  %v9091_v28 = vpop.f32.mrf.mxu0  ;;  %v9193_v23 = vld [vmem:[#allocation29_spill] sm:$0xff] }
 0x373   :  { %v8485_v49 = vld [vmem:[#allocation11 + $0x30] sm:$0xff]  ;;  %v7421_v4 = vor.u32 %v8418_v45, %v7418_v52  ;;  %4641 = vmatpush.bf16.msrb.mxu2 %v7165_v59  ;;  %v4114_v56 = vadd.f32 %v9003_v10, %v1193_v61  ;;  %v4112_v55 = vadd.f32 %v8993_v36, %v1193_v61  ;;  %v4016_v10 = vadd.f32 %v8964_v2, %v4002_v17  ;;  %v8500_v36 = vld [vmem:[#allocation11 + $0xa8] sm:$0xff] }
 0x374   :  { %v8493_v22 = vld [vmem:[#allocation11 + $0x70] sm:$0xff]  ;;  %5203 = vmatpush.bf16.msra.mxu0 %v8485_v49  ;;  %v3834_v45 = vadd.f32 %v8916_v58, %v3820_v11  ;;  %v8508_v52 = vld [vmem:[#allocation11 + $0xe8] sm:$0xff]  ;;  %v3946_v48 = vadd.f32 %v8944_v53, %v3932_v35  ;;  %v8482_v49 = vld [vmem:[#allocation11 + $0x18] sm:$0xff] }
 0x375   :  { %5217 = vmatpush.bf16.msra.mxu1 %v8493_v22  ;;  %4655 = vmatpush.bf16.msrb.mxu3 %v7421_v4  ;;  %v8501_v34 = vld [vmem:[#allocation11 + $0xb0] sm:$0xff]  ;;  %v4128_v40 = vadd.f32 %v9009_v43, %v4114_v56  ;;  %v4126_v2 = vadd.f32 %v8997_v7, %v4112_v55  ;;  %v8490_v43 = vld [vmem:[#allocation11 + $0x58] sm:$0xff]  ;;  %v8499_v58 = vld [vmem:[#allocation11 + $0xa0] sm:$0xff] }
 0x376   :  { %v8509_v21 = vld [vmem:[#allocation11 + $0xf0] sm:$0xff]  ;;  %4642 = vmatmul.bf16.vlgmr.msrb.gmra.mxu2 %v8874_v62  ;;  %v4030_v62 = vadd.f32 %v8969_v42, %v4016_v10  ;;  %v3848_v42 = vadd.f32 %v8918_v3, %v3834_v45  ;;  %v8507_v53 = vld [vmem:[#allocation11 + $0xe0] sm:$0xff]  ;;  %v3960_v7 = vadd.f32 %v8947_v18, %v3946_v48  ;;  %v8480_v56 = vld [vmem:[#allocation11 + $0x8] sm:$0xff] }
 0x377   :  { %5230 = vmatpush.bf16.msra.mxu2 %v8502_v50  ;;  %v4140_v22 = vadd.f32 %v8999_v14, %v4126_v2  ;;  %v9107_v50 = vpop.f32.mrf.mxu2  ;;  %v8481_v14 = vld [vmem:[#allocation11 + $0x10] sm:$0xff]  ;;  %v8488_v35 = vld [vmem:[#allocation11 + $0x48] sm:$0xff]  ;;  %v8479_v48 = vld [vmem:[#allocation11] sm:$0xff] }
 0x378   :  { %5204 = vmatpush.bf16.msra.mxu0 %v8484_v30  ;;  %4656 = vmatmul.bf16.vlgmr.msrb.gmra.mxu3 %v8876_v0  ;;  %v4142_v0 = vadd.f32 %v9011_v12, %v4128_v40  ;;  %v4044_v31 = vadd.f32 %v8971_v46, %v4030_v62  ;;  %v3862_v51 = vadd.f32 %v8925_v8, %v3848_v42  ;;  %v8489_v3 = vld [vmem:[#allocation11 + $0x50] sm:$0xff]  ;;  %v9194_v8 = vld [vmem:[#allocation21_spill] sm:$0xff]  ;;  %v9198_v45 = vld [vmem:[#allocation30_spill] sm:$0xff] }
 0x379   :  { %5244 = vmatpush.bf16.msra.mxu3 %v8510_v60  ;;  %5218 = vmatpush.bf16.msra.mxu1 %v8492_v27  ;;  %v9099_v59 = vpop.f32.mrf.mxu3  ;;  %v9105_v4 = vpop.f32.mrf.mxu1  ;;  %v3974_v46 = vadd.f32 %v8954_v16, %v3960_v7  ;;  %v9191_v57 = vld [vmem:[#allocation28_spill] sm:$0xff]  ;;  %v9196_v16 = vld [vmem:[#allocation23_spill] sm:$0xff] }
 0x37a   :  { %v4156_v12 = vadd.f32 %v9015_v19, %v4142_v0  ;;  %v4058_v60 = vadd.f32 %v8987_v29, %v4044_v31  ;;  %v4154_v61 = vadd.f32 %v9191_v57, %v4140_v22  ;;  %v9192_v30 = vld [vmem:[#allocation32_spill] sm:$0xff]  ;;  %v4337_v27 = vpop.f32.mrf.mxu0  ;;  %v9195_v29 = vld [vmem:[#allocation25_spill] sm:$0xff]  ;;  %v8496_v7 = vld [vmem:[#allocation11 + $0x88] sm:$0xff] }
 0x37b   :  { %5231 = vmatpush.bf16.msra.mxu2 %v8501_v34  ;;  %v8498_v19 = vld [vmem:[#allocation11 + $0x98] sm:$0xff]  ;;  %v3876_v34 = vadd.f32 %v9194_v8, %v3862_v51  ;;  %v3988_v55 = vadd.f32 %v9196_v16, %v3974_v46  ;;  %v8497_v10 = vld [vmem:[#allocation11 + $0x90] sm:$0xff]  ;;  %v8487_v0 = vld [vmem:[#allocation11 + $0x40] sm:$0xff] }
 0x37c   :  { %5205 = vmatpush.bf16.msra.mxu0 %v8483_v1  ;;  %v4170_v18 = vadd.f32 %v9192_v30, %v4156_v12  ;;  %v4168_v17 = vadd.f32 %v9193_v23, %v4154_v61  ;;  %v9200_v12 = vld [vmem:[#allocation20_spill] sm:$0xff]  ;;  %v9201_v51 = vld [vmem:[#allocation27_spill] sm:$0xff]  ;;  %v9202_v46 = vld [vmem:[#allocation22_spill] sm:$0xff] }
 0x37d   :  { %5245 = vmatpush.bf16.msra.mxu3 %v8509_v21  ;;  %5219 = vmatpush.bf16.msra.mxu1 %v8491_v26  ;;  %v4072_v21 = vadd.f32 %v9195_v29, %v4058_v60  ;;  %v9197_v26 = vld [vmem:[#allocation26_spill] sm:$0xff]  ;;  %v4670_v2 = vmax.f32 %v3876_v34, 0.0  ;;  %v1195_v60 = vperm.slane %v9070_v20, 5  ;;  %v4663_v57 = vmax.f32 %v9202_v46, 0.0  ;;  %v8517_v23 = vld [vmem:[#allocation11 + $0x130] sm:$0xff] }
 0x37e   :  { %v4184_v1 = vadd.f32 %v9025_v5, %v4170_v18  ;;  %v4182_v62 = vadd.f32 %v9198_v45, %v4168_v17  ;;  %v9199_v5 = vld [vmem:[#allocation31_spill] sm:$0xff]  ;;  %v8495_v29 = vld [vmem:[#allocation11 + $0x80] sm:$0xff] }
 0x37f   :  { %5232 = vmatpush.bf16.msra.mxu2 %v8500_v36  ;;  %v4086_v40 = vadd.f32 %v9197_v26, %v4072_v21  ;;  %v8505_v36 = vld [vmem:[#allocation11 + $0xd0] sm:$0xff]  ;;  %v4365_v31 = vpop.f32.mrf.mxu2  ;;  %v8503_v21 = vld [vmem:[#allocation11 + $0xc0] sm:$0xff] }
 0x380   :  { %5206 = vmatpush.bf16.msra.mxu0 %v8482_v49  ;;  %v8518_v49 = vld [vmem:[#allocation11 + $0x138] sm:$0xff]  ;;  %v4196_v22 = vadd.f32 %v9199_v5, %v4182_v62  ;;  %v8525_v34 = vld [vmem:[#allocation11 + $0x170] sm:$0xff]  ;;  %v8524_v62 = vld [vmem:[#allocation11 + $0x168] sm:$0xff] }
 0x381   :  { %5246 = vmatpush.bf16.msra.mxu3 %v8508_v52  ;;  %5220 = vmatpush.bf16.msra.mxu1 %v8490_v43  ;;  %v9119_v11 = vpop.f32.mrf.mxu3  ;;  %v4198_v52 = vadd.f32 %v9027_v9, %v4184_v1  ;;  %v4671_v43 = vmax.f32 %v3988_v55, 0.0  ;;  %v4351_v42 = vpop.f32.mrf.mxu1  ;;  %v4100_v9 = vadd.f32 %v9201_v51, %v4086_v40  ;;  %v9203_v1 = vld [vmem:[#allocation24_spill] sm:$0xff] }
 0x382   :  { %v9132_v18 = vpop.f32.mrf.mxu0  ;;  %v8514_v51 = vld [vmem:[#allocation11 + $0x118] sm:$0xff] }
 0x383   :  { %5233 = vmatpush.bf16.msra.mxu2 %v8499_v58  ;;  %v1194_v58 = vperm.slane %v9070_v20, 4  ;;  %v4212_v61 = vadd.f32 %v9033_v33, %v4198_v52  ;;  %v4679_v17 = vpack.c.bf16 %v4671_v43, %v4663_v57  ;;  %v4672_v33 = vmax.f32 %v4100_v9, 0.0  ;;  %v9206_v9 = vld [vmem:[#allocation35_spill] sm:$0xff] }
 0x384   :  { %5207 = vmatpush.bf16.msra.mxu0 %v8481_v14  ;;  %v4662_v14 = vmax.f32 %v9200_v12, 0.0  ;;  %v8532_v12 = vld [vmem:[#allocation11 + $0x1a8] sm:$0xff] }
 0x385   :  { %5247 = vmatpush.bf16.msra.mxu3 %v8507_v53  ;;  %5221 = vmatpush.bf16.msra.mxu1 %v8489_v3  ;;  %v8526_v53 = vld [vmem:[#allocation11 + $0x178] sm:$0xff]  ;;  %v8504_v3 = vld [vmem:[#allocation11 + $0xc8] sm:$0xff]  ;;  %v4226_v30 = vadd.f32 %v9041_v39, %v1194_v58  ;;  %v4224_v8 = vadd.f32 %v9030_v13, %v1194_v58  ;;  %v4336_v39 = vadd.f32 %v9091_v28, %v1195_v60  ;;  %v8533_v58 = vld [vmem:[#allocation11 + $0x1b0] sm:$0xff] }
 0x386   :  { %v8516_v13 = vld [vmem:[#allocation11 + $0x128] sm:$0xff] }
 0x387   :  { %5234 = vmatpush.bf16.msra.mxu2 %v8498_v19  ;;  %v4678_v19 = vpack.c.bf16 %v4670_v2, %v4662_v14  ;;  %v4240_v16 = vadd.f32 %v9045_v15, %v4226_v30  ;;  %v4238_v40 = vadd.f32 %v9036_v32, %v4224_v8  ;;  %v4419_v45 = vpop.f32.mrf.mxu2  ;;  %v4350_v15 = vadd.f32 %v9105_v4, %v4336_v39  ;;  %v8515_v32 = vld [vmem:[#allocation11 + $0x120] sm:$0xff]  ;;  %v8513_v30 = vld [vmem:[#allocation11 + $0x110] sm:$0xff]  ;;  %v8530_v39 = vld [vmem:[#allocation11 + $0x198] sm:$0xff] }
 0x388   :  { %5208 = vmatpush.bf16.msra.mxu0 %v8480_v56  ;;  %v4210_v56 = vadd.f32 %v9023_v37, %v4196_v22  ;;  %v4664_v37 = vmax.f32 %v9203_v1, 0.0  ;;  %v8523_v22 = vld [vmem:[#allocation11 + $0x160] sm:$0xff] }
 0x389   :  { %5248 = vmatpush.bf16.msra.mxu3 %v8506_v6  ;;  %5222 = vmatpush.bf16.msra.mxu1 %v8488_v35  ;;  %v4338_v6 = vadd.f32 %v4337_v27, %v1195_v60  ;;  %v8534_v35 = vld [vmem:[#allocation11 + $0x1b8] sm:$0xff]  ;;  %v4673_v27 = vmax.f32 %v4212_v61, 0.0  ;;  %v4379_v55 = vpop.f32.mrf.mxu3  ;;  %v4405_v28 = vpop.f32.mrf.mxu1  ;;  %v4364_v43 = vadd.f32 %v9107_v50, %v4350_v15  ;;  %v9205_v4 = vld [vmem:[#allocation34_spill] sm:$0xff] }
 0x38a   :  { %v4665_v26 = vmax.f32 %v4210_v56, 0.0  ;;  %v4680_v52 = vpack.c.bf16 %v4672_v33, %v4664_v37  ;;  %v4393_v5 = vpop.f32.mrf.mxu0  ;;  %v8522_v60 = vld [vmem:[#allocation11 + $0x158] sm:$0xff]  ;;  %v8520_v33 = vld [vmem:[#allocation11 + $0x148] sm:$0xff] }
 0x38b   :  { %5235 = vmatpush.bf16.msra.mxu2 %v8497_v10  ;;  %v4352_v10 = vadd.f32 %v4351_v42, %v4338_v6  ;;  %v4378_v50 = vadd.f32 %v9119_v11, %v4364_v43  ;;  %v8521_v6 = vld [vmem:[#allocation11 + $0x150] sm:$0xff] }
 0x38c   :  { %5209 = vmatpush.bf16.msra.mxu0 %v8479_v48  ;;  %v4681_v2 = vpack.c.bf16 %v4673_v27, %v4665_v26  ;;  %v8511_v27 = vld [vmem:[#allocation11 + $0x100] sm:$0xff] }
 0x38d   :  { %5249 = vmatpush.bf16.msra.mxu3 %v8505_v36  ;;  %5223 = vmatpush.bf16.msra.mxu1 %v8487_v0  ;;  %v4254_v36 = vadd.f32 %v9047_v41, %v4240_v16  ;;  %v4366_v48 = vadd.f32 %v4365_v31, %v4352_v10  ;;  %v9204_v0 = vld [vmem:[#allocation33_spill] sm:$0xff] }
 0x38f   :  { %5236 = vmatpush.bf16.msra.mxu2 %v8496_v7  ;;  %5210 = vmatmul.bf16.vlgmr.msra.gmra.mxu0 %v4678_v19  ;;  %v4268_v41 = vadd.f32 %v9051_v63, %v4254_v36  ;;  %v4380_v42 = vadd.f32 %v4379_v55, %v4366_v48  ;;  %v4421_v61 = vpop.f32.mrf.mxu2  ;;  %v8529_v55 = vld [vmem:[#allocation11 + $0x190] sm:$0xff] }
 0x390   :  { %5258 = vmatpush.bf16.msrb.mxu0 %v8518_v49  ;;  %5224 = vmatmul.bf16.vlgmr.msra.gmra.mxu1 %v4679_v17  ;;  %v4252_v49 = vadd.f32 %v9204_v0, %v4238_v40 }
 0x391   :  { %5272 = vmatpush.bf16.msrb.mxu1 %v8526_v53  ;;  %5250 = vmatpush.bf16.msra.mxu3 %v8504_v3  ;;  %v4282_v53 = vadd.f32 %v9064_v47, %v4268_v41  ;;  %v4433_v7 = vpop.f32.mrf.mxu3  ;;  %v4394_v14 = vadd.f32 %v4393_v5, %v4380_v42  ;;  %v4392_v3 = vadd.f32 %v9132_v18, %v4378_v50  ;;  %v4407_v57 = vpop.f32.mrf.mxu1 }
 0x392   :  { %v4266_v31 = vadd.f32 %v9205_v4, %v4252_v49 }
 0x393   :  { %5237 = vmatpush.bf16.msra.mxu2 %v8495_v29  ;;  %v4296_v46 = vadd.f32 %v9082_v38, %v4282_v53  ;;  %v4408_v47 = vadd.f32 %v4407_v57, %v4394_v14  ;;  %v4406_v17 = vadd.f32 %v4405_v28, %v4392_v3  ;;  %v8512_v38 = vld [vmem:[#allocation11 + $0x108] sm:$0xff] }
 0x394   :  { %5259 = vmatpush.bf16.msrb.mxu0 %v8517_v23  ;;  %v4280_v63 = vadd.f32 %v9206_v9, %v4266_v31  ;;  %v8531_v23 = vld [vmem:[#allocation11 + $0x1a0] sm:$0xff] }
 0x395   :  { %5273 = vmatpush.bf16.msrb.mxu1 %v8525_v34  ;;  %5251 = vmatpush.bf16.msra.mxu3 %v8503_v21  ;;  %v4310_v11 = vadd.f32 %v9084_v25, %v4296_v46  ;;  %v4422_v56 = vadd.f32 %v4421_v61, %v4408_v47  ;;  %v4420_v18 = vadd.f32 %v4419_v45, %v4406_v17  ;;  %v1196_v45 = vperm.slane %v9070_v20, 6  ;;  %v8538_v17 = vld [vmem:[#allocation11 + $0x1d8] sm:$0xff] }
 0x396   :  { %5238 = vmatmul.bf16.vlgmr.msra.gmra.mxu2 %v4680_v52  ;;  %v4294_v19 = vadd.f32 %v9056_v54, %v4280_v63 }
 0x397   :  { %5286 = vmatpush.bf16.msrb.mxu2 %v8534_v35  ;;  %v4324_v34 = vadd.f32 %v9099_v59, %v4310_v11  ;;  %v4434_v21 = vadd.f32 %v4433_v7, %v4420_v18  ;;  %v4447_v35 = vpop.f32.mrf.mxu0  ;;  %v4475_v28 = vpop.f32.mrf.mxu2  ;;  %v8541_v11 = vld [vmem:[#allocation11 + $0x1f0] sm:$0xff]  ;;  %v8536_v18 = vld [vmem:[#allocation11 + $0x1c8] sm:$0xff] }
 0x398   :  { %5260 = vmatpush.bf16.msrb.mxu0 %v8516_v13  ;;  %5252 = vmatmul.bf16.vlgmr.msra.gmra.mxu3 %v4681_v2  ;;  %v4308_v8 = vadd.f32 %v9058_v44, %v4294_v19  ;;  %v8519_v44 = vld [vmem:[#allocation11 + $0x140] sm:$0xff]  ;;  %v8528_v13 = vld [vmem:[#allocation11 + $0x188] sm:$0xff]  ;;  %v4448_v52 = vadd.f32 %v4447_v35, %v1196_v45 }
 0x399   :  { %5274 = vmatpush.bf16.msrb.mxu1 %v8524_v62  ;;  %v4435_v29 = vpop.f32.mrf.mxu3  ;;  %v4674_v16 = vmax.f32 %v4324_v34, 0.0  ;;  %v4667_v59 = vmax.f32 %v4434_v21, 0.0  ;;  %v4461_v40 = vpop.f32.mrf.mxu1  ;;  %v8535_v34 = vld [vmem:[#allocation11 + $0x1c0] sm:$0xff] }
 0x39a   :  { %v4436_v54 = vadd.f32 %v4435_v29, %v4422_v56  ;;  %v4322_v25 = vadd.f32 %v9073_v24, %v4308_v8  ;;  %v8527_v24 = vld [vmem:[#allocation11 + $0x180] sm:$0xff]  ;;  %v4462_v2 = vadd.f32 %v4461_v40, %v4448_v52  ;;  %v8537_v8 = vld [vmem:[#allocation11 + $0x1d0] sm:$0xff] }
 0x39b   :  { %5287 = vmatpush.bf16.msrb.mxu2 %v8533_v58 }
 0x39c   :  { %5261 = vmatpush.bf16.msrb.mxu0 %v8515_v32  ;;  %v4675_v1 = vmax.f32 %v4436_v54, 0.0  ;;  %v4666_v37 = vmax.f32 %v4322_v25, 0.0  ;;  %v4476_v43 = vadd.f32 %v4475_v28, %v4462_v2 }
 0x39d   :  { %5275 = vmatpush.bf16.msrb.mxu1 %v8523_v22 }
 0x39e   :  { %v4682_v10 = vpack.c.bf16 %v4674_v16, %v4666_v37  ;;  %v4683_v26 = vpack.c.bf16 %v4675_v1, %v4667_v59 }
 0x39f   :  { %5288 = vmatpush.bf16.msrb.mxu2 %v8532_v12  ;;  %v4449_v36 = vpop.f32.mrf.mxu0  ;;  %v4477_v49 = vpop.f32.mrf.mxu2 }
 0x3a0   :  { %5262 = vmatpush.bf16.msrb.mxu0 %v8514_v51  ;;  %v4450_v0 = vadd.f32 %v4449_v36, %v1196_v45 }
 0x3a1   :  { %5276 = vmatpush.bf16.msrb.mxu1 %v8522_v60  ;;  %v4489_v62 = vpop.f32.mrf.mxu3  ;;  %v4463_v15 = vpop.f32.mrf.mxu1  ;;  %v8542_v60 = vld [vmem:[#allocation11 + $0x1f8] sm:$0xff] }
 0x3a2   :  { %v4464_v41 = vadd.f32 %v4463_v15, %v4450_v0  ;;  %v4490_v22 = vadd.f32 %v4489_v62, %v4476_v43  ;;  %5300 = vmatpush.bf16.msrb.mxu3 %v8542_v60 }
 0x3a3   :  { %5289 = vmatpush.bf16.msrb.mxu2 %v8531_v23  ;;  %v8539_v23 = vld [vmem:[#allocation11 + $0x1e0] sm:$0xff] }
 0x3a4   :  { %5263 = vmatpush.bf16.msrb.mxu0 %v8513_v30  ;;  %v4478_v58 = vadd.f32 %v4477_v49, %v4464_v41 }
 0x3a5   :  { %5277 = vmatpush.bf16.msrb.mxu1 %v8521_v6  ;;  %v8540_v6 = vld [vmem:[#allocation11 + $0x1e8] sm:$0xff] }
 0x3a6   :  { %5301 = vmatpush.bf16.msrb.mxu3 %v8541_v11 }
 0x3a7   :  { %5290 = vmatpush.bf16.msrb.mxu2 %v8530_v39  ;;  %v4503_v48 = vpop.f32.mrf.mxu0  ;;  %v4531_v31 = vpop.f32.mrf.mxu2  ;;  %v1197_v39 = vperm.slane %v9070_v20, 7 }
 0x3a8   :  { %5264 = vmatpush.bf16.msrb.mxu0 %v8512_v38  ;;  %v4504_v42 = vadd.f32 %v4503_v48, %v4490_v22 }
 0x3a9   :  { %5278 = vmatpush.bf16.msrb.mxu1 %v8520_v33  ;;  %v4491_v32 = vpop.f32.mrf.mxu3  ;;  %v4517_v5 = vpop.f32.mrf.mxu1 }
 0x3aa   :  { %v4492_v53 = vadd.f32 %v4491_v32, %v4478_v58  ;;  %v4518_v12 = vadd.f32 %v4517_v5, %v4504_v42  ;;  %5302 = vmatpush.bf16.msrb.mxu3 %v8540_v6 }
 0x3ab   :  { %5291 = vmatpush.bf16.msrb.mxu2 %v8529_v55 }
 0x3ac   :  { %5265 = vmatpush.bf16.msrb.mxu0 %v8511_v27  ;;  %v4532_v14 = vadd.f32 %v4531_v31, %v4518_v12 }
 0x3ad   :  { %5279 = vmatpush.bf16.msrb.mxu1 %v8519_v44 }
 0x3ae   :  { %5303 = vmatpush.bf16.msrb.mxu3 %v8539_v23 }
 0x3af   :  { %5266 = vmatmul.bf16.vlgmr.msrb.gmra.mxu0 %v4682_v10  ;;  %5292 = vmatpush.bf16.msrb.mxu2 %v8528_v13  ;;  %v4505_v4 = vpop.f32.mrf.mxu0  ;;  %v4533_v63 = vpop.f32.mrf.mxu2 }
 0x3b0   :  { %5280 = vmatmul.bf16.vlgmr.msrb.gmra.mxu1 %v4683_v26  ;;  %v4506_v50 = vadd.f32 %v4505_v4, %v4492_v53  ;;  %v8557_v4 = vld [vmem:[#allocation13] ss:$0 sm:$0xff] }
 0x3b1   :  { %v4545_v7 = vpop.f32.mrf.mxu3  ;;  %v4519_v51 = vpop.f32.mrf.mxu1 }
 0x3b2   :  { %v4520_v9 = vadd.f32 %v4519_v51, %v4506_v50  ;;  %v4546_v3 = vadd.f32 %v4545_v7, %v4532_v14  ;;  %5304 = vmatpush.bf16.msrb.mxu3 %v8538_v17 }
 0x3b3   :  { %5293 = vmatpush.bf16.msrb.mxu2 %v8527_v24 }
 0x3b4   :  { %v4534_v46 = vadd.f32 %v4533_v63, %v4520_v9  ;;  %v4668_v47 = vmax.f32 %v4546_v3, 0.0 }
 0x3b6   :  { %5305 = vmatpush.bf16.msrb.mxu3 %v8537_v8 }
 0x3b7   :  { %v4559_v56 = vpop.f32.mrf.mxu0 }
 0x3b8   :  { %v4560_v25 = vadd.f32 %v4559_v56, %v1197_v39 }
 0x3b9   :  { %v4547_v57 = vpop.f32.mrf.mxu3  ;;  %v4573_v38 = vpop.f32.mrf.mxu1 }
 0x3ba   :  { %v4548_v61 = vadd.f32 %v4547_v57, %v4534_v46  ;;  %5306 = vmatpush.bf16.msrb.mxu3 %v8536_v18  ;;  %v4574_v27 = vadd.f32 %v4573_v38, %v4560_v25 }
 0x3bc   :  { %v4676_v30 = vmax.f32 %v4548_v61, 0.0 }
 0x3be   :  { %v4684_v19 = vpack.c.bf16 %v4676_v30, %v4668_v47  ;;  %5307 = vmatpush.bf16.msrb.mxu3 %v8535_v34 }
 0x3bf   :  { %v4561_v29 = vpop.f32.mrf.mxu0 }
 0x3c0   :  { %5294 = vmatmul.bf16.vlgmr.msrb.gmra.mxu2 %v4684_v19  ;;  %v4562_v16 = vadd.f32 %v4561_v29, %v1197_v39 }
 0x3c1   :  { %v4587_v33 = vpop.f32.mrf.mxu2  ;;  %v4575_v21 = vpop.f32.mrf.mxu1 }
 0x3c2   :  { %v4588_v55 = vadd.f32 %v4587_v33, %v4574_v27  ;;  %v4576_v37 = vadd.f32 %v4575_v21, %v4562_v16 }
 0x3c3   :  { %v4601_v54 = vpop.f32.mrf.mxu3 }
 0x3c4   :  { %v4602_v10 = vadd.f32 %v4601_v54, %v4588_v55 }
 0x3c9   :  { %v4589_v44 = vpop.f32.mrf.mxu2 }
 0x3ca   :  { %v4590_v13 = vadd.f32 %v4589_v44, %v4576_v37 }
 0x3cb   :  { %v4603_v1 = vpop.f32.mrf.mxu3 }
 0x3cc   :  { %v4604_v36 = vadd.f32 %v4603_v1, %v4590_v13 }
 0x3eb   :  { %v4615_v35 = vpop.f32.mrf.mxu0 }
 0x3ec   :  { %v4616_v26 = vadd.f32 %v4615_v35, %v4602_v10 }
 0x3ed   :  { %v4629_v59 = vpop.f32.mrf.mxu1 }
 0x3ee   :  { %v4630_v20 = vadd.f32 %v4629_v59, %v4616_v26 }
 0x3f3   :  { %v4617_v40 = vpop.f32.mrf.mxu0 }
 0x3f4   :  { %v4618_v45 = vadd.f32 %v4617_v40, %v4604_v36 }
 0x3f5   :  { %v4631_v52 = vpop.f32.mrf.mxu1 }
 0x3f6   :  { %v4632_v15 = vadd.f32 %v4631_v52, %v4618_v45 }
 0x3f9   :  { %v4643_v24 = vpop.f32.mrf.mxu2 }
 0x3fa   :  { %v4644_v62 = vadd.f32 %v4643_v24, %v4630_v20 }
 0x3fb   :  { %v4657_v28 = vpop.f32.mrf.mxu3 }
 0x3fc   :  { %v4658_v2 = vadd.f32 %v4657_v28, %v4644_v62 }
 0x3fe   :  { %v4669_v32 = vmax.f32 %v4658_v2, 0.0 }
 0x401   :  { %v4645_v48 = vpop.f32.mrf.mxu2 }
 0x402   :  { %v4646_v0 = vadd.f32 %v4645_v48, %v4632_v15 }
 0x403   :  { %v4659_v49 = vpop.f32.mrf.mxu3 }
 0x404   :  { %v4660_v43 = vadd.f32 %v4659_v49, %v4646_v0 }
 0x406   :  { %v4677_v41 = vmax.f32 %v4660_v43, 0.0 }
 0x408   :  { %v4685_v5 = vpack.c.bf16 %v4677_v41, %v4669_v32 }
 0x40a   :  { %5308 = vmatmul.bf16.vlgmr.msrb.gmra.mxu3 %v4685_v5 }
 0x40c   :  { %v5211_v22 = vpop.f32.mrf.mxu0 }
 0x40d   :  { %v5225_v58 = vpop.f32.mrf.mxu1  ;;  %v5212_v53 = vadd.f32 %v8557_v4, %v5211_v22 }
 0x40f   :  { %v5226_v12 = vadd.f32 %v5225_v58, %v5212_v53 }
 0x414   :  { %v5213_v31 = vpop.f32.mrf.mxu0 }
 0x415   :  { %v5227_v50 = vpop.f32.mrf.mxu1  ;;  %v5214_v63 = vadd.f32 %v8557_v4, %v5213_v31 }
 0x417   :  { %v5228_v46 = vadd.f32 %v5227_v50, %v5214_v63 }
 0x419   :  { %v5239_v42 = vpop.f32.mrf.mxu2 }
 0x41a   :  { %v5240_v51 = vadd.f32 %v5239_v42, %v5226_v12 }
 0x41b   :  { %v5253_v7 = vpop.f32.mrf.mxu3 }
 0x41c   :  { %v5254_v60 = vadd.f32 %v5253_v7, %v5240_v51 }
 0x421   :  { %v5241_v14 = vpop.f32.mrf.mxu2 }
 0x422   :  { %v5242_v30 = vadd.f32 %v5241_v14, %v5228_v46 }
 0x423   :  { %v5255_v3 = vpop.f32.mrf.mxu3 }
 0x424   :  { %v5256_v6 = vadd.f32 %v5255_v3, %v5242_v30 }
 0x42c   :  { %v5267_v9 = vpop.f32.mrf.mxu0 }
 0x42d   :  { %v5268_v57 = vadd.f32 %v5267_v9, %v5254_v60  ;;  %v5281_v61 = vpop.f32.mrf.mxu1 }
 0x42f   :  { %v5282_v19 = vadd.f32 %v5281_v61, %v5268_v57 }
 0x434   :  { %v5269_v11 = vpop.f32.mrf.mxu0 }
 0x435   :  { %v5270_v56 = vadd.f32 %v5269_v11, %v5256_v6  ;;  %v5283_v18 = vpop.f32.mrf.mxu1 }
 0x437   :  { %v5284_v34 = vadd.f32 %v5283_v18, %v5270_v56 }
 0x443   :  { %v5295_v47 = vpop.f32.mrf.mxu2 }
 0x444   :  { %v5296_v23 = vadd.f32 %v5295_v47, %v5282_v19 }
 0x44b   :  { %v5297_v38 = vpop.f32.mrf.mxu2 }
 0x44c   :  { %v5298_v29 = vadd.f32 %v5297_v38, %v5284_v34 }
 0x48d   :  { %v5309_v17 = vpop.f32.mrf.mxu3 }
 0x48e   :  { %v5310_v8 = vadd.f32 %v5309_v17, %v5296_v23 }
 0x490   :  { %5314 = vst [vmem:[#allocation14] sm:$0xff] %v5310_v8 }
 0x495   :  { %v5311_v33 = vpop.f32.mrf.mxu3 }
 0x496   :  { %v5312_v39 = vadd.f32 %v5311_v33, %v5298_v29 }
 0x498   :  { %5315 = vst [vmem:[#allocation14 + $0x8] sm:$0xff] %v5312_v39 }
 0x499   :  { %5328 = dma.vmem_to_hbm [thread:$0]  %s5321_s6, 256, %s5323_s14, [#allocation4], %s8773_s1, %s8773_s1, %s8774_s15  }
 0x49a   :  { %8759 = dma.done.wait [#allocation4], 256  }
 0x49b   :  { %8760 = vsyncadd [#allocation4], 4294967040 }
 0x49c   :  { %5333 = vsyncpa [#allocation3], 1 }
 0x49d   :  { %5334 = vsyncpa [#allocation6], 1 }
 0x49e   :  { %5335 = vsyncpa [#allocation9], 1 }
 0x49f   :  { %5336 = vsyncpa [#allocation12], 1 }
 0x4a0   :  { %5337 = vsyncpa [#allocation4], 1 }

// kernel: tpu_custom_call.1
= control target key start
LH: loop header
LB: loop body
LE: loop exit
PB: predicated region body
PF: predicated region fallthrough
CT: control target
= control target key end

     0   :  { %12 = vsyncpa [#allocation3], 0  ;;  %s9161_s0 = inlined_call_operand.hbm [shape: bf16[16,128], index: 0, kind: input, shape index: {}]   ;;  %s9162_s1 = inlined_call_operand.hbm [shape: bf16[128,1024], index: 1, kind: input, shape index: {}]   ;;  %s9163_s2 = inlined_call_operand.hbm [shape: f32[1,1024], index: 2, kind: input, shape index: {}]   ;;  %s9164_s3 = inlined_call_operand.hbm [shape: bf16[1024,1024], index: 3, kind: input, shape index: {}]   ;;  %s9165_s4 = inlined_call_operand.hbm [shape: f32[1,1024], index: 4, kind: input, shape index: {}]   ;;  %s9166_s5 = inlined_call_operand.hbm [shape: bf16[1024,128], index: 5, kind: input, shape index: {}]   ;;  %s9167_s6 = inlined_call_operand.hbm [shape: f32[1,128], index: 6, kind: input, shape index: {}]   ;;  %s9168_s7 = inlined_call_operand.hbm [shape: f32[16,128], index: 7, kind: output, shape index: {}]  }
   0x1   :  { %13 = vsyncpa [#allocation6], 0 }
   0x2   :  { %14 = vsyncpa [#allocation9], 0 }
   0x3   :  { %15 = vsyncpa [#allocation12], 0  ;;  %s34_s26 = sshll.u32 %s9162_s1, 4  ;;  %s35_s26 = int_to_ptr.hbm [resolvable:$true] %s34_s26 }
   0x4   :  { %16 = vsyncpa [#allocation4], 0  ;;  %s8761_s27 = smov [#allocation5]   ;;  %s58_s8 = sshll.u32 %s9164_s3, 4  ;;  %s59_s8 = int_to_ptr.hbm [resolvable:$true] %s58_s8 }
   0x5   :  { %s36_s28 = sshll.u32 %s8761_s27, 4  ;;  %s8762_s9 = smov 512   ;;  %s37_s28 = int_to_ptr.vmem [resolvable:$true] %s36_s28 }
   0x6   :  { %s8763_s10 = smov 32   ;;  %s8764_s11 = smov [#allocation8]  }
   0x7   :  { %42 = dma.hbm_to_vmem [thread:$0]  %s35_s26, 8192, %s37_s28, [#allocation6], %s8762_s9, %s8762_s9, %s8763_s10  }
   0x8   :  { %s60_s12 = sshll.u32 %s8764_s11, 4  ;;  %s82_s1 = sshll.u32 %s9166_s5, 4  ;;  %s61_s12 = int_to_ptr.vmem [resolvable:$true] %s60_s12  ;;  %s83_s1 = int_to_ptr.hbm [resolvable:$true] %s82_s1 }
   0x9   :  { %66 = dma.hbm_to_vmem [thread:$0]  %s59_s8, 65536, %s61_s12, [#allocation9], %s8762_s9, %s8762_s9, %s8763_s10  }
   0xa   :  { %s8765_s15 = smov [#allocation11]   ;;  %s21_s3 = sshll.u32 %s9161_s0, 4  ;;  %s22_s3 = int_to_ptr.hbm [resolvable:$true] %s21_s3 }
   0xb   :  { %s84_s16 = sshll.u32 %s8765_s15, 4  ;;  %s8766_s19 = smov 64   ;;  %s85_s16 = int_to_ptr.vmem [resolvable:$true] %s84_s16 }
   0xc   :  { %s8767_s20 = smov 4   ;;  %s8768_s21 = smov [#allocation2]  }
   0xd   :  { %90 = dma.hbm_to_vmem [thread:$0]  %s83_s1, 8192, %s85_s16, [#allocation12], %s8766_s19, %s8766_s19, %s8767_s20  }
   0xe   :  { %s23_s22 = sshll.u32 %s8768_s21, 4  ;;  %s48_s25 = sshll.u32 %s9163_s2, 4  ;;  %s24_s22 = int_to_ptr.vmem [resolvable:$true] %s23_s22  ;;  %s49_s25 = int_to_ptr.hbm [resolvable:$true] %s48_s25 }
   0xf   :  { %29 = dma.hbm_to_vmem [thread:$0]  %s22_s3, 128, %s24_s22, [#allocation3], %s8766_s19, %s8766_s19, %s8767_s20  }
  0x10   :  { %s72_s27 = sshll.u32 %s9165_s4, 4  ;;  %s8769_s28 = smov [#allocation7]   ;;  %s73_s27 = int_to_ptr.hbm [resolvable:$true] %s72_s27 }
  0x11   :  { %s50_s29 = sshll.u32 %s8769_s28, 4  ;;  %s8770_s0 = smov [#allocation10]   ;;  %s51_s29 = int_to_ptr.vmem [resolvable:$true] %s50_s29 }
  0x12   :  { %53 = dma.hbm_to_vmem [thread:$0]  %s49_s25, 128, %s51_s29, [#allocation6]  }
  0x13   :  { %s74_s30 = sshll.u32 %s8770_s0, 4  ;;  %s96_s10 = sshll.u32 %s9167_s6, 4  ;;  %s75_s30 = int_to_ptr.vmem [resolvable:$true] %s74_s30  ;;  %s97_s10 = int_to_ptr.hbm [resolvable:$true] %s96_s10 }
  0x14   :  { %77 = dma.hbm_to_vmem [thread:$0]  %s73_s27, 128, %s75_s30, [#allocation9]  }
  0x15   :  { %s8771_s2 = smov [#allocation13]  }
  0x16   :  { %s98_s11 = sshll.u32 %s8771_s2, 4  ;;  %s99_s11 = int_to_ptr.vmem [resolvable:$true] %s98_s11 }
  0x17   :  { %101 = dma.hbm_to_vmem [thread:$0]  %s97_s10, 16, %s99_s11, [#allocation12]  }
  0x18   :  { %8751 = dma.done.wait [#allocation3], 128  }
  0x19   :  { %8752 = vsyncadd [#allocation3], 4294967168 }
  0x1a   :  { %8753 = dma.done.wait [#allocation6], 8320  }
  0x1b   :  { %8754 = vsyncadd [#allocation6], 4294958976 }
  0x1c   :  { %8755 = dma.done.wait [#allocation9], 65664  }
  0x1d   :  { %8756 = vsyncadd [#allocation9], 4294901632 }
  0x1e   :  { %8757 = dma.done.wait [#allocation12], 8208  }
  0x1f   :  { %8758 = vsyncadd [#allocation12], 4294959088  ;;  %v5568_v0 = vld [vmem:[#allocation5 + $0x1c0] sm:$0xf]  ;;  %v7959_v2 = vld [vmem:[#allocation5 + $0x1c4] sm:$0xf] }
  0x20   :  { %v7963_v1 = vld [vmem:[#allocation5 + $0x1dc] sm:$0xf0]  ;;  %v5570_v4 = vld [vmem:[#allocation5 + $0x1e0] sm:$0xf0]  ;;  %v5576_v5 = vld [vmem:[#allocation5 + $0x1c8] sm:$0xf] }
  0x21   :  { %v5569_v3 = vor.u32 %v7963_v1, %v5568_v0  ;;  %v7964_v6 = vld [vmem:[#allocation5 + $0x1e4] sm:$0xf0]  ;;  %v5573_v7 = vor.u32 %v7959_v2, %v5570_v4  ;;  %v7960_v9 = vld [vmem:[#allocation5 + $0x1cc] sm:$0xf]  ;;  %v5536_v11 = vld [vmem:[#allocation5 + $0x180] sm:$0xf] }
  0x22   :  { %v5577_v8 = vor.u32 %v7964_v6, %v5576_v5  ;;  %v5578_v10 = vld [vmem:[#allocation5 + $0x1e8] sm:$0xf0]  ;;  %v7955_v13 = vld [vmem:[#allocation5 + $0x19c] sm:$0xf0]  ;;  %v7951_v14 = vld [vmem:[#allocation5 + $0x184] sm:$0xf] }
  0x23   :  { %540 = vmatpush.bf16.msra.mxu0 %v5569_v3  ;;  %v5581_v12 = vor.u32 %v7960_v9, %v5578_v10  ;;  %v5538_v15 = vld [vmem:[#allocation5 + $0x1a0] sm:$0xf0]  ;;  %554 = vmatpush.bf16.msra.mxu1 %v5573_v7  ;;  %v5537_v16 = vor.u32 %v7955_v13, %v5536_v11  ;;  %v5544_v18 = vld [vmem:[#allocation5 + $0x188] sm:$0xf]  ;;  %v7952_v20 = vld [vmem:[#allocation5 + $0x18c] sm:$0xf] }
  0x24   :  { %568 = vmatpush.bf16.msra.mxu2 %v5577_v8  ;;  %v5541_v17 = vor.u32 %v7951_v14, %v5538_v15  ;;  %v7956_v19 = vld [vmem:[#allocation5 + $0x1a4] sm:$0xf0]  ;;  %v5546_v22 = vld [vmem:[#allocation5 + $0x1a8] sm:$0xf0]  ;;  %v5504_v23 = vld [vmem:[#allocation5 + $0x140] sm:$0xf] }
  0x25   :  { %582 = vmatpush.bf16.msra.mxu3 %v5581_v12  ;;  %v5545_v21 = vor.u32 %v7956_v19, %v5544_v18  ;;  %v7947_v24 = vld [vmem:[#allocation5 + $0x15c] sm:$0xf0]  ;;  %v5549_v25 = vor.u32 %v7952_v20, %v5546_v22  ;;  %v7943_v26 = vld [vmem:[#allocation5 + $0x144] sm:$0xf]  ;;  %v5512_v28 = vld [vmem:[#allocation5 + $0x148] sm:$0xf] }
  0x26   :  { %v5506_v27 = vld [vmem:[#allocation5 + $0x160] sm:$0xf0]  ;;  %v5505_v29 = vor.u32 %v7947_v24, %v5504_v23  ;;  %v7948_v30 = vld [vmem:[#allocation5 + $0x164] sm:$0xf0]  ;;  %v7944_v31 = vld [vmem:[#allocation5 + $0x14c] sm:$0xf] }
  0x27   :  { %541 = vmatpush.bf16.msra.mxu0 %v5537_v16  ;;  %v5514_v32 = vld [vmem:[#allocation5 + $0x168] sm:$0xf0]  ;;  %555 = vmatpush.bf16.msra.mxu1 %v5541_v17  ;;  %v5509_v33 = vor.u32 %v7943_v26, %v5506_v27  ;;  %v5513_v34 = vor.u32 %v7948_v30, %v5512_v28  ;;  %v5472_v35 = vld [vmem:[#allocation5 + $0x100] sm:$0xf]  ;;  %v7935_v37 = vld [vmem:[#allocation5 + $0x104] sm:$0xf] }
  0x28   :  { %569 = vmatpush.bf16.msra.mxu2 %v5545_v21  ;;  %v7939_v36 = vld [vmem:[#allocation5 + $0x11c] sm:$0xf0]  ;;  %v5517_v38 = vor.u32 %v7944_v31, %v5514_v32  ;;  %v5474_v39 = vld [vmem:[#allocation5 + $0x120] sm:$0xf0]  ;;  %v5480_v40 = vld [vmem:[#allocation5 + $0x108] sm:$0xf] }
  0x29   :  { %583 = vmatpush.bf16.msra.mxu3 %v5549_v25  ;;  %v7940_v41 = vld [vmem:[#allocation5 + $0x124] sm:$0xf0]  ;;  %v7936_v42 = vld [vmem:[#allocation5 + $0x10c] sm:$0xf]  ;;  %v5473_v44 = vor.u32 %v7939_v36, %v5472_v35  ;;  %v5477_v45 = vor.u32 %v7935_v37, %v5474_v39  ;;  %v5440_v47 = vld [vmem:[#allocation5 + $0xc0] sm:$0xf] }
  0x2a   :  { %v5482_v43 = vld [vmem:[#allocation5 + $0x128] sm:$0xf0]  ;;  %v5481_v46 = vor.u32 %v7940_v41, %v5480_v40  ;;  %v7931_v48 = vld [vmem:[#allocation5 + $0xdc] sm:$0xf0]  ;;  %v7927_v49 = vld [vmem:[#allocation5 + $0xc4] sm:$0xf] }
  0x2b   :  { %542 = vmatpush.bf16.msra.mxu0 %v5505_v29  ;;  %556 = vmatpush.bf16.msra.mxu1 %v5509_v33  ;;  %v5485_v50 = vor.u32 %v7936_v42, %v5482_v43  ;;  %v5442_v51 = vld [vmem:[#allocation5 + $0xe0] sm:$0xf0]  ;;  %v5448_v52 = vld [vmem:[#allocation5 + $0xc8] sm:$0xf]  ;;  %v7928_v54 = vld [vmem:[#allocation5 + $0xcc] sm:$0xf]  ;;  %v5441_v56 = vor.u32 %v7931_v48, %v5440_v47 }
  0x2c   :  { %570 = vmatpush.bf16.msra.mxu2 %v5513_v34  ;;  %v7932_v53 = vld [vmem:[#allocation5 + $0xe4] sm:$0xf0]  ;;  %v5450_v55 = vld [vmem:[#allocation5 + $0xe8] sm:$0xf0]  ;;  %v5445_v57 = vor.u32 %v7927_v49, %v5442_v51  ;;  %v5408_v59 = vld [vmem:[#allocation5 + $0x80] sm:$0xf] }
  0x2d   :  { %584 = vmatpush.bf16.msra.mxu3 %v5517_v38  ;;  %v5449_v58 = vor.u32 %v7932_v53, %v5448_v52  ;;  %v7923_v60 = vld [vmem:[#allocation5 + $0x9c] sm:$0xf0]  ;;  %v7919_v61 = vld [vmem:[#allocation5 + $0x84] sm:$0xf]  ;;  %v5453_v62 = vor.u32 %v7928_v54, %v5450_v55  ;;  %v5416_v0 = vld [vmem:[#allocation5 + $0x88] sm:$0xf] }
  0x2e   :  { %v5410_v63 = vld [vmem:[#allocation5 + $0xa0] sm:$0xf0]  ;;  %v7924_v1 = vld [vmem:[#allocation5 + $0xa4] sm:$0xf0]  ;;  %v7920_v2 = vld [vmem:[#allocation5 + $0x8c] sm:$0xf]  ;;  %v5409_v4 = vor.u32 %v7923_v60, %v5408_v59 }
  0x2f   :  { %543 = vmatpush.bf16.msra.mxu0 %v5473_v44  ;;  %557 = vmatpush.bf16.msra.mxu1 %v5477_v45  ;;  %v5418_v3 = vld [vmem:[#allocation5 + $0xa8] sm:$0xf0]  ;;  %v5413_v5 = vor.u32 %v7919_v61, %v5410_v63  ;;  %v5417_v6 = vor.u32 %v7924_v1, %v5416_v0  ;;  %v5376_v7 = vld [vmem:[#allocation5 + $0x40] sm:$0xf]  ;;  %v7911_v9 = vld [vmem:[#allocation5 + $0x44] sm:$0xf] }
  0x30   :  { %571 = vmatpush.bf16.msra.mxu2 %v5481_v46  ;;  %v7915_v8 = vld [vmem:[#allocation5 + $0x5c] sm:$0xf0]  ;;  %v5421_v10 = vor.u32 %v7920_v2, %v5418_v3  ;;  %v5378_v11 = vld [vmem:[#allocation5 + $0x60] sm:$0xf0]  ;;  %v5384_v12 = vld [vmem:[#allocation5 + $0x48] sm:$0xf] }
  0x31   :  { %585 = vmatpush.bf16.msra.mxu3 %v5485_v50  ;;  %v7916_v13 = vld [vmem:[#allocation5 + $0x64] sm:$0xf0]  ;;  %v7912_v14 = vld [vmem:[#allocation5 + $0x4c] sm:$0xf]  ;;  %v5377_v16 = vor.u32 %v7915_v8, %v5376_v7  ;;  %v5344_v17 = vld [vmem:[#allocation5] sm:$0xf]  ;;  %v5381_v19 = vor.u32 %v7911_v9, %v5378_v11 }
  0x32   :  { %v5386_v15 = vld [vmem:[#allocation5 + $0x68] sm:$0xf0]  ;;  %v7907_v18 = vld [vmem:[#allocation5 + $0x1c] sm:$0xf0]  ;;  %v5385_v20 = vor.u32 %v7916_v13, %v5384_v12  ;;  %v7903_v21 = vld [vmem:[#allocation5 + $0x4] sm:$0xf] }
  0x33   :  { %544 = vmatpush.bf16.msra.mxu0 %v5441_v56  ;;  %558 = vmatpush.bf16.msra.mxu1 %v5445_v57  ;;  %v5346_v22 = vld [vmem:[#allocation5 + $0x20] sm:$0xf0]  ;;  %v5352_v23 = vld [vmem:[#allocation5 + $0x8] sm:$0xf]  ;;  %v5389_v24 = vor.u32 %v7912_v14, %v5386_v15  ;;  %v7904_v26 = vld [vmem:[#allocation5 + $0xc] sm:$0xf]  ;;  %v5345_v31 = vor.u32 %v7907_v18, %v5344_v17 }
  0x34   :  { %572 = vmatpush.bf16.msra.mxu2 %v5449_v58  ;;  %v7908_v25 = vld [vmem:[#allocation5 + $0x24] sm:$0xf0]  ;;  %v5354_v27 = vld [vmem:[#allocation5 + $0x28] sm:$0xf0]  ;;  %v5584_v28 = vld [vmem:[#allocation5 + $0x1d0] sm:$0xf]  ;;  %v5349_v35 = vor.u32 %v7903_v21, %v5346_v22 }
  0x35   :  { %586 = vmatpush.bf16.msra.mxu3 %v5453_v62  ;;  %v7965_v29 = vld [vmem:[#allocation5 + $0x1ec] sm:$0xf0]  ;;  %v7961_v30 = vld [vmem:[#allocation5 + $0x1d4] sm:$0xf]  ;;  %v5592_v33 = vld [vmem:[#allocation5 + $0x1d8] sm:$0xf]  ;;  %v5353_v36 = vor.u32 %v7908_v25, %v5352_v23  ;;  %v5357_v39 = vor.u32 %v7904_v26, %v5354_v27 }
  0x36   :  { %v5586_v32 = vld [vmem:[#allocation5 + $0x1f0] sm:$0xf0]  ;;  %v7966_v34 = vld [vmem:[#allocation5 + $0x1f4] sm:$0xf0]  ;;  %v7962_v37 = vld [vmem:[#allocation5 + $0x1dc] sm:$0xf]  ;;  %v5585_v40 = vor.u32 %v7965_v29, %v5584_v28 }
  0x37   :  { %545 = vmatpush.bf16.msra.mxu0 %v5409_v4  ;;  %559 = vmatpush.bf16.msra.mxu1 %v5413_v5  ;;  %v5594_v38 = vld [vmem:[#allocation5 + $0x1f8] sm:$0xf0]  ;;  %v5589_v42 = vor.u32 %v7961_v30, %v5586_v32  ;;  %v5593_v43 = vor.u32 %v7966_v34, %v5592_v33  ;;  %v5552_v44 = vld [vmem:[#allocation5 + $0x190] sm:$0xf]  ;;  %v7953_v46 = vld [vmem:[#allocation5 + $0x194] sm:$0xf] }
  0x38   :  { %573 = vmatpush.bf16.msra.mxu2 %v5417_v6  ;;  %v8836_v41 = vld [vmem:[#allocation2] sm:$0xff]  ;;  %v7957_v45 = vld [vmem:[#allocation5 + $0x1ac] sm:$0xf0]  ;;  %v5597_v47 = vor.u32 %v7962_v37, %v5594_v38  ;;  %v5554_v48 = vld [vmem:[#allocation5 + $0x1b0] sm:$0xf0]  ;;  %s8772_s4 = smov [#allocation14]  }
  0x39   :  { %587 = vmatpush.bf16.msra.mxu3 %v5421_v10  ;;  %v5560_v49 = vld [vmem:[#allocation5 + $0x198] sm:$0xf]  ;;  %v7954_v51 = vld [vmem:[#allocation5 + $0x19c] sm:$0xf]  ;;  %v5553_v53 = vor.u32 %v7957_v45, %v5552_v44  ;;  %v5557_v54 = vor.u32 %v7953_v46, %v5554_v48  ;;  %v5520_v56 = vld [vmem:[#allocation5 + $0x150] sm:$0xf] }
  0x3a   :  { %v7958_v50 = vld [vmem:[#allocation5 + $0x1b4] sm:$0xf0]  ;;  %v5562_v52 = vld [vmem:[#allocation5 + $0x1b8] sm:$0xf0]  ;;  %v7949_v57 = vld [vmem:[#allocation5 + $0x16c] sm:$0xf0] }
  0x3b   :  { %546 = vmatpush.bf16.msra.mxu0 %v5377_v16  ;;  %560 = vmatpush.bf16.msra.mxu1 %v5381_v19  ;;  %v5561_v55 = vor.u32 %v7958_v50, %v5560_v49  ;;  %v7945_v58 = vld [vmem:[#allocation5 + $0x154] sm:$0xf]  ;;  %v5565_v59 = vor.u32 %v7954_v51, %v5562_v52  ;;  %v5528_v61 = vld [vmem:[#allocation5 + $0x158] sm:$0xf]  ;;  %v7946_v63 = vld [vmem:[#allocation5 + $0x15c] sm:$0xf]  ;;  %v5521_v1 = vor.u32 %v7949_v57, %v5520_v56 }
  0x3c   :  { %574 = vmatpush.bf16.msra.mxu2 %v5385_v20  ;;  %v5522_v60 = vld [vmem:[#allocation5 + $0x170] sm:$0xf0]  ;;  %v7950_v62 = vld [vmem:[#allocation5 + $0x174] sm:$0xf0]  ;;  %v5530_v0 = vld [vmem:[#allocation5 + $0x178] sm:$0xf0] }
  0x3d   :  { %588 = vmatpush.bf16.msra.mxu3 %v5389_v24  ;;  %v5525_v2 = vor.u32 %v7945_v58, %v5522_v60  ;;  %v5529_v3 = vor.u32 %v7950_v62, %v5528_v61  ;;  %v5488_v4 = vld [vmem:[#allocation5 + $0x110] sm:$0xf]  ;;  %v7937_v6 = vld [vmem:[#allocation5 + $0x114] sm:$0xf]  ;;  %v5533_v7 = vor.u32 %v7946_v63, %v5530_v0  ;;  %v5496_v9 = vld [vmem:[#allocation5 + $0x118] sm:$0xf] }
  0x3e   :  { %v7941_v5 = vld [vmem:[#allocation5 + $0x12c] sm:$0xf0]  ;;  %v5490_v8 = vld [vmem:[#allocation5 + $0x130] sm:$0xf0]  ;;  %v7942_v10 = vld [vmem:[#allocation5 + $0x134] sm:$0xf0] }
  0x3f   :  { %547 = vmatpush.bf16.msra.mxu0 %v5345_v31  ;;  %561 = vmatpush.bf16.msra.mxu1 %v5349_v35  ;;  %v7938_v11 = vld [vmem:[#allocation5 + $0x11c] sm:$0xf]  ;;  %v5489_v13 = vor.u32 %v7941_v5, %v5488_v4  ;;  %v5493_v14 = vor.u32 %v7937_v6, %v5490_v8  ;;  %v5497_v15 = vor.u32 %v7942_v10, %v5496_v9  ;;  %v5456_v16 = vld [vmem:[#allocation5 + $0xd0] sm:$0xf]  ;;  %v7929_v18 = vld [vmem:[#allocation5 + $0xd4] sm:$0xf] }
  0x40   :  { %575 = vmatpush.bf16.msra.mxu2 %v5353_v36  ;;  %v5498_v12 = vld [vmem:[#allocation5 + $0x138] sm:$0xf0]  ;;  %v7933_v17 = vld [vmem:[#allocation5 + $0xec] sm:$0xf0]  ;;  %v5458_v20 = vld [vmem:[#allocation5 + $0xf0] sm:$0xf0] }
  0x41   :  { %589 = vmatpush.bf16.msra.mxu3 %v5357_v39  ;;  %v5501_v19 = vor.u32 %v7938_v11, %v5498_v12  ;;  %v5464_v21 = vld [vmem:[#allocation5 + $0xd8] sm:$0xf]  ;;  %v7930_v23 = vld [vmem:[#allocation5 + $0xdc] sm:$0xf]  ;;  %v5457_v25 = vor.u32 %v7933_v17, %v5456_v16  ;;  %v5461_v26 = vor.u32 %v7929_v18, %v5458_v20  ;;  %v5424_v28 = vld [vmem:[#allocation5 + $0x90] sm:$0xf] }
  0x42   :  { %548 = vmatmul.bf16.vlgmr.msra.gmra.mxu0 %v8836_v41  ;;  %562 = vmatmul.bf16.vlgmr.msra.gmra.mxu1 %v8836_v41  ;;  %v7934_v22 = vld [vmem:[#allocation5 + $0xf4] sm:$0xf0]  ;;  %v5466_v24 = vld [vmem:[#allocation5 + $0xf8] sm:$0xf0]  ;;  %v7925_v29 = vld [vmem:[#allocation5 + $0xac] sm:$0xf0] }
  0x43   :  { %596 = vmatpush.bf16.msrb.mxu0 %v5585_v40  ;;  %610 = vmatpush.bf16.msrb.mxu1 %v5589_v42  ;;  %v5465_v27 = vor.u32 %v7934_v22, %v5464_v21  ;;  %v7921_v30 = vld [vmem:[#allocation5 + $0x94] sm:$0xf]  ;;  %v5469_v31 = vor.u32 %v7930_v23, %v5466_v24  ;;  %v5432_v33 = vld [vmem:[#allocation5 + $0x98] sm:$0xf]  ;;  %v7922_v35 = vld [vmem:[#allocation5 + $0x9c] sm:$0xf]  ;;  %v5425_v37 = vor.u32 %v7925_v29, %v5424_v28 }
  0x44   :  { %624 = vmatpush.bf16.msrb.mxu2 %v5593_v43  ;;  %590 = vmatmul.bf16.vlgmr.msra.gmra.mxu3 %v8836_v41  ;;  %v5426_v32 = vld [vmem:[#allocation5 + $0xb0] sm:$0xf0]  ;;  %v7926_v34 = vld [vmem:[#allocation5 + $0xb4] sm:$0xf0]  ;;  %v5434_v36 = vld [vmem:[#allocation5 + $0xb8] sm:$0xf0] }
  0x45   :  { %638 = vmatpush.bf16.msrb.mxu3 %v5597_v47  ;;  %576 = vmatmul.bf16.vlgmr.msra.gmra.mxu2 %v8836_v41  ;;  %v5429_v38 = vor.u32 %v7921_v30, %v5426_v32  ;;  %v5433_v39 = vor.u32 %v7926_v34, %v5432_v33  ;;  %v5392_v40 = vld [vmem:[#allocation5 + $0x50] sm:$0xf]  ;;  %v7913_v43 = vld [vmem:[#allocation5 + $0x54] sm:$0xf]  ;;  %v5437_v44 = vor.u32 %v7922_v35, %v5434_v36  ;;  %v5400_v46 = vld [vmem:[#allocation5 + $0x58] sm:$0xf] }
  0x46   :  { %v7917_v42 = vld [vmem:[#allocation5 + $0x6c] sm:$0xf0]  ;;  %v5394_v45 = vld [vmem:[#allocation5 + $0x70] sm:$0xf0]  ;;  %v7918_v47 = vld [vmem:[#allocation5 + $0x74] sm:$0xf0] }
  0x47   :  { %597 = vmatpush.bf16.msrb.mxu0 %v5553_v53  ;;  %611 = vmatpush.bf16.msrb.mxu1 %v5557_v54  ;;  %v7914_v48 = vld [vmem:[#allocation5 + $0x5c] sm:$0xf]  ;;  %v5393_v50 = vor.u32 %v7917_v42, %v5392_v40  ;;  %v5360_v51 = vld [vmem:[#allocation5 + $0x10] sm:$0xf]  ;;  %v5397_v52 = vor.u32 %v7913_v43, %v5394_v45  ;;  %v5401_v53 = vor.u32 %v7918_v47, %v5400_v46  ;;  %v5362_v56 = vld [vmem:[#allocation5 + $0x30] sm:$0xf0] }
  0x48   :  { %625 = vmatpush.bf16.msrb.mxu2 %v5561_v55  ;;  %v5402_v49 = vld [vmem:[#allocation5 + $0x78] sm:$0xf0]  ;;  %v7909_v54 = vld [vmem:[#allocation5 + $0x2c] sm:$0xf0]  ;;  %v7905_v55 = vld [vmem:[#allocation5 + $0x14] sm:$0xf] }
  0x49   :  { %639 = vmatpush.bf16.msrb.mxu3 %v5565_v59  ;;  %v5405_v57 = vor.u32 %v7914_v48, %v5402_v49  ;;  %v5368_v58 = vld [vmem:[#allocation5 + $0x18] sm:$0xf]  ;;  %v7906_v60 = vld [vmem:[#allocation5 + $0x1c] sm:$0xf]  ;;  %v5824_v62 = vld [vmem:[#allocation8 + $0x1c0] sm:$0xf]  ;;  %v5361_v0 = vor.u32 %v7909_v54, %v5360_v51 }
  0x4a   :  { %v7910_v59 = vld [vmem:[#allocation5 + $0x34] sm:$0xf0]  ;;  %v5370_v61 = vld [vmem:[#allocation5 + $0x38] sm:$0xf0]  ;;  %v8027_v63 = vld [vmem:[#allocation8 + $0x1dc] sm:$0xf0] }
  0x4b   :  { %598 = vmatpush.bf16.msrb.mxu0 %v5521_v1  ;;  %612 = vmatpush.bf16.msrb.mxu1 %v5525_v2  ;;  %v6080_v1 = vld [vmem:[#allocation8 + $0x3c0] sm:$0xf]  ;;  %v5369_v4 = vor.u32 %v7910_v59, %v5368_v58  ;;  %v5373_v5 = vor.u32 %v7906_v60, %v5370_v61  ;;  %v5825_v6 = vor.u32 %v8027_v63, %v5824_v62  ;;  %s5320_s6 = sshll.u32 %s8772_s4, 4  ;;  %s5322_s14 = sshll.u32 %s9168_s7, 4  ;;  %s5321_s6 = int_to_ptr.vmem [resolvable:$true] %s5320_s6  ;;  %s5323_s14 = int_to_ptr.hbm [resolvable:$true] %s5322_s14 }
  0x4c   :  { %626 = vmatpush.bf16.msrb.mxu2 %v5529_v3  ;;  %v8091_v2 = vld [vmem:[#allocation8 + $0x3dc] sm:$0xf0]  ;;  %v5365_v3 = vor.u32 %v7905_v55, %v5362_v56  ;;  %s8773_s1 = smov 128   ;;  %s8774_s15 = smov 8  }
  0x4d   :  { %640 = vmatpush.bf16.msrb.mxu3 %v5533_v7  ;;  %v5792_v7 = vld [vmem:[#allocation8 + $0x180] sm:$0xf]  ;;  %v6081_v10 = vor.u32 %v8091_v2, %v6080_v1 }
  0x4e   :  { %v6336_v8 = vld [vmem:[#allocation8 + $0x5c0] sm:$0xf] }
  0x4f   :  { %599 = vmatpush.bf16.msrb.mxu0 %v5489_v13  ;;  %613 = vmatpush.bf16.msrb.mxu1 %v5493_v14  ;;  %v8155_v9 = vld [vmem:[#allocation8 + $0x5dc] sm:$0xf0] }
  0x50   :  { %627 = vmatpush.bf16.msrb.mxu2 %v5497_v15  ;;  %v8019_v11 = vld [vmem:[#allocation8 + $0x19c] sm:$0xf0]  ;;  %v6337_v16 = vor.u32 %v8155_v9, %v6336_v8 }
  0x51   :  { %641 = vmatpush.bf16.msrb.mxu3 %v5501_v19  ;;  %v6592_v12 = vld [vmem:[#allocation8 + $0x7c0] sm:$0xf]  ;;  %v5793_v17 = vor.u32 %v8019_v11, %v5792_v7 }
  0x52   :  { %v8219_v13 = vld [vmem:[#allocation8 + $0x7dc] sm:$0xf0] }
  0x53   :  { %600 = vmatpush.bf16.msrb.mxu0 %v5457_v25  ;;  %614 = vmatpush.bf16.msrb.mxu1 %v5461_v26  ;;  %v6048_v14 = vld [vmem:[#allocation8 + $0x380] sm:$0xf]  ;;  %v6593_v18 = vor.u32 %v8219_v13, %v6592_v12 }
  0x54   :  { %628 = vmatpush.bf16.msrb.mxu2 %v5465_v27  ;;  %v8083_v15 = vld [vmem:[#allocation8 + $0x39c] sm:$0xf0] }
  0x55   :  { %642 = vmatpush.bf16.msrb.mxu3 %v5469_v31  ;;  %v5760_v19 = vld [vmem:[#allocation8 + $0x140] sm:$0xf]  ;;  %v6049_v22 = vor.u32 %v8083_v15, %v6048_v14 }
  0x56   :  { %v6304_v20 = vld [vmem:[#allocation8 + $0x580] sm:$0xf] }
  0x57   :  { %601 = vmatpush.bf16.msrb.mxu0 %v5425_v37  ;;  %615 = vmatpush.bf16.msrb.mxu1 %v5429_v38  ;;  %v8147_v21 = vld [vmem:[#allocation8 + $0x59c] sm:$0xf0] }
  0x58   :  { %629 = vmatpush.bf16.msrb.mxu2 %v5433_v39  ;;  %v8011_v23 = vld [vmem:[#allocation8 + $0x15c] sm:$0xf0]  ;;  %v6305_v28 = vor.u32 %v8147_v21, %v6304_v20 }
  0x59   :  { %643 = vmatpush.bf16.msrb.mxu3 %v5437_v44  ;;  %v6560_v24 = vld [vmem:[#allocation8 + $0x780] sm:$0xf]  ;;  %v5761_v29 = vor.u32 %v8011_v23, %v5760_v19 }
  0x5a   :  { %v8211_v25 = vld [vmem:[#allocation8 + $0x79c] sm:$0xf0] }
  0x5b   :  { %602 = vmatpush.bf16.msrb.mxu0 %v5393_v50  ;;  %616 = vmatpush.bf16.msrb.mxu1 %v5397_v52  ;;  %v6016_v26 = vld [vmem:[#allocation8 + $0x340] sm:$0xf]  ;;  %v6561_v30 = vor.u32 %v8211_v25, %v6560_v24 }
  0x5c   :  { %630 = vmatpush.bf16.msrb.mxu2 %v5401_v53  ;;  %v8075_v27 = vld [vmem:[#allocation8 + $0x35c] sm:$0xf0] }
  0x5d   :  { %644 = vmatpush.bf16.msrb.mxu3 %v5405_v57  ;;  %v5728_v31 = vld [vmem:[#allocation8 + $0x100] sm:$0xf]  ;;  %v6017_v34 = vor.u32 %v8075_v27, %v6016_v26 }
  0x5e   :  { %v6272_v32 = vld [vmem:[#allocation8 + $0x540] sm:$0xf] }
  0x5f   :  { %603 = vmatpush.bf16.msrb.mxu0 %v5361_v0  ;;  %617 = vmatpush.bf16.msrb.mxu1 %v5365_v3  ;;  %v8139_v33 = vld [vmem:[#allocation8 + $0x55c] sm:$0xf0] }
  0x60   :  { %631 = vmatpush.bf16.msrb.mxu2 %v5369_v4  ;;  %v8003_v35 = vld [vmem:[#allocation8 + $0x11c] sm:$0xf0]  ;;  %v6273_v40 = vor.u32 %v8139_v33, %v6272_v32 }
  0x61   :  { %645 = vmatpush.bf16.msrb.mxu3 %v5373_v5  ;;  %v6528_v36 = vld [vmem:[#allocation8 + $0x740] sm:$0xf] }
  0x62   :  { %604 = vmatmul.bf16.vlgmr.msrb.gmra.mxu0 %v8836_v41  ;;  %618 = vmatmul.bf16.vlgmr.msrb.gmra.mxu1 %v8836_v41  ;;  %v8203_v37 = vld [vmem:[#allocation8 + $0x75c] sm:$0xf0] }
  0x63   :  { %3766 = vmatpush.bf16.msra.mxu0 %v5825_v6  ;;  %3780 = vmatpush.bf16.msra.mxu1 %v6081_v10  ;;  %v5984_v38 = vld [vmem:[#allocation8 + $0x300] sm:$0xf]  ;;  %v6529_v43 = vor.u32 %v8203_v37, %v6528_v36 }
  0x64   :  { %632 = vmatmul.bf16.vlgmr.msrb.gmra.mxu2 %v8836_v41  ;;  %646 = vmatmul.bf16.vlgmr.msrb.gmra.mxu3 %v8836_v41  ;;  %v8067_v39 = vld [vmem:[#allocation8 + $0x31c] sm:$0xf0]  ;;  %v5729_v41 = vor.u32 %v8003_v35, %v5728_v31 }
  0x65   :  { %3794 = vmatpush.bf16.msra.mxu2 %v6337_v16  ;;  %3808 = vmatpush.bf16.msra.mxu3 %v6593_v18  ;;  %v5696_v42 = vld [vmem:[#allocation8 + $0xc0] sm:$0xf]  ;;  %v5985_v46 = vor.u32 %v8067_v39, %v5984_v38 }
  0x66   :  { %v6240_v44 = vld [vmem:[#allocation8 + $0x500] sm:$0xf] }
  0x67   :  { %3767 = vmatpush.bf16.msra.mxu0 %v5793_v17  ;;  %3781 = vmatpush.bf16.msra.mxu1 %v6049_v22  ;;  %v8131_v45 = vld [vmem:[#allocation8 + $0x51c] sm:$0xf0] }
  0x68   :  { %v7995_v47 = vld [vmem:[#allocation8 + $0xdc] sm:$0xf0]  ;;  %v6241_v52 = vor.u32 %v8131_v45, %v6240_v44 }
  0x69   :  { %3795 = vmatpush.bf16.msra.mxu2 %v6305_v28  ;;  %3809 = vmatpush.bf16.msra.mxu3 %v6561_v30  ;;  %v6496_v48 = vld [vmem:[#allocation8 + $0x700] sm:$0xf]  ;;  %v5697_v53 = vor.u32 %v7995_v47, %v5696_v42 }
  0x6a   :  { %v8195_v49 = vld [vmem:[#allocation8 + $0x71c] sm:$0xf0] }
  0x6b   :  { %3768 = vmatpush.bf16.msra.mxu0 %v5761_v29  ;;  %3782 = vmatpush.bf16.msra.mxu1 %v6017_v34  ;;  %v5952_v50 = vld [vmem:[#allocation8 + $0x2c0] sm:$0xf]  ;;  %v6497_v54 = vor.u32 %v8195_v49, %v6496_v48 }
  0x6c   :  { %v8059_v51 = vld [vmem:[#allocation8 + $0x2dc] sm:$0xf0] }
  0x6d   :  { %3796 = vmatpush.bf16.msra.mxu2 %v6273_v40  ;;  %3810 = vmatpush.bf16.msra.mxu3 %v6529_v43  ;;  %v5664_v55 = vld [vmem:[#allocation8 + $0x80] sm:$0xf]  ;;  %v5953_v58 = vor.u32 %v8059_v51, %v5952_v50 }
  0x6e   :  { %v6208_v56 = vld [vmem:[#allocation8 + $0x4c0] sm:$0xf] }
  0x6f   :  { %3769 = vmatpush.bf16.msra.mxu0 %v5729_v41  ;;  %v8123_v57 = vld [vmem:[#allocation8 + $0x4dc] sm:$0xf0]  ;;  %3783 = vmatpush.bf16.msra.mxu1 %v5985_v46 }
  0x70   :  { %v7987_v59 = vld [vmem:[#allocation8 + $0x9c] sm:$0xf0]  ;;  %v6209_v0 = vor.u32 %v8123_v57, %v6208_v56 }
  0x71   :  { %v6464_v60 = vld [vmem:[#allocation8 + $0x6c0] sm:$0xf]  ;;  %3797 = vmatpush.bf16.msra.mxu2 %v6241_v52  ;;  %3811 = vmatpush.bf16.msra.mxu3 %v6497_v54  ;;  %v5665_v1 = vor.u32 %v7987_v59, %v5664_v55 }
  0x72   :  { %v8187_v61 = vld [vmem:[#allocation8 + $0x6dc] sm:$0xf0] }
  0x73   :  { %v5920_v62 = vld [vmem:[#allocation8 + $0x280] sm:$0xf]  ;;  %3770 = vmatpush.bf16.msra.mxu0 %v5697_v53  ;;  %v6465_v2 = vor.u32 %v8187_v61, %v6464_v60  ;;  %3784 = vmatpush.bf16.msra.mxu1 %v5953_v58 }
  0x74   :  { %v8051_v63 = vld [vmem:[#allocation8 + $0x29c] sm:$0xf0] }
  0x75   :  { %v5632_v3 = vld [vmem:[#allocation8 + $0x40] sm:$0xf]  ;;  %v5921_v6 = vor.u32 %v8051_v63, %v5920_v62  ;;  %3798 = vmatpush.bf16.msra.mxu2 %v6209_v0  ;;  %3812 = vmatpush.bf16.msra.mxu3 %v6465_v2 }
  0x76   :  { %v6176_v4 = vld [vmem:[#allocation8 + $0x480] sm:$0xf] }
  0x77   :  { %v8115_v5 = vld [vmem:[#allocation8 + $0x49c] sm:$0xf0]  ;;  %3771 = vmatpush.bf16.msra.mxu0 %v5665_v1  ;;  %3785 = vmatpush.bf16.msra.mxu1 %v5921_v6 }
  0x78   :  { %v7979_v7 = vld [vmem:[#allocation8 + $0x5c] sm:$0xf0]  ;;  %v6177_v12 = vor.u32 %v8115_v5, %v6176_v4 }
  0x79   :  { %v6432_v8 = vld [vmem:[#allocation8 + $0x680] sm:$0xf]  ;;  %v5633_v14 = vor.u32 %v7979_v7, %v5632_v3 }
  0x7a   :  { %v8179_v9 = vld [vmem:[#allocation8 + $0x69c] sm:$0xf0]  ;;  %3799 = vmatpush.bf16.msra.mxu2 %v6177_v12 }
  0x7b   :  { %v5888_v10 = vld [vmem:[#allocation8 + $0x240] sm:$0xf]  ;;  %v6433_v15 = vor.u32 %v8179_v9, %v6432_v8  ;;  %3772 = vmatpush.bf16.msra.mxu0 %v5633_v14 }
  0x7c   :  { %v8043_v11 = vld [vmem:[#allocation8 + $0x25c] sm:$0xf0] }
  0x7d   :  { %v5600_v13 = vld [vmem:[#allocation8] sm:$0xf]  ;;  %v5889_v19 = vor.u32 %v8043_v11, %v5888_v10  ;;  %3813 = vmatpush.bf16.msra.mxu3 %v6433_v15 }
  0x7e   :  { %v7971_v16 = vld [vmem:[#allocation8 + $0x1c] sm:$0xf0] }
  0x7f   :  { %v6144_v17 = vld [vmem:[#allocation8 + $0x440] sm:$0xf]  ;;  %v5601_v29 = vor.u32 %v7971_v16, %v5600_v13  ;;  %3786 = vmatpush.bf16.msra.mxu1 %v5889_v19 }
  0x80   :  { %v8107_v18 = vld [vmem:[#allocation8 + $0x45c] sm:$0xf0] }
  0x81   :  { %v5856_v20 = vld [vmem:[#allocation8 + $0x200] sm:$0xf]  ;;  %v6145_v28 = vor.u32 %v8107_v18, %v6144_v17  ;;  %3773 = vmatpush.bf16.msra.mxu0 %v5601_v29 }
  0x82   :  { %v6400_v21 = vld [vmem:[#allocation8 + $0x640] sm:$0xf] }
  0x83   :  { %v8171_v22 = vld [vmem:[#allocation8 + $0x65c] sm:$0xf0]  ;;  %3800 = vmatpush.bf16.msra.mxu2 %v6145_v28 }
  0x84   :  { %v8035_v23 = vld [vmem:[#allocation8 + $0x21c] sm:$0xf0]  ;;  %v6401_v30 = vor.u32 %v8171_v22, %v6400_v21 }
  0x85   :  { %v6848_v24 = vld [vmem:[#allocation8 + $0x9c0] sm:$0xf]  ;;  %v5857_v35 = vor.u32 %v8035_v23, %v5856_v20 }
  0x86   :  { %v8283_v25 = vld [vmem:[#allocation8 + $0x9dc] sm:$0xf0]  ;;  %3814 = vmatpush.bf16.msra.mxu3 %v6401_v30 }
  0x87   :  { %v7104_v26 = vld [vmem:[#allocation8 + $0xbc0] sm:$0xf]  ;;  %v6849_v36 = vor.u32 %v8283_v25, %v6848_v24  ;;  %3787 = vmatpush.bf16.msra.mxu1 %v5857_v35 }
  0x88   :  { %v8347_v27 = vld [vmem:[#allocation8 + $0xbdc] sm:$0xf0] }
  0x89   :  { %v6816_v31 = vld [vmem:[#allocation8 + $0x980] sm:$0xf]  ;;  %v7105_v40 = vor.u32 %v8347_v27, %v7104_v26  ;;  %3822 = vmatpush.bf16.msrb.mxu0 %v6849_v36 }
  0x8a   :  { %v6112_v32 = vld [vmem:[#allocation8 + $0x400] sm:$0xf] }
  0x8b   :  { %v8099_v33 = vld [vmem:[#allocation8 + $0x41c] sm:$0xf0]  ;;  %3836 = vmatpush.bf16.msrb.mxu1 %v7105_v40 }
  0x8c   :  { %v6368_v34 = vld [vmem:[#allocation8 + $0x600] sm:$0xf]  ;;  %v6113_v46 = vor.u32 %v8099_v33, %v6112_v32 }
  0x8d   :  { %v8163_v37 = vld [vmem:[#allocation8 + $0x61c] sm:$0xf0] }
  0x8e   :  { %v7360_v38 = vld [vmem:[#allocation8 + $0xdc0] sm:$0xf]  ;;  %v6369_v47 = vor.u32 %v8163_v37, %v6368_v34  ;;  %3801 = vmatpush.bf16.msra.mxu2 %v6113_v46 }
  0x8f   :  { %v8411_v39 = vld [vmem:[#allocation8 + $0xddc] sm:$0xf0] }
  0x90   :  { %v8275_v42 = vld [vmem:[#allocation8 + $0x99c] sm:$0xf0]  ;;  %v7361_v48 = vor.u32 %v8411_v39, %v7360_v38  ;;  %3815 = vmatpush.bf16.msra.mxu3 %v6369_v47 }
  0x91   :  { %v7616_v41 = vld [vmem:[#allocation8 + $0xfc0] sm:$0xf]  ;;  %v6817_v49 = vor.u32 %v8275_v42, %v6816_v31 }
  0x92   :  { %v8475_v43 = vld [vmem:[#allocation8 + $0xfdc] sm:$0xf0]  ;;  %3850 = vmatpush.bf16.msrb.mxu2 %v7361_v48 }
  0x93   :  { %v7072_v44 = vld [vmem:[#allocation8 + $0xb80] sm:$0xf]  ;;  %v7617_v50 = vor.u32 %v8475_v43, %v7616_v41  ;;  %3823 = vmatpush.bf16.msrb.mxu0 %v6817_v49 }
  0x94   :  { %v8339_v45 = vld [vmem:[#allocation8 + $0xb9c] sm:$0xf0] }
  0x95   :  { %v6784_v51 = vld [vmem:[#allocation8 + $0x940] sm:$0xf]  ;;  %v7073_v54 = vor.u32 %v8339_v45, %v7072_v44  ;;  %3864 = vmatpush.bf16.msrb.mxu3 %v7617_v50 }
  0x96   :  { %v7328_v52 = vld [vmem:[#allocation8 + $0xd80] sm:$0xf] }
  0x97   :  { %v8403_v53 = vld [vmem:[#allocation8 + $0xd9c] sm:$0xf0]  ;;  %3837 = vmatpush.bf16.msrb.mxu1 %v7073_v54 }
  0x98   :  { %v8267_v55 = vld [vmem:[#allocation8 + $0x95c] sm:$0xf0]  ;;  %v7329_v60 = vor.u32 %v8403_v53, %v7328_v52 }
  0x99   :  { %v7584_v56 = vld [vmem:[#allocation8 + $0xf80] sm:$0xf]  ;;  %v6785_v61 = vor.u32 %v8267_v55, %v6784_v51 }
  0x9a   :  { %v8467_v57 = vld [vmem:[#allocation8 + $0xf9c] sm:$0xf0]  ;;  %3851 = vmatpush.bf16.msrb.mxu2 %v7329_v60 }
  0x9b   :  { %v7040_v58 = vld [vmem:[#allocation8 + $0xb40] sm:$0xf]  ;;  %v7585_v62 = vor.u32 %v8467_v57, %v7584_v56  ;;  %3824 = vmatpush.bf16.msrb.mxu0 %v6785_v61 }
  0x9c   :  { %v8331_v59 = vld [vmem:[#allocation8 + $0xb5c] sm:$0xf0] }
  0x9d   :  { %v7041_v63 = vor.u32 %v8331_v59, %v7040_v58  ;;  %v6752_v0 = vld [vmem:[#allocation8 + $0x900] sm:$0xf]  ;;  %3865 = vmatpush.bf16.msrb.mxu3 %v7585_v62 }
  0x9e   :  { %v8259_v1 = vld [vmem:[#allocation8 + $0x91c] sm:$0xf0] }
  0x9f   :  { %v7008_v2 = vld [vmem:[#allocation8 + $0xb00] sm:$0xf]  ;;  %v6753_v4 = vor.u32 %v8259_v1, %v6752_v0  ;;  %3838 = vmatpush.bf16.msrb.mxu1 %v7041_v63 }
  0xa0   :  { %v8323_v3 = vld [vmem:[#allocation8 + $0xb1c] sm:$0xf0] }
  0xa1   :  { %v7009_v5 = vor.u32 %v8323_v3, %v7008_v2  ;;  %3825 = vmatpush.bf16.msrb.mxu0 %v6753_v4  ;;  %v7296_v6 = vld [vmem:[#allocation8 + $0xd40] sm:$0xf]  ;;  %v8846_v2 = vld [vmem:[#allocation7] sm:$0xff] }
  0xa2   :  { %v8395_v7 = vld [vmem:[#allocation8 + $0xd5c] sm:$0xf0]  ;;  %v198_v4 = vperm.slane %v8846_v2, 0 }
  0xa3   :  { %3839 = vmatpush.bf16.msrb.mxu1 %v7009_v5  ;;  %v7552_v8 = vld [vmem:[#allocation8 + $0xf40] sm:$0xf]  ;;  %v7297_v9 = vor.u32 %v8395_v7, %v7296_v6  ;;  %v199_v6 = vperm.slane %v8846_v2, 1 }
  0xa4   :  { %v8459_v10 = vld [vmem:[#allocation8 + $0xf5c] sm:$0xf0] }
  0xa5   :  { %v7553_v11 = vor.u32 %v8459_v10, %v7552_v8  ;;  %v6720_v12 = vld [vmem:[#allocation8 + $0x8c0] sm:$0xf]  ;;  %3852 = vmatpush.bf16.msrb.mxu2 %v7297_v9 }
  0xa6   :  { %v8251_v13 = vld [vmem:[#allocation8 + $0x8dc] sm:$0xf0] }
  0xa7   :  { %v6976_v14 = vld [vmem:[#allocation8 + $0xac0] sm:$0xf]  ;;  %v6721_v15 = vor.u32 %v8251_v13, %v6720_v12  ;;  %3866 = vmatpush.bf16.msrb.mxu3 %v7553_v11 }
  0xa8   :  { %v8315_v16 = vld [vmem:[#allocation8 + $0xadc] sm:$0xf0] }
  0xa9   :  { %v6977_v17 = vor.u32 %v8315_v16, %v6976_v14  ;;  %v7264_v18 = vld [vmem:[#allocation8 + $0xd00] sm:$0xf]  ;;  %3826 = vmatpush.bf16.msrb.mxu0 %v6721_v15  ;;  %v8023_v15 = vld [vmem:[#allocation8 + $0x1c4] sm:$0xf] }
  0xaa   :  { %v8387_v19 = vld [vmem:[#allocation8 + $0xd1c] sm:$0xf0]  ;;  %v5826_v16 = vld [vmem:[#allocation8 + $0x1e0] sm:$0xf0] }
  0xab   :  { %v7265_v20 = vor.u32 %v8387_v19, %v7264_v18  ;;  %v7520_v21 = vld [vmem:[#allocation8 + $0xf00] sm:$0xf]  ;;  %3840 = vmatpush.bf16.msrb.mxu1 %v6977_v17  ;;  %v200_v18 = vperm.slane %v8846_v2, 2 }
  0xac   :  { %v8451_v22 = vld [vmem:[#allocation8 + $0xf1c] sm:$0xf0] }
  0xad   :  { %v7521_v23 = vor.u32 %v8451_v22, %v7520_v21  ;;  %v6688_v24 = vld [vmem:[#allocation8 + $0x880] sm:$0xf]  ;;  %3853 = vmatpush.bf16.msrb.mxu2 %v7265_v20  ;;  %v8087_v20 = vld [vmem:[#allocation8 + $0x3c4] sm:$0xf]  ;;  %v201_v22 = vperm.slane %v8846_v2, 3 }
  0xae   :  { %v8243_v25 = vld [vmem:[#allocation8 + $0x89c] sm:$0xf0]  ;;  %v6082_v21 = vld [vmem:[#allocation8 + $0x3e0] sm:$0xf0] }
  0xaf   :  { %v6944_v26 = vld [vmem:[#allocation8 + $0xa80] sm:$0xf]  ;;  %v6689_v27 = vor.u32 %v8243_v25, %v6688_v24  ;;  %3867 = vmatpush.bf16.msrb.mxu3 %v7521_v23  ;;  %v5829_v25 = vor.u32 %v8023_v15, %v5826_v16  ;;  %v5954_v15 = vld [vmem:[#allocation8 + $0x2e0] sm:$0xf0] }
  0xb0   :  { %v8307_v28 = vld [vmem:[#allocation8 + $0xa9c] sm:$0xf0] }
  0xb1   :  { %v6945_v29 = vor.u32 %v8307_v28, %v6944_v26  ;;  %v7232_v30 = vld [vmem:[#allocation8 + $0xcc0] sm:$0xf]  ;;  %3827 = vmatpush.bf16.msrb.mxu0 %v6689_v27  ;;  %v6085_v27 = vor.u32 %v8087_v20, %v6082_v21  ;;  %v8015_v28 = vld [vmem:[#allocation8 + $0x184] sm:$0xf] }
  0xb2   :  { %v8379_v31 = vld [vmem:[#allocation8 + $0xcdc] sm:$0xf0]  ;;  %v6242_v20 = vld [vmem:[#allocation8 + $0x520] sm:$0xf0] }
  0xb3   :  { %v7488_v32 = vld [vmem:[#allocation8 + $0xec0] sm:$0xf]  ;;  %v7233_v33 = vor.u32 %v8379_v31, %v7232_v30  ;;  %3841 = vmatpush.bf16.msrb.mxu1 %v6945_v29  ;;  %v5794_v29 = vld [vmem:[#allocation8 + $0x1a0] sm:$0xf0] }
  0xb4   :  { %v8443_v34 = vld [vmem:[#allocation8 + $0xedc] sm:$0xf0]  ;;  %v8191_v21 = vld [vmem:[#allocation8 + $0x704] sm:$0xf] }
  0xb5   :  { %v7489_v35 = vor.u32 %v8443_v34, %v7488_v32  ;;  %v6656_v36 = vld [vmem:[#allocation8 + $0x840] sm:$0xf]  ;;  %3854 = vmatpush.bf16.msrb.mxu2 %v7233_v33  ;;  %v8079_v32 = vld [vmem:[#allocation8 + $0x384] sm:$0xf] }
  0xb6   :  { %v8235_v37 = vld [vmem:[#allocation8 + $0x85c] sm:$0xf0]  ;;  %v6050_v33 = vld [vmem:[#allocation8 + $0x3a0] sm:$0xf0] }
  0xb7   :  { %v6657_v38 = vor.u32 %v8235_v37, %v6656_v36  ;;  %v6912_v39 = vld [vmem:[#allocation8 + $0xa40] sm:$0xf]  ;;  %3868 = vmatpush.bf16.msrb.mxu3 %v7489_v35 }
  0xb8   :  { %v8299_v40 = vld [vmem:[#allocation8 + $0xa5c] sm:$0xf0] }
  0xb9   :  { %v6913_v42 = vor.u32 %v8299_v40, %v6912_v39  ;;  %v7200_v41 = vld [vmem:[#allocation8 + $0xc80] sm:$0xf]  ;;  %3828 = vmatpush.bf16.msrb.mxu0 %v6657_v38  ;;  %v5797_v38 = vor.u32 %v8015_v28, %v5794_v29  ;;  %v8151_v39 = vld [vmem:[#allocation8 + $0x5c4] sm:$0xf]  ;;  %v202_v28 = vperm.slane %v8846_v2, 4 }
  0xba   :  { %v8371_v43 = vld [vmem:[#allocation8 + $0xc9c] sm:$0xf0]  ;;  %v6338_v40 = vld [vmem:[#allocation8 + $0x5e0] sm:$0xf0] }
  0xbb   :  { %v7456_v44 = vld [vmem:[#allocation8 + $0xe80] sm:$0xf]  ;;  %v7201_v45 = vor.u32 %v8371_v43, %v7200_v41  ;;  %3842 = vmatpush.bf16.msrb.mxu1 %v6913_v42  ;;  %v8215_v42 = vld [vmem:[#allocation8 + $0x7c4] sm:$0xf]  ;;  %v6053_v43 = vor.u32 %v8079_v32, %v6050_v33  ;;  %v203_v33 = vperm.slane %v8846_v2, 5 }
  0xbc   :  { %v8435_v46 = vld [vmem:[#allocation8 + $0xe9c] sm:$0xf0]  ;;  %v5922_v32 = vld [vmem:[#allocation8 + $0x2a0] sm:$0xf0] }
  0xbd   :  { %v7457_v47 = vor.u32 %v8435_v46, %v7456_v44  ;;  %v6624_v48 = vld [vmem:[#allocation8 + $0x800] sm:$0xf]  ;;  %3855 = vmatpush.bf16.msrb.mxu2 %v7201_v45  ;;  %v6594_v44 = vld [vmem:[#allocation8 + $0x7e0] sm:$0xf0] }
  0xbe   :  { %v8227_v49 = vld [vmem:[#allocation8 + $0x81c] sm:$0xf0]  ;;  %v8007_v45 = vld [vmem:[#allocation8 + $0x144] sm:$0xf] }
  0xbf   :  { %v6880_v50 = vld [vmem:[#allocation8 + $0xa00] sm:$0xf]  ;;  %v6625_v51 = vor.u32 %v8227_v49, %v6624_v48  ;;  %3869 = vmatpush.bf16.msrb.mxu3 %v7457_v47  ;;  %v549_v3 = vpop.f32.mrf.mxu0  ;;  %v563_v5 = vpop.f32.mrf.mxu1  ;;  %v5762_v46 = vld [vmem:[#allocation8 + $0x160] sm:$0xf0] }
  0xc0   :  { %v8291_v52 = vld [vmem:[#allocation8 + $0xa1c] sm:$0xf0]  ;;  %v550_v7 = vadd.f32 %v549_v3, %v198_v4  ;;  %v564_v8 = vadd.f32 %v563_v5, %v199_v6  ;;  %v8071_v49 = vld [vmem:[#allocation8 + $0x344] sm:$0xf] }
  0xc1   :  { %v6881_v53 = vor.u32 %v8291_v52, %v6880_v50  ;;  %v7168_v54 = vld [vmem:[#allocation8 + $0xc40] sm:$0xf]  ;;  %3829 = vmatpush.bf16.msrb.mxu0 %v6625_v51  ;;  %v6018_v50 = vld [vmem:[#allocation8 + $0x360] sm:$0xf0] }
  0xc2   :  { %v8363_v55 = vld [vmem:[#allocation8 + $0xc5c] sm:$0xf0]  ;;  %v652_v12 = vmax.f32 %v550_v7, 0.0  ;;  %v653_v17 = vmax.f32 %v564_v8, 0.0  ;;  %v5986_v3 = vld [vmem:[#allocation8 + $0x320] sm:$0xf0] }
  0xc3   :  { %v7424_v56 = vld [vmem:[#allocation8 + $0xe40] sm:$0xf]  ;;  %3843 = vmatpush.bf16.msrb.mxu1 %v6881_v53  ;;  %v7169_v58 = vor.u32 %v8363_v55, %v7168_v54  ;;  %v6341_v53 = vor.u32 %v8151_v39, %v6338_v40  ;;  %v6597_v55 = vor.u32 %v8215_v42, %v6594_v44  ;;  %v8135_v7 = vld [vmem:[#allocation8 + $0x544] sm:$0xf] }
  0xc4   :  { %v8427_v57 = vld [vmem:[#allocation8 + $0xe5c] sm:$0xf0]  ;;  %v6274_v8 = vld [vmem:[#allocation8 + $0x560] sm:$0xf0] }
  0xc5   :  { %v7425_v59 = vor.u32 %v8427_v57, %v7424_v56  ;;  %3856 = vmatpush.bf16.msrb.mxu2 %v7169_v58  ;;  %v7136_v60 = vld [vmem:[#allocation8 + $0xc00] sm:$0xf]  ;;  %v5765_v56 = vor.u32 %v8007_v45, %v5762_v46  ;;  %v8143_v57 = vld [vmem:[#allocation8 + $0x584] sm:$0xf]  ;;  %v6277_v16 = vor.u32 %v8135_v7, %v6274_v8  ;;  %v204_v8 = vperm.slane %v8846_v2, 6 }
  0xc6   :  { %v8355_v61 = vld [vmem:[#allocation8 + $0xc1c] sm:$0xf0]  ;;  %v6306_v58 = vld [vmem:[#allocation8 + $0x5a0] sm:$0xf0] }
  0xc7   :  { %3870 = vmatpush.bf16.msrb.mxu3 %v7425_v59  ;;  %v7137_v62 = vor.u32 %v8355_v61, %v7136_v60  ;;  %v7392_v63 = vld [vmem:[#allocation8 + $0xe00] sm:$0xf]  ;;  %v591_v10 = vpop.f32.mrf.mxu3  ;;  %v551_v11 = vpop.f32.mrf.mxu0  ;;  %v8207_v59 = vld [vmem:[#allocation8 + $0x784] sm:$0xf]  ;;  %v6021_v61 = vor.u32 %v8071_v49, %v6018_v50 }
  0xc8   :  { %v8419_v0 = vld [vmem:[#allocation8 + $0xe1c] sm:$0xf0]  ;;  %v577_v9 = vpop.f32.mrf.mxu2  ;;  %v552_v13 = vadd.f32 %v551_v11, %v198_v4  ;;  %v565_v14 = vpop.f32.mrf.mxu1  ;;  %v592_v34 = vadd.f32 %v591_v10, %v201_v22  ;;  %v6309_v4 = vor.u32 %v8143_v57, %v6306_v58  ;;  %v6530_v11 = vld [vmem:[#allocation8 + $0x760] sm:$0xf0] }
  0xc9   :  { %v7393_v1 = vor.u32 %v8419_v0, %v7392_v63  ;;  %3857 = vmatpush.bf16.msrb.mxu2 %v7137_v62  ;;  %v566_v19 = vadd.f32 %v565_v14, %v199_v6  ;;  %v578_v30 = vadd.f32 %v577_v9, %v200_v18  ;;  %v6562_v62 = vld [vmem:[#allocation8 + $0x7a0] sm:$0xf0] }
  0xca   :  { %v660_v23 = vmax.f32 %v552_v13, 0.0  ;;  %v655_v51 = vmax.f32 %v592_v34, 0.0  ;;  %v7999_v63 = vld [vmem:[#allocation8 + $0x104] sm:$0xf]  ;;  %v6565_v5 = vor.u32 %v8207_v59, %v6562_v62 }
  0xcb   :  { %3871 = vmatpush.bf16.msrb.mxu3 %v7393_v1  ;;  %v661_v24 = vmax.f32 %v566_v19, 0.0  ;;  %v654_v47 = vmax.f32 %v578_v30, 0.0  ;;  %v5730_v0 = vld [vmem:[#allocation8 + $0x120] sm:$0xf0] }
  0xcc   :  { %v8852_v26 = vpack.c.bf16 %v660_v23, %v652_v12  ;;  %v8063_v1 = vld [vmem:[#allocation8 + $0x304] sm:$0xf]  ;;  %v5733_v6 = vor.u32 %v7999_v63, %v5730_v0 }
  0xcd   :  { %v8854_v31 = vpack.c.bf16 %v661_v24, %v653_v17  ;;  %v8199_v9 = vld [vmem:[#allocation8 + $0x744] sm:$0xf]  ;;  %v5989_v10 = vor.u32 %v8063_v1, %v5986_v3 }
  0xce   :  { %3774 = vmatmul.bf16.vlgmr.msra.gmra.mxu0 %v8852_v26  ;;  %v7991_v12 = vld [vmem:[#allocation8 + $0xc4] sm:$0xf]  ;;  %v6533_v17 = vor.u32 %v8199_v9, %v6530_v11 }
  0xcf   :  { %v593_v37 = vpop.f32.mrf.mxu3  ;;  %3788 = vmatmul.bf16.vlgmr.msra.gmra.mxu1 %v8854_v31  ;;  %3878 = vmatpush.bf16.msra.mxu0 %v5829_v25  ;;  %v5698_v13 = vld [vmem:[#allocation8 + $0xe0] sm:$0xf0] }
  0xd0   :  { %v579_v35 = vpop.f32.mrf.mxu2  ;;  %v594_v41 = vadd.f32 %v593_v37, %v201_v22  ;;  %3892 = vmatpush.bf16.msra.mxu1 %v6085_v27  ;;  %v8055_v14 = vld [vmem:[#allocation8 + $0x2c4] sm:$0xf] }
  0xd1   :  { %v580_v36 = vadd.f32 %v579_v35, %v200_v18  ;;  %v5701_v18 = vor.u32 %v7991_v12, %v5698_v13  ;;  %v8127_v19 = vld [vmem:[#allocation8 + $0x504] sm:$0xf]  ;;  %v5957_v23 = vor.u32 %v8055_v14, %v5954_v15  ;;  %v205_v13 = vperm.slane %v8846_v2, 7 }
  0xd2   :  { %v663_v52 = vmax.f32 %v594_v41, 0.0  ;;  %v6498_v24 = vld [vmem:[#allocation8 + $0x720] sm:$0xf0]  ;;  %v6245_v34 = vor.u32 %v8127_v19, %v6242_v20 }
  0xd3   :  { %v662_v48 = vmax.f32 %v580_v36, 0.0  ;;  %3879 = vmatpush.bf16.msra.mxu0 %v5797_v38  ;;  %v7983_v25 = vld [vmem:[#allocation8 + $0x84] sm:$0xf]  ;;  %v6501_v35 = vor.u32 %v8191_v21, %v6498_v24 }
  0xd4   :  { %v8860_v60 = vpack.c.bf16 %v663_v52, %v655_v51  ;;  %3893 = vmatpush.bf16.msra.mxu1 %v6053_v43  ;;  %v5666_v27 = vld [vmem:[#allocation8 + $0xa0] sm:$0xf0] }
  0xd5   :  { %v8858_v54 = vpack.c.bf16 %v662_v48, %v654_v47  ;;  %v8047_v30 = vld [vmem:[#allocation8 + $0x284] sm:$0xf]  ;;  %v5669_v36 = vor.u32 %v7983_v25, %v5666_v27 }
  0xd6   :  { %3816 = vmatmul.bf16.vlgmr.msra.gmra.mxu3 %v8860_v60  ;;  %v8119_v37 = vld [vmem:[#allocation8 + $0x4c4] sm:$0xf]  ;;  %v5925_v40 = vor.u32 %v8047_v30, %v5922_v32 }
  0xd7   :  { %3802 = vmatmul.bf16.vlgmr.msra.gmra.mxu2 %v8858_v54  ;;  %3920 = vmatpush.bf16.msra.mxu3 %v6597_v55  ;;  %v6210_v38 = vld [vmem:[#allocation8 + $0x4e0] sm:$0xf0] }
  0xd8   :  { %3906 = vmatpush.bf16.msra.mxu2 %v6341_v53  ;;  %3880 = vmatpush.bf16.msra.mxu0 %v5765_v56  ;;  %v8183_v39 = vld [vmem:[#allocation8 + $0x6c4] sm:$0xf]  ;;  %v6213_v48 = vor.u32 %v8119_v37, %v6210_v38 }
  0xd9   :  { %3894 = vmatpush.bf16.msra.mxu1 %v6021_v61  ;;  %v6466_v42 = vld [vmem:[#allocation8 + $0x6e0] sm:$0xf0] }
  0xda   :  { %v7975_v41 = vld [vmem:[#allocation8 + $0x44] sm:$0xf]  ;;  %v6469_v52 = vor.u32 %v8183_v39, %v6466_v42 }
  0xdb   :  { %3921 = vmatpush.bf16.msra.mxu3 %v6565_v5  ;;  %v5634_v43 = vld [vmem:[#allocation8 + $0x60] sm:$0xf0] }
  0xdc   :  { %3907 = vmatpush.bf16.msra.mxu2 %v6309_v4  ;;  %3881 = vmatpush.bf16.msra.mxu0 %v5733_v6  ;;  %v8039_v45 = vld [vmem:[#allocation8 + $0x244] sm:$0xf]  ;;  %v5637_v53 = vor.u32 %v7975_v41, %v5634_v43 }
  0xdd   :  { %3895 = vmatpush.bf16.msra.mxu1 %v5989_v10  ;;  %v5890_v46 = vld [vmem:[#allocation8 + $0x260] sm:$0xf0] }
  0xde   :  { %v8111_v49 = vld [vmem:[#allocation8 + $0x484] sm:$0xf]  ;;  %v5893_v61 = vor.u32 %v8039_v45, %v5890_v46 }
  0xdf   :  { %v605_v22 = vpop.f32.mrf.mxu0  ;;  %v619_v29 = vpop.f32.mrf.mxu1  ;;  %3922 = vmatpush.bf16.msra.mxu3 %v6533_v17  ;;  %v6178_v50 = vld [vmem:[#allocation8 + $0x4a0] sm:$0xf0] }
  0xe0   :  { %3908 = vmatpush.bf16.msra.mxu2 %v6277_v16  ;;  %3882 = vmatpush.bf16.msra.mxu0 %v5701_v18  ;;  %v606_v44 = vadd.f32 %v605_v22, %v202_v28  ;;  %v620_v47 = vadd.f32 %v619_v29, %v203_v33  ;;  %v8175_v55 = vld [vmem:[#allocation8 + $0x684] sm:$0xf]  ;;  %v6181_v10 = vor.u32 %v8111_v49, %v6178_v50 }
  0xe1   :  { %3896 = vmatpush.bf16.msra.mxu1 %v5957_v23  ;;  %v6434_v56 = vld [vmem:[#allocation8 + $0x6a0] sm:$0xf0] }
  0xe2   :  { %v7967_v57 = vld [vmem:[#allocation8 + $0x4] sm:$0xf]  ;;  %v656_v1 = vmax.f32 %v606_v44, 0.0  ;;  %v657_v7 = vmax.f32 %v620_v47, 0.0  ;;  %v6437_v15 = vor.u32 %v8175_v55, %v6434_v56 }
  0xe3   :  { %3923 = vmatpush.bf16.msra.mxu3 %v6501_v35  ;;  %v5602_v62 = vld [vmem:[#allocation8 + $0x20] sm:$0xf0] }
  0xe4   :  { %3909 = vmatpush.bf16.msra.mxu2 %v6245_v34  ;;  %3883 = vmatpush.bf16.msra.mxu0 %v5669_v36  ;;  %v8031_v63 = vld [vmem:[#allocation8 + $0x204] sm:$0xf]  ;;  %v5605_v16 = vor.u32 %v7967_v57, %v5602_v62 }
  0xe5   :  { %3897 = vmatpush.bf16.msra.mxu1 %v5925_v40  ;;  %v5858_v0 = vld [vmem:[#allocation8 + $0x220] sm:$0xf0] }
  0xe6   :  { %v8279_v5 = vld [vmem:[#allocation8 + $0x9c4] sm:$0xf]  ;;  %v5861_v20 = vor.u32 %v8031_v63, %v5858_v0 }
  0xe7   :  { %v633_v51 = vpop.f32.mrf.mxu2  ;;  %v647_v58 = vpop.f32.mrf.mxu3  ;;  %v6850_v6 = vld [vmem:[#allocation8 + $0x9e0] sm:$0xf0]  ;;  %3924 = vmatpush.bf16.msra.mxu3 %v6469_v52 }
  0xe8   :  { %v607_v59 = vpop.f32.mrf.mxu0  ;;  %v621_v4 = vpop.f32.mrf.mxu1  ;;  %3910 = vmatpush.bf16.msra.mxu2 %v6213_v48  ;;  %v8343_v11 = vld [vmem:[#allocation8 + $0xbc4] sm:$0xf]  ;;  %3884 = vmatpush.bf16.msra.mxu0 %v5637_v53  ;;  %v6853_v24 = vor.u32 %v8279_v5, %v6850_v6  ;;  %v634_v25 = vadd.f32 %v633_v51, %v204_v8 }
  0xe9   :  { %v608_v3 = vadd.f32 %v607_v59, %v202_v28  ;;  %v622_v9 = vadd.f32 %v621_v4, %v203_v33  ;;  %v7106_v12 = vld [vmem:[#allocation8 + $0xbe0] sm:$0xf0]  ;;  %3898 = vmatpush.bf16.msra.mxu1 %v5893_v61  ;;  %v648_v33 = vadd.f32 %v647_v58, %v205_v13 }
  0xea   :  { %v8103_v17 = vld [vmem:[#allocation8 + $0x444] sm:$0xf]  ;;  %v7109_v2 = vor.u32 %v8343_v11, %v7106_v12  ;;  %v658_v49 = vmax.f32 %v634_v25, 0.0 }
  0xeb   :  { %v664_v14 = vmax.f32 %v608_v3, 0.0  ;;  %v6146_v18 = vld [vmem:[#allocation8 + $0x460] sm:$0xf0]  ;;  %v665_v19 = vmax.f32 %v622_v9, 0.0  ;;  %3925 = vmatpush.bf16.msra.mxu3 %v6437_v15  ;;  %v659_v56 = vmax.f32 %v648_v33, 0.0 }
  0xec   :  { %v8167_v21 = vld [vmem:[#allocation8 + $0x644] sm:$0xf]  ;;  %3911 = vmatpush.bf16.msra.mxu2 %v6181_v10  ;;  %v6149_v28 = vor.u32 %v8103_v17, %v6146_v18  ;;  %3885 = vmatpush.bf16.msra.mxu0 %v5605_v16 }
  0xed   :  { %v6402_v22 = vld [vmem:[#allocation8 + $0x660] sm:$0xf0]  ;;  %v8868_v23 = vpack.c.bf16 %v664_v14, %v656_v1  ;;  %v8870_v27 = vpack.c.bf16 %v665_v19, %v657_v7  ;;  %3899 = vmatpush.bf16.msra.mxu1 %v5861_v20 }
  0xee   :  { %v8271_v29 = vld [vmem:[#allocation8 + $0x984] sm:$0xf]  ;;  %v6405_v35 = vor.u32 %v8167_v21, %v6402_v22 }
  0xef   :  { %v6818_v30 = vld [vmem:[#allocation8 + $0x9a0] sm:$0xf0]  ;;  %v635_v34 = vpop.f32.mrf.mxu2  ;;  %v649_v40 = vpop.f32.mrf.mxu3  ;;  %3830 = vmatmul.bf16.vlgmr.msrb.gmra.mxu0 %v8868_v23  ;;  %3844 = vmatmul.bf16.vlgmr.msrb.gmra.mxu1 %v8870_v27 }
  0xf0   :  { %v8335_v32 = vld [vmem:[#allocation8 + $0xb84] sm:$0xf]  ;;  %v636_v39 = vadd.f32 %v635_v34, %v204_v8  ;;  %v650_v44 = vadd.f32 %v649_v40, %v205_v13  ;;  %3934 = vmatpush.bf16.msrb.mxu0 %v6853_v24  ;;  %v6821_v45 = vor.u32 %v8271_v29, %v6818_v30  ;;  %3912 = vmatpush.bf16.msra.mxu2 %v6149_v28 }
  0xf1   :  { %v7074_v36 = vld [vmem:[#allocation8 + $0xba0] sm:$0xf0]  ;;  %3948 = vmatpush.bf16.msrb.mxu1 %v7109_v2  ;;  %3926 = vmatpush.bf16.msra.mxu3 %v6405_v35 }
  0xf2   :  { %v8095_v37 = vld [vmem:[#allocation8 + $0x404] sm:$0xf]  ;;  %v666_v50 = vmax.f32 %v636_v39, 0.0  ;;  %v7077_v51 = vor.u32 %v8335_v32, %v7074_v36  ;;  %v667_v57 = vmax.f32 %v650_v44, 0.0 }
  0xf3   :  { %v6114_v38 = vld [vmem:[#allocation8 + $0x420] sm:$0xf0] }
  0xf4   :  { %v8159_v42 = vld [vmem:[#allocation8 + $0x604] sm:$0xf]  ;;  %v6117_v52 = vor.u32 %v8095_v37, %v6114_v38  ;;  %v8874_v62 = vpack.c.bf16 %v666_v50, %v658_v49  ;;  %v8876_v0 = vpack.c.bf16 %v667_v57, %v659_v56  ;;  %3935 = vmatpush.bf16.msrb.mxu0 %v6821_v45 }
  0xf5   :  { %v6370_v41 = vld [vmem:[#allocation8 + $0x620] sm:$0xf0]  ;;  %3949 = vmatpush.bf16.msrb.mxu1 %v7077_v51 }
  0xf6   :  { %v8407_v43 = vld [vmem:[#allocation8 + $0xdc4] sm:$0xf]  ;;  %v6373_v58 = vor.u32 %v8159_v42, %v6370_v41  ;;  %3913 = vmatpush.bf16.msra.mxu2 %v6117_v52  ;;  %3872 = vmatmul.bf16.vlgmr.msrb.gmra.mxu3 %v8876_v0 }
  0xf7   :  { %v7362_v46 = vld [vmem:[#allocation8 + $0xde0] sm:$0xf0]  ;;  %3858 = vmatmul.bf16.vlgmr.msrb.gmra.mxu2 %v8874_v62 }
  0xf8   :  { %v8471_v47 = vld [vmem:[#allocation8 + $0xfc4] sm:$0xf]  ;;  %v7365_v63 = vor.u32 %v8407_v43, %v7362_v46  ;;  %3927 = vmatpush.bf16.msra.mxu3 %v6373_v58 }
  0xf9   :  { %v7618_v48 = vld [vmem:[#allocation8 + $0xfe0] sm:$0xf0] }
  0xfa   :  { %v8263_v53 = vld [vmem:[#allocation8 + $0x944] sm:$0xf]  ;;  %v7621_v1 = vor.u32 %v8471_v47, %v7618_v48  ;;  %3962 = vmatpush.bf16.msrb.mxu2 %v7365_v63 }
  0xfb   :  { %v6786_v55 = vld [vmem:[#allocation8 + $0x960] sm:$0xf0] }
  0xfc   :  { %v8327_v59 = vld [vmem:[#allocation8 + $0xb44] sm:$0xf]  ;;  %v6789_v3 = vor.u32 %v8263_v53, %v6786_v55  ;;  %3976 = vmatpush.bf16.msrb.mxu3 %v7621_v1 }
  0xfd   :  { %v7042_v61 = vld [vmem:[#allocation8 + $0xb60] sm:$0xf0] }
  0xfe   :  { %v8399_v4 = vld [vmem:[#allocation8 + $0xd84] sm:$0xf]  ;;  %v7045_v7 = vor.u32 %v8327_v59, %v7042_v61  ;;  %3936 = vmatpush.bf16.msrb.mxu0 %v6789_v3 }
  0xff   :  { %v7330_v5 = vld [vmem:[#allocation8 + $0xda0] sm:$0xf0]  ;;  %3886 = vmatmul.bf16.vlgmr.msra.gmra.mxu0 %v8852_v26  ;;  %3900 = vmatmul.bf16.vlgmr.msra.gmra.mxu1 %v8854_v31 }
 0x100   :  { %v8463_v6 = vld [vmem:[#allocation8 + $0xf84] sm:$0xf]  ;;  %v7333_v13 = vor.u32 %v8399_v4, %v7330_v5  ;;  %3950 = vmatpush.bf16.msrb.mxu1 %v7045_v7  ;;  %v5832_v5 = vld [vmem:[#allocation8 + $0x1c8] sm:$0xf] }
 0x101   :  { %v7586_v8 = vld [vmem:[#allocation8 + $0xfa0] sm:$0xf0]  ;;  %v8028_v7 = vld [vmem:[#allocation8 + $0x1e4] sm:$0xf0] }
 0x102   :  { %v8255_v9 = vld [vmem:[#allocation8 + $0x904] sm:$0xf]  ;;  %v7589_v14 = vor.u32 %v8463_v6, %v7586_v8  ;;  %3963 = vmatpush.bf16.msrb.mxu2 %v7333_v13  ;;  %v6088_v8 = vld [vmem:[#allocation8 + $0x3c8] sm:$0xf] }
 0x103   :  { %v6754_v10 = vld [vmem:[#allocation8 + $0x920] sm:$0xf0] }
 0x104   :  { %v8319_v11 = vld [vmem:[#allocation8 + $0xb04] sm:$0xf]  ;;  %v6757_v15 = vor.u32 %v8255_v9, %v6754_v10  ;;  %3977 = vmatpush.bf16.msrb.mxu3 %v7589_v14  ;;  %v8092_v9 = vld [vmem:[#allocation8 + $0x3e4] sm:$0xf0] }
 0x105   :  { %v7010_v12 = vld [vmem:[#allocation8 + $0xb20] sm:$0xf0] }
 0x106   :  { %v8391_v16 = vld [vmem:[#allocation8 + $0xd44] sm:$0xf]  ;;  %v7013_v18 = vor.u32 %v8319_v11, %v7010_v12  ;;  %3937 = vmatpush.bf16.msrb.mxu0 %v6757_v15  ;;  %3928 = vmatmul.bf16.vlgmr.msra.gmra.mxu3 %v8860_v60 }
 0x107   :  { %v7298_v17 = vld [vmem:[#allocation8 + $0xd60] sm:$0xf0]  ;;  %3914 = vmatmul.bf16.vlgmr.msra.gmra.mxu2 %v8858_v54 }
 0x108   :  { %v8455_v19 = vld [vmem:[#allocation8 + $0xf44] sm:$0xf]  ;;  %v7301_v2 = vor.u32 %v8391_v16, %v7298_v17  ;;  %3951 = vmatpush.bf16.msrb.mxu1 %v7013_v18  ;;  %v5833_v17 = vor.u32 %v8028_v7, %v5832_v5  ;;  %v6089_v18 = vor.u32 %v8092_v9, %v6088_v8  ;;  %v5704_v5 = vld [vmem:[#allocation8 + $0xc8] sm:$0xf] }
 0x109   :  { %v7554_v20 = vld [vmem:[#allocation8 + $0xf60] sm:$0xf0]  ;;  %v5960_v7 = vld [vmem:[#allocation8 + $0x2c8] sm:$0xf] }
 0x10a   :  { %v8247_v21 = vld [vmem:[#allocation8 + $0x8c4] sm:$0xf]  ;;  %v7557_v28 = vor.u32 %v8455_v19, %v7554_v20  ;;  %3964 = vmatpush.bf16.msrb.mxu2 %v7301_v2  ;;  %v5800_v19 = vld [vmem:[#allocation8 + $0x188] sm:$0xf] }
 0x10b   :  { %v6722_v22 = vld [vmem:[#allocation8 + $0x8e0] sm:$0xf0]  ;;  %v8060_v8 = vld [vmem:[#allocation8 + $0x2e4] sm:$0xf0] }
 0x10c   :  { %v8311_v24 = vld [vmem:[#allocation8 + $0xac4] sm:$0xf]  ;;  %v6725_v32 = vor.u32 %v8247_v21, %v6722_v22  ;;  %3978 = vmatpush.bf16.msrb.mxu3 %v7557_v28  ;;  %v8020_v21 = vld [vmem:[#allocation8 + $0x1a4] sm:$0xf0] }
 0x10d   :  { %v6978_v25 = vld [vmem:[#allocation8 + $0xae0] sm:$0xf0]  ;;  %v6056_v22 = vld [vmem:[#allocation8 + $0x388] sm:$0xf] }
 0x10e   :  { %v8383_v29 = vld [vmem:[#allocation8 + $0xd04] sm:$0xf]  ;;  %v6981_v33 = vor.u32 %v8311_v24, %v6978_v25  ;;  %3938 = vmatpush.bf16.msrb.mxu0 %v6725_v32  ;;  %v8084_v24 = vld [vmem:[#allocation8 + $0x3a4] sm:$0xf0] }
 0x10f   :  { %v7266_v30 = vld [vmem:[#allocation8 + $0xd20] sm:$0xf0]  ;;  %v6344_v32 = vld [vmem:[#allocation8 + $0x5c8] sm:$0xf] }
 0x110   :  { %v8447_v34 = vld [vmem:[#allocation8 + $0xf04] sm:$0xf]  ;;  %v7269_v40 = vor.u32 %v8383_v29, %v7266_v30  ;;  %3952 = vmatpush.bf16.msrb.mxu1 %v6981_v33  ;;  %v8156_v33 = vld [vmem:[#allocation8 + $0x5e4] sm:$0xf0] }
 0x111   :  { %v7522_v35 = vld [vmem:[#allocation8 + $0xf20] sm:$0xf0] }
 0x112   :  { %v8239_v36 = vld [vmem:[#allocation8 + $0x884] sm:$0xf]  ;;  %v7525_v42 = vor.u32 %v8447_v34, %v7522_v35  ;;  %3965 = vmatpush.bf16.msrb.mxu2 %v7269_v40  ;;  %v5801_v34 = vor.u32 %v8020_v21, %v5800_v19  ;;  %v6057_v35 = vor.u32 %v8084_v24, %v6056_v22  ;;  %v8012_v40 = vld [vmem:[#allocation8 + $0x164] sm:$0xf0] }
 0x113   :  { %v6690_v37 = vld [vmem:[#allocation8 + $0x8a0] sm:$0xf0]  ;;  %v5928_v19 = vld [vmem:[#allocation8 + $0x288] sm:$0xf] }
 0x114   :  { %v8303_v38 = vld [vmem:[#allocation8 + $0xa84] sm:$0xf]  ;;  %v6693_v44 = vor.u32 %v8239_v36, %v6690_v37  ;;  %3979 = vmatpush.bf16.msrb.mxu3 %v7525_v42  ;;  %v6600_v36 = vld [vmem:[#allocation8 + $0x7c8] sm:$0xf] }
 0x115   :  { %v6946_v39 = vld [vmem:[#allocation8 + $0xaa0] sm:$0xf0]  ;;  %v8220_v37 = vld [vmem:[#allocation8 + $0x7e4] sm:$0xf0] }
 0x116   :  { %v8375_v41 = vld [vmem:[#allocation8 + $0xcc4] sm:$0xf]  ;;  %v6949_v45 = vor.u32 %v8303_v38, %v6946_v39  ;;  %3939 = vmatpush.bf16.msrb.mxu0 %v6693_v44  ;;  %v5768_v38 = vld [vmem:[#allocation8 + $0x148] sm:$0xf]  ;;  %v6345_v44 = vor.u32 %v8156_v33, %v6344_v32 }
 0x117   :  { %v7234_v43 = vld [vmem:[#allocation8 + $0xce0] sm:$0xf0]  ;;  %v6024_v42 = vld [vmem:[#allocation8 + $0x348] sm:$0xf] }
 0x118   :  { %v8439_v46 = vld [vmem:[#allocation8 + $0xec4] sm:$0xf]  ;;  %v7237_v52 = vor.u32 %v8375_v41, %v7234_v43  ;;  %3953 = vmatpush.bf16.msrb.mxu1 %v6949_v45  ;;  %v8076_v41 = vld [vmem:[#allocation8 + $0x364] sm:$0xf0]  ;;  %v6601_v45 = vor.u32 %v8220_v37, %v6600_v36 }
 0x119   :  { %v7490_v47 = vld [vmem:[#allocation8 + $0xee0] sm:$0xf0]  ;;  %v6216_v24 = vld [vmem:[#allocation8 + $0x4c8] sm:$0xf] }
 0x11a   :  { %v8231_v48 = vld [vmem:[#allocation8 + $0x844] sm:$0xf]  ;;  %v7493_v53 = vor.u32 %v8439_v46, %v7490_v47  ;;  %3966 = vmatpush.bf16.msrb.mxu2 %v7237_v52  ;;  %v6312_v46 = vld [vmem:[#allocation8 + $0x588] sm:$0xf] }
 0x11b   :  { %v6658_v49 = vld [vmem:[#allocation8 + $0x860] sm:$0xf0]  ;;  %v8148_v47 = vld [vmem:[#allocation8 + $0x5a4] sm:$0xf0] }
 0x11c   :  { %v8295_v50 = vld [vmem:[#allocation8 + $0xa44] sm:$0xf]  ;;  %v6661_v58 = vor.u32 %v8231_v48, %v6658_v49  ;;  %3980 = vmatpush.bf16.msrb.mxu3 %v7493_v53  ;;  %v5769_v48 = vor.u32 %v8012_v40, %v5768_v38  ;;  %v6025_v49 = vor.u32 %v8076_v41, %v6024_v42  ;;  %v5736_v52 = vld [vmem:[#allocation8 + $0x108] sm:$0xf] }
 0x11d   :  { %v6914_v51 = vld [vmem:[#allocation8 + $0xa60] sm:$0xf0]  ;;  %v8004_v53 = vld [vmem:[#allocation8 + $0x124] sm:$0xf0] }
 0x11e   :  { %v8367_v55 = vld [vmem:[#allocation8 + $0xc84] sm:$0xf]  ;;  %v6917_v59 = vor.u32 %v8295_v50, %v6914_v51  ;;  %3940 = vmatpush.bf16.msrb.mxu0 %v6661_v58  ;;  %v6568_v50 = vld [vmem:[#allocation8 + $0x788] sm:$0xf] }
 0x11f   :  { %v7202_v56 = vld [vmem:[#allocation8 + $0xca0] sm:$0xf0]  ;;  %v8212_v51 = vld [vmem:[#allocation8 + $0x7a4] sm:$0xf0] }
 0x120   :  { %v8431_v57 = vld [vmem:[#allocation8 + $0xe84] sm:$0xf]  ;;  %v7205_v6 = vor.u32 %v8367_v55, %v7202_v56  ;;  %3954 = vmatpush.bf16.msrb.mxu1 %v6917_v59  ;;  %v5992_v55 = vld [vmem:[#allocation8 + $0x308] sm:$0xf]  ;;  %v6569_v58 = vor.u32 %v8212_v51, %v6568_v50 }
 0x121   :  { %v7458_v61 = vld [vmem:[#allocation8 + $0xea0] sm:$0xf0]  ;;  %v8068_v56 = vld [vmem:[#allocation8 + $0x324] sm:$0xf0] }
 0x122   :  { %v8223_v63 = vld [vmem:[#allocation8 + $0x804] sm:$0xf]  ;;  %v7461_v10 = vor.u32 %v8431_v57, %v7458_v61  ;;  %3967 = vmatpush.bf16.msrb.mxu2 %v7205_v6  ;;  %v6313_v57 = vor.u32 %v8148_v47, %v6312_v46  ;;  %v6280_v59 = vld [vmem:[#allocation8 + $0x548] sm:$0xf] }
 0x123   :  { %v6626_v1 = vld [vmem:[#allocation8 + $0x820] sm:$0xf0]  ;;  %v8140_v61 = vld [vmem:[#allocation8 + $0x564] sm:$0xf0] }
 0x124   :  { %v8287_v3 = vld [vmem:[#allocation8 + $0xa04] sm:$0xf]  ;;  %v6629_v13 = vor.u32 %v8223_v63, %v6626_v1  ;;  %3981 = vmatpush.bf16.msrb.mxu3 %v7461_v10  ;;  %v5737_v63 = vor.u32 %v8004_v53, %v5736_v52  ;;  %v5993_v1 = vor.u32 %v8068_v56, %v5992_v55  ;;  %v7996_v6 = vld [vmem:[#allocation8 + $0xe4] sm:$0xf0]  ;;  %v6281_v9 = vor.u32 %v8140_v61, %v6280_v59 }
 0x125   :  { %v6882_v4 = vld [vmem:[#allocation8 + $0xa20] sm:$0xf0]  ;;  %v5640_v32 = vld [vmem:[#allocation8 + $0x48] sm:$0xf] }
 0x126   :  { %v8359_v11 = vld [vmem:[#allocation8 + $0xc44] sm:$0xf]  ;;  %v6885_v14 = vor.u32 %v8287_v3, %v6882_v4  ;;  %3941 = vmatpush.bf16.msrb.mxu0 %v6629_v13  ;;  %v6536_v3 = vld [vmem:[#allocation8 + $0x748] sm:$0xf]  ;;  %v5705_v13 = vor.u32 %v7996_v6, %v5704_v5 }
 0x127   :  { %v7170_v12 = vld [vmem:[#allocation8 + $0xc60] sm:$0xf0]  ;;  %v8204_v4 = vld [vmem:[#allocation8 + $0x764] sm:$0xf0] }
 0x128   :  { %v8423_v15 = vld [vmem:[#allocation8 + $0xe44] sm:$0xf]  ;;  %v7173_v20 = vor.u32 %v8359_v11, %v7170_v12  ;;  %3955 = vmatpush.bf16.msrb.mxu1 %v6885_v14  ;;  %v6537_v10 = vor.u32 %v8204_v4, %v6536_v3  ;;  %v6248_v11 = vld [vmem:[#allocation8 + $0x508] sm:$0xf]  ;;  %v5961_v14 = vor.u32 %v8060_v8, %v5960_v7 }
 0x129   :  { %v7426_v16 = vld [vmem:[#allocation8 + $0xe60] sm:$0xf0]  ;;  %3942 = vmatmul.bf16.vlgmr.msrb.gmra.mxu0 %v8868_v23  ;;  %v8132_v12 = vld [vmem:[#allocation8 + $0x524] sm:$0xf0] }
 0x12a   :  { %v7429_v25 = vor.u32 %v8423_v15, %v7426_v16  ;;  %v8351_v2 = vld [vmem:[#allocation8 + $0xc04] sm:$0xf]  ;;  %3990 = vmatpush.bf16.msra.mxu0 %v5833_v17  ;;  %3968 = vmatpush.bf16.msrb.mxu2 %v7173_v20  ;;  %v6504_v15 = vld [vmem:[#allocation8 + $0x708] sm:$0xf]  ;;  %v6249_v21 = vor.u32 %v8132_v12, %v6248_v11 }
 0x12b   :  { %v7138_v28 = vld [vmem:[#allocation8 + $0xc20] sm:$0xf0]  ;;  %3956 = vmatmul.bf16.vlgmr.msrb.gmra.mxu1 %v8870_v27  ;;  %v8196_v16 = vld [vmem:[#allocation8 + $0x724] sm:$0xf0] }
 0x12c   :  { %v8415_v29 = vld [vmem:[#allocation8 + $0xe04] sm:$0xf]  ;;  %4004 = vmatpush.bf16.msra.mxu1 %v6089_v18  ;;  %v7141_v39 = vor.u32 %v8351_v2, %v7138_v28  ;;  %3982 = vmatpush.bf16.msrb.mxu3 %v7429_v25  ;;  %v5672_v17 = vld [vmem:[#allocation8 + $0x88] sm:$0xf]  ;;  %v6505_v22 = vor.u32 %v8196_v16, %v6504_v15 }
 0x12d   :  { %v7394_v30 = vld [vmem:[#allocation8 + $0xe20] sm:$0xf0]  ;;  %v7988_v18 = vld [vmem:[#allocation8 + $0xa4] sm:$0xf0] }
 0x12e   :  { %v7397_v43 = vor.u32 %v8415_v29, %v7394_v30  ;;  %3991 = vmatpush.bf16.msra.mxu0 %v5801_v34  ;;  %3969 = vmatpush.bf16.msrb.mxu2 %v7141_v39  ;;  %v8052_v20 = vld [vmem:[#allocation8 + $0x2a4] sm:$0xf0]  ;;  %v5673_v2 = vor.u32 %v7988_v18, %v5672_v17 }
 0x12f   :  { %v8124_v25 = vld [vmem:[#allocation8 + $0x4e4] sm:$0xf0]  ;;  %v5929_v28 = vor.u32 %v8052_v20, %v5928_v19 }
 0x130   :  { %4005 = vmatpush.bf16.msra.mxu1 %v6057_v35  ;;  %3983 = vmatpush.bf16.msrb.mxu3 %v7397_v43  ;;  %v6472_v29 = vld [vmem:[#allocation8 + $0x6c8] sm:$0xf]  ;;  %v6217_v36 = vor.u32 %v8124_v25, %v6216_v24 }
 0x131   :  { %3970 = vmatmul.bf16.vlgmr.msrb.gmra.mxu2 %v8874_v62  ;;  %v8188_v30 = vld [vmem:[#allocation8 + $0x6e4] sm:$0xf0] }
 0x132   :  { %4018 = vmatpush.bf16.msra.mxu2 %v6345_v44  ;;  %3992 = vmatpush.bf16.msra.mxu0 %v5769_v48  ;;  %v7980_v33 = vld [vmem:[#allocation8 + $0x64] sm:$0xf0]  ;;  %v6473_v37 = vor.u32 %v8188_v30, %v6472_v29 }
 0x133   :  { %3984 = vmatmul.bf16.vlgmr.msrb.gmra.mxu3 %v8876_v0  ;;  %v5896_v34 = vld [vmem:[#allocation8 + $0x248] sm:$0xf]  ;;  %v5641_v42 = vor.u32 %v7980_v33, %v5640_v32 }
 0x134   :  { %4032 = vmatpush.bf16.msra.mxu3 %v6601_v45  ;;  %4006 = vmatpush.bf16.msra.mxu1 %v6025_v49  ;;  %v8044_v35 = vld [vmem:[#allocation8 + $0x264] sm:$0xf0] }
 0x135   :  { %v6184_v38 = vld [vmem:[#allocation8 + $0x488] sm:$0xf]  ;;  %v5897_v41 = vor.u32 %v8044_v35, %v5896_v34 }
 0x136   :  { %4019 = vmatpush.bf16.msra.mxu2 %v6313_v57  ;;  %3993 = vmatpush.bf16.msra.mxu0 %v5737_v63  ;;  %v8116_v39 = vld [vmem:[#allocation8 + $0x4a4] sm:$0xf0] }
 0x137   :  { %v6440_v40 = vld [vmem:[#allocation8 + $0x688] sm:$0xf]  ;;  %v6185_v49 = vor.u32 %v8116_v39, %v6184_v38 }
 0x138   :  { %4033 = vmatpush.bf16.msra.mxu3 %v6569_v58  ;;  %4007 = vmatpush.bf16.msra.mxu1 %v5993_v1  ;;  %v8180_v43 = vld [vmem:[#allocation8 + $0x6a4] sm:$0xf0] }
 0x139   :  { %v5608_v44 = vld [vmem:[#allocation8 + $0x8] sm:$0xf]  ;;  %v6441_v53 = vor.u32 %v8180_v43, %v6440_v40 }
 0x13a   :  { %4020 = vmatpush.bf16.msra.mxu2 %v6281_v9  ;;  %3994 = vmatpush.bf16.msra.mxu0 %v5705_v13  ;;  %v7972_v45 = vld [vmem:[#allocation8 + $0x24] sm:$0xf0] }
 0x13b   :  { %v5864_v46 = vld [vmem:[#allocation8 + $0x208] sm:$0xf]  ;;  %v5609_v57 = vor.u32 %v7972_v45, %v5608_v44 }
 0x13c   :  { %4034 = vmatpush.bf16.msra.mxu3 %v6537_v10  ;;  %4008 = vmatpush.bf16.msra.mxu1 %v5961_v14  ;;  %v8036_v47 = vld [vmem:[#allocation8 + $0x224] sm:$0xf0] }
 0x13d   :  { %v6856_v48 = vld [vmem:[#allocation8 + $0x9c8] sm:$0xf]  ;;  %v5865_v58 = vor.u32 %v8036_v47, %v5864_v46 }
 0x13e   :  { %4021 = vmatpush.bf16.msra.mxu2 %v6249_v21  ;;  %3995 = vmatpush.bf16.msra.mxu0 %v5673_v2  ;;  %v8284_v50 = vld [vmem:[#allocation8 + $0x9e4] sm:$0xf0] }
 0x13f   :  { %v7112_v51 = vld [vmem:[#allocation8 + $0xbc8] sm:$0xf]  ;;  %v6857_v63 = vor.u32 %v8284_v50, %v6856_v48 }
 0x140   :  { %4035 = vmatpush.bf16.msra.mxu3 %v6505_v22  ;;  %4009 = vmatpush.bf16.msra.mxu1 %v5929_v28  ;;  %v8348_v52 = vld [vmem:[#allocation8 + $0xbe4] sm:$0xf0] }
 0x141   :  { %v6152_v55 = vld [vmem:[#allocation8 + $0x448] sm:$0xf]  ;;  %v7113_v1 = vor.u32 %v8348_v52, %v7112_v51 }
 0x142   :  { %4022 = vmatpush.bf16.msra.mxu2 %v6217_v36  ;;  %v8108_v56 = vld [vmem:[#allocation8 + $0x464] sm:$0xf0]  ;;  %3996 = vmatpush.bf16.msra.mxu0 %v5641_v42 }
 0x143   :  { %v6408_v59 = vld [vmem:[#allocation8 + $0x648] sm:$0xf]  ;;  %v6153_v4 = vor.u32 %v8108_v56, %v6152_v55 }
 0x144   :  { %4036 = vmatpush.bf16.msra.mxu3 %v6473_v37  ;;  %4010 = vmatpush.bf16.msra.mxu1 %v5897_v41  ;;  %v8172_v61 = vld [vmem:[#allocation8 + $0x664] sm:$0xf0] }
 0x145   :  { %v6824_v3 = vld [vmem:[#allocation8 + $0x988] sm:$0xf]  ;;  %v6409_v8 = vor.u32 %v8172_v61, %v6408_v59 }
 0x146   :  { %4023 = vmatpush.bf16.msra.mxu2 %v6185_v49  ;;  %v8276_v5 = vld [vmem:[#allocation8 + $0x9a4] sm:$0xf0]  ;;  %3997 = vmatpush.bf16.msra.mxu0 %v5609_v57 }
 0x147   :  { %v7080_v6 = vld [vmem:[#allocation8 + $0xb88] sm:$0xf]  ;;  %v6825_v15 = vor.u32 %v8276_v5, %v6824_v3 }
 0x148   :  { %v8340_v7 = vld [vmem:[#allocation8 + $0xba4] sm:$0xf0]  ;;  %4037 = vmatpush.bf16.msra.mxu3 %v6441_v53  ;;  %4011 = vmatpush.bf16.msra.mxu1 %v5865_v58 }
 0x149   :  { %v6120_v9 = vld [vmem:[#allocation8 + $0x408] sm:$0xf]  ;;  %v7081_v16 = vor.u32 %v8340_v7, %v7080_v6  ;;  %3998 = vmatmul.bf16.vlgmr.msra.gmra.mxu0 %v8852_v26 }
 0x14a   :  { %v8100_v10 = vld [vmem:[#allocation8 + $0x424] sm:$0xf0]  ;;  %4046 = vmatpush.bf16.msrb.mxu0 %v6857_v63  ;;  %4024 = vmatpush.bf16.msra.mxu2 %v6153_v4 }
 0x14b   :  { %v6376_v11 = vld [vmem:[#allocation8 + $0x608] sm:$0xf]  ;;  %v6121_v19 = vor.u32 %v8100_v10, %v6120_v9  ;;  %4012 = vmatmul.bf16.vlgmr.msra.gmra.mxu1 %v8854_v31 }
 0x14c   :  { %v8164_v12 = vld [vmem:[#allocation8 + $0x624] sm:$0xf0]  ;;  %4060 = vmatpush.bf16.msrb.mxu1 %v7113_v1  ;;  %4038 = vmatpush.bf16.msra.mxu3 %v6409_v8 }
 0x14d   :  { %v7368_v13 = vld [vmem:[#allocation8 + $0xdc8] sm:$0xf]  ;;  %v6377_v22 = vor.u32 %v8164_v12, %v6376_v11 }
 0x14e   :  { %v8412_v14 = vld [vmem:[#allocation8 + $0xde4] sm:$0xf0]  ;;  %4047 = vmatpush.bf16.msrb.mxu0 %v6825_v15  ;;  %4025 = vmatpush.bf16.msra.mxu2 %v6121_v19 }
 0x14f   :  { %v7624_v17 = vld [vmem:[#allocation8 + $0xfc8] sm:$0xf]  ;;  %v7369_v24 = vor.u32 %v8412_v14, %v7368_v13 }
 0x150   :  { %v8476_v18 = vld [vmem:[#allocation8 + $0xfe4] sm:$0xf0]  ;;  %4061 = vmatpush.bf16.msrb.mxu1 %v7081_v16  ;;  %4039 = vmatpush.bf16.msra.mxu3 %v6377_v22 }
 0x151   :  { %v6792_v20 = vld [vmem:[#allocation8 + $0x948] sm:$0xf]  ;;  %v7625_v28 = vor.u32 %v8476_v18, %v7624_v17  ;;  %4026 = vmatmul.bf16.vlgmr.msra.gmra.mxu2 %v8858_v54 }
 0x152   :  { %v8268_v21 = vld [vmem:[#allocation8 + $0x964] sm:$0xf0]  ;;  %4074 = vmatpush.bf16.msrb.mxu2 %v7369_v24 }
 0x153   :  { %v7048_v25 = vld [vmem:[#allocation8 + $0xb48] sm:$0xf]  ;;  %v6793_v32 = vor.u32 %v8268_v21, %v6792_v20  ;;  %4040 = vmatmul.bf16.vlgmr.msra.gmra.mxu3 %v8860_v60 }
 0x154   :  { %v8332_v2 = vld [vmem:[#allocation8 + $0xb64] sm:$0xf0]  ;;  %4088 = vmatpush.bf16.msrb.mxu3 %v7625_v28 }
 0x155   :  { %v7336_v29 = vld [vmem:[#allocation8 + $0xd88] sm:$0xf]  ;;  %v7049_v35 = vor.u32 %v8332_v2, %v7048_v25  ;;  %4048 = vmatpush.bf16.msrb.mxu0 %v6793_v32 }
 0x156   :  { %v8404_v30 = vld [vmem:[#allocation8 + $0xda4] sm:$0xf0] }
 0x157   :  { %v7592_v33 = vld [vmem:[#allocation8 + $0xf88] sm:$0xf]  ;;  %v7337_v38 = vor.u32 %v8404_v30, %v7336_v29  ;;  %4062 = vmatpush.bf16.msrb.mxu1 %v7049_v35  ;;  %v8088_v35 = vld [vmem:[#allocation8 + $0x3cc] sm:$0xf] }
 0x158   :  { %v8468_v34 = vld [vmem:[#allocation8 + $0xfa4] sm:$0xf0] }
 0x159   :  { %v6760_v36 = vld [vmem:[#allocation8 + $0x908] sm:$0xf]  ;;  %v7593_v42 = vor.u32 %v8468_v34, %v7592_v33  ;;  %4075 = vmatpush.bf16.msrb.mxu2 %v7337_v38  ;;  %v8024_v33 = vld [vmem:[#allocation8 + $0x1cc] sm:$0xf] }
 0x15a   :  { %v8260_v37 = vld [vmem:[#allocation8 + $0x924] sm:$0xf0]  ;;  %v5834_v34 = vld [vmem:[#allocation8 + $0x1e8] sm:$0xf0] }
 0x15b   :  { %v7016_v39 = vld [vmem:[#allocation8 + $0xb08] sm:$0xf]  ;;  %v6761_v44 = vor.u32 %v8260_v37, %v6760_v36  ;;  %4089 = vmatpush.bf16.msrb.mxu3 %v7593_v42  ;;  %v6090_v37 = vld [vmem:[#allocation8 + $0x3e8] sm:$0xf0] }
 0x15c   :  { %v8324_v40 = vld [vmem:[#allocation8 + $0xb24] sm:$0xf0] }
 0x15d   :  { %v7304_v41 = vld [vmem:[#allocation8 + $0xd48] sm:$0xf]  ;;  %v7017_v47 = vor.u32 %v8324_v40, %v7016_v39  ;;  %4049 = vmatpush.bf16.msrb.mxu0 %v6761_v44  ;;  %v5837_v44 = vor.u32 %v8024_v33, %v5834_v34  ;;  %v8200_v34 = vld [vmem:[#allocation8 + $0x74c] sm:$0xf] }
 0x15e   :  { %v8396_v43 = vld [vmem:[#allocation8 + $0xd64] sm:$0xf0] }
 0x15f   :  { %v7560_v45 = vld [vmem:[#allocation8 + $0xf48] sm:$0xf]  ;;  %v7305_v50 = vor.u32 %v8396_v43, %v7304_v41  ;;  %4063 = vmatpush.bf16.msrb.mxu1 %v7017_v47 }
 0x160   :  { %v8460_v46 = vld [vmem:[#allocation8 + $0xf64] sm:$0xf0] }
 0x161   :  { %v6728_v48 = vld [vmem:[#allocation8 + $0x8c8] sm:$0xf]  ;;  %v7561_v53 = vor.u32 %v8460_v46, %v7560_v45  ;;  %4076 = vmatpush.bf16.msrb.mxu2 %v7305_v50  ;;  %v8016_v45 = vld [vmem:[#allocation8 + $0x18c] sm:$0xf]  ;;  %v6093_v46 = vor.u32 %v8088_v35, %v6090_v37 }
 0x162   :  { %v8252_v49 = vld [vmem:[#allocation8 + $0x8e4] sm:$0xf0]  ;;  %v6058_v50 = vld [vmem:[#allocation8 + $0x3a8] sm:$0xf0] }
 0x163   :  { %v6984_v51 = vld [vmem:[#allocation8 + $0xac8] sm:$0xf]  ;;  %v6729_v57 = vor.u32 %v8252_v49, %v6728_v48  ;;  %4090 = vmatpush.bf16.msrb.mxu3 %v7561_v53  ;;  %v5802_v48 = vld [vmem:[#allocation8 + $0x1a8] sm:$0xf0] }
 0x164   :  { %v8316_v52 = vld [vmem:[#allocation8 + $0xae4] sm:$0xf0]  ;;  %v8080_v49 = vld [vmem:[#allocation8 + $0x38c] sm:$0xf] }
 0x165   :  { %v7272_v55 = vld [vmem:[#allocation8 + $0xd08] sm:$0xf]  ;;  %v6985_v61 = vor.u32 %v8316_v52, %v6984_v51  ;;  %4050 = vmatpush.bf16.msrb.mxu0 %v6729_v57  ;;  %v8152_v57 = vld [vmem:[#allocation8 + $0x5cc] sm:$0xf] }
 0x166   :  { %v8388_v56 = vld [vmem:[#allocation8 + $0xd24] sm:$0xf0]  ;;  %v6538_v35 = vld [vmem:[#allocation8 + $0x768] sm:$0xf0] }
 0x167   :  { %v7528_v58 = vld [vmem:[#allocation8 + $0xf08] sm:$0xf]  ;;  %v7273_v3 = vor.u32 %v8388_v56, %v7272_v55  ;;  %4064 = vmatpush.bf16.msrb.mxu1 %v6985_v61  ;;  %v8216_v61 = vld [vmem:[#allocation8 + $0x7cc] sm:$0xf] }
 0x168   :  { %v8452_v59 = vld [vmem:[#allocation8 + $0xf24] sm:$0xf0] }
 0x169   :  { %v6696_v63 = vld [vmem:[#allocation8 + $0x888] sm:$0xf]  ;;  %v7529_v6 = vor.u32 %v8452_v59, %v7528_v58  ;;  %4077 = vmatpush.bf16.msrb.mxu2 %v7273_v3  ;;  %v6346_v58 = vld [vmem:[#allocation8 + $0x5e8] sm:$0xf0]  ;;  %v5805_v59 = vor.u32 %v8016_v45, %v5802_v48  ;;  %v6061_v3 = vor.u32 %v8080_v49, %v6058_v50 }
 0x16a   :  { %v8244_v1 = vld [vmem:[#allocation8 + $0x8a4] sm:$0xf0]  ;;  %v6250_v45 = vld [vmem:[#allocation8 + $0x528] sm:$0xf0] }
 0x16b   :  { %v6952_v4 = vld [vmem:[#allocation8 + $0xa88] sm:$0xf]  ;;  %v6697_v9 = vor.u32 %v8244_v1, %v6696_v63  ;;  %4091 = vmatpush.bf16.msrb.mxu3 %v7529_v6  ;;  %v6602_v63 = vld [vmem:[#allocation8 + $0x7e8] sm:$0xf0]  ;;  %v8892_v1 = vld [vmem:[#allocation10] sm:$0xff] }
 0x16c   :  { %v8308_v5 = vld [vmem:[#allocation8 + $0xaa4] sm:$0xf0]  ;;  %v5770_v6 = vld [vmem:[#allocation8 + $0x168] sm:$0xf0] }
 0x16d   :  { %v7240_v7 = vld [vmem:[#allocation8 + $0xcc8] sm:$0xf]  ;;  %v6953_v12 = vor.u32 %v8308_v5, %v6952_v4  ;;  %4051 = vmatpush.bf16.msrb.mxu0 %v6697_v9  ;;  %v8008_v5 = vld [vmem:[#allocation8 + $0x14c] sm:$0xf] }
 0x16e   :  { %v8380_v8 = vld [vmem:[#allocation8 + $0xce4] sm:$0xf0]  ;;  %v8072_v9 = vld [vmem:[#allocation8 + $0x34c] sm:$0xf] }
 0x16f   :  { %v7496_v10 = vld [vmem:[#allocation8 + $0xec8] sm:$0xf]  ;;  %v7241_v15 = vor.u32 %v8380_v8, %v7240_v7  ;;  %4065 = vmatpush.bf16.msrb.mxu1 %v6953_v12  ;;  %v6349_v8 = vor.u32 %v8152_v57, %v6346_v58  ;;  %v9170_v12 = vperm.slane %v8892_v1, 0  ;;  %v6506_v48 = vld [vmem:[#allocation8 + $0x728] sm:$0xf0] }
 0x170   :  { %v8444_v11 = vld [vmem:[#allocation8 + $0xee4] sm:$0xf0]  ;;  %v7984_v50 = vld [vmem:[#allocation8 + $0x8c] sm:$0xf] }
 0x171   :  { %v6664_v13 = vld [vmem:[#allocation8 + $0x848] sm:$0xf]  ;;  %v7497_v18 = vor.u32 %v8444_v11, %v7496_v10  ;;  %4078 = vmatpush.bf16.msrb.mxu2 %v7241_v15  ;;  %v6026_v10 = vld [vmem:[#allocation8 + $0x368] sm:$0xf0]  ;;  %v6605_v11 = vor.u32 %v8216_v61, %v6602_v63  ;;  %v5773_v15 = vor.u32 %v8008_v5, %v5770_v6 }
 0x172   :  { %v8236_v14 = vld [vmem:[#allocation8 + $0x864] sm:$0xf0]  ;;  %v8120_v57 = vld [vmem:[#allocation8 + $0x4cc] sm:$0xf] }
 0x173   :  { %v6920_v16 = vld [vmem:[#allocation8 + $0xa48] sm:$0xf]  ;;  %v6665_v21 = vor.u32 %v8236_v14, %v6664_v13  ;;  %4092 = vmatpush.bf16.msrb.mxu3 %v7497_v18  ;;  %v8144_v13 = vld [vmem:[#allocation8 + $0x58c] sm:$0xf]  ;;  %v6029_v18 = vor.u32 %v8072_v9, %v6026_v10  ;;  %v3803_v9 = vpop.f32.mrf.mxu2 }
 0x174   :  { %v8300_v17 = vld [vmem:[#allocation8 + $0xa64] sm:$0xf0]  ;;  %v6314_v14 = vld [vmem:[#allocation8 + $0x5a8] sm:$0xf0] }
 0x175   :  { %v7208_v19 = vld [vmem:[#allocation8 + $0xc88] sm:$0xf]  ;;  %v6921_v2 = vor.u32 %v8300_v17, %v6920_v16  ;;  %4052 = vmatpush.bf16.msrb.mxu0 %v6665_v21  ;;  %v8208_v16 = vld [vmem:[#allocation8 + $0x78c] sm:$0xf]  ;;  %v3775_v21 = vpop.f32.mrf.mxu0 }
 0x176   :  { %v8372_v20 = vld [vmem:[#allocation8 + $0xca4] sm:$0xf0]  ;;  %v6570_v17 = vld [vmem:[#allocation8 + $0x7a8] sm:$0xf0] }
 0x177   :  { %v7464_v22 = vld [vmem:[#allocation8 + $0xe88] sm:$0xf]  ;;  %v7209_v32 = vor.u32 %v8372_v20, %v7208_v19  ;;  %4066 = vmatpush.bf16.msrb.mxu1 %v6921_v2  ;;  %v8000_v19 = vld [vmem:[#allocation8 + $0x10c] sm:$0xf]  ;;  %v3776_v2 = vadd.f32 %v3775_v21, %v9170_v12  ;;  %v8082_v12 = vld [vmem:[#allocation8 + $0x39c] sm:$0xf] }
 0x178   :  { %v8436_v24 = vld [vmem:[#allocation8 + $0xea4] sm:$0xf0]  ;;  %v5738_v20 = vld [vmem:[#allocation8 + $0x128] sm:$0xf0] }
 0x179   :  { %v6632_v25 = vld [vmem:[#allocation8 + $0x808] sm:$0xf]  ;;  %v7465_v36 = vor.u32 %v8436_v24, %v7464_v22  ;;  %4079 = vmatpush.bf16.msrb.mxu2 %v7209_v32  ;;  %v6317_v22 = vor.u32 %v8144_v13, %v6314_v14  ;;  %v8064_v24 = vld [vmem:[#allocation8 + $0x30c] sm:$0xf]  ;;  %v3789_v32 = vpop.f32.mrf.mxu1  ;;  %v5741_v33 = vor.u32 %v8000_v19, %v5738_v20  ;;  %v3817_v19 = vpop.f32.mrf.mxu3 }
 0x17a   :  { %v8228_v28 = vld [vmem:[#allocation8 + $0x824] sm:$0xf0]  ;;  %v6218_v58 = vld [vmem:[#allocation8 + $0x4e8] sm:$0xf0] }
 0x17b   :  { %v6888_v29 = vld [vmem:[#allocation8 + $0xa08] sm:$0xf]  ;;  %v6633_v40 = vor.u32 %v8228_v28, %v6632_v25  ;;  %4093 = vmatpush.bf16.msrb.mxu3 %v7465_v36  ;;  %v5994_v25 = vld [vmem:[#allocation8 + $0x328] sm:$0xf0]  ;;  %v6573_v28 = vor.u32 %v8208_v16, %v6570_v17  ;;  %v3790_v36 = vadd.f32 %v3789_v32, %v3776_v2  ;;  %v6221_v6 = vor.u32 %v8120_v57, %v6218_v58 }
 0x17c   :  { %v8292_v30 = vld [vmem:[#allocation8 + $0xa24] sm:$0xf0]  ;;  %v5997_v37 = vor.u32 %v8064_v24, %v5994_v25  ;;  %v8184_v61 = vld [vmem:[#allocation8 + $0x6cc] sm:$0xf] }
 0x17d   :  { %v7176_v38 = vld [vmem:[#allocation8 + $0xc48] sm:$0xf]  ;;  %v6889_v43 = vor.u32 %v8292_v30, %v6888_v29  ;;  %4053 = vmatpush.bf16.msrb.mxu0 %v6633_v40  ;;  %v8136_v29 = vld [vmem:[#allocation8 + $0x54c] sm:$0xf]  ;;  %v3804_v14 = vadd.f32 %v3803_v9, %v3790_v36 }
 0x17e   :  { %v8364_v39 = vld [vmem:[#allocation8 + $0xc64] sm:$0xf0]  ;;  %v6282_v30 = vld [vmem:[#allocation8 + $0x568] sm:$0xf0] }
 0x17f   :  { %v7432_v42 = vld [vmem:[#allocation8 + $0xe48] sm:$0xf]  ;;  %v7177_v47 = vor.u32 %v8364_v39, %v7176_v38  ;;  %4067 = vmatpush.bf16.msrb.mxu1 %v6889_v43  ;;  %v7992_v38 = vld [vmem:[#allocation8 + $0xcc] sm:$0xf]  ;;  %v6285_v40 = vor.u32 %v8136_v29, %v6282_v30  ;;  %v6541_v43 = vor.u32 %v8200_v34, %v6538_v35  ;;  %v8901_v25 = vadd.f32 %v3817_v19, %v3804_v14 }
 0x180   :  { %v8428_v41 = vld [vmem:[#allocation8 + $0xe64] sm:$0xf0]  ;;  %4054 = vmatmul.bf16.vlgmr.msrb.gmra.mxu0 %v8868_v23  ;;  %v5706_v39 = vld [vmem:[#allocation8 + $0xe8] sm:$0xf0] }
 0x181   :  { %v7433_v51 = vor.u32 %v8428_v41, %v7432_v42  ;;  %v7144_v52 = vld [vmem:[#allocation8 + $0xc08] sm:$0xf]  ;;  %4102 = vmatpush.bf16.msra.mxu0 %v5837_v44  ;;  %4080 = vmatpush.bf16.msrb.mxu2 %v7177_v47  ;;  %v8056_v42 = vld [vmem:[#allocation8 + $0x2cc] sm:$0xf] }
 0x182   :  { %v8356_v53 = vld [vmem:[#allocation8 + $0xc24] sm:$0xf0]  ;;  %4068 = vmatmul.bf16.vlgmr.msrb.gmra.mxu1 %v8870_v27  ;;  %v5962_v41 = vld [vmem:[#allocation8 + $0x2e8] sm:$0xf0] }
 0x183   :  { %v7400_v55 = vld [vmem:[#allocation8 + $0xe08] sm:$0xf]  ;;  %4116 = vmatpush.bf16.msra.mxu1 %v6093_v46  ;;  %v7145_v4 = vor.u32 %v8356_v53, %v7144_v52  ;;  %4094 = vmatpush.bf16.msrb.mxu3 %v7433_v51  ;;  %v8128_v44 = vld [vmem:[#allocation8 + $0x50c] sm:$0xf]  ;;  %v5709_v46 = vor.u32 %v7992_v38, %v5706_v39  ;;  %v5965_v49 = vor.u32 %v8056_v42, %v5962_v41 }
 0x184   :  { %v8420_v56 = vld [vmem:[#allocation8 + $0xe24] sm:$0xf0]  ;;  %v8192_v47 = vld [vmem:[#allocation8 + $0x70c] sm:$0xf]  ;;  %v6253_v52 = vor.u32 %v8128_v44, %v6250_v45 }
 0x185   :  { %v7401_v7 = vor.u32 %v8420_v56, %v7400_v55  ;;  %4103 = vmatpush.bf16.msra.mxu0 %v5805_v59  ;;  %4081 = vmatpush.bf16.msrb.mxu2 %v7145_v4  ;;  %v5674_v51 = vld [vmem:[#allocation8 + $0xa8] sm:$0xf0]  ;;  %v6509_v56 = vor.u32 %v8192_v47, %v6506_v48 }
 0x186   :  { %v8048_v53 = vld [vmem:[#allocation8 + $0x28c] sm:$0xf]  ;;  %v5677_v59 = vor.u32 %v7984_v50, %v5674_v51  ;;  %v8903_v51 = vpop.f32.mrf.mxu0 }
 0x187   :  { %4117 = vmatpush.bf16.msra.mxu1 %v6061_v3  ;;  %4095 = vmatpush.bf16.msrb.mxu3 %v7401_v7  ;;  %v5930_v55 = vld [vmem:[#allocation8 + $0x2a8] sm:$0xf0] }
 0x188   :  { %4082 = vmatmul.bf16.vlgmr.msrb.gmra.mxu2 %v8874_v62  ;;  %v6474_v63 = vld [vmem:[#allocation8 + $0x6e8] sm:$0xf0]  ;;  %v5933_v3 = vor.u32 %v8048_v53, %v5930_v55 }
 0x189   :  { %4130 = vmatpush.bf16.msra.mxu2 %v6349_v8  ;;  %4104 = vmatpush.bf16.msra.mxu0 %v5773_v15  ;;  %v7976_v4 = vld [vmem:[#allocation8 + $0x4c] sm:$0xf]  ;;  %v6477_v10 = vor.u32 %v8184_v61, %v6474_v63 }
 0x18a   :  { %4096 = vmatmul.bf16.vlgmr.msrb.gmra.mxu3 %v8876_v0  ;;  %v5642_v5 = vld [vmem:[#allocation8 + $0x68] sm:$0xf0] }
 0x18b   :  { %4144 = vmatpush.bf16.msra.mxu3 %v6605_v11  ;;  %4118 = vmatpush.bf16.msra.mxu1 %v6029_v18  ;;  %v8040_v7 = vld [vmem:[#allocation8 + $0x24c] sm:$0xf]  ;;  %v5645_v15 = vor.u32 %v7976_v4, %v5642_v5 }
 0x18c   :  { %v5898_v8 = vld [vmem:[#allocation8 + $0x268] sm:$0xf0] }
 0x18d   :  { %4131 = vmatpush.bf16.msra.mxu2 %v6317_v22  ;;  %4105 = vmatpush.bf16.msra.mxu0 %v5741_v33  ;;  %v8112_v11 = vld [vmem:[#allocation8 + $0x48c] sm:$0xf]  ;;  %v5901_v20 = vor.u32 %v8040_v7, %v5898_v8 }
 0x18e   :  { %v6186_v13 = vld [vmem:[#allocation8 + $0x4a8] sm:$0xf0] }
 0x18f   :  { %4145 = vmatpush.bf16.msra.mxu3 %v6573_v28  ;;  %4119 = vmatpush.bf16.msra.mxu1 %v5997_v37  ;;  %v8176_v16 = vld [vmem:[#allocation8 + $0x68c] sm:$0xf]  ;;  %v6189_v2 = vor.u32 %v8112_v11, %v6186_v13 }
 0x190   :  { %v6442_v17 = vld [vmem:[#allocation8 + $0x6a8] sm:$0xf0] }
 0x191   :  { %4132 = vmatpush.bf16.msra.mxu2 %v6285_v40  ;;  %4106 = vmatpush.bf16.msra.mxu0 %v5709_v46  ;;  %v7968_v18 = vld [vmem:[#allocation8 + $0xc] sm:$0xf]  ;;  %v6445_v32 = vor.u32 %v8176_v16, %v6442_v17 }
 0x192   :  { %v5610_v21 = vld [vmem:[#allocation8 + $0x28] sm:$0xf0] }
 0x193   :  { %4146 = vmatpush.bf16.msra.mxu3 %v6541_v43  ;;  %4120 = vmatpush.bf16.msra.mxu1 %v5965_v49  ;;  %v8032_v22 = vld [vmem:[#allocation8 + $0x20c] sm:$0xf]  ;;  %v5613_v36 = vor.u32 %v7968_v18, %v5610_v21 }
 0x194   :  { %v5866_v24 = vld [vmem:[#allocation8 + $0x228] sm:$0xf0] }
 0x195   :  { %4133 = vmatpush.bf16.msra.mxu2 %v6253_v52  ;;  %4107 = vmatpush.bf16.msra.mxu0 %v5677_v59  ;;  %v8280_v28 = vld [vmem:[#allocation8 + $0x9cc] sm:$0xf]  ;;  %v5869_v39 = vor.u32 %v8032_v22, %v5866_v24  ;;  %v3831_v22 = vpop.f32.mrf.mxu0 }
 0x196   :  { %v6858_v29 = vld [vmem:[#allocation8 + $0x9e8] sm:$0xf0] }
 0x197   :  { %4147 = vmatpush.bf16.msra.mxu3 %v6509_v56  ;;  %4121 = vmatpush.bf16.msra.mxu1 %v5933_v3  ;;  %v8344_v30 = vld [vmem:[#allocation8 + $0xbcc] sm:$0xf]  ;;  %v6861_v40 = vor.u32 %v8280_v28, %v6858_v29  ;;  %v8905_v56 = vpop.f32.mrf.mxu1  ;;  %v3832_v29 = vadd.f32 %v3831_v22, %v8901_v25  ;;  %v8912_v25 = vpop.f32.mrf.mxu2 }
 0x198   :  { %v7114_v33 = vld [vmem:[#allocation8 + $0xbe8] sm:$0xf0] }
 0x199   :  { %4134 = vmatpush.bf16.msra.mxu2 %v6221_v6  ;;  %v8104_v34 = vld [vmem:[#allocation8 + $0x44c] sm:$0xf]  ;;  %4108 = vmatpush.bf16.msra.mxu0 %v5645_v15  ;;  %v7117_v41 = vor.u32 %v8344_v30, %v7114_v33 }
 0x19a   :  { %v6154_v35 = vld [vmem:[#allocation8 + $0x468] sm:$0xf0] }
 0x19b   :  { %4148 = vmatpush.bf16.msra.mxu3 %v6477_v10  ;;  %v8168_v37 = vld [vmem:[#allocation8 + $0x64c] sm:$0xf]  ;;  %4122 = vmatpush.bf16.msra.mxu1 %v5901_v20  ;;  %v6157_v43 = vor.u32 %v8104_v34, %v6154_v35 }
 0x19c   :  { %v6410_v38 = vld [vmem:[#allocation8 + $0x668] sm:$0xf0] }
 0x19d   :  { %v8272_v42 = vld [vmem:[#allocation8 + $0x98c] sm:$0xf]  ;;  %4135 = vmatpush.bf16.msra.mxu2 %v6189_v2  ;;  %v6413_v47 = vor.u32 %v8168_v37, %v6410_v38  ;;  %4109 = vmatpush.bf16.msra.mxu0 %v5613_v36 }
 0x19e   :  { %v6826_v44 = vld [vmem:[#allocation8 + $0x9a8] sm:$0xf0] }
 0x19f   :  { %v8336_v45 = vld [vmem:[#allocation8 + $0xb8c] sm:$0xf]  ;;  %4149 = vmatpush.bf16.msra.mxu3 %v6445_v32  ;;  %4123 = vmatpush.bf16.msra.mxu1 %v5869_v39  ;;  %v6829_v57 = vor.u32 %v8272_v42, %v6826_v44  ;;  %v3845_v30 = vpop.f32.mrf.mxu1 }
 0x1a0   :  { %v7082_v46 = vld [vmem:[#allocation8 + $0xba8] sm:$0xf0]  ;;  %4110 = vmatmul.bf16.vlgmr.msra.gmra.mxu0 %v8852_v26  ;;  %v3846_v38 = vadd.f32 %v3845_v30, %v3832_v29 }
 0x1a1   :  { %v8096_v48 = vld [vmem:[#allocation8 + $0x40c] sm:$0xf]  ;;  %4158 = vmatpush.bf16.msrb.mxu0 %v6861_v40  ;;  %4136 = vmatpush.bf16.msra.mxu2 %v6157_v43  ;;  %v7085_v61 = vor.u32 %v8336_v45, %v7082_v46 }
 0x1a2   :  { %v6122_v49 = vld [vmem:[#allocation8 + $0x428] sm:$0xf0]  ;;  %4124 = vmatmul.bf16.vlgmr.msra.gmra.mxu1 %v8854_v31 }
 0x1a3   :  { %v8160_v50 = vld [vmem:[#allocation8 + $0x60c] sm:$0xf]  ;;  %4172 = vmatpush.bf16.msrb.mxu1 %v7117_v41  ;;  %v6125_v63 = vor.u32 %v8096_v48, %v6122_v49  ;;  %4150 = vmatpush.bf16.msra.mxu3 %v6413_v47  ;;  %v8914_v48 = vpop.f32.mrf.mxu3 }
 0x1a4   :  { %v6378_v52 = vld [vmem:[#allocation8 + $0x628] sm:$0xf0] }
 0x1a5   :  { %v8408_v53 = vld [vmem:[#allocation8 + $0xdcc] sm:$0xf]  ;;  %v6381_v5 = vor.u32 %v8160_v50, %v6378_v52  ;;  %4159 = vmatpush.bf16.msrb.mxu0 %v6829_v57  ;;  %4137 = vmatpush.bf16.msra.mxu2 %v6125_v63 }
 0x1a6   :  { %v7370_v55 = vld [vmem:[#allocation8 + $0xde8] sm:$0xf0] }
 0x1a7   :  { %v8472_v58 = vld [vmem:[#allocation8 + $0xfcc] sm:$0xf]  ;;  %v7373_v6 = vor.u32 %v8408_v53, %v7370_v55  ;;  %4173 = vmatpush.bf16.msrb.mxu1 %v7085_v61  ;;  %4151 = vmatpush.bf16.msra.mxu3 %v6381_v5 }
 0x1a8   :  { %v7626_v59 = vld [vmem:[#allocation8 + $0xfe8] sm:$0xf0]  ;;  %4138 = vmatmul.bf16.vlgmr.msra.gmra.mxu2 %v8858_v54 }
 0x1a9   :  { %v8264_v3 = vld [vmem:[#allocation8 + $0x94c] sm:$0xf]  ;;  %v7629_v9 = vor.u32 %v8472_v58, %v7626_v59  ;;  %4186 = vmatpush.bf16.msrb.mxu2 %v7373_v6  ;;  %v8916_v58 = vpop.f32.mrf.mxu0 }
 0x1aa   :  { %v6794_v4 = vld [vmem:[#allocation8 + $0x968] sm:$0xf0]  ;;  %4152 = vmatmul.bf16.vlgmr.msra.gmra.mxu3 %v8860_v60 }
 0x1ab   :  { %v8328_v7 = vld [vmem:[#allocation8 + $0xb4c] sm:$0xf]  ;;  %v6797_v13 = vor.u32 %v8264_v3, %v6794_v4  ;;  %4200 = vmatpush.bf16.msrb.mxu3 %v7629_v9  ;;  %v8918_v3 = vpop.f32.mrf.mxu1 }
 0x1ac   :  { %v7050_v8 = vld [vmem:[#allocation8 + $0xb68] sm:$0xf0] }
 0x1ad   :  { %v8400_v10 = vld [vmem:[#allocation8 + $0xd8c] sm:$0xf]  ;;  %v7053_v16 = vor.u32 %v8328_v7, %v7050_v8  ;;  %4160 = vmatpush.bf16.msrb.mxu0 %v6797_v13 }
 0x1ae   :  { %v7338_v11 = vld [vmem:[#allocation8 + $0xda8] sm:$0xf0] }
 0x1af   :  { %v8464_v14 = vld [vmem:[#allocation8 + $0xf8c] sm:$0xf]  ;;  %v7341_v19 = vor.u32 %v8400_v10, %v7338_v11  ;;  %4174 = vmatpush.bf16.msrb.mxu1 %v7053_v16 }
 0x1b0   :  { %v7594_v15 = vld [vmem:[#allocation8 + $0xfa8] sm:$0xf0] }
 0x1b1   :  { %v8256_v17 = vld [vmem:[#allocation8 + $0x90c] sm:$0xf]  ;;  %v7597_v24 = vor.u32 %v8464_v14, %v7594_v15  ;;  %4187 = vmatpush.bf16.msrb.mxu2 %v7341_v19 }
 0x1b2   :  { %v6762_v18 = vld [vmem:[#allocation8 + $0x928] sm:$0xf0] }
 0x1b3   :  { %v8320_v20 = vld [vmem:[#allocation8 + $0xb0c] sm:$0xf]  ;;  %v6765_v32 = vor.u32 %v8256_v17, %v6762_v18  ;;  %4201 = vmatpush.bf16.msrb.mxu3 %v7597_v24  ;;  %v3859_v18 = vpop.f32.mrf.mxu2 }
 0x1b4   :  { %v7018_v21 = vld [vmem:[#allocation8 + $0xb28] sm:$0xf0]  ;;  %v3860_v24 = vadd.f32 %v3859_v18, %v3846_v38 }
 0x1b5   :  { %v8392_v2 = vld [vmem:[#allocation8 + $0xd4c] sm:$0xf]  ;;  %v7021_v35 = vor.u32 %v8320_v20, %v7018_v21  ;;  %4161 = vmatpush.bf16.msrb.mxu0 %v6765_v32  ;;  %v9171_v20 = vperm.slane %v8892_v1, 1 }
 0x1b6   :  { %v7306_v28 = vld [vmem:[#allocation8 + $0xd68] sm:$0xf0] }
 0x1b7   :  { %v8456_v33 = vld [vmem:[#allocation8 + $0xf4c] sm:$0xf]  ;;  %v7309_v39 = vor.u32 %v8392_v2, %v7306_v28  ;;  %4175 = vmatpush.bf16.msrb.mxu1 %v7021_v35  ;;  %v3873_v2 = vpop.f32.mrf.mxu3  ;;  %v8029_v35 = vld [vmem:[#allocation8 + $0x1ec] sm:$0xf0] }
 0x1b8   :  { %v7562_v34 = vld [vmem:[#allocation8 + $0xf68] sm:$0xf0] }
 0x1b9   :  { %v8248_v36 = vld [vmem:[#allocation8 + $0x8cc] sm:$0xf]  ;;  %v7565_v41 = vor.u32 %v8456_v33, %v7562_v34  ;;  %4188 = vmatpush.bf16.msrb.mxu2 %v7309_v39  ;;  %v5840_v34 = vld [vmem:[#allocation8 + $0x1d0] sm:$0xf]  ;;  %v3887_v39 = vpop.f32.mrf.mxu0 }
 0x1ba   :  { %v6730_v37 = vld [vmem:[#allocation8 + $0x8e8] sm:$0xf0]  ;;  %v3888_v38 = vadd.f32 %v3887_v39, %v9171_v20  ;;  %v8213_v39 = vld [vmem:[#allocation8 + $0x7ac] sm:$0xf0]  ;;  %v8358_v20 = vld [vmem:[#allocation8 + $0xc34] sm:$0xf0] }
 0x1bb   :  { %v8312_v40 = vld [vmem:[#allocation8 + $0xacc] sm:$0xf]  ;;  %v6733_v45 = vor.u32 %v8248_v36, %v6730_v37  ;;  %4202 = vmatpush.bf16.msrb.mxu3 %v7565_v41  ;;  %v6096_v36 = vld [vmem:[#allocation8 + $0x3d0] sm:$0xf]  ;;  %v8921_v37 = vadd.f32 %v3873_v2, %v3860_v24 }
 0x1bc   :  { %v6986_v42 = vld [vmem:[#allocation8 + $0xae8] sm:$0xf0] }
 0x1bd   :  { %v8384_v43 = vld [vmem:[#allocation8 + $0xd0c] sm:$0xf]  ;;  %v6989_v49 = vor.u32 %v8312_v40, %v6986_v42  ;;  %4162 = vmatpush.bf16.msrb.mxu0 %v6733_v45  ;;  %9172 = vst [vmem:[#allocation20_spill] sm:$0xff] %v8921_v37  ;;  %v8093_v42 = vld [vmem:[#allocation8 + $0x3ec] sm:$0xf0] }
 0x1be   :  { %v7274_v44 = vld [vmem:[#allocation8 + $0xd28] sm:$0xf0] }
 0x1bf   :  { %v8448_v46 = vld [vmem:[#allocation8 + $0xf0c] sm:$0xf]  ;;  %v7277_v53 = vor.u32 %v8384_v43, %v7274_v44  ;;  %4176 = vmatpush.bf16.msrb.mxu1 %v6989_v49  ;;  %v3901_v44 = vpop.f32.mrf.mxu1 }
 0x1c0   :  { %v7530_v47 = vld [vmem:[#allocation8 + $0xf28] sm:$0xf0] }
 0x1c1   :  { %v8240_v50 = vld [vmem:[#allocation8 + $0x88c] sm:$0xf]  ;;  %v7533_v59 = vor.u32 %v8448_v46, %v7530_v47  ;;  %4189 = vmatpush.bf16.msrb.mxu2 %v7277_v53  ;;  %v3902_v53 = vadd.f32 %v3901_v44, %v3888_v38  ;;  %v6000_v38 = vld [vmem:[#allocation8 + $0x310] sm:$0xf] }
 0x1c2   :  { %v6698_v52 = vld [vmem:[#allocation8 + $0x8a8] sm:$0xf0]  ;;  %v8069_v44 = vld [vmem:[#allocation8 + $0x32c] sm:$0xf0] }
 0x1c3   :  { %v8304_v55 = vld [vmem:[#allocation8 + $0xa8c] sm:$0xf]  ;;  %v6701_v4 = vor.u32 %v8240_v50, %v6698_v52  ;;  %4203 = vmatpush.bf16.msrb.mxu3 %v7533_v59  ;;  %v5841_v50 = vor.u32 %v8029_v35, %v5840_v34  ;;  %v5808_v52 = vld [vmem:[#allocation8 + $0x190] sm:$0xf] }
 0x1c4   :  { %v6954_v57 = vld [vmem:[#allocation8 + $0xaa8] sm:$0xf0]  ;;  %v8021_v59 = vld [vmem:[#allocation8 + $0x1ac] sm:$0xf0] }
 0x1c5   :  { %v8376_v61 = vld [vmem:[#allocation8 + $0xccc] sm:$0xf]  ;;  %v6957_v7 = vor.u32 %v8304_v55, %v6954_v57  ;;  %4163 = vmatpush.bf16.msrb.mxu0 %v6701_v4  ;;  %v6097_v55 = vor.u32 %v8093_v42, %v6096_v36  ;;  %v8149_v34 = vld [vmem:[#allocation8 + $0x5ac] sm:$0xf0] }
 0x1c6   :  { %v7242_v63 = vld [vmem:[#allocation8 + $0xce8] sm:$0xf0]  ;;  %v6576_v36 = vld [vmem:[#allocation8 + $0x790] sm:$0xf] }
 0x1c7   :  { %v8440_v5 = vld [vmem:[#allocation8 + $0xecc] sm:$0xf]  ;;  %v7245_v10 = vor.u32 %v8376_v61, %v7242_v63  ;;  %4177 = vmatpush.bf16.msrb.mxu1 %v6957_v7  ;;  %v6064_v61 = vld [vmem:[#allocation8 + $0x390] sm:$0xf] }
 0x1c8   :  { %v7498_v6 = vld [vmem:[#allocation8 + $0xee8] sm:$0xf0]  ;;  %v8085_v63 = vld [vmem:[#allocation8 + $0x3ac] sm:$0xf0] }
 0x1c9   :  { %v8232_v8 = vld [vmem:[#allocation8 + $0x84c] sm:$0xf]  ;;  %v7501_v14 = vor.u32 %v8440_v5, %v7498_v6  ;;  %4190 = vmatpush.bf16.msrb.mxu2 %v7245_v10  ;;  %v6352_v10 = vld [vmem:[#allocation8 + $0x5d0] sm:$0xf] }
 0x1ca   :  { %v6666_v9 = vld [vmem:[#allocation8 + $0x868] sm:$0xf0]  ;;  %v5744_v42 = vld [vmem:[#allocation8 + $0x110] sm:$0xf] }
 0x1cb   :  { %v8296_v11 = vld [vmem:[#allocation8 + $0xa4c] sm:$0xf]  ;;  %v6669_v19 = vor.u32 %v8232_v8, %v6666_v9  ;;  %4204 = vmatpush.bf16.msrb.mxu3 %v7501_v14  ;;  %v8925_v8 = vpop.f32.mrf.mxu2  ;;  %v5809_v14 = vor.u32 %v8021_v59, %v5808_v52  ;;  %v8205_v59 = vld [vmem:[#allocation8 + $0x76c] sm:$0xf0] }
 0x1cc   :  { %v6922_v13 = vld [vmem:[#allocation8 + $0xa68] sm:$0xf0] }
 0x1cd   :  { %v8368_v15 = vld [vmem:[#allocation8 + $0xc8c] sm:$0xf]  ;;  %v6925_v28 = vor.u32 %v8296_v11, %v6922_v13  ;;  %4164 = vmatpush.bf16.msrb.mxu0 %v6669_v19  ;;  %v8157_v11 = vld [vmem:[#allocation8 + $0x5ec] sm:$0xf0]  ;;  %v8927_v13 = vpop.f32.mrf.mxu3 }
 0x1ce   :  { %v7210_v16 = vld [vmem:[#allocation8 + $0xca8] sm:$0xf0]  ;;  %9173 = vst [vmem:[#allocation21_spill] sm:$0xff] %v8927_v13  ;;  %v5776_v19 = vld [vmem:[#allocation8 + $0x150] sm:$0xf]  ;;  %v6353_v2 = vor.u32 %v8157_v11, %v6352_v10 }
 0x1cf   :  { %v8432_v17 = vld [vmem:[#allocation8 + $0xe8c] sm:$0xf]  ;;  %v7213_v33 = vor.u32 %v8368_v15, %v7210_v16  ;;  %4178 = vmatpush.bf16.msrb.mxu1 %v6925_v28  ;;  %v6608_v15 = vld [vmem:[#allocation8 + $0x7d0] sm:$0xf]  ;;  %v8274_v13 = vld [vmem:[#allocation8 + $0x99c] sm:$0xf] }
 0x1d0   :  { %v7466_v21 = vld [vmem:[#allocation8 + $0xea8] sm:$0xf0]  ;;  %v8221_v16 = vld [vmem:[#allocation8 + $0x7ec] sm:$0xf0] }
 0x1d1   :  { %v8224_v22 = vld [vmem:[#allocation8 + $0x80c] sm:$0xf]  ;;  %v7469_v40 = vor.u32 %v8432_v17, %v7466_v21  ;;  %4191 = vmatpush.bf16.msrb.mxu2 %v7213_v33  ;;  %v6065_v17 = vor.u32 %v8085_v63, %v6064_v61  ;;  %v8013_v21 = vld [vmem:[#allocation8 + $0x16c] sm:$0xf0]  ;;  %v6001_v61 = vor.u32 %v8069_v44, %v6000_v38 }
 0x1d2   :  { %v6634_v29 = vld [vmem:[#allocation8 + $0x828] sm:$0xf0]  ;;  %v6032_v28 = vld [vmem:[#allocation8 + $0x350] sm:$0xf]  ;;  %v5777_v35 = vor.u32 %v8013_v21, %v5776_v19 }
 0x1d3   :  { %v8288_v30 = vld [vmem:[#allocation8 + $0xa0c] sm:$0xf]  ;;  %v6637_v45 = vor.u32 %v8224_v22, %v6634_v29  ;;  %4205 = vmatpush.bf16.msrb.mxu3 %v7469_v40  ;;  %v8930_v22 = vpop.f32.mrf.mxu0  ;;  %v8077_v29 = vld [vmem:[#allocation8 + $0x36c] sm:$0xf0] }
 0x1d4   :  { %v6890_v32 = vld [vmem:[#allocation8 + $0xa28] sm:$0xf0]  ;;  %v6320_v33 = vld [vmem:[#allocation8 + $0x590] sm:$0xf]  ;;  %v6033_v40 = vor.u32 %v8077_v29, %v6032_v28 }
 0x1d5   :  { %v8360_v41 = vld [vmem:[#allocation8 + $0xc4c] sm:$0xf]  ;;  %v6893_v49 = vor.u32 %v8288_v30, %v6890_v32  ;;  %4165 = vmatpush.bf16.msrb.mxu0 %v6637_v45  ;;  %v8933_v30 = vpop.f32.mrf.mxu1  ;;  %v6609_v32 = vor.u32 %v8221_v16, %v6608_v15  ;;  %v3915_v45 = vpop.f32.mrf.mxu2  ;;  %v5712_v63 = vld [vmem:[#allocation8 + $0xd0] sm:$0xf] }
 0x1d6   :  { %v7178_v43 = vld [vmem:[#allocation8 + $0xc68] sm:$0xf0]  ;;  %v3929_v52 = vpop.f32.mrf.mxu3  ;;  %v6256_v11 = vld [vmem:[#allocation8 + $0x510] sm:$0xf] }
 0x1d7   :  { %v8424_v46 = vld [vmem:[#allocation8 + $0xe4c] sm:$0xf]  ;;  %v7181_v57 = vor.u32 %v8360_v41, %v7178_v43  ;;  %4179 = vmatpush.bf16.msrb.mxu1 %v6893_v49  ;;  %v8005_v41 = vld [vmem:[#allocation8 + $0x12c] sm:$0xf0]  ;;  %v6321_v43 = vor.u32 %v8149_v34, %v6320_v33 }
 0x1d8   :  { %v7434_v47 = vld [vmem:[#allocation8 + $0xe68] sm:$0xf0]  ;;  %4166 = vmatmul.bf16.vlgmr.msrb.gmra.mxu0 %v8868_v23  ;;  %v8141_v49 = vld [vmem:[#allocation8 + $0x56c] sm:$0xf0] }
 0x1d9   :  { %v7437_v4 = vor.u32 %v8424_v46, %v7434_v47  ;;  %v8352_v5 = vld [vmem:[#allocation8 + $0xc0c] sm:$0xf]  ;;  %4214 = vmatpush.bf16.msra.mxu0 %v5841_v50  ;;  %4192 = vmatpush.bf16.msrb.mxu2 %v7181_v57  ;;  %v6577_v46 = vor.u32 %v8213_v39, %v6576_v36  ;;  %v6288_v47 = vld [vmem:[#allocation8 + $0x550] sm:$0xf]  ;;  %v3916_v50 = vadd.f32 %v3915_v45, %v3902_v53 }
 0x1da   :  { %v7146_v6 = vld [vmem:[#allocation8 + $0xc28] sm:$0xf0]  ;;  %4180 = vmatmul.bf16.vlgmr.msrb.gmra.mxu1 %v8870_v27  ;;  %v6544_v57 = vld [vmem:[#allocation8 + $0x750] sm:$0xf] }
 0x1db   :  { %v8416_v7 = vld [vmem:[#allocation8 + $0xe0c] sm:$0xf]  ;;  %4228 = vmatpush.bf16.msra.mxu1 %v6097_v55  ;;  %v7149_v18 = vor.u32 %v8352_v5, %v7146_v6  ;;  %4206 = vmatpush.bf16.msrb.mxu3 %v7437_v4  ;;  %v5745_v55 = vor.u32 %v8005_v41, %v5744_v42  ;;  %v7997_v4 = vld [vmem:[#allocation8 + $0xec] sm:$0xf0]  ;;  %v3930_v5 = vadd.f32 %v3929_v52, %v3916_v50  ;;  %v3943_v53 = vpop.f32.mrf.mxu0 }
 0x1dc   :  { %v7402_v9 = vld [vmem:[#allocation8 + $0xe28] sm:$0xf0]  ;;  %v6289_v6 = vor.u32 %v8141_v49, %v6288_v47  ;;  %v6545_v10 = vor.u32 %v8205_v59, %v6544_v57  ;;  %v5713_v16 = vor.u32 %v7997_v4, %v5712_v63  ;;  %v8053_v33 = vld [vmem:[#allocation8 + $0x2ac] sm:$0xf0] }
 0x1dd   :  { %v7405_v24 = vor.u32 %v8416_v7, %v7402_v9  ;;  %4215 = vmatpush.bf16.msra.mxu0 %v5809_v14  ;;  %4193 = vmatpush.bf16.msrb.mxu2 %v7149_v18  ;;  %v5968_v7 = vld [vmem:[#allocation8 + $0x2d0] sm:$0xf]  ;;  %v3944_v15 = vadd.f32 %v3943_v53, %v3930_v5  ;;  %v3957_v19 = vpop.f32.mrf.mxu1  ;;  %v8937_v34 = vpop.f32.mrf.mxu2 }
 0x1de   :  { %v8061_v9 = vld [vmem:[#allocation8 + $0x2ec] sm:$0xf0] }
 0x1df   :  { %4229 = vmatpush.bf16.msra.mxu1 %v6065_v17  ;;  %4207 = vmatpush.bf16.msrb.mxu3 %v7405_v24  ;;  %v8133_v14 = vld [vmem:[#allocation8 + $0x52c] sm:$0xf0]  ;;  %v5969_v21 = vor.u32 %v8061_v9, %v5968_v7  ;;  %v3958_v28 = vadd.f32 %v3957_v19, %v3944_v15 }
 0x1e0   :  { %4194 = vmatmul.bf16.vlgmr.msrb.gmra.mxu2 %v8874_v62  ;;  %v6512_v17 = vld [vmem:[#allocation8 + $0x710] sm:$0xf]  ;;  %v6257_v29 = vor.u32 %v8133_v14, %v6256_v11 }
 0x1e1   :  { %4242 = vmatpush.bf16.msra.mxu2 %v6353_v2  ;;  %4216 = vmatpush.bf16.msra.mxu0 %v5777_v35  ;;  %v8197_v18 = vld [vmem:[#allocation8 + $0x72c] sm:$0xf0] }
 0x1e2   :  { %4208 = vmatmul.bf16.vlgmr.msrb.gmra.mxu3 %v8876_v0  ;;  %v5680_v24 = vld [vmem:[#allocation8 + $0x90] sm:$0xf]  ;;  %v6513_v35 = vor.u32 %v8197_v18, %v6512_v17 }
 0x1e3   :  { %4256 = vmatpush.bf16.msra.mxu3 %v6609_v32  ;;  %4230 = vmatpush.bf16.msra.mxu1 %v6033_v40  ;;  %v7989_v2 = vld [vmem:[#allocation8 + $0xac] sm:$0xf0]  ;;  %v8939_v40 = vpop.f32.mrf.mxu3 }
 0x1e4   :  { %v5936_v32 = vld [vmem:[#allocation8 + $0x290] sm:$0xf]  ;;  %v5681_v42 = vor.u32 %v7989_v2, %v5680_v24 }
 0x1e5   :  { %4243 = vmatpush.bf16.msra.mxu2 %v6321_v43  ;;  %4217 = vmatpush.bf16.msra.mxu0 %v5745_v55  ;;  %v6224_v36 = vld [vmem:[#allocation8 + $0x4d0] sm:$0xf]  ;;  %v5937_v38 = vor.u32 %v8053_v33, %v5936_v32  ;;  %v3971_v18 = vpop.f32.mrf.mxu2 }
 0x1e6   :  { %v8125_v39 = vld [vmem:[#allocation8 + $0x4ec] sm:$0xf0]  ;;  %v3972_v2 = vadd.f32 %v3971_v18, %v3958_v28  ;;  %v8947_v18 = vpop.f32.mrf.mxu1 }
 0x1e7   :  { %4257 = vmatpush.bf16.msra.mxu3 %v6577_v46  ;;  %4231 = vmatpush.bf16.msra.mxu1 %v6001_v61  ;;  %v6480_v41 = vld [vmem:[#allocation8 + $0x6d0] sm:$0xf]  ;;  %v6225_v46 = vor.u32 %v8125_v39, %v6224_v36 }
 0x1e8   :  { %v8189_v43 = vld [vmem:[#allocation8 + $0x6ec] sm:$0xf0] }
 0x1e9   :  { %4244 = vmatpush.bf16.msra.mxu2 %v6289_v6  ;;  %4218 = vmatpush.bf16.msra.mxu0 %v5713_v16  ;;  %v5648_v44 = vld [vmem:[#allocation8 + $0x50] sm:$0xf]  ;;  %v6481_v50 = vor.u32 %v8189_v43, %v6480_v41 }
 0x1ea   :  { %v7981_v45 = vld [vmem:[#allocation8 + $0x6c] sm:$0xf0] }
 0x1eb   :  { %4258 = vmatpush.bf16.msra.mxu3 %v6545_v10  ;;  %4232 = vmatpush.bf16.msra.mxu1 %v5969_v21  ;;  %v5904_v47 = vld [vmem:[#allocation8 + $0x250] sm:$0xf]  ;;  %v5649_v57 = vor.u32 %v7981_v45, %v5648_v44 }
 0x1ec   :  { %v8045_v49 = vld [vmem:[#allocation8 + $0x26c] sm:$0xf0] }
 0x1ed   :  { %4245 = vmatpush.bf16.msra.mxu2 %v6257_v29  ;;  %v6192_v52 = vld [vmem:[#allocation8 + $0x490] sm:$0xf]  ;;  %4219 = vmatpush.bf16.msra.mxu0 %v5681_v42  ;;  %v5905_v4 = vor.u32 %v8045_v49, %v5904_v47 }
 0x1ee   :  { %v8117_v55 = vld [vmem:[#allocation8 + $0x4ac] sm:$0xf0] }
 0x1ef   :  { %4259 = vmatpush.bf16.msra.mxu3 %v6513_v35  ;;  %v6448_v59 = vld [vmem:[#allocation8 + $0x690] sm:$0xf]  ;;  %4233 = vmatpush.bf16.msra.mxu1 %v5937_v38  ;;  %v6193_v9 = vor.u32 %v8117_v55, %v6192_v52  ;;  %v3985_v35 = vpop.f32.mrf.mxu3 }
 0x1f0   :  { %v8181_v61 = vld [vmem:[#allocation8 + $0x6ac] sm:$0xf0]  ;;  %v8941_v38 = vadd.f32 %v3985_v35, %v3972_v2 }
 0x1f1   :  { %v5616_v63 = vld [vmem:[#allocation8 + $0x10] sm:$0xf]  ;;  %4246 = vmatpush.bf16.msra.mxu2 %v6225_v46  ;;  %v6449_v14 = vor.u32 %v8181_v61, %v6448_v59  ;;  %4220 = vmatpush.bf16.msra.mxu0 %v5649_v57 }
 0x1f2   :  { %v7973_v5 = vld [vmem:[#allocation8 + $0x2c] sm:$0xf0]  ;;  %9174 = vst [vmem:[#allocation22_spill] sm:$0xff] %v8941_v38 }
 0x1f3   :  { %v5872_v6 = vld [vmem:[#allocation8 + $0x210] sm:$0xf]  ;;  %4260 = vmatpush.bf16.msra.mxu3 %v6481_v50  ;;  %v5617_v19 = vor.u32 %v7973_v5, %v5616_v63  ;;  %4234 = vmatpush.bf16.msra.mxu1 %v5905_v4 }
 0x1f4   :  { %v8037_v7 = vld [vmem:[#allocation8 + $0x22c] sm:$0xf0] }
 0x1f5   :  { %v6864_v53 = vld [vmem:[#allocation8 + $0x9d0] sm:$0xf]  ;;  %v5873_v29 = vor.u32 %v8037_v7, %v5872_v6  ;;  %4247 = vmatpush.bf16.msra.mxu2 %v6193_v9  ;;  %4221 = vmatpush.bf16.msra.mxu0 %v5617_v19 }
 0x1f6   :  { %v8285_v10 = vld [vmem:[#allocation8 + $0x9ec] sm:$0xf0] }
 0x1f7   :  { %v7120_v11 = vld [vmem:[#allocation8 + $0xbd0] sm:$0xf]  ;;  %v6865_v32 = vor.u32 %v8285_v10, %v6864_v53  ;;  %4261 = vmatpush.bf16.msra.mxu3 %v6449_v14  ;;  %4235 = vmatpush.bf16.msra.mxu1 %v5873_v29  ;;  %v8944_v53 = vpop.f32.mrf.mxu0 }
 0x1f8   :  { %v8349_v15 = vld [vmem:[#allocation8 + $0xbec] sm:$0xf0]  ;;  %4222 = vmatmul.bf16.vlgmr.msra.gmra.mxu0 %v8852_v26 }
 0x1f9   :  { %v6160_v16 = vld [vmem:[#allocation8 + $0x450] sm:$0xf]  ;;  %v7121_v36 = vor.u32 %v8349_v15, %v7120_v11  ;;  %4270 = vmatpush.bf16.msrb.mxu0 %v6865_v32 }
 0x1fa   :  { %v8109_v17 = vld [vmem:[#allocation8 + $0x46c] sm:$0xf0]  ;;  %4236 = vmatmul.bf16.vlgmr.msra.gmra.mxu1 %v8854_v31 }
 0x1fb   :  { %v6416_v21 = vld [vmem:[#allocation8 + $0x650] sm:$0xf]  ;;  %v6161_v39 = vor.u32 %v8109_v17, %v6160_v16  ;;  %4284 = vmatpush.bf16.msrb.mxu1 %v7121_v36 }
 0x1fc   :  { %v8173_v24 = vld [vmem:[#allocation8 + $0x66c] sm:$0xf0] }
 0x1fd   :  { %v6832_v33 = vld [vmem:[#allocation8 + $0x990] sm:$0xf]  ;;  %v6417_v44 = vor.u32 %v8173_v24, %v6416_v21  ;;  %4248 = vmatpush.bf16.msra.mxu2 %v6161_v39  ;;  %v9169_v39 = vperm.slane %v8892_v1, 2 }
 0x1fe   :  { %v8277_v42 = vld [vmem:[#allocation8 + $0x9ac] sm:$0xf0] }
 0x1ff   :  { %v7088_v41 = vld [vmem:[#allocation8 + $0xb90] sm:$0xf]  ;;  %v6833_v52 = vor.u32 %v8277_v42, %v6832_v33  ;;  %4262 = vmatpush.bf16.msra.mxu3 %v6417_v44 }
 0x200   :  { %v8341_v43 = vld [vmem:[#allocation8 + $0xbac] sm:$0xf0] }
 0x201   :  { %v6128_v45 = vld [vmem:[#allocation8 + $0x410] sm:$0xf]  ;;  %v7089_v59 = vor.u32 %v8341_v43, %v7088_v41  ;;  %4271 = vmatpush.bf16.msrb.mxu0 %v6833_v52 }
 0x202   :  { %v8101_v46 = vld [vmem:[#allocation8 + $0x42c] sm:$0xf0] }
 0x203   :  { %v6384_v47 = vld [vmem:[#allocation8 + $0x610] sm:$0xf]  ;;  %v6129_v61 = vor.u32 %v8101_v46, %v6128_v45  ;;  %4285 = vmatpush.bf16.msrb.mxu1 %v7089_v59 }
 0x204   :  { %v8165_v28 = vld [vmem:[#allocation8 + $0x62c] sm:$0xf0] }
 0x205   :  { %v7376_v49 = vld [vmem:[#allocation8 + $0xdd0] sm:$0xf]  ;;  %v6385_v5 = vor.u32 %v8165_v28, %v6384_v47  ;;  %4249 = vmatpush.bf16.msra.mxu2 %v6129_v61 }
 0x206   :  { %v8413_v50 = vld [vmem:[#allocation8 + $0xdec] sm:$0xf0] }
 0x207   :  { %v7632_v55 = vld [vmem:[#allocation8 + $0xfd0] sm:$0xf]  ;;  %v7377_v6 = vor.u32 %v8413_v50, %v7376_v49  ;;  %4263 = vmatpush.bf16.msra.mxu3 %v6385_v5  ;;  %v3999_v50 = vpop.f32.mrf.mxu0  ;;  %v4013_v5 = vpop.f32.mrf.mxu1 }
 0x208   :  { %v8477_v57 = vld [vmem:[#allocation8 + $0xfec] sm:$0xf0]  ;;  %4250 = vmatmul.bf16.vlgmr.msra.gmra.mxu2 %v8858_v54  ;;  %v4000_v59 = vadd.f32 %v3999_v50, %v9169_v39 }
 0x209   :  { %v6800_v63 = vld [vmem:[#allocation8 + $0x950] sm:$0xf]  ;;  %v7633_v10 = vor.u32 %v8477_v57, %v7632_v55  ;;  %4298 = vmatpush.bf16.msrb.mxu2 %v7377_v6 }
 0x20a   :  { %v8269_v4 = vld [vmem:[#allocation8 + $0x96c] sm:$0xf0]  ;;  %4264 = vmatmul.bf16.vlgmr.msra.gmra.mxu3 %v8860_v60 }
 0x20b   :  { %v7056_v7 = vld [vmem:[#allocation8 + $0xb50] sm:$0xf]  ;;  %v6801_v15 = vor.u32 %v8269_v4, %v6800_v63  ;;  %4312 = vmatpush.bf16.msrb.mxu3 %v7633_v10  ;;  %v4014_v10 = vadd.f32 %v4013_v5, %v4000_v59  ;;  %v8089_v5 = vld [vmem:[#allocation8 + $0x3d4] sm:$0xf] }
 0x20c   :  { %v8333_v9 = vld [vmem:[#allocation8 + $0xb6c] sm:$0xf0] }
 0x20d   :  { %v7344_v11 = vld [vmem:[#allocation8 + $0xd90] sm:$0xf]  ;;  %v7057_v19 = vor.u32 %v8333_v9, %v7056_v7  ;;  %4272 = vmatpush.bf16.msrb.mxu0 %v6801_v15 }
 0x20e   :  { %v8405_v14 = vld [vmem:[#allocation8 + $0xdac] sm:$0xf0] }
 0x20f   :  { %v7600_v16 = vld [vmem:[#allocation8 + $0xf90] sm:$0xf]  ;;  %v7345_v2 = vor.u32 %v8405_v14, %v7344_v11  ;;  %4286 = vmatpush.bf16.msrb.mxu1 %v7057_v19 }
 0x210   :  { %v8469_v17 = vld [vmem:[#allocation8 + $0xfac] sm:$0xf0] }
 0x211   :  { %v6768_v21 = vld [vmem:[#allocation8 + $0x910] sm:$0xf]  ;;  %v7601_v33 = vor.u32 %v8469_v17, %v7600_v16  ;;  %4299 = vmatpush.bf16.msrb.mxu2 %v7345_v2  ;;  %v8954_v16 = vpop.f32.mrf.mxu2 }
 0x212   :  { %v8261_v24 = vld [vmem:[#allocation8 + $0x92c] sm:$0xf0] }
 0x213   :  { %v7024_v29 = vld [vmem:[#allocation8 + $0xb10] sm:$0xf]  ;;  %v6769_v42 = vor.u32 %v8261_v24, %v6768_v21  ;;  %4313 = vmatpush.bf16.msrb.mxu3 %v7601_v33 }
 0x214   :  { %v8325_v32 = vld [vmem:[#allocation8 + $0xb2c] sm:$0xf0] }
 0x215   :  { %v7312_v35 = vld [vmem:[#allocation8 + $0xd50] sm:$0xf]  ;;  %v7025_v44 = vor.u32 %v8325_v32, %v7024_v29  ;;  %4273 = vmatpush.bf16.msrb.mxu0 %v6769_v42  ;;  %v8956_v32 = vpop.f32.mrf.mxu3 }
 0x216   :  { %v8397_v36 = vld [vmem:[#allocation8 + $0xd6c] sm:$0xf0]  ;;  %9175 = vst [vmem:[#allocation23_spill] sm:$0xff] %v8956_v32 }
 0x217   :  { %v7568_v41 = vld [vmem:[#allocation8 + $0xf50] sm:$0xf]  ;;  %v7313_v47 = vor.u32 %v8397_v36, %v7312_v35  ;;  %4287 = vmatpush.bf16.msrb.mxu1 %v7025_v44 }
 0x218   :  { %v8461_v43 = vld [vmem:[#allocation8 + $0xf6c] sm:$0xf0] }
 0x219   :  { %v6736_v45 = vld [vmem:[#allocation8 + $0x8d0] sm:$0xf]  ;;  %v7569_v52 = vor.u32 %v8461_v43, %v7568_v41  ;;  %4300 = vmatpush.bf16.msrb.mxu2 %v7313_v47 }
 0x21a   :  { %v8253_v46 = vld [vmem:[#allocation8 + $0x8ec] sm:$0xf0] }
 0x21b   :  { %v6992_v28 = vld [vmem:[#allocation8 + $0xad0] sm:$0xf]  ;;  %v6737_v61 = vor.u32 %v8253_v46, %v6736_v45  ;;  %4314 = vmatpush.bf16.msrb.mxu3 %v7569_v52 }
 0x21c   :  { %v8317_v49 = vld [vmem:[#allocation8 + $0xaec] sm:$0xf0] }
 0x21d   :  { %v7280_v55 = vld [vmem:[#allocation8 + $0xd10] sm:$0xf]  ;;  %v6993_v6 = vor.u32 %v8317_v49, %v6992_v28  ;;  %4274 = vmatpush.bf16.msrb.mxu0 %v6737_v61 }
 0x21e   :  { %v8389_v57 = vld [vmem:[#allocation8 + $0xd2c] sm:$0xf0] }
 0x21f   :  { %v7536_v63 = vld [vmem:[#allocation8 + $0xf10] sm:$0xf]  ;;  %v7281_v11 = vor.u32 %v8389_v57, %v7280_v55  ;;  %4288 = vmatpush.bf16.msrb.mxu1 %v6993_v6  ;;  %v4027_v6 = vpop.f32.mrf.mxu2 }
 0x220   :  { %v8453_v4 = vld [vmem:[#allocation8 + $0xf2c] sm:$0xf0] }
 0x221   :  { %v6704_v7 = vld [vmem:[#allocation8 + $0x890] sm:$0xf]  ;;  %v7537_v17 = vor.u32 %v8453_v4, %v7536_v63  ;;  %4301 = vmatpush.bf16.msrb.mxu2 %v7281_v11  ;;  %v8025_v63 = vld [vmem:[#allocation8 + $0x1d4] sm:$0xf] }
 0x222   :  { %v8245_v9 = vld [vmem:[#allocation8 + $0x8ac] sm:$0xf0]  ;;  %v5842_v4 = vld [vmem:[#allocation8 + $0x1f0] sm:$0xf0] }
 0x223   :  { %v6960_v14 = vld [vmem:[#allocation8 + $0xa90] sm:$0xf]  ;;  %v6705_v24 = vor.u32 %v8245_v9, %v6704_v7  ;;  %4315 = vmatpush.bf16.msrb.mxu3 %v7537_v17  ;;  %v6098_v9 = vld [vmem:[#allocation8 + $0x3f0] sm:$0xf0] }
 0x224   :  { %v8309_v15 = vld [vmem:[#allocation8 + $0xaac] sm:$0xf0] }
 0x225   :  { %v7248_v19 = vld [vmem:[#allocation8 + $0xcd0] sm:$0xf]  ;;  %v6961_v33 = vor.u32 %v8309_v15, %v6960_v14  ;;  %4275 = vmatpush.bf16.msrb.mxu0 %v6705_v24  ;;  %v4028_v15 = vadd.f32 %v4027_v6, %v4014_v10  ;;  %v4041_v24 = vpop.f32.mrf.mxu3 }
 0x226   :  { %v8381_v21 = vld [vmem:[#allocation8 + $0xcec] sm:$0xf0] }
 0x227   :  { %v7504_v2 = vld [vmem:[#allocation8 + $0xed0] sm:$0xf]  ;;  %v7249_v42 = vor.u32 %v8381_v21, %v7248_v19  ;;  %4289 = vmatpush.bf16.msrb.mxu1 %v6961_v33  ;;  %v8017_v33 = vld [vmem:[#allocation8 + $0x194] sm:$0xf] }
 0x228   :  { %v8445_v29 = vld [vmem:[#allocation8 + $0xeec] sm:$0xf0] }
 0x229   :  { %v6672_v35 = vld [vmem:[#allocation8 + $0x850] sm:$0xf]  ;;  %v7505_v44 = vor.u32 %v8445_v29, %v7504_v2  ;;  %4302 = vmatpush.bf16.msrb.mxu2 %v7249_v42  ;;  %v5845_v29 = vor.u32 %v8025_v63, %v5842_v4  ;;  %v8009_v63 = vld [vmem:[#allocation8 + $0x154] sm:$0xf] }
 0x22a   :  { %v8237_v36 = vld [vmem:[#allocation8 + $0x86c] sm:$0xf0]  ;;  %v5778_v4 = vld [vmem:[#allocation8 + $0x170] sm:$0xf0] }
 0x22b   :  { %v6928_v41 = vld [vmem:[#allocation8 + $0xa50] sm:$0xf]  ;;  %v6673_v47 = vor.u32 %v8237_v36, %v6672_v35  ;;  %4316 = vmatpush.bf16.msrb.mxu3 %v7505_v44  ;;  %v8958_v35 = vadd.f32 %v4041_v24, %v4028_v15  ;;  %v6101_v36 = vor.u32 %v8089_v5, %v6098_v9  ;;  %v6066_v44 = vld [vmem:[#allocation8 + $0x3b0] sm:$0xf0] }
 0x22c   :  { %v8301_v43 = vld [vmem:[#allocation8 + $0xa6c] sm:$0xf0]  ;;  %v6034_v9 = vld [vmem:[#allocation8 + $0x370] sm:$0xf0] }
 0x22d   :  { %v7216_v45 = vld [vmem:[#allocation8 + $0xc90] sm:$0xf]  ;;  %v6929_v52 = vor.u32 %v8301_v43, %v6928_v41  ;;  %4276 = vmatpush.bf16.msrb.mxu0 %v6673_v47  ;;  %v5810_v41 = vld [vmem:[#allocation8 + $0x1b0] sm:$0xf0] }
 0x22e   :  { %v8373_v46 = vld [vmem:[#allocation8 + $0xcac] sm:$0xf0]  ;;  %v8081_v43 = vld [vmem:[#allocation8 + $0x394] sm:$0xf] }
 0x22f   :  { %v7472_v28 = vld [vmem:[#allocation8 + $0xe90] sm:$0xf]  ;;  %v7217_v61 = vor.u32 %v8373_v46, %v7216_v45  ;;  %4290 = vmatpush.bf16.msrb.mxu1 %v6929_v52  ;;  %v5813_v52 = vor.u32 %v8017_v33, %v5810_v41  ;;  %v8145_v15 = vld [vmem:[#allocation8 + $0x594] sm:$0xf] }
 0x230   :  { %v8437_v49 = vld [vmem:[#allocation8 + $0xeac] sm:$0xf0]  ;;  %v6578_v24 = vld [vmem:[#allocation8 + $0x7b0] sm:$0xf0] }
 0x231   :  { %v6640_v50 = vld [vmem:[#allocation8 + $0x810] sm:$0xf]  ;;  %v7473_v7 = vor.u32 %v8437_v49, %v7472_v28  ;;  %4303 = vmatpush.bf16.msrb.mxu2 %v7217_v61  ;;  %v8153_v49 = vld [vmem:[#allocation8 + $0x5d4] sm:$0xf] }
 0x232   :  { %v8229_v55 = vld [vmem:[#allocation8 + $0x82c] sm:$0xf0]  ;;  %v8001_v33 = vld [vmem:[#allocation8 + $0x114] sm:$0xf] }
 0x233   :  { %v6896_v57 = vld [vmem:[#allocation8 + $0xa10] sm:$0xf]  ;;  %v6641_v17 = vor.u32 %v8229_v55, %v6640_v50  ;;  %4317 = vmatpush.bf16.msrb.mxu3 %v7473_v7  ;;  %v6354_v50 = vld [vmem:[#allocation8 + $0x5f0] sm:$0xf0] }
 0x234   :  { %v8293_v59 = vld [vmem:[#allocation8 + $0xa2c] sm:$0xf0]  ;;  %v8217_v55 = vld [vmem:[#allocation8 + $0x7d4] sm:$0xf]  ;;  %v6357_v6 = vor.u32 %v8153_v49, %v6354_v50 }
 0x235   :  { %v7184_v11 = vld [vmem:[#allocation8 + $0xc50] sm:$0xf]  ;;  %v6897_v2 = vor.u32 %v8293_v59, %v6896_v57  ;;  %4277 = vmatpush.bf16.msrb.mxu0 %v6641_v17  ;;  %v6610_v57 = vld [vmem:[#allocation8 + $0x7f0] sm:$0xf0]  ;;  %v6069_v59 = vor.u32 %v8081_v43, %v6066_v44 }
 0x236   :  { %v8365_v14 = vld [vmem:[#allocation8 + $0xc6c] sm:$0xf0]  ;;  %v8073_v7 = vld [vmem:[#allocation8 + $0x354] sm:$0xf] }
 0x237   :  { %v7440_v19 = vld [vmem:[#allocation8 + $0xe50] sm:$0xf]  ;;  %v7185_v42 = vor.u32 %v8365_v14, %v7184_v11  ;;  %4291 = vmatpush.bf16.msrb.mxu1 %v6897_v2  ;;  %v8961_v11 = vpop.f32.mrf.mxu0  ;;  %v6613_v14 = vor.u32 %v8217_v55, %v6610_v57  ;;  %v6322_v17 = vld [vmem:[#allocation8 + $0x5b0] sm:$0xf0]  ;;  %v8964_v2 = vpop.f32.mrf.mxu1 }
 0x238   :  { %v8429_v21 = vld [vmem:[#allocation8 + $0xe6c] sm:$0xf0]  ;;  %4278 = vmatmul.bf16.vlgmr.msrb.gmra.mxu0 %v8868_v23  ;;  %v8065_v41 = vld [vmem:[#allocation8 + $0x314] sm:$0xf] }
 0x239   :  { %v7441_v45 = vor.u32 %v8429_v21, %v7440_v19  ;;  %v7152_v10 = vld [vmem:[#allocation8 + $0xc10] sm:$0xf]  ;;  %4326 = vmatpush.bf16.msra.mxu0 %v5845_v29  ;;  %4304 = vmatpush.bf16.msrb.mxu2 %v7185_v42  ;;  %v5781_v19 = vor.u32 %v8009_v63, %v5778_v4  ;;  %v8209_v21 = vld [vmem:[#allocation8 + $0x794] sm:$0xf]  ;;  %v6037_v29 = vor.u32 %v8073_v7, %v6034_v9 }
 0x23a   :  { %v8357_v46 = vld [vmem:[#allocation8 + $0xc2c] sm:$0xf0]  ;;  %4292 = vmatmul.bf16.vlgmr.msrb.gmra.mxu1 %v8870_v27  ;;  %v6325_v42 = vor.u32 %v8145_v15, %v6322_v17  ;;  %v6002_v43 = vld [vmem:[#allocation8 + $0x330] sm:$0xf0]  ;;  %v6581_v44 = vor.u32 %v8209_v21, %v6578_v24 }
 0x23b   :  { %v7408_v47 = vld [vmem:[#allocation8 + $0xe10] sm:$0xf]  ;;  %4340 = vmatpush.bf16.msra.mxu1 %v6101_v36  ;;  %v7153_v61 = vor.u32 %v8357_v46, %v7152_v10  ;;  %4318 = vmatpush.bf16.msrb.mxu3 %v7441_v45  ;;  %v5746_v36 = vld [vmem:[#allocation8 + $0x130] sm:$0xf0]  ;;  %v6005_v49 = vor.u32 %v8065_v41, %v6002_v43 }
 0x23c   :  { %v8421_v28 = vld [vmem:[#allocation8 + $0xe2c] sm:$0xf0]  ;;  %v8137_v45 = vld [vmem:[#allocation8 + $0x554] sm:$0xf]  ;;  %v5749_v46 = vor.u32 %v8001_v33, %v5746_v36 }
 0x23d   :  { %v7409_v5 = vor.u32 %v8421_v28, %v7408_v47  ;;  %4327 = vmatpush.bf16.msra.mxu0 %v5813_v52  ;;  %4305 = vmatpush.bf16.msrb.mxu2 %v7153_v61  ;;  %v6290_v10 = vld [vmem:[#allocation8 + $0x570] sm:$0xf0] }
 0x23e   :  { %v8201_v47 = vld [vmem:[#allocation8 + $0x754] sm:$0xf]  ;;  %v6293_v55 = vor.u32 %v8137_v45, %v6290_v10 }
 0x23f   :  { %4341 = vmatpush.bf16.msra.mxu1 %v6069_v59  ;;  %4319 = vmatpush.bf16.msrb.mxu3 %v7409_v5  ;;  %v6546_v28 = vld [vmem:[#allocation8 + $0x770] sm:$0xf0]  ;;  %v4055_v61 = vpop.f32.mrf.mxu0  ;;  %v4069_v15 = vpop.f32.mrf.mxu1 }
 0x240   :  { %4306 = vmatmul.bf16.vlgmr.msrb.gmra.mxu2 %v8874_v62  ;;  %v7993_v50 = vld [vmem:[#allocation8 + $0xd4] sm:$0xf]  ;;  %v6549_v63 = vor.u32 %v8201_v47, %v6546_v28 }
 0x241   :  { %4354 = vmatpush.bf16.msra.mxu2 %v6357_v6  ;;  %4328 = vmatpush.bf16.msra.mxu0 %v5781_v19  ;;  %v5714_v52 = vld [vmem:[#allocation8 + $0xf0] sm:$0xf0]  ;;  %v4056_v6 = vadd.f32 %v4055_v61, %v8958_v35 }
 0x242   :  { %4320 = vmatmul.bf16.vlgmr.msrb.gmra.mxu3 %v8876_v0  ;;  %v8057_v57 = vld [vmem:[#allocation8 + $0x2d4] sm:$0xf]  ;;  %v5717_v7 = vor.u32 %v7993_v50, %v5714_v52 }
 0x243   :  { %4368 = vmatpush.bf16.msra.mxu3 %v6613_v14  ;;  %4342 = vmatpush.bf16.msra.mxu1 %v6037_v29  ;;  %v5970_v59 = vld [vmem:[#allocation8 + $0x2f0] sm:$0xf0]  ;;  %v4070_v24 = vadd.f32 %v4069_v15, %v4056_v6 }
 0x244   :  { %v8129_v4 = vld [vmem:[#allocation8 + $0x514] sm:$0xf]  ;;  %v5973_v17 = vor.u32 %v8057_v57, %v5970_v59 }
 0x245   :  { %4355 = vmatpush.bf16.msra.mxu2 %v6325_v42  ;;  %v6258_v5 = vld [vmem:[#allocation8 + $0x530] sm:$0xf0]  ;;  %4329 = vmatpush.bf16.msra.mxu0 %v5749_v46  ;;  %v8969_v42 = vpop.f32.mrf.mxu2  ;;  %v8971_v46 = vpop.f32.mrf.mxu3 }
 0x246   :  { %v8193_v9 = vld [vmem:[#allocation8 + $0x714] sm:$0xf]  ;;  %v6261_v29 = vor.u32 %v8129_v4, %v6258_v5 }
 0x247   :  { %4369 = vmatpush.bf16.msra.mxu3 %v6581_v44  ;;  %v6514_v14 = vld [vmem:[#allocation8 + $0x730] sm:$0xf0]  ;;  %4343 = vmatpush.bf16.msra.mxu1 %v6005_v49 }
 0x248   :  { %v7985_v19 = vld [vmem:[#allocation8 + $0x94] sm:$0xf]  ;;  %v6517_v41 = vor.u32 %v8193_v9, %v6514_v14 }
 0x249   :  { %v5682_v21 = vld [vmem:[#allocation8 + $0xb0] sm:$0xf0]  ;;  %4356 = vmatpush.bf16.msra.mxu2 %v6293_v55  ;;  %4330 = vmatpush.bf16.msra.mxu0 %v5717_v7 }
 0x24a   :  { %v8049_v33 = vld [vmem:[#allocation8 + $0x294] sm:$0xf]  ;;  %v5685_v44 = vor.u32 %v7985_v19, %v5682_v21 }
 0x24b   :  { %v5938_v36 = vld [vmem:[#allocation8 + $0x2b0] sm:$0xf0]  ;;  %4370 = vmatpush.bf16.msra.mxu3 %v6549_v63  ;;  %4344 = vmatpush.bf16.msra.mxu1 %v5973_v17 }
 0x24c   :  { %v8121_v43 = vld [vmem:[#allocation8 + $0x4d4] sm:$0xf]  ;;  %v5941_v47 = vor.u32 %v8049_v33, %v5938_v36 }
 0x24d   :  { %v6226_v35 = vld [vmem:[#allocation8 + $0x4f0] sm:$0xf0]  ;;  %4357 = vmatpush.bf16.msra.mxu2 %v6261_v29  ;;  %4331 = vmatpush.bf16.msra.mxu0 %v5685_v44  ;;  %v4083_v33 = vpop.f32.mrf.mxu2 }
 0x24e   :  { %v8185_v45 = vld [vmem:[#allocation8 + $0x6d4] sm:$0xf]  ;;  %v6229_v50 = vor.u32 %v8121_v43, %v6226_v35  ;;  %v4084_v44 = vadd.f32 %v4083_v33, %v4070_v24 }
 0x24f   :  { %v6482_v10 = vld [vmem:[#allocation8 + $0x6f0] sm:$0xf0]  ;;  %4371 = vmatpush.bf16.msra.mxu3 %v6517_v41  ;;  %4345 = vmatpush.bf16.msra.mxu1 %v5941_v47 }
 0x250   :  { %v7977_v28 = vld [vmem:[#allocation8 + $0x54] sm:$0xf]  ;;  %v6485_v57 = vor.u32 %v8185_v45, %v6482_v10 }
 0x251   :  { %v5650_v49 = vld [vmem:[#allocation8 + $0x70] sm:$0xf0]  ;;  %4358 = vmatpush.bf16.msra.mxu2 %v6229_v50 }
 0x252   :  { %v8041_v52 = vld [vmem:[#allocation8 + $0x254] sm:$0xf]  ;;  %v5653_v63 = vor.u32 %v7977_v28, %v5650_v49  ;;  %v4097_v28 = vpop.f32.mrf.mxu3 }
 0x253   :  { %v5906_v55 = vld [vmem:[#allocation8 + $0x270] sm:$0xf0]  ;;  %4372 = vmatpush.bf16.msra.mxu3 %v6485_v57 }
 0x254   :  { %v8113_v59 = vld [vmem:[#allocation8 + $0x494] sm:$0xf]  ;;  %v5909_v7 = vor.u32 %v8041_v52, %v5906_v55  ;;  %4332 = vmatpush.bf16.msra.mxu0 %v5653_v63  ;;  %v8973_v55 = vadd.f32 %v4097_v28, %v4084_v44 }
 0x255   :  { %v6194_v61 = vld [vmem:[#allocation8 + $0x4b0] sm:$0xf0] }
 0x256   :  { %v8177_v4 = vld [vmem:[#allocation8 + $0x694] sm:$0xf]  ;;  %v6197_v17 = vor.u32 %v8113_v59, %v6194_v61  ;;  %4346 = vmatpush.bf16.msra.mxu1 %v5909_v7  ;;  %9176 = vst [vmem:[#allocation24_spill] sm:$0xff] %v8973_v55  ;;  %v6362_v55 = vld [vmem:[#allocation8 + $0x5f8] sm:$0xf0] }
 0x257   :  { %v6450_v5 = vld [vmem:[#allocation8 + $0x6b0] sm:$0xf0] }
 0x258   :  { %v7969_v6 = vld [vmem:[#allocation8 + $0x14] sm:$0xf]  ;;  %v6453_v36 = vor.u32 %v8177_v4, %v6450_v5  ;;  %4359 = vmatpush.bf16.msra.mxu2 %v6197_v17 }
 0x259   :  { %v5618_v9 = vld [vmem:[#allocation8 + $0x30] sm:$0xf0] }
 0x25a   :  { %v8033_v14 = vld [vmem:[#allocation8 + $0x214] sm:$0xf]  ;;  %v5621_v45 = vor.u32 %v7969_v6, %v5618_v9  ;;  %4373 = vmatpush.bf16.msra.mxu3 %v6453_v36  ;;  %v8995_v38 = vpop.f32.mrf.mxu3 }
 0x25b   :  { %v5874_v15 = vld [vmem:[#allocation8 + $0x230] sm:$0xf0]  ;;  %9179 = vst [vmem:[#allocation27_spill] sm:$0xff] %v8995_v38 }
 0x25c   :  { %v8281_v19 = vld [vmem:[#allocation8 + $0x9d4] sm:$0xf]  ;;  %v5877_v49 = vor.u32 %v8033_v14, %v5874_v15  ;;  %4333 = vmatpush.bf16.msra.mxu0 %v5621_v45 }
 0x25d   :  { %v6866_v21 = vld [vmem:[#allocation8 + $0x9f0] sm:$0xf0] }
 0x25e   :  { %v8345_v29 = vld [vmem:[#allocation8 + $0xbd4] sm:$0xf]  ;;  %v6869_v52 = vor.u32 %v8281_v19, %v6866_v21  ;;  %4347 = vmatpush.bf16.msra.mxu1 %v5877_v49 }
 0x25f   :  { %v7122_v41 = vld [vmem:[#allocation8 + $0xbf0] sm:$0xf0]  ;;  %4334 = vmatmul.bf16.vlgmr.msra.gmra.mxu0 %v8852_v26 }
 0x260   :  { %v8105_v43 = vld [vmem:[#allocation8 + $0x454] sm:$0xf]  ;;  %v7125_v59 = vor.u32 %v8345_v29, %v7122_v41  ;;  %4382 = vmatpush.bf16.msrb.mxu0 %v6869_v52 }
 0x261   :  { %v6162_v35 = vld [vmem:[#allocation8 + $0x470] sm:$0xf0]  ;;  %4348 = vmatmul.bf16.vlgmr.msra.gmra.mxu1 %v8854_v31 }
 0x262   :  { %v8169_v10 = vld [vmem:[#allocation8 + $0x654] sm:$0xf]  ;;  %v6165_v57 = vor.u32 %v8105_v43, %v6162_v35  ;;  %4396 = vmatpush.bf16.msrb.mxu1 %v7125_v59 }
 0x263   :  { %v6418_v47 = vld [vmem:[#allocation8 + $0x670] sm:$0xf0] }
 0x264   :  { %v8273_v50 = vld [vmem:[#allocation8 + $0x994] sm:$0xf]  ;;  %v6421_v39 = vor.u32 %v8169_v10, %v6418_v47  ;;  %4360 = vmatpush.bf16.msra.mxu2 %v6165_v57 }
 0x265   :  { %v6834_v61 = vld [vmem:[#allocation8 + $0x9b0] sm:$0xf0] }
 0x266   :  { %v8337_v4 = vld [vmem:[#allocation8 + $0xb94] sm:$0xf]  ;;  %v6837_v14 = vor.u32 %v8273_v50, %v6834_v61  ;;  %4374 = vmatpush.bf16.msra.mxu3 %v6421_v39 }
 0x267   :  { %v7090_v5 = vld [vmem:[#allocation8 + $0xbb0] sm:$0xf0] }
 0x268   :  { %v8097_v24 = vld [vmem:[#allocation8 + $0x414] sm:$0xf]  ;;  %v7093_v17 = vor.u32 %v8337_v4, %v7090_v5  ;;  %4383 = vmatpush.bf16.msrb.mxu0 %v6837_v14 }
 0x269   :  { %v6130_v63 = vld [vmem:[#allocation8 + $0x430] sm:$0xf0] }
 0x26a   :  { %v8161_v6 = vld [vmem:[#allocation8 + $0x614] sm:$0xf]  ;;  %v6133_v21 = vor.u32 %v8097_v24, %v6130_v63  ;;  %4397 = vmatpush.bf16.msrb.mxu1 %v7093_v17 }
 0x26b   :  { %v6386_v9 = vld [vmem:[#allocation8 + $0x630] sm:$0xf0] }
 0x26c   :  { %v8409_v33 = vld [vmem:[#allocation8 + $0xdd4] sm:$0xf]  ;;  %v6389_v36 = vor.u32 %v8161_v6, %v6386_v9  ;;  %4361 = vmatpush.bf16.msra.mxu2 %v6133_v21 }
 0x26d   :  { %v7378_v7 = vld [vmem:[#allocation8 + $0xdf0] sm:$0xf0] }
 0x26e   :  { %v8473_v15 = vld [vmem:[#allocation8 + $0xfd4] sm:$0xf]  ;;  %v7381_v43 = vor.u32 %v8409_v33, %v7378_v7  ;;  %4375 = vmatpush.bf16.msra.mxu3 %v6389_v36 }
 0x26f   :  { %v7634_v19 = vld [vmem:[#allocation8 + $0xff0] sm:$0xf0]  ;;  %4362 = vmatmul.bf16.vlgmr.msra.gmra.mxu2 %v8858_v54 }
 0x270   :  { %v8265_v29 = vld [vmem:[#allocation8 + $0x954] sm:$0xf]  ;;  %v7637_v45 = vor.u32 %v8473_v15, %v7634_v19  ;;  %4410 = vmatpush.bf16.msrb.mxu2 %v7381_v43 }
 0x271   :  { %v6802_v41 = vld [vmem:[#allocation8 + $0x970] sm:$0xf0]  ;;  %4376 = vmatmul.bf16.vlgmr.msra.gmra.mxu3 %v8860_v60 }
 0x272   :  { %v8329_v35 = vld [vmem:[#allocation8 + $0xb54] sm:$0xf]  ;;  %v6805_v28 = vor.u32 %v8265_v29, %v6802_v41  ;;  %4424 = vmatpush.bf16.msrb.mxu3 %v7637_v45 }
 0x273   :  { %v7058_v44 = vld [vmem:[#allocation8 + $0xb70] sm:$0xf0] }
 0x274   :  { %v8401_v10 = vld [vmem:[#allocation8 + $0xd94] sm:$0xf]  ;;  %v7061_v50 = vor.u32 %v8329_v35, %v7058_v44  ;;  %4384 = vmatpush.bf16.msrb.mxu0 %v6805_v28 }
 0x275   :  { %v7346_v47 = vld [vmem:[#allocation8 + $0xdb0] sm:$0xf0] }
 0x276   :  { %v8465_v49 = vld [vmem:[#allocation8 + $0xf94] sm:$0xf]  ;;  %v7349_v57 = vor.u32 %v8401_v10, %v7346_v47  ;;  %4398 = vmatpush.bf16.msrb.mxu1 %v7061_v50 }
 0x277   :  { %v7602_v52 = vld [vmem:[#allocation8 + $0xfb0] sm:$0xf0] }
 0x278   :  { %v8257_v59 = vld [vmem:[#allocation8 + $0x914] sm:$0xf]  ;;  %v7605_v5 = vor.u32 %v8465_v49, %v7602_v52  ;;  %4411 = vmatpush.bf16.msrb.mxu2 %v7349_v57 }
 0x279   :  { %v6770_v39 = vld [vmem:[#allocation8 + $0x930] sm:$0xf0] }
 0x27a   :  { %v8321_v61 = vld [vmem:[#allocation8 + $0xb14] sm:$0xf]  ;;  %v6773_v6 = vor.u32 %v8257_v59, %v6770_v39  ;;  %4425 = vmatpush.bf16.msrb.mxu3 %v7605_v5 }
 0x27b   :  { %v7026_v4 = vld [vmem:[#allocation8 + $0xb30] sm:$0xf0] }
 0x27c   :  { %v8393_v24 = vld [vmem:[#allocation8 + $0xd54] sm:$0xf]  ;;  %v7029_v7 = vor.u32 %v8321_v61, %v7026_v4  ;;  %4385 = vmatpush.bf16.msrb.mxu0 %v6773_v6 }
 0x27d   :  { %v7314_v63 = vld [vmem:[#allocation8 + $0xd70] sm:$0xf0] }
 0x27e   :  { %v8457_v9 = vld [vmem:[#allocation8 + $0xf54] sm:$0xf]  ;;  %v7317_v19 = vor.u32 %v8393_v24, %v7314_v63  ;;  %4399 = vmatpush.bf16.msrb.mxu1 %v7029_v7 }
 0x27f   :  { %v7570_v33 = vld [vmem:[#allocation8 + $0xf70] sm:$0xf0] }
 0x280   :  { %v8249_v14 = vld [vmem:[#allocation8 + $0x8d4] sm:$0xf]  ;;  %v7573_v29 = vor.u32 %v8457_v9, %v7570_v33  ;;  %4412 = vmatpush.bf16.msrb.mxu2 %v7317_v19 }
 0x281   :  { %v6738_v15 = vld [vmem:[#allocation8 + $0x8f0] sm:$0xf0] }
 0x282   :  { %v8313_v17 = vld [vmem:[#allocation8 + $0xad4] sm:$0xf]  ;;  %v6741_v43 = vor.u32 %v8249_v14, %v6738_v15  ;;  %4426 = vmatpush.bf16.msrb.mxu3 %v7573_v29 }
 0x283   :  { %v6994_v21 = vld [vmem:[#allocation8 + $0xaf0] sm:$0xf0] }
 0x284   :  { %v8385_v41 = vld [vmem:[#allocation8 + $0xd14] sm:$0xf]  ;;  %v6997_v45 = vor.u32 %v8313_v17, %v6994_v21  ;;  %4386 = vmatpush.bf16.msrb.mxu0 %v6741_v43 }
 0x285   :  { %v7282_v36 = vld [vmem:[#allocation8 + $0xd30] sm:$0xf0] }
 0x286   :  { %v8449_v35 = vld [vmem:[#allocation8 + $0xf14] sm:$0xf]  ;;  %v7285_v28 = vor.u32 %v8385_v41, %v7282_v36  ;;  %4400 = vmatpush.bf16.msrb.mxu1 %v6997_v45  ;;  %v5848_v45 = vld [vmem:[#allocation8 + $0x1d8] sm:$0xf] }
 0x287   :  { %v7538_v44 = vld [vmem:[#allocation8 + $0xf30] sm:$0xf0] }
 0x288   :  { %v8241_v10 = vld [vmem:[#allocation8 + $0x894] sm:$0xf]  ;;  %v7541_v50 = vor.u32 %v8449_v35, %v7538_v44  ;;  %4413 = vmatpush.bf16.msrb.mxu2 %v7285_v28 }
 0x289   :  { %v6706_v47 = vld [vmem:[#allocation8 + $0x8b0] sm:$0xf0] }
 0x28a   :  { %v8305_v49 = vld [vmem:[#allocation8 + $0xa94] sm:$0xf]  ;;  %v6709_v57 = vor.u32 %v8241_v10, %v6706_v47  ;;  %4427 = vmatpush.bf16.msrb.mxu3 %v7541_v50  ;;  %v8030_v10 = vld [vmem:[#allocation8 + $0x1f4] sm:$0xf0] }
 0x28b   :  { %v6962_v52 = vld [vmem:[#allocation8 + $0xab0] sm:$0xf0]  ;;  %v6104_v47 = vld [vmem:[#allocation8 + $0x3d8] sm:$0xf] }
 0x28c   :  { %v8377_v59 = vld [vmem:[#allocation8 + $0xcd4] sm:$0xf]  ;;  %v6965_v5 = vor.u32 %v8305_v49, %v6962_v52  ;;  %4387 = vmatpush.bf16.msrb.mxu0 %v6709_v57  ;;  %v8094_v49 = vld [vmem:[#allocation8 + $0x3f4] sm:$0xf0] }
 0x28d   :  { %v7250_v39 = vld [vmem:[#allocation8 + $0xcf0] sm:$0xf0] }
 0x28e   :  { %v8441_v61 = vld [vmem:[#allocation8 + $0xed4] sm:$0xf]  ;;  %v7253_v6 = vor.u32 %v8377_v59, %v7250_v39  ;;  %4401 = vmatpush.bf16.msrb.mxu1 %v6965_v5  ;;  %v5816_v5 = vld [vmem:[#allocation8 + $0x198] sm:$0xf] }
 0x28f   :  { %v7506_v4 = vld [vmem:[#allocation8 + $0xef0] sm:$0xf0] }
 0x290   :  { %v8233_v24 = vld [vmem:[#allocation8 + $0x854] sm:$0xf]  ;;  %v7509_v7 = vor.u32 %v8441_v61, %v7506_v4  ;;  %4414 = vmatpush.bf16.msrb.mxu2 %v7253_v6  ;;  %v5849_v4 = vor.u32 %v8030_v10, %v5848_v45  ;;  %v8022_v6 = vld [vmem:[#allocation8 + $0x1b4] sm:$0xf0] }
 0x291   :  { %v6674_v63 = vld [vmem:[#allocation8 + $0x870] sm:$0xf0]  ;;  %v5784_v45 = vld [vmem:[#allocation8 + $0x158] sm:$0xf] }
 0x292   :  { %v8297_v9 = vld [vmem:[#allocation8 + $0xa54] sm:$0xf]  ;;  %v6677_v19 = vor.u32 %v8233_v24, %v6674_v63  ;;  %4428 = vmatpush.bf16.msrb.mxu3 %v7509_v7  ;;  %v6105_v24 = vor.u32 %v8094_v49, %v6104_v47  ;;  %v8014_v10 = vld [vmem:[#allocation8 + $0x174] sm:$0xf0] }
 0x293   :  { %v6930_v33 = vld [vmem:[#allocation8 + $0xa70] sm:$0xf0]  ;;  %v6040_v49 = vld [vmem:[#allocation8 + $0x358] sm:$0xf] }
 0x294   :  { %v8369_v14 = vld [vmem:[#allocation8 + $0xc94] sm:$0xf]  ;;  %v6933_v41 = vor.u32 %v8297_v9, %v6930_v33  ;;  %4388 = vmatpush.bf16.msrb.mxu0 %v6677_v19  ;;  %v6072_v9 = vld [vmem:[#allocation8 + $0x398] sm:$0xf] }
 0x295   :  { %v7218_v15 = vld [vmem:[#allocation8 + $0xcb0] sm:$0xf0]  ;;  %v8086_v33 = vld [vmem:[#allocation8 + $0x3b4] sm:$0xf0] }
 0x296   :  { %v8433_v17 = vld [vmem:[#allocation8 + $0xe94] sm:$0xf]  ;;  %v7221_v44 = vor.u32 %v8369_v14, %v7218_v15  ;;  %4402 = vmatpush.bf16.msrb.mxu1 %v6933_v41  ;;  %v5817_v41 = vor.u32 %v8022_v6, %v5816_v5 }
 0x297   :  { %v7474_v21 = vld [vmem:[#allocation8 + $0xeb0] sm:$0xf0] }
 0x298   :  { %v8225_v29 = vld [vmem:[#allocation8 + $0x814] sm:$0xf]  ;;  %v7477_v28 = vor.u32 %v8433_v17, %v7474_v21  ;;  %4415 = vmatpush.bf16.msrb.mxu2 %v7221_v44  ;;  %v6360_v21 = vld [vmem:[#allocation8 + $0x5d8] sm:$0xf] }
 0x299   :  { %v6642_v36 = vld [vmem:[#allocation8 + $0x830] sm:$0xf0] }
 0x29a   :  { %v8289_v43 = vld [vmem:[#allocation8 + $0xa14] sm:$0xf]  ;;  %v6645_v59 = vor.u32 %v8225_v29, %v6642_v36  ;;  %4429 = vmatpush.bf16.msrb.mxu3 %v7477_v28  ;;  %v8158_v29 = vld [vmem:[#allocation8 + $0x5f4] sm:$0xf0] }
 0x29b   :  { %v6898_v35 = vld [vmem:[#allocation8 + $0xa30] sm:$0xf0]  ;;  %v6616_v36 = vld [vmem:[#allocation8 + $0x7d8] sm:$0xf]  ;;  %v6361_v28 = vor.u32 %v8158_v29, %v6360_v21 }
 0x29c   :  { %v8361_v52 = vld [vmem:[#allocation8 + $0xc54] sm:$0xf]  ;;  %v6901_v61 = vor.u32 %v8289_v43, %v6898_v35  ;;  %4389 = vmatpush.bf16.msrb.mxu0 %v6645_v59  ;;  %v8222_v43 = vld [vmem:[#allocation8 + $0x7f4] sm:$0xf0]  ;;  %v6073_v35 = vor.u32 %v8086_v33, %v6072_v9 }
 0x29d   :  { %v7186_v50 = vld [vmem:[#allocation8 + $0xc70] sm:$0xf0]  ;;  %v6328_v59 = vld [vmem:[#allocation8 + $0x598] sm:$0xf] }
 0x29e   :  { %v8425_v39 = vld [vmem:[#allocation8 + $0xe54] sm:$0xf]  ;;  %v7189_v63 = vor.u32 %v8361_v52, %v7186_v50  ;;  %4403 = vmatpush.bf16.msrb.mxu1 %v6901_v61  ;;  %v8078_v52 = vld [vmem:[#allocation8 + $0x374] sm:$0xf0]  ;;  %v6617_v50 = vor.u32 %v8222_v43, %v6616_v36 }
 0x29f   :  { %v7442_v57 = vld [vmem:[#allocation8 + $0xe70] sm:$0xf0]  ;;  %4390 = vmatmul.bf16.vlgmr.msrb.gmra.mxu0 %v8868_v23  ;;  %v6584_v61 = vld [vmem:[#allocation8 + $0x798] sm:$0xf]  ;;  %v6041_v5 = vor.u32 %v8078_v52, %v6040_v49 }
 0x2a0   :  { %v7445_v7 = vor.u32 %v8425_v39, %v7442_v57  ;;  %v8353_v14 = vld [vmem:[#allocation8 + $0xc14] sm:$0xf]  ;;  %4438 = vmatpush.bf16.msra.mxu0 %v5849_v4  ;;  %4416 = vmatpush.bf16.msrb.mxu2 %v7189_v63  ;;  %v8150_v39 = vld [vmem:[#allocation8 + $0x5b4] sm:$0xf0]  ;;  %v5785_v57 = vor.u32 %v8014_v10, %v5784_v45 }
 0x2a1   :  { %v7154_v15 = vld [vmem:[#allocation8 + $0xc30] sm:$0xf0]  ;;  %4404 = vmatmul.bf16.vlgmr.msrb.gmra.mxu1 %v8870_v27  ;;  %v8214_v4 = vld [vmem:[#allocation8 + $0x7b4] sm:$0xf0]  ;;  %v6329_v6 = vor.u32 %v8150_v39, %v6328_v59 }
 0x2a2   :  { %v8417_v17 = vld [vmem:[#allocation8 + $0xe14] sm:$0xf]  ;;  %4452 = vmatpush.bf16.msra.mxu1 %v6105_v24  ;;  %v7157_v44 = vor.u32 %v8353_v14, %v7154_v15  ;;  %4430 = vmatpush.bf16.msrb.mxu3 %v7445_v7  ;;  %v5752_v24 = vld [vmem:[#allocation8 + $0x118] sm:$0xf]  ;;  %v6585_v7 = vor.u32 %v8214_v4, %v6584_v61 }
 0x2a3   :  { %v7410_v19 = vld [vmem:[#allocation8 + $0xe30] sm:$0xf0]  ;;  %v8006_v63 = vld [vmem:[#allocation8 + $0x134] sm:$0xf0] }
 0x2a4   :  { %v7413_v47 = vor.u32 %v8417_v17, %v7410_v19  ;;  %4439 = vmatpush.bf16.msra.mxu0 %v5817_v41  ;;  %4417 = vmatpush.bf16.msrb.mxu2 %v7157_v44  ;;  %v6008_v9 = vld [vmem:[#allocation8 + $0x318] sm:$0xf]  ;;  %v5753_v17 = vor.u32 %v8006_v63, %v5752_v24 }
 0x2a5   :  { %v8070_v33 = vld [vmem:[#allocation8 + $0x334] sm:$0xf0] }
 0x2a6   :  { %4453 = vmatpush.bf16.msra.mxu1 %v6073_v35  ;;  %4431 = vmatpush.bf16.msrb.mxu3 %v7413_v47  ;;  %v6296_v14 = vld [vmem:[#allocation8 + $0x558] sm:$0xf]  ;;  %v6009_v29 = vor.u32 %v8070_v33, %v6008_v9 }
 0x2a7   :  { %v8142_v15 = vld [vmem:[#allocation8 + $0x574] sm:$0xf0]  ;;  %4418 = vmatmul.bf16.vlgmr.msrb.gmra.mxu2 %v8874_v62 }
 0x2a8   :  { %4466 = vmatpush.bf16.msra.mxu2 %v6361_v28  ;;  %4440 = vmatpush.bf16.msra.mxu0 %v5785_v57  ;;  %v6552_v19 = vld [vmem:[#allocation8 + $0x758] sm:$0xf]  ;;  %v6297_v43 = vor.u32 %v8142_v15, %v6296_v14 }
 0x2a9   :  { %v8206_v21 = vld [vmem:[#allocation8 + $0x774] sm:$0xf0]  ;;  %4432 = vmatmul.bf16.vlgmr.msrb.gmra.mxu3 %v8876_v0 }
 0x2aa   :  { %4480 = vmatpush.bf16.msra.mxu3 %v6617_v50  ;;  %4454 = vmatpush.bf16.msra.mxu1 %v6041_v5  ;;  %v5720_v41 = vld [vmem:[#allocation8 + $0xd8] sm:$0xf]  ;;  %v6553_v45 = vor.u32 %v8206_v21, %v6552_v19 }
 0x2ab   :  { %v7998_v36 = vld [vmem:[#allocation8 + $0xf4] sm:$0xf0] }
 0x2ac   :  { %4467 = vmatpush.bf16.msra.mxu2 %v6329_v6  ;;  %v5976_v35 = vld [vmem:[#allocation8 + $0x2d8] sm:$0xf]  ;;  %4441 = vmatpush.bf16.msra.mxu0 %v5753_v17  ;;  %v5721_v28 = vor.u32 %v7998_v36, %v5720_v41 }
 0x2ad   :  { %v8062_v44 = vld [vmem:[#allocation8 + $0x2f4] sm:$0xf0] }
 0x2ae   :  { %4481 = vmatpush.bf16.msra.mxu3 %v6585_v7  ;;  %v6264_v10 = vld [vmem:[#allocation8 + $0x518] sm:$0xf]  ;;  %4455 = vmatpush.bf16.msra.mxu1 %v6009_v29  ;;  %v5977_v50 = vor.u32 %v8062_v44, %v5976_v35 }
 0x2af   :  { %v8134_v47 = vld [vmem:[#allocation8 + $0x534] sm:$0xf0] }
 0x2b0   :  { %v6520_v49 = vld [vmem:[#allocation8 + $0x718] sm:$0xf]  ;;  %4468 = vmatpush.bf16.msra.mxu2 %v6297_v43  ;;  %v6265_v57 = vor.u32 %v8134_v47, %v6264_v10  ;;  %4442 = vmatpush.bf16.msra.mxu0 %v5721_v28 }
 0x2b1   :  { %v8198_v52 = vld [vmem:[#allocation8 + $0x734] sm:$0xf0] }
 0x2b2   :  { %v5688_v59 = vld [vmem:[#allocation8 + $0x98] sm:$0xf]  ;;  %4482 = vmatpush.bf16.msra.mxu3 %v6553_v45  ;;  %v6521_v5 = vor.u32 %v8198_v52, %v6520_v49  ;;  %4456 = vmatpush.bf16.msra.mxu1 %v5977_v50 }
 0x2b3   :  { %v7990_v39 = vld [vmem:[#allocation8 + $0xb4] sm:$0xf0] }
 0x2b4   :  { %v5944_v61 = vld [vmem:[#allocation8 + $0x298] sm:$0xf]  ;;  %v5689_v6 = vor.u32 %v7990_v39, %v5688_v59  ;;  %4469 = vmatpush.bf16.msra.mxu2 %v6265_v57 }
 0x2b5   :  { %v8054_v4 = vld [vmem:[#allocation8 + $0x2b4] sm:$0xf0] }
 0x2b6   :  { %v6232_v24 = vld [vmem:[#allocation8 + $0x4d8] sm:$0xf]  ;;  %v5945_v7 = vor.u32 %v8054_v4, %v5944_v61  ;;  %4483 = vmatpush.bf16.msra.mxu3 %v6521_v5  ;;  %4443 = vmatpush.bf16.msra.mxu0 %v5689_v6 }
 0x2b7   :  { %v8126_v63 = vld [vmem:[#allocation8 + $0x4f4] sm:$0xf0] }
 0x2b8   :  { %v6488_v9 = vld [vmem:[#allocation8 + $0x6d8] sm:$0xf]  ;;  %v6233_v17 = vor.u32 %v8126_v63, %v6232_v24  ;;  %4457 = vmatpush.bf16.msra.mxu1 %v5945_v7 }
 0x2b9   :  { %v8190_v33 = vld [vmem:[#allocation8 + $0x6f4] sm:$0xf0] }
 0x2ba   :  { %v5656_v14 = vld [vmem:[#allocation8 + $0x58] sm:$0xf]  ;;  %v6489_v29 = vor.u32 %v8190_v33, %v6488_v9  ;;  %4470 = vmatpush.bf16.msra.mxu2 %v6233_v17 }
 0x2bb   :  { %v7982_v15 = vld [vmem:[#allocation8 + $0x74] sm:$0xf0] }
 0x2bc   :  { %v5912_v19 = vld [vmem:[#allocation8 + $0x258] sm:$0xf]  ;;  %v5657_v43 = vor.u32 %v7982_v15, %v5656_v14  ;;  %4484 = vmatpush.bf16.msra.mxu3 %v6489_v29 }
 0x2bd   :  { %v8046_v21 = vld [vmem:[#allocation8 + $0x274] sm:$0xf0] }
 0x2be   :  { %v6200_v41 = vld [vmem:[#allocation8 + $0x498] sm:$0xf]  ;;  %v5913_v10 = vor.u32 %v8046_v21, %v5912_v19  ;;  %4444 = vmatpush.bf16.msra.mxu0 %v5657_v43 }
 0x2bf   :  { %v8118_v36 = vld [vmem:[#allocation8 + $0x4b4] sm:$0xf0] }
 0x2c0   :  { %v6456_v35 = vld [vmem:[#allocation8 + $0x698] sm:$0xf]  ;;  %v6201_v52 = vor.u32 %v8118_v36, %v6200_v41  ;;  %4458 = vmatpush.bf16.msra.mxu1 %v5913_v10 }
 0x2c1   :  { %v8182_v44 = vld [vmem:[#allocation8 + $0x6b4] sm:$0xf0] }
 0x2c2   :  { %v5624_v45 = vld [vmem:[#allocation8 + $0x18] sm:$0xf]  ;;  %v6457_v57 = vor.u32 %v8182_v44, %v6456_v35  ;;  %4471 = vmatpush.bf16.msra.mxu2 %v6201_v52 }
 0x2c3   :  { %v7974_v47 = vld [vmem:[#allocation8 + $0x34] sm:$0xf0] }
 0x2c4   :  { %v5880_v28 = vld [vmem:[#allocation8 + $0x218] sm:$0xf]  ;;  %v5625_v24 = vor.u32 %v7974_v47, %v5624_v45  ;;  %4485 = vmatpush.bf16.msra.mxu3 %v6457_v57 }
 0x2c5   :  { %v8038_v49 = vld [vmem:[#allocation8 + $0x234] sm:$0xf0] }
 0x2c6   :  { %v6872_v50 = vld [vmem:[#allocation8 + $0x9d8] sm:$0xf]  ;;  %v5881_v9 = vor.u32 %v8038_v49, %v5880_v28  ;;  %4445 = vmatpush.bf16.msra.mxu0 %v5625_v24 }
 0x2c7   :  { %v8286_v59 = vld [vmem:[#allocation8 + $0x9f4] sm:$0xf0] }
 0x2c8   :  { %v7128_v39 = vld [vmem:[#allocation8 + $0xbd8] sm:$0xf]  ;;  %v6873_v33 = vor.u32 %v8286_v59, %v6872_v50  ;;  %4459 = vmatpush.bf16.msra.mxu1 %v5881_v9 }
 0x2c9   :  { %v8350_v61 = vld [vmem:[#allocation8 + $0xbf4] sm:$0xf0]  ;;  %4446 = vmatmul.bf16.vlgmr.msra.gmra.mxu0 %v8852_v26 }
 0x2ca   :  { %v6168_v4 = vld [vmem:[#allocation8 + $0x458] sm:$0xf]  ;;  %v7129_v14 = vor.u32 %v8350_v61, %v7128_v39  ;;  %4494 = vmatpush.bf16.msrb.mxu0 %v6873_v33 }
 0x2cb   :  { %v8110_v5 = vld [vmem:[#allocation8 + $0x474] sm:$0xf0]  ;;  %4460 = vmatmul.bf16.vlgmr.msra.gmra.mxu1 %v8854_v31 }
 0x2cc   :  { %v6424_v63 = vld [vmem:[#allocation8 + $0x658] sm:$0xf]  ;;  %v6169_v15 = vor.u32 %v8110_v5, %v6168_v4  ;;  %4508 = vmatpush.bf16.msrb.mxu1 %v7129_v14 }
 0x2cd   :  { %v8174_v6 = vld [vmem:[#allocation8 + $0x674] sm:$0xf0] }
 0x2ce   :  { %v6840_v7 = vld [vmem:[#allocation8 + $0x998] sm:$0xf]  ;;  %v6425_v29 = vor.u32 %v8174_v6, %v6424_v63  ;;  %4472 = vmatpush.bf16.msra.mxu2 %v6169_v15 }
 0x2cf   :  { %v8278_v17 = vld [vmem:[#allocation8 + $0x9b4] sm:$0xf0] }
 0x2d0   :  { %v7096_v19 = vld [vmem:[#allocation8 + $0xb98] sm:$0xf]  ;;  %v6841_v10 = vor.u32 %v8278_v17, %v6840_v7  ;;  %4486 = vmatpush.bf16.msra.mxu3 %v6425_v29 }
 0x2d1   :  { %v8342_v21 = vld [vmem:[#allocation8 + $0xbb4] sm:$0xf0] }
 0x2d2   :  { %v6136_v41 = vld [vmem:[#allocation8 + $0x418] sm:$0xf]  ;;  %v7097_v49 = vor.u32 %v8342_v21, %v7096_v19  ;;  %4495 = vmatpush.bf16.msrb.mxu0 %v6841_v10 }
 0x2d3   :  { %v8102_v36 = vld [vmem:[#allocation8 + $0x434] sm:$0xf0] }
 0x2d4   :  { %v6392_v35 = vld [vmem:[#allocation8 + $0x618] sm:$0xf]  ;;  %v6137_v52 = vor.u32 %v8102_v36, %v6136_v41  ;;  %4509 = vmatpush.bf16.msrb.mxu1 %v7097_v49 }
 0x2d5   :  { %v8166_v43 = vld [vmem:[#allocation8 + $0x634] sm:$0xf0] }
 0x2d6   :  { %v7384_v44 = vld [vmem:[#allocation8 + $0xdd8] sm:$0xf]  ;;  %v6393_v39 = vor.u32 %v8166_v43, %v6392_v35  ;;  %4473 = vmatpush.bf16.msra.mxu2 %v6137_v52 }
 0x2d7   :  { %v8414_v45 = vld [vmem:[#allocation8 + $0xdf4] sm:$0xf0] }
 0x2d8   :  { %v7640_v47 = vld [vmem:[#allocation8 + $0xfd8] sm:$0xf]  ;;  %v7385_v57 = vor.u32 %v8414_v45, %v7384_v44  ;;  %4487 = vmatpush.bf16.msra.mxu3 %v6393_v39 }
 0x2d9   :  { %v8478_v28 = vld [vmem:[#allocation8 + $0xff4] sm:$0xf0]  ;;  %4474 = vmatmul.bf16.vlgmr.msra.gmra.mxu2 %v8858_v54 }
 0x2da   :  { %v6808_v50 = vld [vmem:[#allocation8 + $0x958] sm:$0xf]  ;;  %v7641_v5 = vor.u32 %v8478_v28, %v7640_v47  ;;  %4522 = vmatpush.bf16.msrb.mxu2 %v7385_v57 }
 0x2db   :  { %v8270_v59 = vld [vmem:[#allocation8 + $0x974] sm:$0xf0]  ;;  %4488 = vmatmul.bf16.vlgmr.msra.gmra.mxu3 %v8860_v60 }
 0x2dc   :  { %v7064_v61 = vld [vmem:[#allocation8 + $0xb58] sm:$0xf]  ;;  %v6809_v6 = vor.u32 %v8270_v59, %v6808_v50  ;;  %4536 = vmatpush.bf16.msrb.mxu3 %v7641_v5 }
 0x2dd   :  { %v8334_v4 = vld [vmem:[#allocation8 + $0xb74] sm:$0xf0] }
 0x2de   :  { %v7352_v24 = vld [vmem:[#allocation8 + $0xd98] sm:$0xf]  ;;  %v7065_v7 = vor.u32 %v8334_v4, %v7064_v61  ;;  %4496 = vmatpush.bf16.msrb.mxu0 %v6809_v6 }
 0x2df   :  { %v8406_v63 = vld [vmem:[#allocation8 + $0xdb4] sm:$0xf0] }
 0x2e0   :  { %v7608_v9 = vld [vmem:[#allocation8 + $0xf98] sm:$0xf]  ;;  %v7353_v17 = vor.u32 %v8406_v63, %v7352_v24  ;;  %4510 = vmatpush.bf16.msrb.mxu1 %v7065_v7 }
 0x2e1   :  { %v8470_v33 = vld [vmem:[#allocation8 + $0xfb4] sm:$0xf0] }
 0x2e2   :  { %v6776_v14 = vld [vmem:[#allocation8 + $0x918] sm:$0xf]  ;;  %v7609_v29 = vor.u32 %v8470_v33, %v7608_v9  ;;  %4523 = vmatpush.bf16.msrb.mxu2 %v7353_v17 }
 0x2e3   :  { %v8262_v15 = vld [vmem:[#allocation8 + $0x934] sm:$0xf0] }
 0x2e4   :  { %v7032_v19 = vld [vmem:[#allocation8 + $0xb18] sm:$0xf]  ;;  %v6777_v35 = vor.u32 %v8262_v15, %v6776_v14  ;;  %4537 = vmatpush.bf16.msrb.mxu3 %v7609_v29  ;;  %v8987_v29 = vpop.f32.mrf.mxu0 }
 0x2e5   :  { %v8326_v21 = vld [vmem:[#allocation8 + $0xb34] sm:$0xf0] }
 0x2e6   :  { %v7320_v41 = vld [vmem:[#allocation8 + $0xd58] sm:$0xf]  ;;  %v7033_v45 = vor.u32 %v8326_v21, %v7032_v19  ;;  %4497 = vmatpush.bf16.msrb.mxu0 %v6777_v35 }
 0x2e7   :  { %v8398_v36 = vld [vmem:[#allocation8 + $0xd74] sm:$0xf0] }
 0x2e8   :  { %v7576_v43 = vld [vmem:[#allocation8 + $0xf58] sm:$0xf]  ;;  %v7321_v28 = vor.u32 %v8398_v36, %v7320_v41  ;;  %4511 = vmatpush.bf16.msrb.mxu1 %v7033_v45 }
 0x2e9   :  { %v8462_v44 = vld [vmem:[#allocation8 + $0xf74] sm:$0xf0] }
 0x2ea   :  { %v6744_v10 = vld [vmem:[#allocation8 + $0x8d8] sm:$0xf]  ;;  %v7577_v50 = vor.u32 %v8462_v44, %v7576_v43  ;;  %4524 = vmatpush.bf16.msrb.mxu2 %v7321_v28 }
 0x2eb   :  { %v8254_v47 = vld [vmem:[#allocation8 + $0x8f4] sm:$0xf0] }
 0x2ec   :  { %v7000_v49 = vld [vmem:[#allocation8 + $0xad8] sm:$0xf]  ;;  %v6745_v57 = vor.u32 %v8254_v47, %v6744_v10  ;;  %4538 = vmatpush.bf16.msrb.mxu3 %v7577_v50 }
 0x2ed   :  { %v8318_v52 = vld [vmem:[#allocation8 + $0xaf4] sm:$0xf0] }
 0x2ee   :  { %v7288_v59 = vld [vmem:[#allocation8 + $0xd18] sm:$0xf]  ;;  %v7001_v5 = vor.u32 %v8318_v52, %v7000_v49  ;;  %4498 = vmatpush.bf16.msrb.mxu0 %v6745_v57 }
 0x2ef   :  { %v8390_v39 = vld [vmem:[#allocation8 + $0xd34] sm:$0xf0] }
 0x2f0   :  { %v7544_v61 = vld [vmem:[#allocation8 + $0xf18] sm:$0xf]  ;;  %v7289_v6 = vor.u32 %v8390_v39, %v7288_v59  ;;  %4512 = vmatpush.bf16.msrb.mxu1 %v7001_v5 }
 0x2f1   :  { %v8454_v4 = vld [vmem:[#allocation8 + $0xf34] sm:$0xf0] }
 0x2f2   :  { %v6712_v24 = vld [vmem:[#allocation8 + $0x898] sm:$0xf]  ;;  %v7545_v7 = vor.u32 %v8454_v4, %v7544_v61  ;;  %4525 = vmatpush.bf16.msrb.mxu2 %v7289_v6  ;;  %v8090_v6 = vld [vmem:[#allocation8 + $0x3dc] sm:$0xf] }
 0x2f3   :  { %v8246_v63 = vld [vmem:[#allocation8 + $0x8b4] sm:$0xf0] }
 0x2f4   :  { %v6968_v9 = vld [vmem:[#allocation8 + $0xa98] sm:$0xf]  ;;  %v6713_v17 = vor.u32 %v8246_v63, %v6712_v24  ;;  %4539 = vmatpush.bf16.msrb.mxu3 %v7545_v7  ;;  %v8026_v24 = vld [vmem:[#allocation8 + $0x1dc] sm:$0xf] }
 0x2f5   :  { %v8310_v33 = vld [vmem:[#allocation8 + $0xab4] sm:$0xf0]  ;;  %v5850_v63 = vld [vmem:[#allocation8 + $0x1f8] sm:$0xf0] }
 0x2f6   :  { %v7256_v14 = vld [vmem:[#allocation8 + $0xcd8] sm:$0xf]  ;;  %v6969_v41 = vor.u32 %v8310_v33, %v6968_v9  ;;  %4499 = vmatpush.bf16.msrb.mxu0 %v6713_v17  ;;  %v8989_v9 = vpop.f32.mrf.mxu1  ;;  %v8991_v33 = vpop.f32.mrf.mxu2 }
 0x2f7   :  { %v8382_v15 = vld [vmem:[#allocation8 + $0xcf4] sm:$0xf0]  ;;  %9177 = vst [vmem:[#allocation25_spill] sm:$0xff] %v8989_v9  ;;  %v8106_v9 = vld [vmem:[#allocation8 + $0x45c] sm:$0xf] }
 0x2f8   :  { %v7512_v19 = vld [vmem:[#allocation8 + $0xed8] sm:$0xf]  ;;  %v7257_v43 = vor.u32 %v8382_v15, %v7256_v14  ;;  %4513 = vmatpush.bf16.msrb.mxu1 %v6969_v41  ;;  %9178 = vst [vmem:[#allocation26_spill] sm:$0xff] %v8991_v33  ;;  %v6106_v14 = vld [vmem:[#allocation8 + $0x3f8] sm:$0xf0] }
 0x2f9   :  { %v8446_v21 = vld [vmem:[#allocation8 + $0xef4] sm:$0xf0]  ;;  %v5626_v33 = vld [vmem:[#allocation8 + $0x38] sm:$0xf0] }
 0x2fa   :  { %v6680_v36 = vld [vmem:[#allocation8 + $0x858] sm:$0xf]  ;;  %v7513_v10 = vor.u32 %v8446_v21, %v7512_v19  ;;  %4526 = vmatpush.bf16.msrb.mxu2 %v7257_v43  ;;  %v5853_v43 = vor.u32 %v8026_v24, %v5850_v63  ;;  %v8010_v63 = vld [vmem:[#allocation8 + $0x15c] sm:$0xf] }
 0x2fb   :  { %v8238_v35 = vld [vmem:[#allocation8 + $0x874] sm:$0xf0] }
 0x2fc   :  { %v6936_v44 = vld [vmem:[#allocation8 + $0xa58] sm:$0xf]  ;;  %v6681_v49 = vor.u32 %v8238_v35, %v6680_v36  ;;  %4540 = vmatpush.bf16.msrb.mxu3 %v7513_v10  ;;  %v8993_v36 = vpop.f32.mrf.mxu0  ;;  %v6074_v10 = vld [vmem:[#allocation8 + $0x3b8] sm:$0xf0] }
 0x2fd   :  { %v8302_v45 = vld [vmem:[#allocation8 + $0xa74] sm:$0xf0] }
 0x2fe   :  { %v7224_v47 = vld [vmem:[#allocation8 + $0xc98] sm:$0xf]  ;;  %v6937_v39 = vor.u32 %v8302_v45, %v6936_v44  ;;  %4500 = vmatpush.bf16.msrb.mxu0 %v6681_v49  ;;  %v8018_v44 = vld [vmem:[#allocation8 + $0x19c] sm:$0xf]  ;;  %v6109_v45 = vor.u32 %v8090_v6, %v6106_v14  ;;  %v8999_v14 = vpop.f32.mrf.mxu2 }
 0x2ff   :  { %v8374_v28 = vld [vmem:[#allocation8 + $0xcb4] sm:$0xf0]  ;;  %v5786_v6 = vld [vmem:[#allocation8 + $0x178] sm:$0xf0] }
 0x300   :  { %v7480_v52 = vld [vmem:[#allocation8 + $0xe98] sm:$0xf]  ;;  %v7225_v5 = vor.u32 %v8374_v28, %v7224_v47  ;;  %4514 = vmatpush.bf16.msrb.mxu1 %v6937_v39  ;;  %v5818_v28 = vld [vmem:[#allocation8 + $0x1b8] sm:$0xf0] }
 0x301   :  { %v8438_v50 = vld [vmem:[#allocation8 + $0xeb4] sm:$0xf0]  ;;  %v5821_v39 = vor.u32 %v8018_v44, %v5818_v28  ;;  %v6586_v44 = vld [vmem:[#allocation8 + $0x7b8] sm:$0xf0] }
 0x302   :  { %v6648_v59 = vld [vmem:[#allocation8 + $0x818] sm:$0xf]  ;;  %v7481_v7 = vor.u32 %v8438_v50, %v7480_v52  ;;  %4527 = vmatpush.bf16.msrb.mxu2 %v7225_v5  ;;  %v6077_v5 = vor.u32 %v8082_v12, %v6074_v10  ;;  %v5789_v12 = vor.u32 %v8010_v63, %v5786_v6  ;;  %v5754_v28 = vld [vmem:[#allocation8 + $0x138] sm:$0xf0] }
 0x303   :  { %v8230_v57 = vld [vmem:[#allocation8 + $0x834] sm:$0xf0]  ;;  %v7994_v63 = vld [vmem:[#allocation8 + $0xdc] sm:$0xf] }
 0x304   :  { %v6904_v61 = vld [vmem:[#allocation8 + $0xa18] sm:$0xf]  ;;  %v6649_v19 = vor.u32 %v8230_v57, %v6648_v59  ;;  %4541 = vmatpush.bf16.msrb.mxu3 %v7481_v7  ;;  %v8154_v57 = vld [vmem:[#allocation8 + $0x5dc] sm:$0xf]  ;;  %v8997_v7 = vpop.f32.mrf.mxu1  ;;  %v9003_v10 = vpop.f32.mrf.mxu0 }
 0x305   :  { %v8294_v4 = vld [vmem:[#allocation8 + $0xa34] sm:$0xf0]  ;;  %v5722_v6 = vld [vmem:[#allocation8 + $0xf8] sm:$0xf0] }
 0x306   :  { %v7192_v15 = vld [vmem:[#allocation8 + $0xc58] sm:$0xf]  ;;  %v6905_v35 = vor.u32 %v8294_v4, %v6904_v61  ;;  %4501 = vmatpush.bf16.msrb.mxu0 %v6649_v19  ;;  %v8218_v61 = vld [vmem:[#allocation8 + $0x7dc] sm:$0xf] }
 0x307   :  { %v8366_v17 = vld [vmem:[#allocation8 + $0xc74] sm:$0xf0]  ;;  %v6618_v4 = vld [vmem:[#allocation8 + $0x7f8] sm:$0xf0] }
 0x308   :  { %v7448_v21 = vld [vmem:[#allocation8 + $0xe58] sm:$0xf]  ;;  %v7193_v47 = vor.u32 %v8366_v17, %v7192_v15  ;;  %4515 = vmatpush.bf16.msrb.mxu1 %v6905_v35  ;;  %v6365_v17 = vor.u32 %v8154_v57, %v6362_v55  ;;  %v8074_v19 = vld [vmem:[#allocation8 + $0x35c] sm:$0xf] }
 0x309   :  { %v8430_v41 = vld [vmem:[#allocation8 + $0xe74] sm:$0xf0]  ;;  %4502 = vmatmul.bf16.vlgmr.msrb.gmra.mxu0 %v8868_v23  ;;  %v8146_v35 = vld [vmem:[#allocation8 + $0x59c] sm:$0xf] }
 0x30a   :  { %v7449_v52 = vor.u32 %v8430_v41, %v7448_v21  ;;  %v7160_v50 = vld [vmem:[#allocation8 + $0xc18] sm:$0xf]  ;;  %4550 = vmatpush.bf16.msra.mxu0 %v5853_v43  ;;  %4528 = vmatpush.bf16.msrb.mxu2 %v7193_v47  ;;  %v6042_v21 = vld [vmem:[#allocation8 + $0x378] sm:$0xf0]  ;;  %v6621_v41 = vor.u32 %v8218_v61, %v6618_v4 }
 0x30b   :  { %v7416_v49 = vld [vmem:[#allocation8 + $0xe18] sm:$0xf]  ;;  %v7161_v24 = vor.u32 %v8358_v20, %v7160_v50  ;;  %4516 = vmatmul.bf16.vlgmr.msrb.gmra.mxu1 %v8870_v27  ;;  %v6330_v43 = vld [vmem:[#allocation8 + $0x5b8] sm:$0xf0] }
 0x30c   :  { %v8422_v59 = vld [vmem:[#allocation8 + $0xe34] sm:$0xf0]  ;;  %4564 = vmatpush.bf16.msra.mxu1 %v6109_v45  ;;  %4542 = vmatpush.bf16.msrb.mxu3 %v7449_v52  ;;  %v8210_v20 = vld [vmem:[#allocation8 + $0x79c] sm:$0xf]  ;;  %v6045_v45 = vor.u32 %v8074_v19, %v6042_v21  ;;  %v6333_v55 = vor.u32 %v8146_v35, %v6330_v43  ;;  %v9009_v43 = vpop.f32.mrf.mxu1 }
 0x30d   :  { %v7417_v15 = vor.u32 %v8422_v59, %v7416_v49  ;;  %v8002_v47 = vld [vmem:[#allocation8 + $0x11c] sm:$0xf]  ;;  %v6589_v49 = vor.u32 %v8210_v20, %v6586_v44  ;;  %v5725_v20 = vor.u32 %v7994_v63, %v5722_v6 }
 0x30e   :  { %4551 = vmatpush.bf16.msra.mxu0 %v5821_v39  ;;  %4529 = vmatpush.bf16.msrb.mxu2 %v7161_v24  ;;  %v8066_v52 = vld [vmem:[#allocation8 + $0x31c] sm:$0xf]  ;;  %v9005_v39 = vpop.f32.mrf.mxu3  ;;  %v5757_v61 = vor.u32 %v8002_v47, %v5754_v28 }
 0x30f   :  { %v6010_v50 = vld [vmem:[#allocation8 + $0x338] sm:$0xf0]  ;;  %9180 = vst [vmem:[#allocation28_spill] sm:$0xff] %v9005_v39 }
 0x310   :  { %4565 = vmatpush.bf16.msra.mxu1 %v6077_v5  ;;  %4543 = vmatpush.bf16.msrb.mxu3 %v7417_v15  ;;  %v8138_v59 = vld [vmem:[#allocation8 + $0x55c] sm:$0xf]  ;;  %v6013_v24 = vor.u32 %v8066_v52, %v6010_v50 }
 0x311   :  { %v6298_v57 = vld [vmem:[#allocation8 + $0x578] sm:$0xf0]  ;;  %4530 = vmatmul.bf16.vlgmr.msrb.gmra.mxu2 %v8874_v62 }
 0x312   :  { %4578 = vmatpush.bf16.msra.mxu2 %v6365_v17  ;;  %4552 = vmatpush.bf16.msra.mxu0 %v5789_v12  ;;  %v8202_v4 = vld [vmem:[#allocation8 + $0x75c] sm:$0xf]  ;;  %v6301_v15 = vor.u32 %v8138_v59, %v6298_v57  ;;  %v9011_v12 = vpop.f32.mrf.mxu2 }
 0x313   :  { %v6554_v5 = vld [vmem:[#allocation8 + $0x778] sm:$0xf0]  ;;  %4544 = vmatmul.bf16.vlgmr.msrb.gmra.mxu3 %v8876_v0 }
 0x314   :  { %4592 = vmatpush.bf16.msra.mxu3 %v6621_v41  ;;  %4566 = vmatpush.bf16.msra.mxu1 %v6045_v45  ;;  %v8058_v17 = vld [vmem:[#allocation8 + $0x2dc] sm:$0xf]  ;;  %v6557_v21 = vor.u32 %v8202_v4, %v6554_v5 }
 0x315   :  { %v5978_v19 = vld [vmem:[#allocation8 + $0x2f8] sm:$0xf0] }
 0x316   :  { %4579 = vmatpush.bf16.msra.mxu2 %v6333_v55  ;;  %v8130_v41 = vld [vmem:[#allocation8 + $0x51c] sm:$0xf]  ;;  %4553 = vmatpush.bf16.msra.mxu0 %v5757_v61  ;;  %v5981_v45 = vor.u32 %v8058_v17, %v5978_v19  ;;  %v9013_v55 = vpop.f32.mrf.mxu0  ;;  %v9015_v19 = vpop.f32.mrf.mxu3 }
 0x317   :  { %v6266_v35 = vld [vmem:[#allocation8 + $0x538] sm:$0xf0]  ;;  %9181 = vst [vmem:[#allocation29_spill] sm:$0xff] %v9013_v55 }
 0x318   :  { %4593 = vmatpush.bf16.msra.mxu3 %v6589_v49  ;;  %v8194_v44 = vld [vmem:[#allocation8 + $0x71c] sm:$0xf]  ;;  %4567 = vmatpush.bf16.msra.mxu1 %v6013_v24  ;;  %v6269_v50 = vor.u32 %v8130_v41, %v6266_v35 }
 0x319   :  { %v6522_v47 = vld [vmem:[#allocation8 + $0x738] sm:$0xf0] }
 0x31a   :  { %v7986_v28 = vld [vmem:[#allocation8 + $0x9c] sm:$0xf]  ;;  %4580 = vmatpush.bf16.msra.mxu2 %v6301_v15  ;;  %v6525_v57 = vor.u32 %v8194_v44, %v6522_v47  ;;  %4554 = vmatpush.bf16.msra.mxu0 %v5725_v20  ;;  %v9017_v47 = vpop.f32.mrf.mxu1  ;;  %v9019_v20 = vpop.f32.mrf.mxu2 }
 0x31b   :  { %v5690_v52 = vld [vmem:[#allocation8 + $0xb8] sm:$0xf0]  ;;  %9182 = vst [vmem:[#allocation30_spill] sm:$0xff] %v9017_v47 }
 0x31c   :  { %v8050_v49 = vld [vmem:[#allocation8 + $0x29c] sm:$0xf]  ;;  %4594 = vmatpush.bf16.msra.mxu3 %v6557_v21  ;;  %v5693_v38 = vor.u32 %v7986_v28, %v5690_v52  ;;  %4568 = vmatpush.bf16.msra.mxu1 %v5981_v45  ;;  %9183 = vst [vmem:[#allocation31_spill] sm:$0xff] %v9019_v20 }
 0x31d   :  { %v5946_v59 = vld [vmem:[#allocation8 + $0x2b8] sm:$0xf0] }
 0x31e   :  { %v8122_v4 = vld [vmem:[#allocation8 + $0x4dc] sm:$0xf]  ;;  %v5949_v6 = vor.u32 %v8050_v49, %v5946_v59  ;;  %4581 = vmatpush.bf16.msra.mxu2 %v6269_v50  ;;  %4555 = vmatpush.bf16.msra.mxu0 %v5693_v38  ;;  %v9021_v38 = vpop.f32.mrf.mxu0 }
 0x31f   :  { %v6234_v5 = vld [vmem:[#allocation8 + $0x4f8] sm:$0xf0]  ;;  %9184 = vst [vmem:[#allocation32_spill] sm:$0xff] %v9021_v38 }
 0x320   :  { %v8186_v61 = vld [vmem:[#allocation8 + $0x6dc] sm:$0xf]  ;;  %v6237_v37 = vor.u32 %v8122_v4, %v6234_v5  ;;  %4595 = vmatpush.bf16.msra.mxu3 %v6525_v57  ;;  %4569 = vmatpush.bf16.msra.mxu1 %v5949_v6 }
 0x321   :  { %v6490_v63 = vld [vmem:[#allocation8 + $0x6f8] sm:$0xf0] }
 0x322   :  { %v7978_v24 = vld [vmem:[#allocation8 + $0x5c] sm:$0xf]  ;;  %v6493_v35 = vor.u32 %v8186_v61, %v6490_v63  ;;  %4582 = vmatpush.bf16.msra.mxu2 %v6237_v37  ;;  %v9023_v37 = vpop.f32.mrf.mxu3 }
 0x323   :  { %v5658_v17 = vld [vmem:[#allocation8 + $0x78] sm:$0xf0] }
 0x324   :  { %v8042_v15 = vld [vmem:[#allocation8 + $0x25c] sm:$0xf]  ;;  %v5661_v28 = vor.u32 %v7978_v24, %v5658_v17  ;;  %4596 = vmatpush.bf16.msra.mxu3 %v6493_v35 }
 0x325   :  { %v5914_v41 = vld [vmem:[#allocation8 + $0x278] sm:$0xf0] }
 0x326   :  { %v8114_v21 = vld [vmem:[#allocation8 + $0x49c] sm:$0xf]  ;;  %v5917_v59 = vor.u32 %v8042_v15, %v5914_v41  ;;  %4556 = vmatpush.bf16.msra.mxu0 %v5661_v28 }
 0x327   :  { %v6202_v44 = vld [vmem:[#allocation8 + $0x4b8] sm:$0xf0] }
 0x328   :  { %v8178_v45 = vld [vmem:[#allocation8 + $0x69c] sm:$0xf]  ;;  %v6205_v5 = vor.u32 %v8114_v21, %v6202_v44  ;;  %4570 = vmatpush.bf16.msra.mxu1 %v5917_v59 }
 0x329   :  { %v6458_v52 = vld [vmem:[#allocation8 + $0x6b8] sm:$0xf0] }
 0x32a   :  { %v7970_v49 = vld [vmem:[#allocation8 + $0x1c] sm:$0xf]  ;;  %v6461_v32 = vor.u32 %v8178_v45, %v6458_v52  ;;  %4583 = vmatpush.bf16.msra.mxu2 %v6205_v5  ;;  %v9025_v5 = vpop.f32.mrf.mxu1 }
 0x32b   :  { %v8034_v50 = vld [vmem:[#allocation8 + $0x21c] sm:$0xf]  ;;  %v5629_v24 = vor.u32 %v7970_v49, %v5626_v33 }
 0x32c   :  { %v5882_v4 = vld [vmem:[#allocation8 + $0x238] sm:$0xf0]  ;;  %4597 = vmatpush.bf16.msra.mxu3 %v6461_v32 }
 0x32d   :  { %v8282_v57 = vld [vmem:[#allocation8 + $0x9dc] sm:$0xf]  ;;  %v5885_v15 = vor.u32 %v8034_v50, %v5882_v4  ;;  %4557 = vmatpush.bf16.msra.mxu0 %v5629_v24 }
 0x32e   :  { %v6874_v61 = vld [vmem:[#allocation8 + $0x9f8] sm:$0xf0] }
 0x32f   :  { %v8346_v63 = vld [vmem:[#allocation8 + $0xbdc] sm:$0xf]  ;;  %v6877_v41 = vor.u32 %v8282_v57, %v6874_v61  ;;  %4571 = vmatpush.bf16.msra.mxu1 %v5885_v15 }
 0x330   :  { %v7130_v47 = vld [vmem:[#allocation8 + $0xbf8] sm:$0xf0]  ;;  %4558 = vmatmul.bf16.vlgmr.msra.gmra.mxu0 %v8852_v26 }
 0x331   :  { %v6170_v20 = vld [vmem:[#allocation8 + $0x478] sm:$0xf0]  ;;  %v7133_v21 = vor.u32 %v8346_v63, %v7130_v47  ;;  %4606 = vmatpush.bf16.msrb.mxu0 %v6877_v41 }
 0x332   :  { %v8170_v17 = vld [vmem:[#allocation8 + $0x65c] sm:$0xf]  ;;  %v6173_v44 = vor.u32 %v8106_v9, %v6170_v20  ;;  %v9027_v9 = vpop.f32.mrf.mxu2  ;;  %4572 = vmatmul.bf16.vlgmr.msra.gmra.mxu1 %v8854_v31 }
 0x333   :  { %v6426_v6 = vld [vmem:[#allocation8 + $0x678] sm:$0xf0]  ;;  %4620 = vmatpush.bf16.msrb.mxu1 %v7133_v21 }
 0x334   :  { %v6842_v35 = vld [vmem:[#allocation8 + $0x9b8] sm:$0xf0]  ;;  %v6429_v55 = vor.u32 %v8170_v17, %v6426_v6  ;;  %4584 = vmatpush.bf16.msra.mxu2 %v6173_v44 }
 0x335   :  { %v8338_v45 = vld [vmem:[#allocation8 + $0xb9c] sm:$0xf]  ;;  %v6845_v50 = vor.u32 %v8274_v13, %v6842_v35  ;;  %v9030_v13 = vpop.f32.mrf.mxu0 }
 0x336   :  { %v7098_v52 = vld [vmem:[#allocation8 + $0xbb8] sm:$0xf0]  ;;  %4598 = vmatpush.bf16.msra.mxu3 %v6429_v55 }
 0x337   :  { %v8098_v39 = vld [vmem:[#allocation8 + $0x41c] sm:$0xf]  ;;  %v7101_v32 = vor.u32 %v8338_v45, %v7098_v52  ;;  %4607 = vmatpush.bf16.msrb.mxu0 %v6845_v50 }
 0x338   :  { %v6138_v38 = vld [vmem:[#allocation8 + $0x438] sm:$0xf0] }
 0x339   :  { %v8162_v28 = vld [vmem:[#allocation8 + $0x61c] sm:$0xf]  ;;  %v6141_v47 = vor.u32 %v8098_v39, %v6138_v38  ;;  %4621 = vmatpush.bf16.msrb.mxu1 %v7101_v32  ;;  %v9036_v32 = vpop.f32.mrf.mxu1 }
 0x33a   :  { %v6394_v33 = vld [vmem:[#allocation8 + $0x638] sm:$0xf0] }
 0x33b   :  { %v8410_v49 = vld [vmem:[#allocation8 + $0xddc] sm:$0xf]  ;;  %v6397_v63 = vor.u32 %v8162_v28, %v6394_v33  ;;  %4585 = vmatpush.bf16.msra.mxu2 %v6141_v47  ;;  %v9033_v33 = vpop.f32.mrf.mxu3  ;;  %v9038_v47 = vpop.f32.mrf.mxu2 }
 0x33c   :  { %v7386_v59 = vld [vmem:[#allocation8 + $0xdf8] sm:$0xf0]  ;;  %9185 = vst [vmem:[#allocation33_spill] sm:$0xff] %v9038_v47 }
 0x33d   :  { %v8474_v4 = vld [vmem:[#allocation8 + $0xfdc] sm:$0xf]  ;;  %v7389_v24 = vor.u32 %v8410_v49, %v7386_v59  ;;  %4599 = vmatpush.bf16.msra.mxu3 %v6397_v63 }
 0x33e   :  { %v7642_v57 = vld [vmem:[#allocation8 + $0xff8] sm:$0xf0]  ;;  %4586 = vmatmul.bf16.vlgmr.msra.gmra.mxu2 %v8858_v54 }
 0x33f   :  { %v8266_v20 = vld [vmem:[#allocation8 + $0x95c] sm:$0xf]  ;;  %v7645_v15 = vor.u32 %v8474_v4, %v7642_v57  ;;  %4634 = vmatpush.bf16.msrb.mxu2 %v7389_v24 }
 0x340   :  { %v6810_v61 = vld [vmem:[#allocation8 + $0x978] sm:$0xf0]  ;;  %4600 = vmatmul.bf16.vlgmr.msra.gmra.mxu3 %v8860_v60 }
 0x341   :  { %v8330_v17 = vld [vmem:[#allocation8 + $0xb5c] sm:$0xf]  ;;  %v6813_v21 = vor.u32 %v8266_v20, %v6810_v61  ;;  %4648 = vmatpush.bf16.msrb.mxu3 %v7645_v15 }
 0x342   :  { %v7066_v6 = vld [vmem:[#allocation8 + $0xb78] sm:$0xf0] }
 0x343   :  { %v8402_v41 = vld [vmem:[#allocation8 + $0xd9c] sm:$0xf]  ;;  %v7069_v55 = vor.u32 %v8330_v17, %v7066_v6  ;;  %4608 = vmatpush.bf16.msrb.mxu0 %v6813_v21 }
 0x344   :  { %v7354_v35 = vld [vmem:[#allocation8 + $0xdb8] sm:$0xf0] }
 0x345   :  { %v8466_v44 = vld [vmem:[#allocation8 + $0xf9c] sm:$0xf]  ;;  %v7357_v45 = vor.u32 %v8402_v41, %v7354_v35  ;;  %4622 = vmatpush.bf16.msrb.mxu1 %v7069_v55 }
 0x346   :  { %v7610_v39 = vld [vmem:[#allocation8 + $0xfb8] sm:$0xf0] }
 0x347   :  { %v8258_v38 = vld [vmem:[#allocation8 + $0x91c] sm:$0xf]  ;;  %v7613_v31 = vor.u32 %v8466_v44, %v7610_v39  ;;  %4635 = vmatpush.bf16.msrb.mxu2 %v7357_v45  ;;  %v9041_v39 = vpop.f32.mrf.mxu0 }
 0x348   :  { %v6778_v26 = vld [vmem:[#allocation8 + $0x938] sm:$0xf0] }
 0x349   :  { %v8322_v52 = vld [vmem:[#allocation8 + $0xb1c] sm:$0xf]  ;;  %v6781_v50 = vor.u32 %v8258_v38, %v6778_v26  ;;  %4649 = vmatpush.bf16.msrb.mxu3 %v7613_v31 }
 0x34a   :  { %v7034_v28 = vld [vmem:[#allocation8 + $0xb38] sm:$0xf0] }
 0x34b   :  { %v8394_v49 = vld [vmem:[#allocation8 + $0xd5c] sm:$0xf]  ;;  %v7037_v20 = vor.u32 %v8322_v52, %v7034_v28  ;;  %4609 = vmatpush.bf16.msrb.mxu0 %v6781_v50  ;;  %v9043_v28 = vpop.f32.mrf.mxu3 }
 0x34c   :  { %v7322_v59 = vld [vmem:[#allocation8 + $0xd78] sm:$0xf0]  ;;  %9186 = vst [vmem:[#allocation34_spill] sm:$0xff] %v9043_v28 }
 0x34d   :  { %v8458_v4 = vld [vmem:[#allocation8 + $0xf5c] sm:$0xf]  ;;  %v7325_v24 = vor.u32 %v8394_v49, %v7322_v59  ;;  %4623 = vmatpush.bf16.msrb.mxu1 %v7037_v20 }
 0x34e   :  { %v7578_v57 = vld [vmem:[#allocation8 + $0xf78] sm:$0xf0] }
 0x34f   :  { %v8250_v61 = vld [vmem:[#allocation8 + $0x8dc] sm:$0xf]  ;;  %v7581_v54 = vor.u32 %v8458_v4, %v7578_v57  ;;  %4636 = vmatpush.bf16.msrb.mxu2 %v7325_v24 }
 0x350   :  { %v6746_v63 = vld [vmem:[#allocation8 + $0x8f8] sm:$0xf0] }
 0x351   :  { %v8314_v17 = vld [vmem:[#allocation8 + $0xadc] sm:$0xf]  ;;  %v6749_v35 = vor.u32 %v8250_v61, %v6746_v63  ;;  %4650 = vmatpush.bf16.msrb.mxu3 %v7581_v54 }
 0x352   :  { %v7002_v6 = vld [vmem:[#allocation8 + $0xaf8] sm:$0xf0] }
 0x353   :  { %v8386_v15 = vld [vmem:[#allocation8 + $0xd1c] sm:$0xf]  ;;  %v7005_v60 = vor.u32 %v8314_v17, %v7002_v6  ;;  %4610 = vmatpush.bf16.msrb.mxu0 %v6749_v35 }
 0x354   :  { %v7290_v41 = vld [vmem:[#allocation8 + $0xd38] sm:$0xf0] }
 0x355   :  { %v8450_v21 = vld [vmem:[#allocation8 + $0xf1c] sm:$0xf]  ;;  %v7293_v26 = vor.u32 %v8386_v15, %v7290_v41  ;;  %4624 = vmatpush.bf16.msrb.mxu1 %v7005_v60  ;;  %v9045_v15 = vpop.f32.mrf.mxu1  ;;  %v9047_v41 = vpop.f32.mrf.mxu2 }
 0x356   :  { %v7546_v44 = vld [vmem:[#allocation8 + $0xf38] sm:$0xf0]  ;;  %v9049_v60 = vpop.f32.mrf.mxu0 }
 0x357   :  { %v8242_v55 = vld [vmem:[#allocation8 + $0x89c] sm:$0xf]  ;;  %v7549_v31 = vor.u32 %v8450_v21, %v7546_v44  ;;  %4637 = vmatpush.bf16.msrb.mxu2 %v7293_v26  ;;  %9187 = vst [vmem:[#allocation35_spill] sm:$0xff] %v9049_v60 }
 0x358   :  { %v6714_v38 = vld [vmem:[#allocation8 + $0x8b8] sm:$0xf0] }
 0x359   :  { %v8306_v45 = vld [vmem:[#allocation8 + $0xa9c] sm:$0xf]  ;;  %v6717_v50 = vor.u32 %v8242_v55, %v6714_v38  ;;  %4651 = vmatpush.bf16.msrb.mxu3 %v7549_v31 }
 0x35a   :  { %v6970_v52 = vld [vmem:[#allocation8 + $0xab8] sm:$0xf0] }
 0x35b   :  { %v8378_v49 = vld [vmem:[#allocation8 + $0xcdc] sm:$0xf]  ;;  %v6973_v61 = vor.u32 %v8306_v45, %v6970_v52  ;;  %4611 = vmatpush.bf16.msrb.mxu0 %v6717_v50 }
 0x35c   :  { %v7258_v59 = vld [vmem:[#allocation8 + $0xcf8] sm:$0xf0] }
 0x35d   :  { %v8442_v4 = vld [vmem:[#allocation8 + $0xedc] sm:$0xf]  ;;  %v7261_v17 = vor.u32 %v8378_v49, %v7258_v59  ;;  %4625 = vmatpush.bf16.msrb.mxu1 %v6973_v61  ;;  %v8486_v61 = vld [vmem:[#allocation11 + $0x38] sm:$0xff] }
 0x35e   :  { %v7514_v57 = vld [vmem:[#allocation8 + $0xef8] sm:$0xf0] }
 0x35f   :  { %v8234_v20 = vld [vmem:[#allocation8 + $0x85c] sm:$0xf]  ;;  %v7517_v54 = vor.u32 %v8442_v4, %v7514_v57  ;;  %4638 = vmatpush.bf16.msrb.mxu2 %v7261_v17  ;;  %v9188_v17 = vperm.slane %v8892_v1, 1 }
 0x360   :  { %v6682_v63 = vld [vmem:[#allocation8 + $0x878] sm:$0xf0] }
 0x361   :  { %v8298_v24 = vld [vmem:[#allocation8 + $0xa5c] sm:$0xf]  ;;  %v6685_v35 = vor.u32 %v8234_v20, %v6682_v63  ;;  %4652 = vmatpush.bf16.msrb.mxu3 %v7517_v54  ;;  %v9051_v63 = vpop.f32.mrf.mxu3  ;;  %v9056_v54 = vpop.f32.mrf.mxu1 }
 0x362   :  { %v6938_v6 = vld [vmem:[#allocation8 + $0xa78] sm:$0xf0] }
 0x363   :  { %v8370_v21 = vld [vmem:[#allocation8 + $0xc9c] sm:$0xf]  ;;  %v6941_v45 = vor.u32 %v8298_v24, %v6938_v6  ;;  %4612 = vmatpush.bf16.msrb.mxu0 %v6685_v35  ;;  %v8494_v24 = vld [vmem:[#allocation11 + $0x78] sm:$0xff] }
 0x364   :  { %v7226_v44 = vld [vmem:[#allocation8 + $0xcb8] sm:$0xf0] }
 0x365   :  { %v8434_v55 = vld [vmem:[#allocation8 + $0xe9c] sm:$0xf]  ;;  %v7229_v49 = vor.u32 %v8370_v21, %v7226_v44  ;;  %4626 = vmatpush.bf16.msrb.mxu1 %v6941_v45  ;;  %v3890_v21 = vadd.f32 %v8930_v22, %v9188_v17  ;;  %v9058_v44 = vpop.f32.mrf.mxu2 }
 0x366   :  { %v7482_v38 = vld [vmem:[#allocation8 + $0xeb8] sm:$0xf0] }
 0x367   :  { %v8226_v26 = vld [vmem:[#allocation8 + $0x81c] sm:$0xf]  ;;  %v7485_v47 = vor.u32 %v8434_v55, %v7482_v38  ;;  %4639 = vmatpush.bf16.msrb.mxu2 %v7229_v49 }
 0x368   :  { %v6650_v52 = vld [vmem:[#allocation8 + $0x838] sm:$0xf0] }
 0x369   :  { %v8290_v59 = vld [vmem:[#allocation8 + $0xa1c] sm:$0xf]  ;;  %v6653_v57 = vor.u32 %v8226_v26, %v6650_v52  ;;  %4653 = vmatpush.bf16.msrb.mxu3 %v7485_v47  ;;  %v9189_v26 = vperm.slane %v8892_v1, 0  ;;  %v9064_v47 = vpop.f32.mrf.mxu0 }
 0x36a   :  { %v6906_v28 = vld [vmem:[#allocation8 + $0xa38] sm:$0xf0] }
 0x36b   :  { %v8362_v31 = vld [vmem:[#allocation8 + $0xc5c] sm:$0xf]  ;;  %v6909_v60 = vor.u32 %v8290_v59, %v6906_v28  ;;  %v3778_v28 = vadd.f32 %v8903_v51, %v9189_v26  ;;  %4613 = vmatpush.bf16.msrb.mxu0 %v6653_v57  ;;  %v8491_v26 = vld [vmem:[#allocation11 + $0x60] sm:$0xff] }
 0x36c   :  { %v7194_v4 = vld [vmem:[#allocation8 + $0xc78] sm:$0xf0] }
 0x36d   :  { %v8426_v50 = vld [vmem:[#allocation8 + $0xe5c] sm:$0xf]  ;;  %v7197_v6 = vor.u32 %v8362_v31, %v7194_v4  ;;  %4627 = vmatpush.bf16.msrb.mxu1 %v6909_v60  ;;  %v3904_v31 = vadd.f32 %v8933_v30, %v3890_v21  ;;  %v3792_v51 = vadd.f32 %v8905_v56, %v3778_v28  ;;  %v8510_v60 = vld [vmem:[#allocation11 + $0xf8] sm:$0xff]  ;;  %v8484_v30 = vld [vmem:[#allocation11 + $0x28] sm:$0xff] }
 0x36e   :  { %v7450_v20 = vld [vmem:[#allocation8 + $0xe78] sm:$0xf0]  ;;  %4614 = vmatmul.bf16.vlgmr.msrb.gmra.mxu0 %v8868_v23  ;;  %v9190_v23 = vperm.slane %v8892_v1, 2  ;;  %v8483_v1 = vld [vmem:[#allocation11 + $0x20] sm:$0xff] }
 0x36f   :  { %v7453_v35 = vor.u32 %v8426_v50, %v7450_v20  ;;  %v8354_v55 = vld [vmem:[#allocation8 + $0xc1c] sm:$0xf]  ;;  %5202 = vmatpush.bf16.msra.mxu0 %v8486_v61  ;;  %4640 = vmatpush.bf16.msrb.mxu2 %v7197_v6  ;;  %v8502_v50 = vld [vmem:[#allocation11 + $0xb8] sm:$0xff]  ;;  %v3918_v57 = vadd.f32 %v8937_v34, %v3904_v31  ;;  %v3806_v6 = vadd.f32 %v8912_v25, %v3792_v51  ;;  %v9084_v25 = vpop.f32.mrf.mxu2 }
 0x370   :  { %v7162_v38 = vld [vmem:[#allocation8 + $0xc38] sm:$0xf0]  ;;  %4628 = vmatmul.bf16.vlgmr.msrb.gmra.mxu1 %v8870_v27  ;;  %v9070_v20 = vld [vmem:[#allocation10] sm:$0xff]  ;;  %v4002_v17 = vadd.f32 %v8961_v11, %v9190_v23  ;;  %v8492_v27 = vld [vmem:[#allocation11 + $0x68] sm:$0xff] }
 0x371   :  { %v8418_v45 = vld [vmem:[#allocation8 + $0xe1c] sm:$0xf]  ;;  %5216 = vmatpush.bf16.msra.mxu1 %v8494_v24  ;;  %v7165_v59 = vor.u32 %v8354_v55, %v7162_v38  ;;  %4654 = vmatpush.bf16.msrb.mxu3 %v7453_v35  ;;  %v1193_v61 = vperm.slane %v9070_v20, 3  ;;  %v9073_v24 = vpop.f32.mrf.mxu3  ;;  %v3932_v35 = vadd.f32 %v8939_v40, %v3918_v57  ;;  %v9082_v38 = vpop.f32.mrf.mxu1  ;;  %v3820_v11 = vadd.f32 %v8914_v48, %v3806_v6  ;;  %v8506_v6 = vld [vmem:[#allocation11 + $0xd8] sm:$0xff] }
 0x372   :  { %v7418_v52 = vld [vmem:[#allocation8 + $0xe38] sm:$0xf0]  ;;  %v9091_v28 = vpop.f32.mrf.mxu0  ;;  %v9193_v23 = vld [vmem:[#allocation29_spill] sm:$0xff] }
 0x373   :  { %v8485_v49 = vld [vmem:[#allocation11 + $0x30] sm:$0xff]  ;;  %v7421_v4 = vor.u32 %v8418_v45, %v7418_v52  ;;  %4641 = vmatpush.bf16.msrb.mxu2 %v7165_v59  ;;  %v4114_v56 = vadd.f32 %v9003_v10, %v1193_v61  ;;  %v4112_v55 = vadd.f32 %v8993_v36, %v1193_v61  ;;  %v4016_v10 = vadd.f32 %v8964_v2, %v4002_v17  ;;  %v8500_v36 = vld [vmem:[#allocation11 + $0xa8] sm:$0xff] }
 0x374   :  { %v8493_v22 = vld [vmem:[#allocation11 + $0x70] sm:$0xff]  ;;  %5203 = vmatpush.bf16.msra.mxu0 %v8485_v49  ;;  %v3834_v45 = vadd.f32 %v8916_v58, %v3820_v11  ;;  %v8508_v52 = vld [vmem:[#allocation11 + $0xe8] sm:$0xff]  ;;  %v3946_v48 = vadd.f32 %v8944_v53, %v3932_v35  ;;  %v8482_v49 = vld [vmem:[#allocation11 + $0x18] sm:$0xff] }
 0x375   :  { %5217 = vmatpush.bf16.msra.mxu1 %v8493_v22  ;;  %4655 = vmatpush.bf16.msrb.mxu3 %v7421_v4  ;;  %v8501_v34 = vld [vmem:[#allocation11 + $0xb0] sm:$0xff]  ;;  %v4128_v40 = vadd.f32 %v9009_v43, %v4114_v56  ;;  %v4126_v2 = vadd.f32 %v8997_v7, %v4112_v55  ;;  %v8490_v43 = vld [vmem:[#allocation11 + $0x58] sm:$0xff]  ;;  %v8499_v58 = vld [vmem:[#allocation11 + $0xa0] sm:$0xff] }
 0x376   :  { %v8509_v21 = vld [vmem:[#allocation11 + $0xf0] sm:$0xff]  ;;  %4642 = vmatmul.bf16.vlgmr.msrb.gmra.mxu2 %v8874_v62  ;;  %v4030_v62 = vadd.f32 %v8969_v42, %v4016_v10  ;;  %v3848_v42 = vadd.f32 %v8918_v3, %v3834_v45  ;;  %v8507_v53 = vld [vmem:[#allocation11 + $0xe0] sm:$0xff]  ;;  %v3960_v7 = vadd.f32 %v8947_v18, %v3946_v48  ;;  %v8480_v56 = vld [vmem:[#allocation11 + $0x8] sm:$0xff] }
 0x377   :  { %5230 = vmatpush.bf16.msra.mxu2 %v8502_v50  ;;  %v4140_v22 = vadd.f32 %v8999_v14, %v4126_v2  ;;  %v9107_v50 = vpop.f32.mrf.mxu2  ;;  %v8481_v14 = vld [vmem:[#allocation11 + $0x10] sm:$0xff]  ;;  %v8488_v35 = vld [vmem:[#allocation11 + $0x48] sm:$0xff]  ;;  %v8479_v48 = vld [vmem:[#allocation11] sm:$0xff] }
 0x378   :  { %5204 = vmatpush.bf16.msra.mxu0 %v8484_v30  ;;  %4656 = vmatmul.bf16.vlgmr.msrb.gmra.mxu3 %v8876_v0  ;;  %v4142_v0 = vadd.f32 %v9011_v12, %v4128_v40  ;;  %v4044_v31 = vadd.f32 %v8971_v46, %v4030_v62  ;;  %v3862_v51 = vadd.f32 %v8925_v8, %v3848_v42  ;;  %v8489_v3 = vld [vmem:[#allocation11 + $0x50] sm:$0xff]  ;;  %v9194_v8 = vld [vmem:[#allocation21_spill] sm:$0xff]  ;;  %v9198_v45 = vld [vmem:[#allocation30_spill] sm:$0xff] }
 0x379   :  { %5244 = vmatpush.bf16.msra.mxu3 %v8510_v60  ;;  %5218 = vmatpush.bf16.msra.mxu1 %v8492_v27  ;;  %v9099_v59 = vpop.f32.mrf.mxu3  ;;  %v9105_v4 = vpop.f32.mrf.mxu1  ;;  %v3974_v46 = vadd.f32 %v8954_v16, %v3960_v7  ;;  %v9191_v57 = vld [vmem:[#allocation28_spill] sm:$0xff]  ;;  %v9196_v16 = vld [vmem:[#allocation23_spill] sm:$0xff] }
 0x37a   :  { %v4156_v12 = vadd.f32 %v9015_v19, %v4142_v0  ;;  %v4058_v60 = vadd.f32 %v8987_v29, %v4044_v31  ;;  %v4154_v61 = vadd.f32 %v9191_v57, %v4140_v22  ;;  %v9192_v30 = vld [vmem:[#allocation32_spill] sm:$0xff]  ;;  %v4337_v27 = vpop.f32.mrf.mxu0  ;;  %v9195_v29 = vld [vmem:[#allocation25_spill] sm:$0xff]  ;;  %v8496_v7 = vld [vmem:[#allocation11 + $0x88] sm:$0xff] }
 0x37b   :  { %5231 = vmatpush.bf16.msra.mxu2 %v8501_v34  ;;  %v8498_v19 = vld [vmem:[#allocation11 + $0x98] sm:$0xff]  ;;  %v3876_v34 = vadd.f32 %v9194_v8, %v3862_v51  ;;  %v3988_v55 = vadd.f32 %v9196_v16, %v3974_v46  ;;  %v8497_v10 = vld [vmem:[#allocation11 + $0x90] sm:$0xff]  ;;  %v8487_v0 = vld [vmem:[#allocation11 + $0x40] sm:$0xff] }
 0x37c   :  { %5205 = vmatpush.bf16.msra.mxu0 %v8483_v1  ;;  %v4170_v18 = vadd.f32 %v9192_v30, %v4156_v12  ;;  %v4168_v17 = vadd.f32 %v9193_v23, %v4154_v61  ;;  %v9200_v12 = vld [vmem:[#allocation20_spill] sm:$0xff]  ;;  %v9201_v51 = vld [vmem:[#allocation27_spill] sm:$0xff]  ;;  %v9202_v46 = vld [vmem:[#allocation22_spill] sm:$0xff] }
 0x37d   :  { %5245 = vmatpush.bf16.msra.mxu3 %v8509_v21  ;;  %5219 = vmatpush.bf16.msra.mxu1 %v8491_v26  ;;  %v4072_v21 = vadd.f32 %v9195_v29, %v4058_v60  ;;  %v9197_v26 = vld [vmem:[#allocation26_spill] sm:$0xff]  ;;  %v4670_v2 = vmax.f32 %v3876_v34, 0.0  ;;  %v1195_v60 = vperm.slane %v9070_v20, 5  ;;  %v4663_v57 = vmax.f32 %v9202_v46, 0.0  ;;  %v8517_v23 = vld [vmem:[#allocation11 + $0x130] sm:$0xff] }
 0x37e   :  { %v4184_v1 = vadd.f32 %v9025_v5, %v4170_v18  ;;  %v4182_v62 = vadd.f32 %v9198_v45, %v4168_v17  ;;  %v9199_v5 = vld [vmem:[#allocation31_spill] sm:$0xff]  ;;  %v8495_v29 = vld [vmem:[#allocation11 + $0x80] sm:$0xff] }
 0x37f   :  { %5232 = vmatpush.bf16.msra.mxu2 %v8500_v36  ;;  %v4086_v40 = vadd.f32 %v9197_v26, %v4072_v21  ;;  %v8505_v36 = vld [vmem:[#allocation11 + $0xd0] sm:$0xff]  ;;  %v4365_v31 = vpop.f32.mrf.mxu2  ;;  %v8503_v21 = vld [vmem:[#allocation11 + $0xc0] sm:$0xff] }
 0x380   :  { %5206 = vmatpush.bf16.msra.mxu0 %v8482_v49  ;;  %v8518_v49 = vld [vmem:[#allocation11 + $0x138] sm:$0xff]  ;;  %v4196_v22 = vadd.f32 %v9199_v5, %v4182_v62  ;;  %v8525_v34 = vld [vmem:[#allocation11 + $0x170] sm:$0xff]  ;;  %v8524_v62 = vld [vmem:[#allocation11 + $0x168] sm:$0xff] }
 0x381   :  { %5246 = vmatpush.bf16.msra.mxu3 %v8508_v52  ;;  %5220 = vmatpush.bf16.msra.mxu1 %v8490_v43  ;;  %v9119_v11 = vpop.f32.mrf.mxu3  ;;  %v4198_v52 = vadd.f32 %v9027_v9, %v4184_v1  ;;  %v4671_v43 = vmax.f32 %v3988_v55, 0.0  ;;  %v4351_v42 = vpop.f32.mrf.mxu1  ;;  %v4100_v9 = vadd.f32 %v9201_v51, %v4086_v40  ;;  %v9203_v1 = vld [vmem:[#allocation24_spill] sm:$0xff] }
 0x382   :  { %v9132_v18 = vpop.f32.mrf.mxu0  ;;  %v8514_v51 = vld [vmem:[#allocation11 + $0x118] sm:$0xff] }
 0x383   :  { %5233 = vmatpush.bf16.msra.mxu2 %v8499_v58  ;;  %v1194_v58 = vperm.slane %v9070_v20, 4  ;;  %v4212_v61 = vadd.f32 %v9033_v33, %v4198_v52  ;;  %v4679_v17 = vpack.c.bf16 %v4671_v43, %v4663_v57  ;;  %v4672_v33 = vmax.f32 %v4100_v9, 0.0  ;;  %v9206_v9 = vld [vmem:[#allocation35_spill] sm:$0xff] }
 0x384   :  { %5207 = vmatpush.bf16.msra.mxu0 %v8481_v14  ;;  %v4662_v14 = vmax.f32 %v9200_v12, 0.0  ;;  %v8532_v12 = vld [vmem:[#allocation11 + $0x1a8] sm:$0xff] }
 0x385   :  { %5247 = vmatpush.bf16.msra.mxu3 %v8507_v53  ;;  %5221 = vmatpush.bf16.msra.mxu1 %v8489_v3  ;;  %v8526_v53 = vld [vmem:[#allocation11 + $0x178] sm:$0xff]  ;;  %v8504_v3 = vld [vmem:[#allocation11 + $0xc8] sm:$0xff]  ;;  %v4226_v30 = vadd.f32 %v9041_v39, %v1194_v58  ;;  %v4224_v8 = vadd.f32 %v9030_v13, %v1194_v58  ;;  %v4336_v39 = vadd.f32 %v9091_v28, %v1195_v60  ;;  %v8533_v58 = vld [vmem:[#allocation11 + $0x1b0] sm:$0xff] }
 0x386   :  { %v8516_v13 = vld [vmem:[#allocation11 + $0x128] sm:$0xff] }
 0x387   :  { %5234 = vmatpush.bf16.msra.mxu2 %v8498_v19  ;;  %v4678_v19 = vpack.c.bf16 %v4670_v2, %v4662_v14  ;;  %v4240_v16 = vadd.f32 %v9045_v15, %v4226_v30  ;;  %v4238_v40 = vadd.f32 %v9036_v32, %v4224_v8  ;;  %v4419_v45 = vpop.f32.mrf.mxu2  ;;  %v4350_v15 = vadd.f32 %v9105_v4, %v4336_v39  ;;  %v8515_v32 = vld [vmem:[#allocation11 + $0x120] sm:$0xff]  ;;  %v8513_v30 = vld [vmem:[#allocation11 + $0x110] sm:$0xff]  ;;  %v8530_v39 = vld [vmem:[#allocation11 + $0x198] sm:$0xff] }
 0x388   :  { %5208 = vmatpush.bf16.msra.mxu0 %v8480_v56  ;;  %v4210_v56 = vadd.f32 %v9023_v37, %v4196_v22  ;;  %v4664_v37 = vmax.f32 %v9203_v1, 0.0  ;;  %v8523_v22 = vld [vmem:[#allocation11 + $0x160] sm:$0xff] }
 0x389   :  { %5248 = vmatpush.bf16.msra.mxu3 %v8506_v6  ;;  %5222 = vmatpush.bf16.msra.mxu1 %v8488_v35  ;;  %v4338_v6 = vadd.f32 %v4337_v27, %v1195_v60  ;;  %v8534_v35 = vld [vmem:[#allocation11 + $0x1b8] sm:$0xff]  ;;  %v4673_v27 = vmax.f32 %v4212_v61, 0.0  ;;  %v4379_v55 = vpop.f32.mrf.mxu3  ;;  %v4405_v28 = vpop.f32.mrf.mxu1  ;;  %v4364_v43 = vadd.f32 %v9107_v50, %v4350_v15  ;;  %v9205_v4 = vld [vmem:[#allocation34_spill] sm:$0xff] }
 0x38a   :  { %v4665_v26 = vmax.f32 %v4210_v56, 0.0  ;;  %v4680_v52 = vpack.c.bf16 %v4672_v33, %v4664_v37  ;;  %v4393_v5 = vpop.f32.mrf.mxu0  ;;  %v8522_v60 = vld [vmem:[#allocation11 + $0x158] sm:$0xff]  ;;  %v8520_v33 = vld [vmem:[#allocation11 + $0x148] sm:$0xff] }
 0x38b   :  { %5235 = vmatpush.bf16.msra.mxu2 %v8497_v10  ;;  %v4352_v10 = vadd.f32 %v4351_v42, %v4338_v6  ;;  %v4378_v50 = vadd.f32 %v9119_v11, %v4364_v43  ;;  %v8521_v6 = vld [vmem:[#allocation11 + $0x150] sm:$0xff] }
 0x38c   :  { %5209 = vmatpush.bf16.msra.mxu0 %v8479_v48  ;;  %v4681_v2 = vpack.c.bf16 %v4673_v27, %v4665_v26  ;;  %v8511_v27 = vld [vmem:[#allocation11 + $0x100] sm:$0xff] }
 0x38d   :  { %5249 = vmatpush.bf16.msra.mxu3 %v8505_v36  ;;  %5223 = vmatpush.bf16.msra.mxu1 %v8487_v0  ;;  %v4254_v36 = vadd.f32 %v9047_v41, %v4240_v16  ;;  %v4366_v48 = vadd.f32 %v4365_v31, %v4352_v10  ;;  %v9204_v0 = vld [vmem:[#allocation33_spill] sm:$0xff] }
 0x38f   :  { %5236 = vmatpush.bf16.msra.mxu2 %v8496_v7  ;;  %5210 = vmatmul.bf16.vlgmr.msra.gmra.mxu0 %v4678_v19  ;;  %v4268_v41 = vadd.f32 %v9051_v63, %v4254_v36  ;;  %v4380_v42 = vadd.f32 %v4379_v55, %v4366_v48  ;;  %v4421_v61 = vpop.f32.mrf.mxu2  ;;  %v8529_v55 = vld [vmem:[#allocation11 + $0x190] sm:$0xff] }
 0x390   :  { %5258 = vmatpush.bf16.msrb.mxu0 %v8518_v49  ;;  %5224 = vmatmul.bf16.vlgmr.msra.gmra.mxu1 %v4679_v17  ;;  %v4252_v49 = vadd.f32 %v9204_v0, %v4238_v40 }
 0x391   :  { %5272 = vmatpush.bf16.msrb.mxu1 %v8526_v53  ;;  %5250 = vmatpush.bf16.msra.mxu3 %v8504_v3  ;;  %v4282_v53 = vadd.f32 %v9064_v47, %v4268_v41  ;;  %v4433_v7 = vpop.f32.mrf.mxu3  ;;  %v4394_v14 = vadd.f32 %v4393_v5, %v4380_v42  ;;  %v4392_v3 = vadd.f32 %v9132_v18, %v4378_v50  ;;  %v4407_v57 = vpop.f32.mrf.mxu1 }
 0x392   :  { %v4266_v31 = vadd.f32 %v9205_v4, %v4252_v49 }
 0x393   :  { %5237 = vmatpush.bf16.msra.mxu2 %v8495_v29  ;;  %v4296_v46 = vadd.f32 %v9082_v38, %v4282_v53  ;;  %v4408_v47 = vadd.f32 %v4407_v57, %v4394_v14  ;;  %v4406_v17 = vadd.f32 %v4405_v28, %v4392_v3  ;;  %v8512_v38 = vld [vmem:[#allocation11 + $0x108] sm:$0xff] }
 0x394   :  { %5259 = vmatpush.bf16.msrb.mxu0 %v8517_v23  ;;  %v4280_v63 = vadd.f32 %v9206_v9, %v4266_v31  ;;  %v8531_v23 = vld [vmem:[#allocation11 + $0x1a0] sm:$0xff] }
 0x395   :  { %5273 = vmatpush.bf16.msrb.mxu1 %v8525_v34  ;;  %5251 = vmatpush.bf16.msra.mxu3 %v8503_v21  ;;  %v4310_v11 = vadd.f32 %v9084_v25, %v4296_v46  ;;  %v4422_v56 = vadd.f32 %v4421_v61, %v4408_v47  ;;  %v4420_v18 = vadd.f32 %v4419_v45, %v4406_v17  ;;  %v1196_v45 = vperm.slane %v9070_v20, 6  ;;  %v8538_v17 = vld [vmem:[#allocation11 + $0x1d8] sm:$0xff] }
 0x396   :  { %5238 = vmatmul.bf16.vlgmr.msra.gmra.mxu2 %v4680_v52  ;;  %v4294_v19 = vadd.f32 %v9056_v54, %v4280_v63 }
 0x397   :  { %5286 = vmatpush.bf16.msrb.mxu2 %v8534_v35  ;;  %v4324_v34 = vadd.f32 %v9099_v59, %v4310_v11  ;;  %v4434_v21 = vadd.f32 %v4433_v7, %v4420_v18  ;;  %v4447_v35 = vpop.f32.mrf.mxu0  ;;  %v4475_v28 = vpop.f32.mrf.mxu2  ;;  %v8541_v11 = vld [vmem:[#allocation11 + $0x1f0] sm:$0xff]  ;;  %v8536_v18 = vld [vmem:[#allocation11 + $0x1c8] sm:$0xff] }
 0x398   :  { %5260 = vmatpush.bf16.msrb.mxu0 %v8516_v13  ;;  %5252 = vmatmul.bf16.vlgmr.msra.gmra.mxu3 %v4681_v2  ;;  %v4308_v8 = vadd.f32 %v9058_v44, %v4294_v19  ;;  %v8519_v44 = vld [vmem:[#allocation11 + $0x140] sm:$0xff]  ;;  %v8528_v13 = vld [vmem:[#allocation11 + $0x188] sm:$0xff]  ;;  %v4448_v52 = vadd.f32 %v4447_v35, %v1196_v45 }
 0x399   :  { %5274 = vmatpush.bf16.msrb.mxu1 %v8524_v62  ;;  %v4435_v29 = vpop.f32.mrf.mxu3  ;;  %v4674_v16 = vmax.f32 %v4324_v34, 0.0  ;;  %v4667_v59 = vmax.f32 %v4434_v21, 0.0  ;;  %v4461_v40 = vpop.f32.mrf.mxu1  ;;  %v8535_v34 = vld [vmem:[#allocation11 + $0x1c0] sm:$0xff] }
 0x39a   :  { %v4436_v54 = vadd.f32 %v4435_v29, %v4422_v56  ;;  %v4322_v25 = vadd.f32 %v9073_v24, %v4308_v8  ;;  %v8527_v24 = vld [vmem:[#allocation11 + $0x180] sm:$0xff]  ;;  %v4462_v2 = vadd.f32 %v4461_v40, %v4448_v52  ;;  %v8537_v8 = vld [vmem:[#allocation11 + $0x1d0] sm:$0xff] }
 0x39b   :  { %5287 = vmatpush.bf16.msrb.mxu2 %v8533_v58 }
 0x39c   :  { %5261 = vmatpush.bf16.msrb.mxu0 %v8515_v32  ;;  %v4675_v1 = vmax.f32 %v4436_v54, 0.0  ;;  %v4666_v37 = vmax.f32 %v4322_v25, 0.0  ;;  %v4476_v43 = vadd.f32 %v4475_v28, %v4462_v2 }
 0x39d   :  { %5275 = vmatpush.bf16.msrb.mxu1 %v8523_v22 }
 0x39e   :  { %v4682_v10 = vpack.c.bf16 %v4674_v16, %v4666_v37  ;;  %v4683_v26 = vpack.c.bf16 %v4675_v1, %v4667_v59 }
 0x39f   :  { %5288 = vmatpush.bf16.msrb.mxu2 %v8532_v12  ;;  %v4449_v36 = vpop.f32.mrf.mxu0  ;;  %v4477_v49 = vpop.f32.mrf.mxu2 }
 0x3a0   :  { %5262 = vmatpush.bf16.msrb.mxu0 %v8514_v51  ;;  %v4450_v0 = vadd.f32 %v4449_v36, %v1196_v45 }
 0x3a1   :  { %5276 = vmatpush.bf16.msrb.mxu1 %v8522_v60  ;;  %v4489_v62 = vpop.f32.mrf.mxu3  ;;  %v4463_v15 = vpop.f32.mrf.mxu1  ;;  %v8542_v60 = vld [vmem:[#allocation11 + $0x1f8] sm:$0xff] }
 0x3a2   :  { %v4464_v41 = vadd.f32 %v4463_v15, %v4450_v0  ;;  %v4490_v22 = vadd.f32 %v4489_v62, %v4476_v43  ;;  %5300 = vmatpush.bf16.msrb.mxu3 %v8542_v60 }
 0x3a3   :  { %5289 = vmatpush.bf16.msrb.mxu2 %v8531_v23  ;;  %v8539_v23 = vld [vmem:[#allocation11 + $0x1e0] sm:$0xff] }
 0x3a4   :  { %5263 = vmatpush.bf16.msrb.mxu0 %v8513_v30  ;;  %v4478_v58 = vadd.f32 %v4477_v49, %v4464_v41 }
 0x3a5   :  { %5277 = vmatpush.bf16.msrb.mxu1 %v8521_v6  ;;  %v8540_v6 = vld [vmem:[#allocation11 + $0x1e8] sm:$0xff] }
 0x3a6   :  { %5301 = vmatpush.bf16.msrb.mxu3 %v8541_v11 }
 0x3a7   :  { %5290 = vmatpush.bf16.msrb.mxu2 %v8530_v39  ;;  %v4503_v48 = vpop.f32.mrf.mxu0  ;;  %v4531_v31 = vpop.f32.mrf.mxu2  ;;  %v1197_v39 = vperm.slane %v9070_v20, 7 }
 0x3a8   :  { %5264 = vmatpush.bf16.msrb.mxu0 %v8512_v38  ;;  %v4504_v42 = vadd.f32 %v4503_v48, %v4490_v22 }
 0x3a9   :  { %5278 = vmatpush.bf16.msrb.mxu1 %v8520_v33  ;;  %v4491_v32 = vpop.f32.mrf.mxu3  ;;  %v4517_v5 = vpop.f32.mrf.mxu1 }
 0x3aa   :  { %v4492_v53 = vadd.f32 %v4491_v32, %v4478_v58  ;;  %v4518_v12 = vadd.f32 %v4517_v5, %v4504_v42  ;;  %5302 = vmatpush.bf16.msrb.mxu3 %v8540_v6 }
 0x3ab   :  { %5291 = vmatpush.bf16.msrb.mxu2 %v8529_v55 }
 0x3ac   :  { %5265 = vmatpush.bf16.msrb.mxu0 %v8511_v27  ;;  %v4532_v14 = vadd.f32 %v4531_v31, %v4518_v12 }
 0x3ad   :  { %5279 = vmatpush.bf16.msrb.mxu1 %v8519_v44 }
 0x3ae   :  { %5303 = vmatpush.bf16.msrb.mxu3 %v8539_v23 }
 0x3af   :  { %5266 = vmatmul.bf16.vlgmr.msrb.gmra.mxu0 %v4682_v10  ;;  %5292 = vmatpush.bf16.msrb.mxu2 %v8528_v13  ;;  %v4505_v4 = vpop.f32.mrf.mxu0  ;;  %v4533_v63 = vpop.f32.mrf.mxu2 }
 0x3b0   :  { %5280 = vmatmul.bf16.vlgmr.msrb.gmra.mxu1 %v4683_v26  ;;  %v4506_v50 = vadd.f32 %v4505_v4, %v4492_v53  ;;  %v8557_v4 = vld [vmem:[#allocation13] ss:$0 sm:$0xff] }
 0x3b1   :  { %v4545_v7 = vpop.f32.mrf.mxu3  ;;  %v4519_v51 = vpop.f32.mrf.mxu1 }
 0x3b2   :  { %v4520_v9 = vadd.f32 %v4519_v51, %v4506_v50  ;;  %v4546_v3 = vadd.f32 %v4545_v7, %v4532_v14  ;;  %5304 = vmatpush.bf16.msrb.mxu3 %v8538_v17 }
 0x3b3   :  { %5293 = vmatpush.bf16.msrb.mxu2 %v8527_v24 }
 0x3b4   :  { %v4534_v46 = vadd.f32 %v4533_v63, %v4520_v9  ;;  %v4668_v47 = vmax.f32 %v4546_v3, 0.0 }
 0x3b6   :  { %5305 = vmatpush.bf16.msrb.mxu3 %v8537_v8 }
 0x3b7   :  { %v4559_v56 = vpop.f32.mrf.mxu0 }
 0x3b8   :  { %v4560_v25 = vadd.f32 %v4559_v56, %v1197_v39 }
 0x3b9   :  { %v4547_v57 = vpop.f32.mrf.mxu3  ;;  %v4573_v38 = vpop.f32.mrf.mxu1 }
 0x3ba   :  { %v4548_v61 = vadd.f32 %v4547_v57, %v4534_v46  ;;  %5306 = vmatpush.bf16.msrb.mxu3 %v8536_v18  ;;  %v4574_v27 = vadd.f32 %v4573_v38, %v4560_v25 }
 0x3bc   :  { %v4676_v30 = vmax.f32 %v4548_v61, 0.0 }
 0x3be   :  { %v4684_v19 = vpack.c.bf16 %v4676_v30, %v4668_v47  ;;  %5307 = vmatpush.bf16.msrb.mxu3 %v8535_v34 }
 0x3bf   :  { %v4561_v29 = vpop.f32.mrf.mxu0 }
 0x3c0   :  { %5294 = vmatmul.bf16.vlgmr.msrb.gmra.mxu2 %v4684_v19  ;;  %v4562_v16 = vadd.f32 %v4561_v29, %v1197_v39 }
 0x3c1   :  { %v4587_v33 = vpop.f32.mrf.mxu2  ;;  %v4575_v21 = vpop.f32.mrf.mxu1 }
 0x3c2   :  { %v4588_v55 = vadd.f32 %v4587_v33, %v4574_v27  ;;  %v4576_v37 = vadd.f32 %v4575_v21, %v4562_v16 }
 0x3c3   :  { %v4601_v54 = vpop.f32.mrf.mxu3 }
 0x3c4   :  { %v4602_v10 = vadd.f32 %v4601_v54, %v4588_v55 }
 0x3c9   :  { %v4589_v44 = vpop.f32.mrf.mxu2 }
 0x3ca   :  { %v4590_v13 = vadd.f32 %v4589_v44, %v4576_v37 }
 0x3cb   :  { %v4603_v1 = vpop.f32.mrf.mxu3 }
 0x3cc   :  { %v4604_v36 = vadd.f32 %v4603_v1, %v4590_v13 }
 0x3eb   :  { %v4615_v35 = vpop.f32.mrf.mxu0 }
 0x3ec   :  { %v4616_v26 = vadd.f32 %v4615_v35, %v4602_v10 }
 0x3ed   :  { %v4629_v59 = vpop.f32.mrf.mxu1 }
 0x3ee   :  { %v4630_v20 = vadd.f32 %v4629_v59, %v4616_v26 }
 0x3f3   :  { %v4617_v40 = vpop.f32.mrf.mxu0 }
 0x3f4   :  { %v4618_v45 = vadd.f32 %v4617_v40, %v4604_v36 }
 0x3f5   :  { %v4631_v52 = vpop.f32.mrf.mxu1 }
 0x3f6   :  { %v4632_v15 = vadd.f32 %v4631_v52, %v4618_v45 }
 0x3f9   :  { %v4643_v24 = vpop.f32.mrf.mxu2 }
 0x3fa   :  { %v4644_v62 = vadd.f32 %v4643_v24, %v4630_v20 }
 0x3fb   :  { %v4657_v28 = vpop.f32.mrf.mxu3 }
 0x3fc   :  { %v4658_v2 = vadd.f32 %v4657_v28, %v4644_v62 }
 0x3fe   :  { %v4669_v32 = vmax.f32 %v4658_v2, 0.0 }
 0x401   :  { %v4645_v48 = vpop.f32.mrf.mxu2 }
 0x402   :  { %v4646_v0 = vadd.f32 %v4645_v48, %v4632_v15 }
 0x403   :  { %v4659_v49 = vpop.f32.mrf.mxu3 }
 0x404   :  { %v4660_v43 = vadd.f32 %v4659_v49, %v4646_v0 }
 0x406   :  { %v4677_v41 = vmax.f32 %v4660_v43, 0.0 }
 0x408   :  { %v4685_v5 = vpack.c.bf16 %v4677_v41, %v4669_v32 }
 0x40a   :  { %5308 = vmatmul.bf16.vlgmr.msrb.gmra.mxu3 %v4685_v5 }
 0x40c   :  { %v5211_v22 = vpop.f32.mrf.mxu0 }
 0x40d   :  { %v5225_v58 = vpop.f32.mrf.mxu1  ;;  %v5212_v53 = vadd.f32 %v8557_v4, %v5211_v22 }
 0x40f   :  { %v5226_v12 = vadd.f32 %v5225_v58, %v5212_v53 }
 0x414   :  { %v5213_v31 = vpop.f32.mrf.mxu0 }
 0x415   :  { %v5227_v50 = vpop.f32.mrf.mxu1  ;;  %v5214_v63 = vadd.f32 %v8557_v4, %v5213_v31 }
 0x417   :  { %v5228_v46 = vadd.f32 %v5227_v50, %v5214_v63 }
 0x419   :  { %v5239_v42 = vpop.f32.mrf.mxu2 }
 0x41a   :  { %v5240_v51 = vadd.f32 %v5239_v42, %v5226_v12 }
 0x41b   :  { %v5253_v7 = vpop.f32.mrf.mxu3 }
 0x41c   :  { %v5254_v60 = vadd.f32 %v5253_v7, %v5240_v51 }
 0x421   :  { %v5241_v14 = vpop.f32.mrf.mxu2 }
 0x422   :  { %v5242_v30 = vadd.f32 %v5241_v14, %v5228_v46 }
 0x423   :  { %v5255_v3 = vpop.f32.mrf.mxu3 }
 0x424   :  { %v5256_v6 = vadd.f32 %v5255_v3, %v5242_v30 }
 0x42c   :  { %v5267_v9 = vpop.f32.mrf.mxu0 }
 0x42d   :  { %v5268_v57 = vadd.f32 %v5267_v9, %v5254_v60  ;;  %v5281_v61 = vpop.f32.mrf.mxu1 }
 0x42f   :  { %v5282_v19 = vadd.f32 %v5281_v61, %v5268_v57 }
 0x434   :  { %v5269_v11 = vpop.f32.mrf.mxu0 }
 0x435   :  { %v5270_v56 = vadd.f32 %v5269_v11, %v5256_v6  ;;  %v5283_v18 = vpop.f32.mrf.mxu1 }
 0x437   :  { %v5284_v34 = vadd.f32 %v5283_v18, %v5270_v56 }
 0x443   :  { %v5295_v47 = vpop.f32.mrf.mxu2 }
 0x444   :  { %v5296_v23 = vadd.f32 %v5295_v47, %v5282_v19 }
 0x44b   :  { %v5297_v38 = vpop.f32.mrf.mxu2 }
 0x44c   :  { %v5298_v29 = vadd.f32 %v5297_v38, %v5284_v34 }
 0x48d   :  { %v5309_v17 = vpop.f32.mrf.mxu3 }
 0x48e   :  { %v5310_v8 = vadd.f32 %v5309_v17, %v5296_v23 }
 0x490   :  { %5314 = vst [vmem:[#allocation14] sm:$0xff] %v5310_v8 }
 0x495   :  { %v5311_v33 = vpop.f32.mrf.mxu3 }
 0x496   :  { %v5312_v39 = vadd.f32 %v5311_v33, %v5298_v29 }
 0x498   :  { %5315 = vst [vmem:[#allocation14 + $0x8] sm:$0xff] %v5312_v39 }
 0x499   :  { %5328 = dma.vmem_to_hbm [thread:$0]  %s5321_s6, 256, %s5323_s14, [#allocation4], %s8773_s1, %s8773_s1, %s8774_s15  }
 0x49a   :  { %8759 = dma.done.wait [#allocation4], 256  }
 0x49b   :  { %8760 = vsyncadd [#allocation4], 4294967040 }
 0x49c   :  { %5333 = vsyncpa [#allocation3], 1 }
 0x49d   :  { %5334 = vsyncpa [#allocation6], 1 }
 0x49e   :  { %5335 = vsyncpa [#allocation9], 1 }
 0x49f   :  { %5336 = vsyncpa [#allocation12], 1 }
 0x4a0   :  { %5337 = vsyncpa [#allocation4], 1 }

</bundles_post_ra>
